<compile_context>
chip_gen: v7x
topology: tpu7x:2x2x1
jax: 0.10.0
libtpu: 0.0.40
codegen_flags: <defaults>
</compile_context>

<pallas_src>
import jax
import jax.numpy as jnp
from jax.experimental import pallas as pl
from jax.experimental.pallas import tpu as pltpu

NODES = 100
FEAT = 65
K1 = NODES * FEAT            # 6500
TK1 = 3328                   # 26 * 128  -> 2 K-steps over the padded K axis
K1_PAD = 2 * TK1             # 6656
TN1 = 512                    # 2 N-tiles -> "parallel" axis can shard v7x's 2 TCs
BN_EPS = 1e-5


# ----------------------------------------------------------------------------
# Kernel 1: two fused GCN layers, `bb` batch elements per grid step.
# ----------------------------------------------------------------------------
def _make_gcn2_kernel(bb):
    def kernel(x_ref, a_ref, w1_ref, b1_ref, w2_ref, b2_ref, o_ref):
        w1 = w1_ref[...]
        w2 = w2_ref[...]
        b1 = b1_ref[...]
        b2 = b2_ref[...]
        # TODO(synk): the per-sample (100,65) dots could be merged into one
        # (bb*100,65)@(65,65) matmul for better MXU row occupancy; the GCN
        # stage is <1% of the forward so the simple unrolled loop is kept.
        for i in range(bb):                      # static unroll, bb is tiny
            x = x_ref[i]                         # (Nn, F)
            a = a_ref[i]                         # (Nn, Nn)
            xw = jnp.dot(x, w1, preferred_element_type=jnp.float32)
            h = jnp.dot(a, xw, preferred_element_type=jnp.float32) + b1
            h = jnp.maximum(h, 0.0)
            hw = jnp.dot(h, w2, preferred_element_type=jnp.float32)
            h2 = jnp.dot(a, hw, preferred_element_type=jnp.float32) + b2
            o_ref[i] = jnp.maximum(h2, 0.0).astype(o_ref.dtype)

    return kernel


def gcn2_forward(X, A, w1, b1, w2, b2):
    B, Nn, F = X.shape
    bb = next(d for d in (8, 4, 2, 1) if B % d == 0)     # whole batch when small
    return pl.pallas_call(
        _make_gcn2_kernel(bb),
        out_shape=jax.ShapeDtypeStruct((B, Nn, F), jnp.float32),
        grid_spec=pltpu.PrefetchScalarGridSpec(
            num_scalar_prefetch=0,
            grid=(B // bb,),
            in_specs=[
                pl.BlockSpec((bb, Nn, F), lambda i: (i, 0, 0)),
                pl.BlockSpec((bb, Nn, Nn), lambda i: (i, 0, 0)),
                pl.BlockSpec((F, F), lambda i: (0, 0)),
                pl.BlockSpec((1, F), lambda i: (0, 0)),
                pl.BlockSpec((F, F), lambda i: (0, 0)),
                pl.BlockSpec((1, F), lambda i: (0, 0)),
            ],
            out_specs=pl.BlockSpec((bb, Nn, F), lambda i: (i, 0, 0)),
        ),
        compiler_params=pltpu.CompilerParams(dimension_semantics=("parallel",)),
    )(X, A, w1, b1.reshape(1, F), w2, b2.reshape(1, F))


# ----------------------------------------------------------------------------
# Kernel 2: big Linear (6656->1024, bf16 weight stream) + BatchNorm1d
# (training stats) + ReLU.  grid = (N-tiles [parallel], K-tiles [reduction]);
# the VMEM-resident output block itself is the f32 accumulator.
# ----------------------------------------------------------------------------
def _linear_bn_relu_kernel(x_ref, w_ref, b_ref, g_ref, be_ref, o_ref):
    k = pl.program_id(1)

    @pl.when(k == 0)
    def _():
        o_ref[...] = jnp.zeros_like(o_ref)

    # bf16 weight tile streamed from HBM, upcast on-chip -> exact f32 math
    # with a halved HBM stream; the cast hides under the weight DMA.
    w = w_ref[...].astype(jnp.float32)
    o_ref[...] += jnp.dot(x_ref[...], w, preferred_element_type=jnp.float32)

    @pl.when(k == pl.num_programs(1) - 1)
    def _():
        y = o_ref[...] + b_ref[...]                       # (B, tn)
        mean = jnp.mean(y, axis=0, keepdims=True)         # BN over batch axis
        var = jnp.mean((y - mean) ** 2, axis=0, keepdims=True)
        y = (y - mean) * jax.lax.rsqrt(var + BN_EPS)
        y = y * g_ref[...] + be_ref[...]
        o_ref[...] = jnp.maximum(y, 0.0)


def linear_bn_relu(x, w, b, gamma, beta, *, tk, tn):
    B, K = x.shape
    Kw, N = w.shape
    assert K == Kw and K % tk == 0 and N % tn == 0
    cost = pl.CostEstimate(
        flops=2 * B * K * N,
        transcendentals=0,
        bytes_accessed=K * N * w.dtype.itemsize + B * K * 4 + B * N * 4,
    )
    return pl.pallas_call(
        _linear_bn_relu_kernel,
        out_shape=jax.ShapeDtypeStruct((B, N), jnp.float32),
        grid_spec=pltpu.PrefetchScalarGridSpec(
            num_scalar_prefetch=0,
            grid=(N // tn, K // tk),
            in_specs=[
                pl.BlockSpec((B, tk), lambda n, k: (0, k)),
                pl.BlockSpec((tk, tn), lambda n, k: (k, n)),
                pl.BlockSpec((1, tn), lambda n, k: (0, n)),
                pl.BlockSpec((1, tn), lambda n, k: (0, n)),
                pl.BlockSpec((1, tn), lambda n, k: (0, n)),
            ],
            out_specs=pl.BlockSpec((B, tn), lambda n, k: (0, n)),
        ),
        compiler_params=pltpu.CompilerParams(
            dimension_semantics=("parallel", "arbitrary"),
            vmem_limit_bytes=32 * 1024 * 1024),
        cost_estimate=cost,
    )(x, w, b.reshape(1, N), gamma.reshape(1, N), beta.reshape(1, N))


# ----------------------------------------------------------------------------
# Kernel 3: fused tail — Linear(1024->128)+BN+ReLU, Linear(128->128)+BN+ReLU,
# Linear(128->1), sigmoid, and BCE loss, all in one VMEM-resident call.
# ----------------------------------------------------------------------------
def _tail_kernel(x_ref, w2_ref, b2_ref, g2_ref, be2_ref,
                 w3_ref, b3_ref, g3_ref, be3_ref,
                 wf_ref, bf_ref, lbl_ref,
                 probs_ref, loss_ref):
    def bn_relu(y, g, be):
        mean = jnp.mean(y, axis=0, keepdims=True)
        var = jnp.mean((y - mean) ** 2, axis=0, keepdims=True)
        y = (y - mean) * jax.lax.rsqrt(var + BN_EPS)
        return jnp.maximum(y * g + be, 0.0)

    x = x_ref[...]                                                    # (B,1024)
    y = jnp.dot(x, w2_ref[...], preferred_element_type=jnp.float32) + b2_ref[...]
    y = bn_relu(y, g2_ref[...], be2_ref[...])                         # (B,128)
    y = jnp.dot(y, w3_ref[...], preferred_element_type=jnp.float32) + b3_ref[...]
    y = bn_relu(y, g3_ref[...], be3_ref[...])                         # (B,128)
    logits = jnp.dot(y, wf_ref[...], preferred_element_type=jnp.float32) + bf_ref[...]
    p = jax.nn.sigmoid(logits)                                        # (B,1)
    probs_ref[...] = p.astype(probs_ref.dtype)

    lbl = lbl_ref[...]                                                # (B,1)
    logp = jnp.maximum(jnp.log(p), -100.0)
    log1mp = jnp.maximum(jnp.log(1.0 - p), -100.0)
    per = lbl * logp + (1.0 - lbl) * log1mp
    loss_ref[...] = -jnp.mean(per, axis=(0, 1), keepdims=True)


def tail_forward(h, w2, b2, g2, be2, w3, b3, g3, be3, wf, bf, label):
    B = h.shape[0]
    vmem_spec = pl.BlockSpec(memory_space=pltpu.MemorySpace.VMEM)
    probs, loss = pl.pallas_call(
        _tail_kernel,
        out_shape=(jax.ShapeDtypeStruct((B, 1), jnp.float32),
                   jax.ShapeDtypeStruct((1, 1), jnp.float32)),
        in_specs=[vmem_spec] * 12,
        out_specs=(vmem_spec, vmem_spec),
    )(h,
      w2, b2.reshape(1, -1), g2.reshape(1, -1), be2.reshape(1, -1),
      w3, b3.reshape(1, -1), g3.reshape(1, -1), be3.reshape(1, -1),
      wf, bf.reshape(1, 1), label.reshape(B, 1))
    return probs[:, 0], loss[0, 0]


# ----------------------------------------------------------------------------
# Parameter construction (deterministic, synthetic).  p1_w is pre-padded to
# K1_PAD rows and stored in bf16 (halves the dominant HBM weight stream).
# ----------------------------------------------------------------------------
def init_params(key):
    ks = jax.random.split(key, 8)

    def lin(k, fan_in, fan_out):
        scale = 1.0 / jnp.sqrt(jnp.float32(fan_in))
        w = jax.random.normal(k, (fan_in, fan_out), jnp.float32) * scale
        b = jnp.zeros((fan_out,), jnp.float32)
        return w, b

    p = {}
    # GCN layers (PyTorch: torch.randn(65,65), zeros(65)) -- scaled for stability.
    p["gcn_w1"] = jax.random.normal(ks[0], (FEAT, FEAT), jnp.float32) * 0.05
    p["gcn_b1"] = jnp.zeros((FEAT,), jnp.float32)
    p["gcn_w2"] = jax.random.normal(ks[1], (FEAT, FEAT), jnp.float32) * 0.05
    p["gcn_b2"] = jnp.zeros((FEAT,), jnp.float32)
    # GraphModel.proj
    p1_w, p["p1_b"] = lin(ks[2], K1, 1024)
    p["p1_w"] = jnp.pad(p1_w, ((0, K1_PAD - K1), (0, 0))).astype(jnp.bfloat16)
    p["p1_g"] = jnp.ones((1024,), jnp.float32)
    p["p1_beta"] = jnp.zeros((1024,), jnp.float32)
    p["p2_w"], p["p2_b"] = lin(ks[3], 1024, 128)
    p["p2_g"] = jnp.ones((128,), jnp.float32)
    p["p2_beta"] = jnp.zeros((128,), jnp.float32)
    # MyModel.proj
    p["p3_w"], p["p3_b"] = lin(ks[4], 128, 128)
    p["p3_g"] = jnp.ones((128,), jnp.float32)
    p["p3_beta"] = jnp.zeros((128,), jnp.float32)
    # MyModel.fc
    p["fc_w"], p["fc_b"] = lin(ks[5], 128, 1)
    return p


# ----------------------------------------------------------------------------
# Full forward pass (MyModel.forward(f, X, A, label) -> (probs, loss)).
# ----------------------------------------------------------------------------
@jax.jit
def my_model_forward(params, f, X, A, label):
    del f  # FpModel is constructed but never used in MyModel.forward
    B = X.shape[0]
    # GraphModel GCN stack
    h = gcn2_forward(X, A, params["gcn_w1"], params["gcn_b1"],
                     params["gcn_w2"], params["gcn_b2"])              # (B,100,65)
    h = h.reshape(B, K1)                                              # free reshape
    h = jnp.pad(h, ((0, 0), (0, K1_PAD - K1)))                        # tiny activation pad
    # Linear 6500->1024 + BN + ReLU (K-tiled, N-parallel, bf16 weight stream)
    h = linear_bn_relu(h, params["p1_w"], params["p1_b"],
                       params["p1_g"], params["p1_beta"], tk=TK1, tn=TN1)
    # Fused tail: 1024->128 BN ReLU, 128->128 BN ReLU, 128->1, sigmoid, BCE
    probs, loss = tail_forward(
        h,
        params["p2_w"], params["p2_b"], params["p2_g"], params["p2_beta"],
        params["p3_w"], params["p3_b"], params["p3_g"], params["p3_beta"],
        params["fc_w"], params["fc_b"], label)
    return probs, loss


# ----------------------------------------------------------------------------
# Pure-JAX reference for validation.
# ----------------------------------------------------------------------------
def reference_forward(params, f, X, A, label):
    del f

    def bn(y, g, be):
        mean = jnp.mean(y, axis=0, keepdims=True)
        var = jnp.mean((y - mean) ** 2, axis=0, keepdims=True)
        return (y - mean) / jnp.sqrt(var + BN_EPS) * g + be

    h = jnp.maximum(jnp.einsum('bnm,bmf->bnf', A, X @ params["gcn_w1"]) + params["gcn_b1"], 0.0)
    h = jnp.maximum(jnp.einsum('bnm,bmf->bnf', A, h @ params["gcn_w2"]) + params["gcn_b2"], 0.0)
    h = h.reshape(h.shape[0], -1)
    p1_w = params["p1_w"][:K1].astype(jnp.float32)        # same bf16-rounded weights
    h = jnp.maximum(bn(h @ p1_w + params["p1_b"],
                       params["p1_g"], params["p1_beta"]), 0.0)
    h = jnp.maximum(bn(h @ params["p2_w"] + params["p2_b"],
                       params["p2_g"], params["p2_beta"]), 0.0)
    h = jnp.maximum(bn(h @ params["p3_w"] + params["p3_b"],
                       params["p3_g"], params["p3_beta"]), 0.0)
    logits = h @ params["fc_w"] + params["fc_b"]
    p = jax.nn.sigmoid(logits)[:, 0]
    logp = jnp.maximum(jnp.log(p), -100.0)
    log1mp = jnp.maximum(jnp.log(1.0 - p), -100.0)
    loss = -jnp.mean(label * logp + (1.0 - label) * log1mp)
    return p, loss


if __name__ == "__main__":
    key = jax.random.PRNGKey(0)
    k_x, k_a, k_f, k_lbl, k_par = jax.random.split(key, 5)

    B = 4
    # 6500 = 100 nodes * 65 features (fixed by Linear(6500,1024) and GCN(65,65)).
    X = jax.random.normal(k_x, (B, NODES, FEAT), jnp.float32)
    A = jax.random.uniform(k_a, (B, NODES, NODES), jnp.float32) * 0.02
    f = jax.random.normal(k_f, (B, 1024), jnp.float32)   # unused in forward
    label = (jax.random.uniform(k_lbl, (B,)) > 0.5).astype(jnp.float32)

    params = init_params(k_par)

    probs, loss = my_model_forward(params, f, X, A, label)
    jax.block_until_ready((probs, loss))

    assert probs.shape == (B,)
    assert loss.shape == ()
    assert bool(jnp.all(jnp.isfinite(probs))) and bool(jnp.isfinite(loss))

    ref_p, ref_l = reference_forward(params, f, X, A, label)
    assert jnp.allclose(probs, ref_p, atol=3e-2, rtol=3e-2), (probs, ref_p)
    assert jnp.allclose(loss, ref_l, atol=3e-2, rtol=3e-2), (loss, ref_l)

    print("KERNEL_OK")
</pallas_src>

<mosaic_0001>
module attributes {stable_mosaic.version = 11 : i64} {
  func.func @kernel(%arg0: i32, %arg1: memref<4x100x65xf32, #tpu.memory_space<vmem>>, %arg2: memref<4x100x100xf32, #tpu.memory_space<vmem>>, %arg3: memref<65x65xf32, #tpu.memory_space<vmem>>, %arg4: memref<1x65xf32, #tpu.memory_space<vmem>>, %arg5: memref<65x65xf32, #tpu.memory_space<vmem>>, %arg6: memref<1x65xf32, #tpu.memory_space<vmem>>, %arg7: memref<4x100x65xf32, #tpu.memory_space<vmem>>) attributes {dimension_semantics = [#tpu.dimension_semantics<parallel>], iteration_bounds = array<i64: 1>, scalar_prefetch = 0 : i64, scratch_operands = 0 : i64, tpu.core_type = #tpu.core_type<tc>, window_params = [{transform_indices = @transform_0, window_bounds = array<i64: 4, 100, 65>}, {transform_indices = @transform_1, window_bounds = array<i64: 4, 100, 100>}, {pipeline_mode = #tpu.pipeline_mode<synchronous>, transform_indices = @transform_2, window_bounds = array<i64: 65, 65>}, {pipeline_mode = #tpu.pipeline_mode<synchronous>, transform_indices = @transform_3, window_bounds = array<i64: 1, 65>}, {pipeline_mode = #tpu.pipeline_mode<synchronous>, transform_indices = @transform_4, window_bounds = array<i64: 65, 65>}, {pipeline_mode = #tpu.pipeline_mode<synchronous>, transform_indices = @transform_5, window_bounds = array<i64: 1, 65>}, {transform_indices = @transform_6, window_bounds = array<i64: 4, 100, 65>}]} {
    %c0 = arith.constant 0 : index
    %c0_0 = arith.constant 0 : index
    %0 = vector.load %arg3[%c0, %c0_0] : memref<65x65xf32, #tpu.memory_space<vmem>>, vector<65x65xf32>
    %c0_1 = arith.constant 0 : index
    %c0_2 = arith.constant 0 : index
    %1 = vector.load %arg5[%c0_1, %c0_2] : memref<65x65xf32, #tpu.memory_space<vmem>>, vector<65x65xf32>
    %c0_3 = arith.constant 0 : index
    %c0_4 = arith.constant 0 : index
    %2 = vector.load %arg4[%c0_3, %c0_4] : memref<1x65xf32, #tpu.memory_space<vmem>>, vector<1x65xf32>
    %c0_5 = arith.constant 0 : index
    %c0_6 = arith.constant 0 : index
    %3 = vector.load %arg6[%c0_5, %c0_6] : memref<1x65xf32, #tpu.memory_space<vmem>>, vector<1x65xf32>
    %c0_7 = arith.constant 0 : index
    %c0_8 = arith.constant 0 : index
    %c0_9 = arith.constant 0 : index
    %4 = vector.load %arg1[%c0_7, %c0_8, %c0_9] : memref<4x100x65xf32, #tpu.memory_space<vmem>>, vector<1x100x65xf32>
    %5 = vector.shape_cast %4 : vector<1x100x65xf32> to vector<100x65xf32>
    %c0_10 = arith.constant 0 : index
    %c0_11 = arith.constant 0 : index
    %c0_12 = arith.constant 0 : index
    %6 = vector.load %arg2[%c0_10, %c0_11, %c0_12] : memref<4x100x100xf32, #tpu.memory_space<vmem>>, vector<1x100x100xf32>
    %7 = vector.shape_cast %6 : vector<1x100x100xf32> to vector<100x100xf32>
    %cst = arith.constant dense<0.000000e+00> : vector<100x65xf32>
    %8 = tpu.matmul %5, %0, %cst {dimension_numbers = #tpu.dot_dimension_numbers<[1], [0], [0], [1], [0, 0, 1, 1], [], []>} : vector<100x65xf32>, vector<65x65xf32>, vector<100x65xf32> -> vector<100x65xf32>
    %cst_13 = arith.constant dense<0.000000e+00> : vector<100x65xf32>
    %9 = tpu.matmul %7, %8, %cst_13 {dimension_numbers = #tpu.dot_dimension_numbers<[1], [0], [0], [1], [0, 0, 1, 1], [], []>} : vector<100x100xf32>, vector<100x65xf32>, vector<100x65xf32> -> vector<100x65xf32>
    %10 = vector.broadcast %2 : vector<1x65xf32> to vector<100x65xf32>
    %11 = arith.addf %9, %10 : vector<100x65xf32>
    %cst_14 = arith.constant 0.000000e+00 : f32
    %12 = vector.broadcast %cst_14 : f32 to vector<100x65xf32>
    %13 = arith.maximumf %11, %12 : vector<100x65xf32>
    %cst_15 = arith.constant dense<0.000000e+00> : vector<100x65xf32>
    %14 = tpu.matmul %13, %1, %cst_15 {dimension_numbers = #tpu.dot_dimension_numbers<[1], [0], [0], [1], [0, 0, 1, 1], [], []>} : vector<100x65xf32>, vector<65x65xf32>, vector<100x65xf32> -> vector<100x65xf32>
    %cst_16 = arith.constant dense<0.000000e+00> : vector<100x65xf32>
    %15 = tpu.matmul %7, %14, %cst_16 {dimension_numbers = #tpu.dot_dimension_numbers<[1], [0], [0], [1], [0, 0, 1, 1], [], []>} : vector<100x100xf32>, vector<100x65xf32>, vector<100x65xf32> -> vector<100x65xf32>
    %16 = vector.broadcast %3 : vector<1x65xf32> to vector<100x65xf32>
    %17 = arith.addf %15, %16 : vector<100x65xf32>
    %cst_17 = arith.constant 0.000000e+00 : f32
    %18 = vector.broadcast %cst_17 : f32 to vector<100x65xf32>
    %19 = arith.maximumf %17, %18 : vector<100x65xf32>
    %c0_18 = arith.constant 0 : index
    %c0_19 = arith.constant 0 : index
    %c0_20 = arith.constant 0 : index
    %20 = vector.load %arg7[%c0_18, %c0_19, %c0_20] : memref<4x100x65xf32, #tpu.memory_space<vmem>>, vector<1x100x65xf32>
    %21 = vector.shape_cast %20 : vector<1x100x65xf32> to vector<100x65xf32>
    %22 = vector.shape_cast %19 : vector<100x65xf32> to vector<1x100x65xf32>
    tpu.vector_store %arg7[%c0_18, %c0_19, %c0_20], %22 {strides = array<i32>} : memref<4x100x65xf32, #tpu.memory_space<vmem>>, vector<1x100x65xf32>,
    %c1 = arith.constant 1 : index
    %c0_21 = arith.constant 0 : index
    %c0_22 = arith.constant 0 : index
    %23 = vector.load %arg1[%c1, %c0_21, %c0_22] : memref<4x100x65xf32, #tpu.memory_space<vmem>>, vector<1x100x65xf32>
    %24 = vector.shape_cast %23 : vector<1x100x65xf32> to vector<100x65xf32>
    %c1_23 = arith.constant 1 : index
    %c0_24 = arith.constant 0 : index
    %c0_25 = arith.constant 0 : index
    %25 = vector.load %arg2[%c1_23, %c0_24, %c0_25] : memref<4x100x100xf32, #tpu.memory_space<vmem>>, vector<1x100x100xf32>
    %26 = vector.shape_cast %25 : vector<1x100x100xf32> to vector<100x100xf32>
    %cst_26 = arith.constant dense<0.000000e+00> : vector<100x65xf32>
    %27 = tpu.matmul %24, %0, %cst_26 {dimension_numbers = #tpu.dot_dimension_numbers<[1], [0], [0], [1], [0, 0, 1, 1], [], []>} : vector<100x65xf32>, vector<65x65xf32>, vector<100x65xf32> -> vector<100x65xf32>
    %cst_27 = arith.constant dense<0.000000e+00> : vector<100x65xf32>
    %28 = tpu.matmul %26, %27, %cst_27 {dimension_numbers = #tpu.dot_dimension_numbers<[1], [0], [0], [1], [0, 0, 1, 1], [], []>} : vector<100x100xf32>, vector<100x65xf32>, vector<100x65xf32> -> vector<100x65xf32>
    %29 = vector.broadcast %2 : vector<1x65xf32> to vector<100x65xf32>
    %30 = arith.addf %28, %29 : vector<100x65xf32>
    %cst_28 = arith.constant 0.000000e+00 : f32
    %31 = vector.broadcast %cst_28 : f32 to vector<100x65xf32>
    %32 = arith.maximumf %30, %31 : vector<100x65xf32>
    %cst_29 = arith.constant dense<0.000000e+00> : vector<100x65xf32>
    %33 = tpu.matmul %32, %1, %cst_29 {dimension_numbers = #tpu.dot_dimension_numbers<[1], [0], [0], [1], [0, 0, 1, 1], [], []>} : vector<100x65xf32>, vector<65x65xf32>, vector<100x65xf32> -> vector<100x65xf32>
    %cst_30 = arith.constant dense<0.000000e+00> : vector<100x65xf32>
    %34 = tpu.matmul %26, %33, %cst_30 {dimension_numbers = #tpu.dot_dimension_numbers<[1], [0], [0], [1], [0, 0, 1, 1], [], []>} : vector<100x100xf32>, vector<100x65xf32>, vector<100x65xf32> -> vector<100x65xf32>
    %35 = vector.broadcast %3 : vector<1x65xf32> to vector<100x65xf32>
    %36 = arith.addf %34, %35 : vector<100x65xf32>
    %cst_31 = arith.constant 0.000000e+00 : f32
    %37 = vector.broadcast %cst_31 : f32 to vector<100x65xf32>
    %38 = arith.maximumf %36, %37 : vector<100x65xf32>
    %c1_32 = arith.constant 1 : index
    %c0_33 = arith.constant 0 : index
    %c0_34 = arith.constant 0 : index
    %39 = vector.load %arg7[%c1_32, %c0_33, %c0_34] : memref<4x100x65xf32, #tpu.memory_space<vmem>>, vector<1x100x65xf32>
    %40 = vector.shape_cast %39 : vector<1x100x65xf32> to vector<100x65xf32>
    %41 = vector.shape_cast %38 : vector<100x65xf32> to vector<1x100x65xf32>
    tpu.vector_store %arg7[%c1_32, %c0_33, %c0_34], %41 {strides = array<i32>} : memref<4x100x65xf32, #tpu.memory_space<vmem>>, vector<1x100x65xf32>,
    %c2 = arith.constant 2 : index
    %c0_35 = arith.constant 0 : index
    %c0_36 = arith.constant 0 : index
    %42 = vector.load %arg1[%c2, %c0_35, %c0_36] : memref<4x100x65xf32, #tpu.memory_space<vmem>>, vector<1x100x65xf32>
    %43 = vector.shape_cast %42 : vector<1x100x65xf32> to vector<100x65xf32>
    %c2_37 = arith.constant 2 : index
    %c0_38 = arith.constant 0 : index
    %c0_39 = arith.constant 0 : index
    %44 = vector.load %arg2[%c2_37, %c0_38, %c0_39] : memref<4x100x100xf32, #tpu.memory_space<vmem>>, vector<1x100x100xf32>
    %45 = vector.shape_cast %44 : vector<1x100x100xf32> to vector<100x100xf32>
    %cst_40 = arith.constant dense<0.000000e+00> : vector<100x65xf32>
    %46 = tpu.matmul %43, %0, %cst_40 {dimension_numbers = #tpu.dot_dimension_numbers<[1], [0], [0], [1], [0, 0, 1, 1], [], []>} : vector<100x65xf32>, vector<65x65xf32>, vector<100x65xf32> -> vector<100x65xf32>
    %cst_41 = arith.constant dense<0.000000e+00> : vector<100x65xf32>
    %47 = tpu.matmul %45, %46, %cst_41 {dimension_numbers = #tpu.dot_dimension_numbers<[1], [0], [0], [1], [0, 0, 1, 1], [], []>} : vector<100x100xf32>, vector<100x65xf32>, vector<100x65xf32> -> vector<100x65xf32>
    %48 = vector.broadcast %2 : vector<1x65xf32> to vector<100x65xf32>
    %49 = arith.addf %47, %48 : vector<100x65xf32>
    %cst_42 = arith.constant 0.000000e+00 : f32
    %50 = vector.broadcast %cst_42 : f32 to vector<100x65xf32>
    %51 = arith.maximumf %49, %50 : vector<100x65xf32>
    %cst_43 = arith.constant dense<0.000000e+00> : vector<100x65xf32>
    %52 = tpu.matmul %51, %1, %cst_43 {dimension_numbers = #tpu.dot_dimension_numbers<[1], [0], [0], [1], [0, 0, 1, 1], [], []>} : vector<100x65xf32>, vector<65x65xf32>, vector<100x65xf32> -> vector<100x65xf32>
    %cst_44 = arith.constant dense<0.000000e+00> : vector<100x65xf32>
    %53 = tpu.matmul %45, %52, %cst_44 {dimension_numbers = #tpu.dot_dimension_numbers<[1], [0], [0], [1], [0, 0, 1, 1], [], []>} : vector<100x100xf32>, vector<100x65xf32>, vector<100x65xf32> -> vector<100x65xf32>
    %54 = vector.broadcast %3 : vector<1x65xf32> to vector<100x65xf32>
    %55 = arith.addf %53, %54 : vector<100x65xf32>
    %cst_45 = arith.constant 0.000000e+00 : f32
    %56 = vector.broadcast %cst_45 : f32 to vector<100x65xf32>
    %57 = arith.maximumf %55, %56 : vector<100x65xf32>
    %c2_46 = arith.constant 2 : index
    %c0_47 = arith.constant 0 : index
    %c0_48 = arith.constant 0 : index
    %58 = vector.load %arg7[%c2_46, %c0_47, %c0_48] : memref<4x100x65xf32, #tpu.memory_space<vmem>>, vector<1x100x65xf32>
    %59 = vector.shape_cast %58 : vector<1x100x65xf32> to vector<100x65xf32>
    %60 = vector.shape_cast %57 : vector<100x65xf32> to vector<1x100x65xf32>
    tpu.vector_store %arg7[%c2_46, %c0_47, %c0_48], %60 {strides = array<i32>} : memref<4x100x65xf32, #tpu.memory_space<vmem>>, vector<1x100x65xf32>,
    %c3 = arith.constant 3 : index
    %c0_49 = arith.constant 0 : index
    %c0_50 = arith.constant 0 : index
    %61 = vector.load %arg1[%c3, %c0_49, %c0_50] : memref<4x100x65xf32, #tpu.memory_space<vmem>>, vector<1x100x65xf32>
    %62 = vector.shape_cast %61 : vector<1x100x65xf32> to vector<100x65xf32>
    %c3_51 = arith.constant 3 : index
    %c0_52 = arith.constant 0 : index
    %c0_53 = arith.constant 0 : index
    %63 = vector.load %arg2[%c3_51, %c0_52, %c0_53] : memref<4x100x100xf32, #tpu.memory_space<vmem>>, vector<1x100x100xf32>
    %64 = vector.shape_cast %63 : vector<1x100x100xf32> to vector<100x100xf32>
    %cst_54 = arith.constant dense<0.000000e+00> : vector<100x65xf32>
    %65 = tpu.matmul %62, %0, %cst_54 {dimension_numbers = #tpu.dot_dimension_numbers<[1], [0], [0], [1], [0, 0, 1, 1], [], []>} : vector<100x65xf32>, vector<65x65xf32>, vector<100x65xf32> -> vector<100x65xf32>
    %cst_55 = arith.constant dense<0.000000e+00> : vector<100x65xf32>
    %66 = tpu.matmul %64, %65, %cst_55 {dimension_numbers = #tpu.dot_dimension_numbers<[1], [0], [0], [1], [0, 0, 1, 1], [], []>} : vector<100x100xf32>, vector<100x65xf32>, vector<100x65xf32> -> vector<100x65xf32>
    %67 = vector.broadcast %2 : vector<1x65xf32> to vector<100x65xf32>
    %68 = arith.addf %66, %67 : vector<100x65xf32>
    %cst_56 = arith.constant 0.000000e+00 : f32
    %69 = vector.broadcast %cst_56 : f32 to vector<100x65xf32>
    %70 = arith.maximumf %68, %69 : vector<100x65xf32>
    %cst_57 = arith.constant dense<0.000000e+00> : vector<100x65xf32>
    %71 = tpu.matmul %70, %1, %cst_57 {dimension_numbers = #tpu.dot_dimension_numbers<[1], [0], [0], [1], [0, 0, 1, 1], [], []>} : vector<100x65xf32>, vector<65x65xf32>, vector<100x65xf32> -> vector<100x65xf32>
    %cst_58 = arith.constant dense<0.000000e+00> : vector<100x65xf32>
    %72 = tpu.matmul %64, %71, %cst_58 {dimension_numbers = #tpu.dot_dimension_numbers<[1], [0], [0], [1], [0, 0, 1, 1], [], []>} : vector<100x100xf32>, vector<100x65xf32>, vector<100x65xf32> -> vector<100x65xf32>
    %73 = vector.broadcast %3 : vector<1x65xf32> to vector<100x65xf32>
    %74 = arith.addf %72, %73 : vector<100x65xf32>
    %cst_59 = arith.constant 0.000000e+00 : f32
    %75 = vector.broadcast %cst_59 : f32 to vector<100x65xf32>
    %76 = arith.maximumf %74, %75 : vector<100x65xf32>
    %c3_60 = arith.constant 3 : index
    %c0_61 = arith.constant 0 : index
    %c0_62 = arith.constant 0 : index
    %77 = vector.load %arg7[%c3_60, %c0_61, %c0_62] : memref<4x100x65xf32, #tpu.memory_space<vmem>>, vector<1x100x65xf32>
    %78 = vector.shape_cast %77 : vector<1x100x65xf32> to vector<100x65xf32>
    %79 = vector.shape_cast %76 : vector<100x65xf32> to vector<1x100x65xf32>
    tpu.vector_store %arg7[%c3_60, %c0_61, %c0_62], %79 {strides = array<i32>} : memref<4x100x65xf32, #tpu.memory_space<vmem>>, vector<1x100x65xf32>,
    return
  }
  func.func @transform_0(%arg0: i32) -> (i32, i32, i32) {
    %c0_i32 = arith.constant 0 : i32
    %c0_i32_0 = arith.constant 0 : i32
    %c0_i32_1 = arith.constant 0 : i32
    return %arg0, %c0_i32, %c0_i32_0 : i32, i32, i32
  }
  func.func @transform_1(%arg0: i32) -> (i32, i32, i32) {
    %c0_i32 = arith.constant 0 : i32
    %c0_i32_0 = arith.constant 0 : i32
    %c0_i32_1 = arith.constant 0 : i32
    return %arg0, %c0_i32, %c0_i32_0 : i32, i32, i32
  }
  func.func @transform_2(%arg0: i32) -> (i32, i32) {
    %c0_i32 = arith.constant 0 : i32
    %c0_i32_0 = arith.constant 0 : i32
    %c0_i32_1 = arith.constant 0 : i32
    return %c0_i32, %c0_i32_0 : i32, i32
  }
  func.func @transform_3(%arg0: i32) -> (i32, i32) {
    %c0_i32 = arith.constant 0 : i32
    %c0_i32_0 = arith.constant 0 : i32
    %c0_i32_1 = arith.constant 0 : i32
    return %c0_i32, %c0_i32_0 : i32, i32
  }
  func.func @transform_4(%arg0: i32) -> (i32, i32) {
    %c0_i32 = arith.constant 0 : i32
    %c0_i32_0 = arith.constant 0 : i32
    %c0_i32_1 = arith.constant 0 : i32
    return %c0_i32, %c0_i32_0 : i32, i32
  }
  func.func @transform_5(%arg0: i32) -> (i32, i32) {
    %c0_i32 = arith.constant 0 : i32
    %c0_i32_0 = arith.constant 0 : i32
    %c0_i32_1 = arith.constant 0 : i32
    return %c0_i32, %c0_i32_0 : i32, i32
  }
  func.func @transform_6(%arg0: i32) -> (i32, i32, i32) {
    %c0_i32 = arith.constant 0 : i32
    %c0_i32_0 = arith.constant 0 : i32
    %c0_i32_1 = arith.constant 0 : i32
    return %arg0, %c0_i32, %c0_i32_0 : i32, i32, i32
  }
}

module attributes {stable_mosaic.version = 11 : i64} {
  func.func @_tail_kernel(%arg0: memref<4x1024xf32, #tpu.memory_space<vmem>>, %arg1: memref<1024x128xf32, #tpu.memory_space<vmem>>, %arg2: memref<1x128xf32, #tpu.memory_space<vmem>>, %arg3: memref<1x128xf32, #tpu.memory_space<vmem>>, %arg4: memref<1x128xf32, #tpu.memory_space<vmem>>, %arg5: memref<128x128xf32, #tpu.memory_space<vmem>>, %arg6: memref<1x128xf32, #tpu.memory_space<vmem>>, %arg7: memref<1x128xf32, #tpu.memory_space<vmem>>, %arg8: memref<1x128xf32, #tpu.memory_space<vmem>>, %arg9: memref<128x1xf32, #tpu.memory_space<vmem>>, %arg10: memref<1x1xf32, #tpu.memory_space<vmem>>, %arg11: memref<4x1xf32, #tpu.memory_space<vmem>>, %arg12: memref<4x1xf32, #tpu.memory_space<vmem>>, %arg13: memref<1x1xf32, #tpu.memory_space<vmem>>) attributes {dimension_semantics = [], scalar_prefetch = 0 : i64, scratch_operands = 0 : i64, tpu.core_type = #tpu.core_type<tc>} {
    %c0 = arith.constant 0 : index
    %c0_0 = arith.constant 0 : index
    %0 = vector.load %arg0[%c0, %c0_0] : memref<4x1024xf32, #tpu.memory_space<vmem>>, vector<4x1024xf32>
    %c0_1 = arith.constant 0 : index
    %c0_2 = arith.constant 0 : index
    %1 = vector.load %arg1[%c0_1, %c0_2] : memref<1024x128xf32, #tpu.memory_space<vmem>>, vector<1024x128xf32>
    %cst = arith.constant dense<0.000000e+00> : vector<4x128xf32>
    %2 = tpu.matmul %0, %1, %cst {dimension_numbers = #tpu.dot_dimension_numbers<[1], [0], [0], [1], [0, 0, 1, 1], [], []>} : vector<4x1024xf32>, vector<1024x128xf32>, vector<4x128xf32> -> vector<4x128xf32>
    %c0_3 = arith.constant 0 : index
    %c0_4 = arith.constant 0 : index
    %3 = vector.load %arg2[%c0_3, %c0_4] : memref<1x128xf32, #tpu.memory_space<vmem>>, vector<1x128xf32>
    %4 = vector.broadcast %3 : vector<1x128xf32> to vector<4x128xf32>
    %5 = arith.addf %2, %4 : vector<4x128xf32>
    %c0_5 = arith.constant 0 : index
    %c0_6 = arith.constant 0 : index
    %6 = vector.load %arg3[%c0_5, %c0_6] : memref<1x128xf32, #tpu.memory_space<vmem>>, vector<1x128xf32>
    %c0_7 = arith.constant 0 : index
    %c0_8 = arith.constant 0 : index
    %7 = vector.load %arg4[%c0_7, %c0_8] : memref<1x128xf32, #tpu.memory_space<vmem>>, vector<1x128xf32>
    %cst_9 = arith.constant dense<0.000000e+00> : vector<128xf32>
    %8 = vector.multi_reduction <add>, %5, %cst_9 [0] : vector<4x128xf32> to vector<128xf32>
    %9 = vector.shape_cast %8 : vector<128xf32> to vector<1x128xf32>
    %cst_10 = arith.constant 4.000000e+00 : f32
    %10 = vector.broadcast %cst_10 : f32 to vector<1x128xf32>
    %11 = arith.divf %9, %10 : vector<1x128xf32>
    %12 = vector.broadcast %11 : vector<1x128xf32> to vector<4x128xf32>
    %13 = arith.subf %5, %12 : vector<4x128xf32>
    %14 = arith.mulf %13, %13 : vector<4x128xf32>
    %cst_11 = arith.constant dense<0.000000e+00> : vector<128xf32>
    %15 = vector.multi_reduction <add>, %14, %cst_11 [0] : vector<4x128xf32> to vector<128xf32>
    %16 = vector.shape_cast %15 : vector<128xf32> to vector<1x128xf32>
    %cst_12 = arith.constant 4.000000e+00 : f32
    %17 = vector.broadcast %cst_12 : f32 to vector<1x128xf32>
    %18 = arith.divf %16, %17 : vector<1x128xf32>
    %19 = vector.broadcast %11 : vector<1x128xf32> to vector<4x128xf32>
    %20 = arith.subf %5, %19 : vector<4x128xf32>
    %cst_13 = arith.constant 9.99999974E-6 : f32
    %21 = vector.broadcast %cst_13 : f32 to vector<1x128xf32>
    %22 = arith.addf %18, %21 : vector<1x128xf32>
    %23 = math.rsqrt %22 : vector<1x128xf32>
    %24 = vector.broadcast %23 : vector<1x128xf32> to vector<4x128xf32>
    %25 = arith.mulf %20, %24 : vector<4x128xf32>
    %26 = vector.broadcast %6 : vector<1x128xf32> to vector<4x128xf32>
    %27 = arith.mulf %25, %26 : vector<4x128xf32>
    %28 = vector.broadcast %7 : vector<1x128xf32> to vector<4x128xf32>
    %29 = arith.addf %27, %28 : vector<4x128xf32>
    %cst_14 = arith.constant 0.000000e+00 : f32
    %30 = vector.broadcast %cst_14 : f32 to vector<4x128xf32>
    %31 = arith.maximumf %29, %30 : vector<4x128xf32>
    %c0_15 = arith.constant 0 : index
    %c0_16 = arith.constant 0 : index
    %32 = vector.load %arg5[%c0_15, %c0_16] : memref<128x128xf32, #tpu.memory_space<vmem>>, vector<128x128xf32>
    %cst_17 = arith.constant dense<0.000000e+00> : vector<4x128xf32>
    %33 = tpu.matmul %31, %32, %cst_17 {dimension_numbers = #tpu.dot_dimension_numbers<[1], [0], [0], [1], [0, 0, 1, 1], [], []>} : vector<4x128xf32>, vector<128x128xf32>, vector<4x128xf32> -> vector<4x128xf32>
    %c0_18 = arith.constant 0 : index
    %c0_19 = arith.constant 0 : index
    %34 = vector.load %arg6[%c0_18, %c0_19] : memref<1x128xf32, #tpu.memory_space<vmem>>, vector<1x128xf32>
    %35 = vector.broadcast %34 : vector<1x128xf32> to vector<4x128xf32>
    %36 = arith.addf %33, %35 : vector<4x128xf32>
    %c0_20 = arith.constant 0 : index
    %c0_21 = arith.constant 0 : index
    %37 = vector.load %arg7[%c0_20, %c0_21] : memref<1x128xf32, #tpu.memory_space<vmem>>, vector<1x128xf32>
    %c0_22 = arith.constant 0 : index
    %c0_23 = arith.constant 0 : index
    %38 = vector.load %arg8[%c0_22, %c0_23] : memref<1x128xf32, #tpu.memory_space<vmem>>, vector<1x128xf32>
    %cst_24 = arith.constant dense<0.000000e+00> : vector<128xf32>
    %39 = vector.multi_reduction <add>, %36, %cst_24 [0] : vector<4x128xf32> to vector<128xf32>
    %40 = vector.shape_cast %39 : vector<128xf32> to vector<1x128xf32>
    %cst_25 = arith.constant 4.000000e+00 : f32
    %41 = vector.broadcast %cst_25 : f32 to vector<1x128xf32>
    %42 = arith.divf %40, %41 : vector<1x128xf32>
    %43 = vector.broadcast %42 : vector<1x128xf32> to vector<4x128xf32>
    %44 = arith.subf %36, %43 : vector<4x128xf32>
    %45 = arith.mulf %44, %44 : vector<4x128xf32>
    %cst_26 = arith.constant dense<0.000000e+00> : vector<128xf32>
    %46 = vector.multi_reduction <add>, %45, %cst_26 [0] : vector<4x128xf32> to vector<128xf32>
    %47 = vector.shape_cast %46 : vector<128xf32> to vector<1x128xf32>
    %cst_27 = arith.constant 4.000000e+00 : f32
    %48 = vector.broadcast %cst_27 : f32 to vector<1x128xf32>
    %49 = arith.divf %47, %48 : vector<1x128xf32>
    %50 = vector.broadcast %42 : vector<1x128xf32> to vector<4x128xf32>
    %51 = arith.subf %36, %50 : vector<4x128xf32>
    %cst_28 = arith.constant 9.99999974E-6 : f32
    %52 = vector.broadcast %cst_28 : f32 to vector<1x128xf32>
    %53 = arith.addf %49, %52 : vector<1x128xf32>
    %54 = math.rsqrt %53 : vector<1x128xf32>
    %55 = vector.broadcast %54 : vector<1x128xf32> to vector<4x128xf32>
    %56 = arith.mulf %51, %55 : vector<4x128xf32>
    %57 = vector.broadcast %37 : vector<1x128xf32> to vector<4x128xf32>
    %58 = arith.mulf %56, %57 : vector<4x128xf32>
    %59 = vector.broadcast %38 : vector<1x128xf32> to vector<4x128xf32>
    %60 = arith.addf %58, %59 : vector<4x128xf32>
    %cst_29 = arith.constant 0.000000e+00 : f32
    %61 = vector.broadcast %cst_29 : f32 to vector<4x128xf32>
    %62 = arith.maximumf %60, %61 : vector<4x128xf32>
    %c0_30 = arith.constant 0 : index
    %c0_31 = arith.constant 0 : index
    %63 = vector.load %arg9[%c0_30, %c0_31] : memref<128x1xf32, #tpu.memory_space<vmem>>, vector<128x1xf32>
    %cst_32 = arith.constant dense<0.000000e+00> : vector<4x1xf32>
    %64 = tpu.matmul %62, %63, %cst_32 {dimension_numbers = #tpu.dot_dimension_numbers<[1], [0], [0], [1], [0, 0, 1, 1], [], []>} : vector<4x128xf32>, vector<128x1xf32>, vector<4x1xf32> -> vector<4x1xf32>
    %c0_33 = arith.constant 0 : index
    %c0_34 = arith.constant 0 : index
    %65 = vector.load %arg10[%c0_33, %c0_34] : memref<1x1xf32, #tpu.memory_space<vmem>>, vector<1x1xf32>
    %66 = vector.broadcast %65 : vector<1x1xf32> to vector<4x1xf32>
    %67 = arith.addf %64, %66 : vector<4x1xf32>
    %68 = arith.negf %67 : vector<4x1xf32>
    %69 = math.exp %68 : vector<4x1xf32>
    %cst_35 = arith.constant 1.000000e+00 : f32
    %70 = vector.broadcast %cst_35 : f32 to vector<4x1xf32>
    %71 = arith.addf %70, %69 : vector<4x1xf32>
    %72 = arith.divf %70, %71 : vector<4x1xf32>
    %c0_36 = arith.constant 0 : index
    %c0_37 = arith.constant 0 : index
    %73 = vector.load %arg12[%c0_36, %c0_37] : memref<4x1xf32, #tpu.memory_space<vmem>>, vector<4x1xf32>
    tpu.vector_store %arg12[%c0_36, %c0_37], %72 {strides = array<i32>} : memref<4x1xf32, #tpu.memory_space<vmem>>, vector<4x1xf32>,
    %c0_38 = arith.constant 0 : index
    %c0_39 = arith.constant 0 : index
    %74 = vector.load %arg11[%c0_38, %c0_39] : memref<4x1xf32, #tpu.memory_space<vmem>>, vector<4x1xf32>
    %75 = math.log %72 : vector<4x1xf32>
    %cst_40 = arith.constant -1.000000e+02 : f32
    %76 = vector.broadcast %cst_40 : f32 to vector<4x1xf32>
    %77 = arith.maximumf %75, %76 : vector<4x1xf32>
    %cst_41 = arith.constant 1.000000e+00 : f32
    %78 = vector.broadcast %cst_41 : f32 to vector<4x1xf32>
    %79 = arith.subf %78, %72 : vector<4x1xf32>
    %80 = math.log %79 : vector<4x1xf32>
    %cst_42 = arith.constant -1.000000e+02 : f32
    %81 = vector.broadcast %cst_42 : f32 to vector<4x1xf32>
    %82 = arith.maximumf %80, %81 : vector<4x1xf32>
    %83 = arith.mulf %74, %77 : vector<4x1xf32>
    %cst_43 = arith.constant 1.000000e+00 : f32
    %84 = vector.broadcast %cst_43 : f32 to vector<4x1xf32>
    %85 = arith.subf %84, %74 : vector<4x1xf32>
    %86 = arith.mulf %85, %82 : vector<4x1xf32>
    %87 = arith.addf %83, %86 : vector<4x1xf32>
    %88 = vector.shape_cast %87 : vector<4x1xf32> to vector<1x4x1xf32>
    %cst_44 = arith.constant dense<0.000000e+00> : vector<1xf32>
    %89 = vector.multi_reduction <add>, %88, %cst_44 [1, 2] : vector<1x4x1xf32> to vector<1xf32>
    %90 = vector.shape_cast %89 : vector<1xf32> to vector<1x1x1xf32>
    %91 = vector.extract %90[0, 0, 0] : f32 from vector<1x1x1xf32>
    %92 = vector.broadcast %91 : f32 to vector<1x1xf32>
    %cst_45 = arith.constant 4.000000e+00 : f32
    %93 = vector.broadcast %cst_45 : f32 to vector<1x1xf32>
    %94 = arith.divf %92, %93 : vector<1x1xf32>
    %cst_46 = arith.constant 0.000000e+00 : f32
    %95 = vector.broadcast %cst_46 : f32 to vector<1x1xf32>
    %96 = arith.subf %95, %94 : vector<1x1xf32>
    %c0_47 = arith.constant 0 : index
    %c0_48 = arith.constant 0 : index
    %97 = vector.load %arg13[%c0_47, %c0_48] : memref<1x1xf32, #tpu.memory_space<vmem>>, vector<1x1xf32>
    tpu.vector_store %arg13[%c0_47, %c0_48], %96 {strides = array<i32>} : memref<1x1xf32, #tpu.memory_space<vmem>>, vector<1x1xf32>,
    return
  }
}

module attributes {stable_mosaic.version = 11 : i64} {
  func.func @_linear_bn_relu_kernel(%arg0: i32, %arg1: i32, %arg2: memref<4x3328xf32, #tpu.memory_space<vmem>>, %arg3: memref<3328x512xbf16, #tpu.memory_space<vmem>>, %arg4: memref<1x512xf32, #tpu.memory_space<vmem>>, %arg5: memref<1x512xf32, #tpu.memory_space<vmem>>, %arg6: memref<1x512xf32, #tpu.memory_space<vmem>>, %arg7: memref<4x512xf32, #tpu.memory_space<vmem>>) attributes {dimension_semantics = [#tpu.dimension_semantics<parallel>, #tpu.dimension_semantics<arbitrary>], iteration_bounds = array<i64: 2, 2>, scalar_prefetch = 0 : i64, scratch_operands = 0 : i64, tpu.core_type = #tpu.core_type<tc>, window_params = [{transform_indices = @transform_0, window_bounds = array<i64: 4, 3328>}, {transform_indices = @transform_1, window_bounds = array<i64: 3328, 512>}, {transform_indices = @transform_2, window_bounds = array<i64: 1, 512>}, {transform_indices = @transform_3, window_bounds = array<i64: 1, 512>}, {transform_indices = @transform_4, window_bounds = array<i64: 1, 512>}, {transform_indices = @transform_5, window_bounds = array<i64: 4, 512>}]} {
    %c0_i32 = arith.constant 0 : i32
    %0 = arith.cmpi eq, %arg1, %c0_i32 : i32
    %1 = arith.extui %0 : i1 to i32
    %c0_i32_0 = arith.constant 0 : i32
    %2 = arith.cmpi ne, %1, %c0_i32_0 : i32
    scf.if %2 {
      %cst_9 = arith.constant 0.000000e+00 : f32
      %13 = vector.broadcast %cst_9 : f32 to vector<4x512xf32>
      %c0_10 = arith.constant 0 : index
      %c0_11 = arith.constant 0 : index
      %14 = vector.load %arg7[%c0_10, %c0_11] : memref<4x512xf32, #tpu.memory_space<vmem>>, vector<4x512xf32>
      tpu.vector_store %arg7[%c0_10, %c0_11], %13 {strides = array<i32>} : memref<4x512xf32, #tpu.memory_space<vmem>>, vector<4x512xf32>,
    } else {
    }
    %c0 = arith.constant 0 : index
    %c0_1 = arith.constant 0 : index
    %3 = vector.load %arg3[%c0, %c0_1] : memref<3328x512xbf16, #tpu.memory_space<vmem>>, vector<3328x512xbf16>
    %4 = arith.extf %3 : vector<3328x512xbf16> to vector<3328x512xf32>
    %c0_2 = arith.constant 0 : index
    %c0_3 = arith.constant 0 : index
    %5 = vector.load %arg7[%c0_2, %c0_3] : memref<4x512xf32, #tpu.memory_space<vmem>>, vector<4x512xf32>
    %c0_4 = arith.constant 0 : index
    %c0_5 = arith.constant 0 : index
    %6 = vector.load %arg2[%c0_4, %c0_5] : memref<4x3328xf32, #tpu.memory_space<vmem>>, vector<4x3328xf32>
    %cst = arith.constant dense<0.000000e+00> : vector<4x512xf32>
    %7 = tpu.matmul %6, %4, %cst {dimension_numbers = #tpu.dot_dimension_numbers<[1], [0], [0], [1], [0, 0, 1, 1], [], []>} : vector<4x3328xf32>, vector<3328x512xf32>, vector<4x512xf32> -> vector<4x512xf32>
    %8 = arith.addf %5, %7 : vector<4x512xf32>
    %c0_6 = arith.constant 0 : index
    %c0_7 = arith.constant 0 : index
    %9 = vector.load %arg7[%c0_6, %c0_7] : memref<4x512xf32, #tpu.memory_space<vmem>>, vector<4x512xf32>
    tpu.vector_store %arg7[%c0_6, %c0_7], %8 {strides = array<i32>} : memref<4x512xf32, #tpu.memory_space<vmem>>, vector<4x512xf32>,
    %c1_i32 = arith.constant 1 : i32
    %10 = arith.cmpi eq, %arg1, %c1_i32 : i32
    %11 = arith.extui %10 : i1 to i32
    %c0_i32_8 = arith.constant 0 : i32
    %12 = arith.cmpi ne, %11, %c0_i32_8 : i32
    scf.if %12 {
      %c0_9 = arith.constant 0 : index
      %c0_10 = arith.constant 0 : index
      %13 = vector.load %arg7[%c0_9, %c0_10] : memref<4x512xf32, #tpu.memory_space<vmem>>, vector<4x512xf32>
      %c0_11 = arith.constant 0 : index
      %c0_12 = arith.constant 0 : index
      %14 = vector.load %arg4[%c0_11, %c0_12] : memref<1x512xf32, #tpu.memory_space<vmem>>, vector<1x512xf32>
      %15 = vector.broadcast %14 : vector<1x512xf32> to vector<4x512xf32>
      %16 = arith.addf %13, %15 : vector<4x512xf32>
      %cst_13 = arith.constant dense<0.000000e+00> : vector<512xf32>
      %17 = vector.multi_reduction <add>, %16, %cst_13 [0] : vector<4x512xf32> to vector<512xf32>
      %18 = vector.shape_cast %17 : vector<512xf32> to vector<1x512xf32>
      %cst_14 = arith.constant 4.000000e+00 : f32
      %19 = vector.broadcast %cst_14 : f32 to vector<1x512xf32>
      %20 = arith.divf %18, %19 : vector<1x512xf32>
      %21 = vector.broadcast %20 : vector<1x512xf32> to vector<4x512xf32>
      %22 = arith.subf %16, %21 : vector<4x512xf32>
      %23 = arith.mulf %22, %22 : vector<4x512xf32>
      %cst_15 = arith.constant dense<0.000000e+00> : vector<512xf32>
      %24 = vector.multi_reduction <add>, %23, %cst_15 [0] : vector<4x512xf32> to vector<512xf32>
      %25 = vector.shape_cast %24 : vector<512xf32> to vector<1x512xf32>
      %cst_16 = arith.constant 4.000000e+00 : f32
      %26 = vector.broadcast %cst_16 : f32 to vector<1x512xf32>
      %27 = arith.divf %25, %26 : vector<1x512xf32>
      %28 = vector.broadcast %20 : vector<1x512xf32> to vector<4x512xf32>
      %29 = arith.subf %16, %28 : vector<4x512xf32>
      %cst_17 = arith.constant 9.99999974E-6 : f32
      %30 = vector.broadcast %cst_17 : f32 to vector<1x512xf32>
      %31 = arith.addf %27, %30 : vector<1x512xf32>
      %32 = math.rsqrt %31 : vector<1x512xf32>
      %33 = vector.broadcast %32 : vector<1x512xf32> to vector<4x512xf32>
      %34 = arith.mulf %29, %33 : vector<4x512xf32>
      %c0_18 = arith.constant 0 : index
      %c0_19 = arith.constant 0 : index
      %35 = vector.load %arg5[%c0_18, %c0_19] : memref<1x512xf32, #tpu.memory_space<vmem>>, vector<1x512xf32>
      %36 = vector.broadcast %35 : vector<1x512xf32> to vector<4x512xf32>
      %37 = arith.mulf %34, %36 : vector<4x512xf32>
      %c0_20 = arith.constant 0 : index
      %c0_21 = arith.constant 0 : index
      %38 = vector.load %arg6[%c0_20, %c0_21] : memref<1x512xf32, #tpu.memory_space<vmem>>, vector<1x512xf32>
      %39 = vector.broadcast %38 : vector<1x512xf32> to vector<4x512xf32>
      %40 = arith.addf %37, %39 : vector<4x512xf32>
      %cst_22 = arith.constant 0.000000e+00 : f32
      %41 = vector.broadcast %cst_22 : f32 to vector<4x512xf32>
      %42 = arith.maximumf %40, %41 : vector<4x512xf32>
      %c0_23 = arith.constant 0 : index
      %c0_24 = arith.constant 0 : index
      %43 = vector.load %arg7[%c0_23, %c0_24] : memref<4x512xf32, #tpu.memory_space<vmem>>, vector<4x512xf32>
      tpu.vector_store %arg7[%c0_23, %c0_24], %42 {strides = array<i32>} : memref<4x512xf32, #tpu.memory_space<vmem>>, vector<4x512xf32>,
    } else {
    }
    return
  }
  func.func @transform_0(%arg0: i32, %arg1: i32) -> (i32, i32) {
    %c0_i32 = arith.constant 0 : i32
    %c0_i32_0 = arith.constant 0 : i32
    return %c0_i32, %arg1 : i32, i32
  }
  func.func @transform_1(%arg0: i32, %arg1: i32) -> (i32, i32) {
    %c0_i32 = arith.constant 0 : i32
    return %arg1, %arg0 : i32, i32
  }
  func.func @transform_2(%arg0: i32, %arg1: i32) -> (i32, i32) {
    %c0_i32 = arith.constant 0 : i32
    %c0_i32_0 = arith.constant 0 : i32
    return %c0_i32, %arg0 : i32, i32
  }
  func.func @transform_3(%arg0: i32, %arg1: i32) -> (i32, i32) {
    %c0_i32 = arith.constant 0 : i32
    %c0_i32_0 = arith.constant 0 : i32
    return %c0_i32, %arg0 : i32, i32
  }
  func.func @transform_4(%arg0: i32, %arg1: i32) -> (i32, i32) {
    %c0_i32 = arith.constant 0 : i32
    %c0_i32_0 = arith.constant 0 : i32
    return %c0_i32, %arg0 : i32, i32
  }
  func.func @transform_5(%arg0: i32, %arg1: i32) -> (i32, i32) {
    %c0_i32 = arith.constant 0 : i32
    %c0_i32_0 = arith.constant 0 : i32
    return %c0_i32, %arg0 : i32, i32
  }
}

</mosaic_0001>

<bundles_post_ra>
// kernel: my_model_forward.5
= control target key start
LH: loop header
LB: loop body
LE: loop exit
PB: predicated region body
PF: predicated region fallthrough
CT: control target
= control target key end

     0   :  { %s1905_s0 = inlined_call_operand.vmem [shape: f32[4,1024], index: 0, kind: input, shape index: {}]   ;;  %s1906_s1 = inlined_call_operand.vmem [shape: f32[1024,128], index: 1, kind: input, shape index: {}]   ;;  %s1907_s2 = inlined_call_operand.vmem [shape: f32[1,128], index: 2, kind: input, shape index: {}]   ;;  %s1908_s3 = inlined_call_operand.vmem [shape: f32[1,128], index: 3, kind: input, shape index: {}]   ;;  %s1909_s4 = inlined_call_operand.vmem [shape: f32[1,128], index: 4, kind: input, shape index: {}]   ;;  %s1910_s5 = inlined_call_operand.vmem [shape: f32[128,128], index: 5, kind: input, shape index: {}]   ;;  %s1911_s6 = inlined_call_operand.vmem [shape: f32[1,128], index: 6, kind: input, shape index: {}]   ;;  %s1912_s7 = inlined_call_operand.vmem [shape: f32[1,128], index: 7, kind: input, shape index: {}]   ;;  %s1913_s8 = inlined_call_operand.vmem [shape: f32[1,128], index: 8, kind: input, shape index: {}]   ;;  %s1914_s9 = inlined_call_operand.vmem [shape: f32[128,1], index: 9, kind: input, shape index: {}]   ;;  %s1915_s10 = inlined_call_operand.<no memory space> [shape: f32[1,1], index: 10, kind: input, shape index: {}]   ;;  %s1916_s11 = inlined_call_operand.vmem [shape: f32[4,1], index: 11, kind: input, shape index: {}]   ;;  %s1917_s12 = inlined_call_operand.vmem [shape: f32[4,1], index: 12, kind: output, shape index: {0}]   ;;  %s1918_s13 = inlined_call_operand.hbm [shape: f32[1,1], index: 13, kind: output, shape index: {1}]  }
   0x1   :  { %v19_v0 = vstv %s1915_s10 }
   0x2   :  { %20 = vst [vmem:[#allocation2] sm:$0x1] %v19_v0 }
   0x3   :  { %v66_v1 = vld [vmem:[%s1906_s1 + $0x80] sm:$0xff]  ;;  %v67_v2 = vld [vmem:[%s1906_s1 + $0x88] sm:$0xff]  ;;  %v68_v12 = vld [vmem:[%s1906_s1 + $0x90] sm:$0xff] }
   0x4   :  { %v50_v3 = vld [vmem:[%s1906_s1] sm:$0xff]  ;;  %v1046_v4 = vpack.c.bf16 %v67_v2, %v66_v1  ;;  %v51_v5 = vld [vmem:[%s1906_s1 + $0x8] sm:$0xff]  ;;  %v69_v14 = vld [vmem:[%s1906_s1 + $0x98] sm:$0xff] }
   0x5   :  { %v98_v6 = vld [vmem:[%s1906_s1 + $0x180] sm:$0xff]  ;;  %v99_v7 = vld [vmem:[%s1906_s1 + $0x188] sm:$0xff]  ;;  %v1048_v8 = vpack.c.bf16 %v51_v5, %v50_v3  ;;  %v52_v15 = vld [vmem:[%s1906_s1 + $0x10] sm:$0xff]  ;;  %v1050_v17 = vpack.c.bf16 %v69_v14, %v68_v12 }
   0x6   :  { %v1078_v9 = vpack.c.bf16 %v99_v7, %v98_v6  ;;  %v82_v10 = vld [vmem:[%s1906_s1 + $0x100] sm:$0xff]  ;;  %v83_v11 = vld [vmem:[%s1906_s1 + $0x108] sm:$0xff]  ;;  %1047 = vmatprep.subr.bf16.mxu0 %v1046_v4  ;;  %v53_v16 = vld [vmem:[%s1906_s1 + $0x18] sm:$0xff] }
   0x7   :  { %v1080_v13 = vpack.c.bf16 %v83_v11, %v82_v10  ;;  %1049 = vmatpush3.bf16.msra.mxu0 %v1048_v8  ;;  %v1052_v18 = vpack.c.bf16 %v53_v16, %v52_v15  ;;  %v100_v19 = vld [vmem:[%s1906_s1 + $0x190] sm:$0xff]  ;;  %v101_v20 = vld [vmem:[%s1906_s1 + $0x198] sm:$0xff]  ;;  %v70_v24 = vld [vmem:[%s1906_s1 + $0xa0] sm:$0xff] }
   0x8   :  { %1079 = vmatprep.subr.bf16.mxu1 %v1078_v9  ;;  %v84_v21 = vld [vmem:[%s1906_s1 + $0x110] sm:$0xff]  ;;  %v1082_v22 = vpack.c.bf16 %v101_v20, %v100_v19  ;;  %v85_v23 = vld [vmem:[%s1906_s1 + $0x118] sm:$0xff]  ;;  %v71_v25 = vld [vmem:[%s1906_s1 + $0xa8] sm:$0xff]  ;;  %1051 = vmatprep.subr.bf16.mxu0 %v1050_v17 }
   0x9   :  { %1081 = vmatpush3.bf16.msra.mxu1 %v1080_v13  ;;  %v1084_v26 = vpack.c.bf16 %v85_v23, %v84_v21  ;;  %v1054_v27 = vpack.c.bf16 %v71_v25, %v70_v24  ;;  %v54_v28 = vld [vmem:[%s1906_s1 + $0x20] sm:$0xff]  ;;  %v55_v29 = vld [vmem:[%s1906_s1 + $0x28] sm:$0xff]  ;;  %v72_v36 = vld [vmem:[%s1906_s1 + $0xb0] sm:$0xff] }
   0xa   :  { %v102_v30 = vld [vmem:[%s1906_s1 + $0x1a0] sm:$0xff]  ;;  %1083 = vmatprep.subr.bf16.mxu1 %v1082_v22  ;;  %v103_v31 = vld [vmem:[%s1906_s1 + $0x1a8] sm:$0xff]  ;;  %v1056_v34 = vpack.c.bf16 %v55_v29, %v54_v28  ;;  %v73_v37 = vld [vmem:[%s1906_s1 + $0xb8] sm:$0xff] }
   0xb   :  { %v86_v32 = vld [vmem:[%s1906_s1 + $0x120] sm:$0xff]  ;;  %v87_v33 = vld [vmem:[%s1906_s1 + $0x128] sm:$0xff]  ;;  %1053 = vmatpush3.bf16.msra.mxu0 %v1052_v18  ;;  %v1086_v35 = vpack.c.bf16 %v103_v31, %v102_v30  ;;  %v56_v38 = vld [vmem:[%s1906_s1 + $0x30] sm:$0xff]  ;;  %v1058_v40 = vpack.c.bf16 %v73_v37, %v72_v36 }
   0xc   :  { %1055 = vmatprep.subr.bf16.mxu0 %v1054_v27  ;;  %v1088_v39 = vpack.c.bf16 %v87_v33, %v86_v32  ;;  %v57_v41 = vld [vmem:[%s1906_s1 + $0x38] sm:$0xff]  ;;  %v104_v42 = vld [vmem:[%s1906_s1 + $0x1b0] sm:$0xff]  ;;  %v74_v47 = vld [vmem:[%s1906_s1 + $0xc0] sm:$0xff] }
   0xd   :  { %1085 = vmatpush3.bf16.msra.mxu1 %v1084_v26  ;;  %v105_v43 = vld [vmem:[%s1906_s1 + $0x1b8] sm:$0xff]  ;;  %v88_v45 = vld [vmem:[%s1906_s1 + $0x130] sm:$0xff]  ;;  %v75_v48 = vld [vmem:[%s1906_s1 + $0xc8] sm:$0xff]  ;;  %v1060_v49 = vpack.c.bf16 %v57_v41, %v56_v38 }
   0xe   :  { %1087 = vmatprep.subr.bf16.mxu1 %v1086_v35  ;;  %v1090_v44 = vpack.c.bf16 %v105_v43, %v104_v42  ;;  %v89_v46 = vld [vmem:[%s1906_s1 + $0x138] sm:$0xff]  ;;  %v106_v50 = vld [vmem:[%s1906_s1 + $0x1c0] sm:$0xff]  ;;  %v107_v51 = vld [vmem:[%s1906_s1 + $0x1c8] sm:$0xff]  ;;  %v1062_v53 = vpack.c.bf16 %v75_v48, %v74_v47 }
   0xf   :  { %1057 = vmatpush3.bf16.msra.mxu0 %v1056_v34  ;;  %v1092_v52 = vpack.c.bf16 %v89_v46, %v88_v45  ;;  %v58_v54 = vld [vmem:[%s1906_s1 + $0x40] sm:$0xff]  ;;  %v59_v55 = vld [vmem:[%s1906_s1 + $0x48] sm:$0xff]  ;;  %v1094_v57 = vpack.c.bf16 %v107_v51, %v106_v50  ;;  %v76_v59 = vld [vmem:[%s1906_s1 + $0xd0] sm:$0xff] }
  0x10   :  { %1059 = vmatprep.subr.bf16.mxu0 %v1058_v40  ;;  %v90_v56 = vld [vmem:[%s1906_s1 + $0x140] sm:$0xff]  ;;  %v91_v58 = vld [vmem:[%s1906_s1 + $0x148] sm:$0xff]  ;;  %v77_v60 = vld [vmem:[%s1906_s1 + $0xd8] sm:$0xff]  ;;  %v1064_v63 = vpack.c.bf16 %v59_v55, %v58_v54 }
  0x11   :  { %1089 = vmatpush3.bf16.msra.mxu1 %v1088_v39  ;;  %v108_v61 = vld [vmem:[%s1906_s1 + $0x1d0] sm:$0xff]  ;;  %v109_v62 = vld [vmem:[%s1906_s1 + $0x1d8] sm:$0xff]  ;;  %v1096_v0 = vpack.c.bf16 %v91_v58, %v90_v56  ;;  %v1066_v1 = vpack.c.bf16 %v77_v60, %v76_v59  ;;  %v78_v7 = vld [vmem:[%s1906_s1 + $0xe0] sm:$0xff] }
  0x12   :  { %1091 = vmatprep.subr.bf16.mxu1 %v1090_v44  ;;  %v60_v2 = vld [vmem:[%s1906_s1 + $0x50] sm:$0xff]  ;;  %v61_v3 = vld [vmem:[%s1906_s1 + $0x58] sm:$0xff]  ;;  %v1098_v5 = vpack.c.bf16 %v109_v62, %v108_v61  ;;  %v79_v8 = vld [vmem:[%s1906_s1 + $0xe8] sm:$0xff] }
  0x13   :  { %1061 = vmatpush3.bf16.msra.mxu0 %v1060_v49  ;;  %v92_v4 = vld [vmem:[%s1906_s1 + $0x150] sm:$0xff]  ;;  %v93_v6 = vld [vmem:[%s1906_s1 + $0x158] sm:$0xff]  ;;  %v110_v9 = vld [vmem:[%s1906_s1 + $0x1e0] sm:$0xff]  ;;  %v1068_v11 = vpack.c.bf16 %v61_v3, %v60_v2  ;;  %v1070_v15 = vpack.c.bf16 %v79_v8, %v78_v7 }
  0x14   :  { %1063 = vmatprep.subr.bf16.mxu0 %v1062_v53  ;;  %v111_v10 = vld [vmem:[%s1906_s1 + $0x1e8] sm:$0xff]  ;;  %v62_v12 = vld [vmem:[%s1906_s1 + $0x60] sm:$0xff]  ;;  %v1100_v14 = vpack.c.bf16 %v93_v6, %v92_v4  ;;  %v80_v20 = vld [vmem:[%s1906_s1 + $0xf0] sm:$0xff] }
  0x15   :  { %1093 = vmatpush3.bf16.msra.mxu1 %v1092_v52  ;;  %v63_v13 = vld [vmem:[%s1906_s1 + $0x68] sm:$0xff]  ;;  %v94_v16 = vld [vmem:[%s1906_s1 + $0x160] sm:$0xff]  ;;  %v1102_v19 = vpack.c.bf16 %v111_v10, %v110_v9  ;;  %v81_v21 = vld [vmem:[%s1906_s1 + $0xf8] sm:$0xff] }
  0x16   :  { %1095 = vmatprep.subr.bf16.mxu1 %v1094_v57  ;;  %v95_v17 = vld [vmem:[%s1906_s1 + $0x168] sm:$0xff]  ;;  %v46_v18 = vld [vmem:[%s1905_s0] sm:$0xff]  ;;  %v112_v24 = vld [vmem:[%s1906_s1 + $0x1f0] sm:$0xff]  ;;  %v1072_v27 = vpack.c.bf16 %v63_v13, %v62_v12  ;;  %v1074_v29 = vpack.c.bf16 %v81_v21, %v80_v20 }
  0x17   :  { %1065 = vmatpush3.bf16.msra.mxu0 %v1064_v63  ;;  %v189_v22 = vcombine.high %v46_v18, %v46_v18  ;;  %v47_v23 = vld [vmem:[%s1905_s0 + $0x8] sm:$0xff]  ;;  %v113_v25 = vld [vmem:[%s1906_s1 + $0x1f8] sm:$0xff]  ;;  %v1104_v28 = vpack.c.bf16 %v95_v17, %v94_v16  ;;  %v64_v30 = vld [vmem:[%s1906_s1 + $0x70] sm:$0xff] }
  0x18   :  { %1067 = vmatprep.subr.bf16.mxu0 %v1066_v1  ;;  %v190_v26 = vcombine.high %v47_v23, %v47_v23  ;;  %v65_v31 = vld [vmem:[%s1906_s1 + $0x78] sm:$0xff]  ;;  %v96_v32 = vld [vmem:[%s1906_s1 + $0x170] sm:$0xff]  ;;  %v1106_v33 = vpack.c.bf16 %v113_v25, %v112_v24  ;;  %v130_v35 = vld [vmem:[%s1906_s1 + $0x280] sm:$0xff] }
  0x19   :  { %1097 = vmatpush3.bf16.msra.mxu1 %v1096_v0  ;;  %261 = vmatprep.mubr.f32.mxu0 %v189_v22  ;;  %v97_v34 = vld [vmem:[%s1906_s1 + $0x178] sm:$0xff]  ;;  %v131_v36 = vld [vmem:[%s1906_s1 + $0x288] sm:$0xff]  ;;  %v162_v37 = vld [vmem:[%s1906_s1 + $0x380] sm:$0xff]  ;;  %v1076_v39 = vpack.c.bf16 %v65_v31, %v64_v30 }
  0x1a   :  { %1099 = vmatprep.subr.bf16.mxu1 %v1098_v5  ;;  %331 = vmatprep.mubr.f32.mxu1 %v190_v26  ;;  %v163_v38 = vld [vmem:[%s1906_s1 + $0x388] sm:$0xff]  ;;  %v1108_v40 = vpack.c.bf16 %v97_v34, %v96_v32  ;;  %v1110_v41 = vpack.c.bf16 %v131_v36, %v130_v35  ;;  %v114_v42 = vld [vmem:[%s1906_s1 + $0x200] sm:$0xff]  ;;  %v132_v47 = vld [vmem:[%s1906_s1 + $0x290] sm:$0xff] }
  0x1b   :  { %1069 = vmatpush3.bf16.msra.mxu0 %v1068_v11  ;;  %v115_v43 = vld [vmem:[%s1906_s1 + $0x208] sm:$0xff]  ;;  %v146_v44 = vld [vmem:[%s1906_s1 + $0x300] sm:$0xff]  ;;  %v1142_v45 = vpack.c.bf16 %v163_v38, %v162_v37  ;;  %v133_v48 = vld [vmem:[%s1906_s1 + $0x298] sm:$0xff] }
  0x1c   :  { %1071 = vmatprep.subr.bf16.mxu0 %v1070_v15  ;;  %v147_v46 = vld [vmem:[%s1906_s1 + $0x308] sm:$0xff]  ;;  %v164_v49 = vld [vmem:[%s1906_s1 + $0x390] sm:$0xff]  ;;  %v165_v50 = vld [vmem:[%s1906_s1 + $0x398] sm:$0xff]  ;;  %v1112_v51 = vpack.c.bf16 %v115_v43, %v114_v42  ;;  %v1114_v53 = vpack.c.bf16 %v133_v48, %v132_v47 }
  0x1d   :  { %1101 = vmatpush3.bf16.msra.mxu1 %v1100_v14  ;;  %v1144_v52 = vpack.c.bf16 %v147_v46, %v146_v44  ;;  %v116_v54 = vld [vmem:[%s1906_s1 + $0x210] sm:$0xff]  ;;  %v117_v55 = vld [vmem:[%s1906_s1 + $0x218] sm:$0xff]  ;;  %v1146_v57 = vpack.c.bf16 %v165_v50, %v164_v49  ;;  %v134_v59 = vld [vmem:[%s1906_s1 + $0x2a0] sm:$0xff] }
  0x1e   :  { %1103 = vmatprep.subr.bf16.mxu1 %v1102_v19  ;;  %v148_v56 = vld [vmem:[%s1906_s1 + $0x310] sm:$0xff]  ;;  %v149_v58 = vld [vmem:[%s1906_s1 + $0x318] sm:$0xff]  ;;  %v135_v60 = vld [vmem:[%s1906_s1 + $0x2a8] sm:$0xff]  ;;  %v1116_v63 = vpack.c.bf16 %v117_v55, %v116_v54 }
  0x1f   :  { %1073 = vmatpush3.bf16.msra.mxu0 %v1072_v27  ;;  %v166_v61 = vld [vmem:[%s1906_s1 + $0x3a0] sm:$0xff]  ;;  %v167_v62 = vld [vmem:[%s1906_s1 + $0x3a8] sm:$0xff]  ;;  %v1148_v0 = vpack.c.bf16 %v149_v58, %v148_v56  ;;  %v1118_v1 = vpack.c.bf16 %v135_v60, %v134_v59  ;;  %v136_v7 = vld [vmem:[%s1906_s1 + $0x2b0] sm:$0xff] }
  0x20   :  { %1075 = vmatprep.subr.bf16.mxu0 %v1074_v29  ;;  %v118_v2 = vld [vmem:[%s1906_s1 + $0x220] sm:$0xff]  ;;  %v119_v3 = vld [vmem:[%s1906_s1 + $0x228] sm:$0xff]  ;;  %v1150_v5 = vpack.c.bf16 %v167_v62, %v166_v61  ;;  %v137_v8 = vld [vmem:[%s1906_s1 + $0x2b8] sm:$0xff] }
  0x21   :  { %1105 = vmatpush3.bf16.msra.mxu1 %v1104_v28  ;;  %v150_v4 = vld [vmem:[%s1906_s1 + $0x320] sm:$0xff]  ;;  %v151_v6 = vld [vmem:[%s1906_s1 + $0x328] sm:$0xff]  ;;  %v168_v9 = vld [vmem:[%s1906_s1 + $0x3b0] sm:$0xff]  ;;  %v1120_v11 = vpack.c.bf16 %v119_v3, %v118_v2  ;;  %v1122_v14 = vpack.c.bf16 %v137_v8, %v136_v7 }
  0x22   :  { %1107 = vmatprep.subr.bf16.mxu1 %v1106_v33  ;;  %v169_v10 = vld [vmem:[%s1906_s1 + $0x3b8] sm:$0xff]  ;;  %v120_v12 = vld [vmem:[%s1906_s1 + $0x230] sm:$0xff]  ;;  %v1152_v13 = vpack.c.bf16 %v151_v6, %v150_v4  ;;  %v138_v19 = vld [vmem:[%s1906_s1 + $0x2c0] sm:$0xff] }
  0x23   :  { %1077 = vmatpush3.bf16.msra.mxu0 %v1076_v39  ;;  %v121_v15 = vld [vmem:[%s1906_s1 + $0x238] sm:$0xff]  ;;  %v152_v16 = vld [vmem:[%s1906_s1 + $0x330] sm:$0xff]  ;;  %v139_v20 = vld [vmem:[%s1906_s1 + $0x2c8] sm:$0xff] }
  0x24   :  { %1111 = vmatprep.subr.bf16.mxu0 %v1110_v41  ;;  %v153_v17 = vld [vmem:[%s1906_s1 + $0x338] sm:$0xff]  ;;  %v170_v21 = vld [vmem:[%s1906_s1 + $0x3c0] sm:$0xff]  ;;  %v171_v22 = vld [vmem:[%s1906_s1 + $0x3c8] sm:$0xff]  ;;  %v1124_v25 = vpack.c.bf16 %v121_v15, %v120_v12 }
  0x25   :  { %1109 = vmatpush3.bf16.msra.mxu1 %v1108_v40  ;;  %v1659_v24 = vld [vmem:[%s1905_s0 + $0x18] sm:$0xff] }
  0x26   :  { %1143 = vmatprep.subr.bf16.mxu1 %v1142_v45  ;;  %262 = vmatmul.mubr.f32.vlgmr.msra.gmra.mrb[0].mxu0 %v46_v18  ;;  %v1154_v18 = vpack.c.bf16 %v169_v10, %v168_v9  ;;  %v192_v27 = vcombine.high %v1659_v24, %v1659_v24 }
  0x27   :  { %1113 = vmatpush3.bf16.msra.mxu0 %v1112_v51 }
  0x28   :  { %332 = vmatmul.mubr.f32.vlgmr.msra.gmra.mrb[0].mxu1 %v47_v23  ;;  %1115 = vmatprep.subr.bf16.mxu0 %v1114_v53  ;;  %v1654_v23 = vld [vmem:[%s1905_s0 + $0x10] sm:$0xff] }
  0x29   :  { %1145 = vmatpush3.bf16.msra.mxu1 %v1144_v52  ;;  %v191_v26 = vcombine.high %v1654_v23, %v1654_v23 }
  0x2a   :  { %1147 = vmatprep.subr.bf16.mxu1 %v1146_v57 }
  0x2b   :  { %1117 = vmatpush3.bf16.msra.mxu0 %v1116_v63 }
  0x2c   :  { %1119 = vmatprep.subr.bf16.mxu0 %v1118_v1 }
  0x2d   :  { %1149 = vmatpush3.bf16.msra.mxu1 %v1148_v0 }
  0x2e   :  { %1151 = vmatprep.subr.bf16.mxu1 %v1150_v5 }
  0x2f   :  { %1121 = vmatpush3.bf16.msra.mxu0 %v1120_v11 }
  0x30   :  { %21 = vsyncpa [#allocation4], 0  ;;  %1123 = vmatprep.subr.bf16.mxu0 %v1122_v14  ;;  %v1156_v28 = vpack.c.bf16 %v153_v17, %v152_v16  ;;  %v1126_v29 = vpack.c.bf16 %v139_v20, %v138_v19  ;;  %v122_v30 = vld [vmem:[%s1906_s1 + $0x240] sm:$0xff]  ;;  %v123_v31 = vld [vmem:[%s1906_s1 + $0x248] sm:$0xff]  ;;  %v1158_v33 = vpack.c.bf16 %v171_v22, %v170_v21  ;;  %401 = vmatprep.mubr.f32.mxu0 %v191_v26  ;;  %v1268_v12 = vmov 0.0|0.0  }
  0x31   :  { %1153 = vmatpush3.bf16.msra.mxu1 %v1152_v13  ;;  %v154_v32 = vld [vmem:[%s1906_s1 + $0x340] sm:$0xff]  ;;  %v155_v34 = vld [vmem:[%s1906_s1 + $0x348] sm:$0xff]  ;;  %v140_v35 = vld [vmem:[%s1906_s1 + $0x2d0] sm:$0xff]  ;;  %471 = vmatprep.mubr.f32.mxu1 %v192_v27  ;;  %v1128_v39 = vpack.c.bf16 %v123_v31, %v122_v30  ;;  %vm1269_vm0 = vmmov 0   ;;  %vm479_vm1 = vcmask 1043456   ;;  %vm747_vm2 = vcmask 3072  }
  0x32   :  { %1155 = vmatprep.subr.bf16.mxu1 %v1154_v18  ;;  %v141_v36 = vld [vmem:[%s1906_s1 + $0x2d8] sm:$0xff]  ;;  %v172_v37 = vld [vmem:[%s1906_s1 + $0x3d0] sm:$0xff]  ;;  %v1160_v40 = vpack.c.bf16 %v155_v34, %v154_v32  ;;  %v142_v47 = vld [vmem:[%s1906_s1 + $0x2e0] sm:$0xff]  ;;  %v1270_v34 = vmov 0.0   ;;  %vm774_vm3 = vcmask 0  }
  0x33   :  { %v173_v38 = vld [vmem:[%s1906_s1 + $0x3d8] sm:$0xff]  ;;  %1125 = vmatpush3.bf16.msra.mxu0 %v1124_v25  ;;  %v1130_v41 = vpack.c.bf16 %v141_v36, %v140_v35  ;;  %v124_v42 = vld [vmem:[%s1906_s1 + $0x250] sm:$0xff]  ;;  %v143_v48 = vld [vmem:[%s1906_s1 + $0x2e8] sm:$0xff] }
  0x34   :  { %1127 = vmatprep.subr.bf16.mxu0 %v1126_v29  ;;  %v125_v43 = vld [vmem:[%s1906_s1 + $0x258] sm:$0xff]  ;;  %v156_v44 = vld [vmem:[%s1906_s1 + $0x350] sm:$0xff]  ;;  %v1162_v45 = vpack.c.bf16 %v173_v38, %v172_v37  ;;  %v174_v49 = vld [vmem:[%s1906_s1 + $0x3e0] sm:$0xff]  ;;  %v1134_v53 = vpack.c.bf16 %v143_v48, %v142_v47 }
  0x35   :  { %1157 = vmatpush3.bf16.msra.mxu1 %v1156_v28  ;;  %v157_v46 = vld [vmem:[%s1906_s1 + $0x358] sm:$0xff]  ;;  %v175_v50 = vld [vmem:[%s1906_s1 + $0x3e8] sm:$0xff]  ;;  %v1132_v51 = vpack.c.bf16 %v125_v43, %v124_v42  ;;  %v126_v54 = vld [vmem:[%s1906_s1 + $0x260] sm:$0xff] }
  0x36   :  { %1159 = vmatprep.subr.bf16.mxu1 %v1158_v33  ;;  %v1164_v52 = vpack.c.bf16 %v157_v46, %v156_v44  ;;  %v127_v55 = vld [vmem:[%s1906_s1 + $0x268] sm:$0xff]  ;;  %v158_v56 = vld [vmem:[%s1906_s1 + $0x360] sm:$0xff]  ;;  %v1166_v57 = vpack.c.bf16 %v175_v50, %v174_v49  ;;  %v144_v59 = vld [vmem:[%s1906_s1 + $0x2f0] sm:$0xff] }
  0x37   :  { %1129 = vmatpush3.bf16.msra.mxu0 %v1128_v39  ;;  %v159_v58 = vld [vmem:[%s1906_s1 + $0x368] sm:$0xff]  ;;  %v145_v60 = vld [vmem:[%s1906_s1 + $0x2f8] sm:$0xff]  ;;  %v176_v61 = vld [vmem:[%s1906_s1 + $0x3f0] sm:$0xff]  ;;  %v1136_v63 = vpack.c.bf16 %v127_v55, %v126_v54 }
  0x38   :  { %1131 = vmatprep.subr.bf16.mxu0 %v1130_v41  ;;  %v177_v62 = vld [vmem:[%s1906_s1 + $0x3f8] sm:$0xff]  ;;  %v1168_v0 = vpack.c.bf16 %v159_v58, %v158_v56  ;;  %v1138_v1 = vpack.c.bf16 %v145_v60, %v144_v59  ;;  %v128_v2 = vld [vmem:[%s1906_s1 + $0x270] sm:$0xff]  ;;  %v517_v9 = vld [vmem:[%s1910_s5] sm:$0xff] }
  0x39   :  { %1161 = vmatpush3.bf16.msra.mxu1 %v1160_v40  ;;  %v129_v3 = vld [vmem:[%s1906_s1 + $0x278] sm:$0xff]  ;;  %v1170_v4 = vpack.c.bf16 %v177_v62, %v176_v61  ;;  %v160_v5 = vld [vmem:[%s1906_s1 + $0x370] sm:$0xff]  ;;  %v518_v10 = vld [vmem:[%s1910_s5 + $0x8] sm:$0xff] }
  0x3a   :  { %1163 = vmatprep.subr.bf16.mxu1 %v1162_v45  ;;  %v161_v6 = vld [vmem:[%s1906_s1 + $0x378] sm:$0xff]  ;;  %v1140_v7 = vpack.c.bf16 %v129_v3, %v128_v2  ;;  %v1175_v11 = vpack.c.bf16 %v518_v10, %v517_v9  ;;  %v519_v13 = vld [vmem:[%s1910_s5 + $0x10] sm:$0xff]  ;;  %v521_v16 = vld [vmem:[%s1910_s5 + $0x20] sm:$0xff] }
  0x3b   :  { %1133 = vmatpush3.bf16.msra.mxu0 %v1132_v51  ;;  %v1172_v8 = vpack.c.bf16 %v161_v6, %v160_v5  ;;  %v520_v14 = vld [vmem:[%s1910_s5 + $0x18] sm:$0xff]  ;;  %v522_v17 = vld [vmem:[%s1910_s5 + $0x28] sm:$0xff]  ;;  %v523_v19 = vld [vmem:[%s1910_s5 + $0x30] sm:$0xff] }
  0x3c   :  { %1135 = vmatprep.subr.bf16.mxu0 %v1134_v53  ;;  %v1178_v15 = vpack.c.bf16 %v520_v14, %v519_v13  ;;  %v1181_v18 = vpack.c.bf16 %v522_v17, %v521_v16  ;;  %v524_v20 = vld [vmem:[%s1910_s5 + $0x38] sm:$0xff]  ;;  %v525_v22 = vld [vmem:[%s1910_s5 + $0x40] sm:$0xff]  ;;  %v527_v25 = vld [vmem:[%s1910_s5 + $0x50] sm:$0xff] }
  0x3d   :  { %1165 = vmatpush3.bf16.msra.mxu1 %v1164_v52  ;;  %v1184_v21 = vpack.c.bf16 %v524_v20, %v523_v19  ;;  %v528_v26 = vld [vmem:[%s1910_s5 + $0x58] sm:$0xff]  ;;  %v529_v28 = vld [vmem:[%s1910_s5 + $0x60] sm:$0xff]  ;;  %v530_v29 = vld [vmem:[%s1910_s5 + $0x68] sm:$0xff] }
  0x3e   :  { %1167 = vmatprep.subr.bf16.mxu1 %v1166_v57  ;;  %v1190_v27 = vpack.c.bf16 %v528_v26, %v527_v25  ;;  %v1193_v30 = vpack.c.bf16 %v530_v29, %v529_v28  ;;  %v531_v31 = vld [vmem:[%s1910_s5 + $0x70] sm:$0xff]  ;;  %v532_v32 = vld [vmem:[%s1910_s5 + $0x78] sm:$0xff]  ;;  %v794_v36 = vld [vmem:[%s1907_s2] ss:$0 sm:$0xff] }
  0x3f   :  { %1137 = vmatpush3.bf16.msra.mxu0 %v1136_v63  ;;  %v1196_v33 = vpack.c.bf16 %v532_v32, %v531_v31  ;;  %v796_v10 = vld [vmem:[%s1909_s4] ss:$0 sm:$0xff]  ;;  %v649_v16 = vld [vmem:[%s1914_s9 + $0x8] sm:$0xff]  ;;  %v651_v19 = vld [vmem:[%s1914_s9 + $0x18] sm:$0xff] }
  0x40   :  { %1139 = vmatprep.subr.bf16.mxu0 %v1138_v1  ;;  %v655_v25 = vld [vmem:[%s1914_s9 + $0x38] sm:$0xff]  ;;  %v657_v28 = vld [vmem:[%s1914_s9 + $0x48] sm:$0xff] }
  0x41   :  { %1169 = vmatpush3.bf16.msra.mxu1 %v1168_v0  ;;  %v659_v31 = vld [vmem:[%s1914_s9 + $0x58] sm:$0xff] }
  0x42   :  { %1171 = vmatprep.subr.bf16.mxu1 %v1170_v4 }
  0x43   :  { %1141 = vmatpush3.bf16.msra.mxu0 %v1140_v7 }
  0x44   :  { %1174 = vmatprep.subr.bf16.mxu0 %v1268_v12 }
  0x45   :  { %1173 = vmatpush3.bf16.msra.mxu1 %v1172_v8  ;;  %v795_v8 = vld [vmem:[%s1908_s3] ss:$0 sm:$0xff] }
  0x46   :  { %402 = vmatmul.mubr.f32.vlgmr.msra.gmra.mrb[2].mxu0 %v1654_v23  ;;  %1198 = vmatprep.subr.bf16.mxu1 %v1268_v12  ;;  %v526_v23 = vld [vmem:[%s1910_s5 + $0x48] sm:$0xff] }
  0x47   :  { %1176 = vmatpush3.bf16.msra.mxu0 %v1175_v11  ;;  %1008 = vmatprep.mubr.msk.f32.mxu0 %vm1269_vm0, %v1270_v34 }
  0x48   :  { %472 = vmatmul.mubr.f32.vlgmr.msra.gmra.mrb[2].mxu1 %v1659_v24  ;;  %1177 = vmatprep.subr.bf16.mxu0 %v1268_v12  ;;  %v1187_v24 = vpack.c.bf16 %v526_v23, %v525_v22  ;;  %v653_v22 = vld [vmem:[%s1914_s9 + $0x28] sm:$0xff] }
  0x49   :  { %1043 = vmatprep.mubr.msk.f32.mxu1 %vm1269_vm0, %v1270_v34  ;;  %v661_v34 = vld [vmem:[%s1914_s9 + $0x68] sm:$0xff] }
  0x4b   :  { %1179 = vmatpush3.bf16.msra.mxu0 %v1178_v15  ;;  %v648_v15 = vld [vmem:[%s1914_s9] sm:$0xff] }
  0x4c   :  { %1180 = vmatprep.subr.bf16.mxu0 %v1268_v12  ;;  %v1199_v17 = vpack.c.bf16 %v649_v16, %v648_v15  ;;  %v749_v15 = vld [vmem:[%s1916_s11] sm:$0xf] }
  0x4e   :  { %1200 = vmatpush3.bf16.msra.mxu1 %v1199_v17 }
  0x4f   :  { %1182 = vmatpush3.bf16.msra.mxu0 %v1181_v18  ;;  %1201 = vmatprep.subr.bf16.mxu1 %v1268_v12  ;;  %v650_v18 = vld [vmem:[%s1914_s9 + $0x10] sm:$0xff] }
  0x50   :  { %1183 = vmatprep.subr.bf16.mxu0 %v1268_v12  ;;  %v1202_v20 = vpack.c.bf16 %v651_v19, %v650_v18 }
  0x52   :  { %1203 = vmatpush3.bf16.msra.mxu1 %v1202_v20  ;;  %v758_v20 = vsub.f32 1.0, %v749_v15 }
  0x53   :  { %1185 = vmatpush3.bf16.msra.mxu0 %v1184_v21  ;;  %1204 = vmatprep.subr.bf16.mxu1 %v1268_v12  ;;  %v652_v21 = vld [vmem:[%s1914_s9 + $0x20] sm:$0xff] }
  0x54   :  { %1186 = vmatprep.subr.bf16.mxu0 %v1268_v12  ;;  %v1205_v23 = vpack.c.bf16 %v653_v22, %v652_v21 }
  0x56   :  { %1206 = vmatpush3.bf16.msra.mxu1 %v1205_v23 }
  0x57   :  { %1188 = vmatpush3.bf16.msra.mxu0 %v1187_v24  ;;  %1207 = vmatprep.subr.bf16.mxu1 %v1268_v12  ;;  %v654_v24 = vld [vmem:[%s1914_s9 + $0x30] sm:$0xff] }
  0x58   :  { %1189 = vmatprep.subr.bf16.mxu0 %v1268_v12  ;;  %v1208_v26 = vpack.c.bf16 %v655_v25, %v654_v24 }
  0x5a   :  { %1209 = vmatpush3.bf16.msra.mxu1 %v1208_v26 }
  0x5b   :  { %1191 = vmatpush3.bf16.msra.mxu0 %v1190_v27  ;;  %1210 = vmatprep.subr.bf16.mxu1 %v1268_v12  ;;  %v656_v27 = vld [vmem:[%s1914_s9 + $0x40] sm:$0xff] }
  0x5c   :  { %1192 = vmatprep.subr.bf16.mxu0 %v1268_v12  ;;  %v1211_v29 = vpack.c.bf16 %v657_v28, %v656_v27 }
  0x5e   :  { %1212 = vmatpush3.bf16.msra.mxu1 %v1211_v29 }
  0x5f   :  { %1194 = vmatpush3.bf16.msra.mxu0 %v1193_v30  ;;  %1213 = vmatprep.subr.bf16.mxu1 %v1268_v12  ;;  %v658_v30 = vld [vmem:[%s1914_s9 + $0x50] sm:$0xff] }
  0x60   :  { %1195 = vmatprep.subr.bf16.mxu0 %v1268_v12  ;;  %v1214_v32 = vpack.c.bf16 %v659_v31, %v658_v30 }
  0x62   :  { %1215 = vmatpush3.bf16.msra.mxu1 %v1214_v32 }
  0x63   :  { %1197 = vmatpush3.bf16.msra.mxu0 %v1196_v33  ;;  %1216 = vmatprep.subr.bf16.mxu1 %v1268_v12  ;;  %v660_v33 = vld [vmem:[%s1914_s9 + $0x60] sm:$0xff] }
  0xf9   :  { %v834_v35 = vpop.f32.mrb[0].mxu0 }
  0xfa   :  { %v835_v37 = vpop.f32.mrb[1].mxu0 }
  0xfb   :  { %v869_v38 = vpop.f32.mrb[0].mxu1  ;;  %v836_v39 = vadd.f32 %v835_v37, %v834_v35  ;;  %v1217_v35 = vpack.c.bf16 %v661_v34, %v660_v33  ;;  %v663_v37 = vld [vmem:[%s1914_s9 + $0x78] sm:$0xff] }
  0xfc   :  { %v870_v40 = vpop.f32.mrb[1].mxu1 }
  0xfd   :  { %v871_v41 = vadd.f32 %v870_v40, %v869_v38  ;;  %v264_v42 = vadd.f32 %v836_v39, %v794_v36  ;;  %1218 = vmatpush3.bf16.msra.mxu1 %v1217_v35  ;;  %v662_v36 = vld [vmem:[%s1914_s9 + $0x70] sm:$0xff]  ;;  %v797_v39 = vld [vmem:[%s1911_s6] ss:$0 sm:$0xff] }
  0xfe   :  { %1219 = vmatprep.subr.bf16.mxu1 %v1268_v12  ;;  %v1220_v38 = vpack.c.bf16 %v663_v37, %v662_v36 }
  0xff   :  { %v334_v43 = vadd.f32 %v871_v41, %v264_v42 }
 0x101   :  { %1221 = vmatpush3.bf16.msra.mxu1 %v1220_v38 }
 0x119   :  { %v904_v44 = vpop.f32.mrb[2].mxu0 }
 0x11a   :  { %v905_v45 = vpop.f32.mrb[3].mxu0 }
 0x11b   :  { %v939_v46 = vpop.f32.mrb[2].mxu1  ;;  %v906_v47 = vadd.f32 %v905_v45, %v904_v44 }
 0x11c   :  { %v940_v48 = vpop.f32.mrb[3].mxu1 }
 0x11d   :  { %v941_v49 = vadd.f32 %v940_v48, %v939_v46  ;;  %v404_v50 = vadd.f32 %v906_v47, %v334_v43 }
 0x11f   :  { %v474_v51 = vadd.f32 %v941_v49, %v404_v50 }
 0x121   :  { %v480_v52 = vsel %vm479_vm1, %v474_v51, 0.0 }
 0x122   :  { %v481_v53 = vrot.slane %v480_v52, 4 }
 0x124   :  { %v482_v54 = vadd.f32 %v481_v53, %v480_v52 }
 0x126   :  { %v483_v55 = vrot.slane %v482_v54, 2 }
 0x128   :  { %v484_v56 = vadd.f32 %v483_v55, %v482_v54 }
 0x12a   :  { %v485_v57 = vrot.slane %v484_v56, 1 }
 0x12c   :  { %v486_v58 = vadd.f32 %v485_v57, %v484_v56 }
 0x12e   :  { %v488_v59 = vmul.f32 0.25, %v486_v58 }
 0x130   :  { %v489_v60 = vsub.f32 %v474_v51, %v488_v59 }
 0x132   :  { %v490_v61 = vmul.f32 %v489_v60, %v489_v60 }
 0x134   :  { %v491_v62 = vsel %vm479_vm1, %v490_v61, 0.0 }
 0x135   :  { %v492_v63 = vrot.slane %v491_v62, 4 }
 0x137   :  { %v493_v0 = vadd.f32 %v492_v63, %v491_v62  ;;  %v798_v62 = vld [vmem:[%s1912_s7] ss:$0 sm:$0xff] }
 0x139   :  { %v494_v1 = vrot.slane %v493_v0, 2 }
 0x13b   :  { %v495_v2 = vadd.f32 %v494_v1, %v493_v0  ;;  %v799_v0 = vld [vmem:[%s1913_s8] ss:$0 sm:$0xff] }
 0x13d   :  { %v496_v3 = vrot.slane %v495_v2, 1 }
 0x13f   :  { %v497_v4 = vadd.f32 %v496_v3, %v495_v2 }
 0x141   :  { %v498_v5 = vmul.f32 0.25, %v497_v4  ;;  %v800_v4 = vld [vmem:[#allocation2] ss:$0 sm:$0xff] }
 0x143   :  { %v499_v6 = vadd.f32 1e-05, %v498_v5 }
 0x145   :  { %1232 = vrsqrt.f32 %v499_v6 }
 0x14f   :  { %v1233_v7 = vpop.eup %1232 }
 0x150   :  { %v501_v9 = vmul.f32 %v1233_v7, %v489_v60 }
 0x152   :  { %v508_v11 = vmul.f32 %v795_v8, %v501_v9 }
 0x154   :  { %v515_v13 = vadd.f32 %v796_v10, %v508_v11 }
 0x156   :  { %v516_v14 = vmax.f32 %v515_v13, 0.0 }
 0x158   :  { %1009 = vmatmul.mubr.f32.vlgmr.msra.gmra.mrb[4].mxu0 %v516_v14 }
 0x22b   :  { %v606_v40 = vpop.f32.mrb[4].mxu0 }
 0x22c   :  { %v607_v41 = vadd.f32 %v797_v39, %v606_v40  ;;  %v1010_v42 = vpop.f32.mrb[5].mxu0 }
 0x22e   :  { %v612_v43 = vsel %vm479_vm1, %v607_v41, 0.0 }
 0x22f   :  { %v613_v12 = vrot.slane %v612_v43, 4 }
 0x231   :  { %v614_v44 = vadd.f32 %v613_v12, %v612_v43 }
 0x233   :  { %v615_v45 = vrot.slane %v614_v44, 2 }
 0x235   :  { %v616_v46 = vadd.f32 %v615_v45, %v614_v44 }
 0x237   :  { %v617_v47 = vrot.slane %v616_v46, 1 }
 0x239   :  { %v618_v48 = vadd.f32 %v617_v47, %v616_v46 }
 0x23b   :  { %v619_v49 = vmul.f32 0.25, %v618_v48 }
 0x23d   :  { %v620_v50 = vsub.f32 %v607_v41, %v619_v49 }
 0x23f   :  { %v621_v51 = vmul.f32 %v620_v50, %v620_v50 }
 0x241   :  { %v622_v52 = vsel %vm479_vm1, %v621_v51, 0.0 }
 0x242   :  { %v623_v53 = vrot.slane %v622_v52, 4 }
 0x244   :  { %v624_v54 = vadd.f32 %v623_v53, %v622_v52 }
 0x246   :  { %v625_v55 = vrot.slane %v624_v54, 2 }
 0x248   :  { %v626_v56 = vadd.f32 %v625_v55, %v624_v54 }
 0x24a   :  { %v627_v57 = vrot.slane %v626_v56, 1 }
 0x24c   :  { %v628_v58 = vadd.f32 %v627_v57, %v626_v56 }
 0x24e   :  { %v629_v59 = vmul.f32 0.25, %v628_v58 }
 0x250   :  { %v630_v60 = vadd.f32 1e-05, %v629_v59 }
 0x252   :  { %1234 = vrsqrt.f32 %v630_v60 }
 0x25c   :  { %v1235_v61 = vpop.eup %1234 }
 0x25d   :  { %v632_v63 = vmul.f32 %v1235_v61, %v620_v50 }
 0x25f   :  { %v639_v1 = vmul.f32 %v798_v62, %v632_v63 }
 0x261   :  { %v646_v2 = vadd.f32 %v799_v0, %v639_v1 }
 0x263   :  { %v647_v3 = vmax.f32 %v646_v2, 0.0 }
 0x265   :  { %1044 = vmatmul.mubr.f32.vlgmr.msra.gmra.mrb[4].mxu1 %v647_v3 }
 0x338   :  { %v737_v5 = vpop.f32.mrb[4].mxu1 }
 0x339   :  { %v738_v6 = vadd.f32 %v800_v4, %v737_v5  ;;  %v1045_v7 = vpop.f32.mrb[5].mxu1 }
 0x33b   :  { %v801_v8 = vmul.f32 -1.442695, %v738_v6 }
 0x33d   :  { %1236 = vpow2.f32 %v801_v8 }
 0x347   :  { %v1237_v9 = vpop.eup %1236 }
 0x348   :  { %v744_v10 = vadd.f32 1.0, %v1237_v9 }
 0x34a   :  { %1238 = vrcp.f32 %v744_v10 }
 0x354   :  { %v1239_v11 = vpop.eup %1238 }
 0x355   :  { %748 = vst.msk [vmem:[%s1917_s12] sm:$0xf] %vm747_vm2, %v1239_v11  ;;  %1240 = vlog2.f32 %v1239_v11  ;;  %v753_v13 = vsub.f32 1.0, %v1239_v11  ;;  %s1271_s12 = smov [#allocation3]  }
 0x356   :  { %s784_s24 = sshll.u32 %s1271_s12, 4  ;;  %s785_s24 = int_to_ptr.vmem [resolvable:$true] %s784_s24 }
 0x357   :  { %1242 = vlog2.f32 %v753_v13  ;;  %s1244_s25 = scalar_lea.vmem %s785_s24, 16  ;;  %s1248_s26 = scalar_lea.vmem %s785_s24, 32 }
 0x358   :  { %p1245_p0 = scmp.ne.s32.totalorder %s785_s24, %s1244_s25  ;;  %p1249_p1 = scmp.lt.s32.totalorder %s785_s24, %s785_s24 }
 0x359   :  { %p1250_p2 = scmp.lt.s32.totalorder %s1248_s26, %s1244_s25 }
 0x35b   :  { %p1251_p3 = por %p1250_p2, %p1249_p1 }
 0x35d   :  { %p1252_p4 = pnand %p1251_p3, %p1245_p0 }
 0x35f   :  { %v1241_v14 = vpop.eup %1240 }
 0x360   :  { %v751_v16 = vmul.f32 0.6931472, %v1241_v14 }
 0x361   :  { %v1243_v17 = vpop.eup %1242 }
 0x362   :  { %v752_v18 = vmax.f32 %v751_v16, -100.0  ;;  %v755_v19 = vmul.f32 0.6931472, %v1243_v17 }
 0x364   :  { %v756_v21 = vmax.f32 %v755_v19, -100.0  ;;  %v757_v22 = vmul.f32 %v752_v18, %v749_v15 }
 0x366   :  { %v759_v23 = vmul.f32 %v758_v20, %v756_v21 }
 0x368   :  { %v760_v24 = vadd.f32 %v759_v23, %v757_v22 }
 0x36a   :  { %v761_v25 = vsel %vm747_vm2, %v760_v24, 0.0 }
 0x36b   :  { %762 = vadd.xlane.f32.xlu0 %v761_v25 }
 0x3f8   :  { %v763_v26 = vpop.xlane.xlu0 %762 }
 0x3f9   :  { %v764_v27 = vrot.slane %v763_v26, 4 }
 0x3fb   :  { %v765_v28 = vadd.f32 %v764_v27, %v763_v26 }
 0x3fd   :  { %v766_v29 = vrot.slane %v765_v28, 2 }
 0x3ff   :  { %v767_v30 = vadd.f32 %v766_v29, %v765_v28 }
 0x401   :  { %v768_v31 = vrot.slane %v767_v30, 1 }
 0x403   :  { %v769_v32 = vadd.f32 %v768_v31, %v767_v30 }
 0x405   :  { %1222 = vpush %v769_v32 }
 0x436   :  { %s1223_s11 = spop %1222 }
 0x437   :  { %v771_v33 = vstv %s1223_s11 }
 0x438   :  { %v772_v34 = vmul.f32 0.25, %v771_v33 }
 0x43a   :  { %v773_v35 = vsub.f32 0.0, %v772_v34 }
 0x43c   :  { %775 = vst.msk [vmem:[#allocation3] sm:$0x1] %vm774_vm3, %v773_v35 }
 0x43d   :  { %1255 = shalt.err (!%p1252_p4)
}
 0x43e   :  { %s1256_s29 = scalar_lea.hbm %s1918_s13, 16 }
 0x43f   :  { %p1257_p5 = scmp.ne.s32.totalorder %s1918_s13, %s1256_s29  ;;  %p1260_p6 = scmp.lt.u32.totalorder %s1256_s29, %s1918_s13 }
 0x441   :  { %p1262_p7 = pnand %p1260_p6, %p1257_p5 }
 0x443   :  { %1265 = shalt.err (!%p1262_p7)
}
 0x444   :  { %787 = dma.vmem_to_hbm [thread:$0]  %s785_s24, 16, %s1918_s13, [#allocation4]  }
 0x445   :  { %1266 = dma.done.wait [#allocation4], 16  }
 0x446   :  { %1267 = vsyncadd [#allocation4], 4294967280 }
 0x447   :  { %793 = vsyncpa [#allocation4], 1 }

// kernel: my_model_forward.3
= control target key start
LH: loop header
LB: loop body
LE: loop exit
PB: predicated region body
PF: predicated region fallthrough
CT: control target
= control target key end

     0   :  { %11 = vsyncpa [#allocation3], 0  ;;  %s6773_s0 = inlined_call_operand.vmem [shape: f32[4,100,65], index: 0, kind: input, shape index: {}]   ;;  %s6774_s1 = inlined_call_operand.vmem [shape: f32[4,100,100], index: 1, kind: input, shape index: {}]   ;;  %s6775_s2 = inlined_call_operand.hbm [shape: f32[65,65], index: 2, kind: input, shape index: {}]   ;;  %s6776_s3 = inlined_call_operand.hbm [shape: f32[1,65], index: 3, kind: input, shape index: {}]   ;;  %s6777_s4 = inlined_call_operand.hbm [shape: f32[65,65], index: 4, kind: input, shape index: {}]   ;;  %s6778_s5 = inlined_call_operand.hbm [shape: f32[1,65], index: 5, kind: input, shape index: {}]   ;;  %s6779_s6 = inlined_call_operand.vmem [shape: f32[4,100,65], index: 6, kind: output, shape index: {}]  }
   0x1   :  { %12 = vsyncpa [#allocation5], 0 }
   0x2   :  { %13 = vsyncpa [#allocation8], 0  ;;  %s5029_s21 = smov [#allocation4]   ;;  %s5030_s23 = smov [#allocation2]  }
   0x3   :  { %s36_s22 = sshll.u32 %s5029_s21, 4  ;;  %s23_s24 = sshll.u32 %s5030_s23, 4  ;;  %s37_s22 = int_to_ptr.vmem [resolvable:$true] %s36_s22  ;;  %s5073_s24 = int_to_ptr.vmem [resolvable:$true] %s23_s24 }
   0x4   :  { %s4935_s27 = scalar_lea.hbm %s6776_s3, 16 }
   0x5   :  { %p4936_p0 = scmp.ne.s32.totalorder %s6776_s3, %s4935_s27  ;;  %p4939_p1 = scmp.lt.u32.totalorder %s4935_s27, %s6776_s3 }
   0x7   :  { %p4941_p2 = pnand %p4939_p1, %p4936_p0 }
   0x9   :  { %4944 = shalt.err (!%p4941_p2)
}
   0xa   :  { %s4945_s8 = scalar_lea.vmem %s37_s22, 16  ;;  %s4949_s9 = scalar_lea.vmem %s37_s22, 32 }
   0xb   :  { %p4946_p3 = scmp.ne.s32.totalorder %s37_s22, %s4945_s8  ;;  %p4950_p4 = scmp.lt.s32.totalorder %s37_s22, %s37_s22 }
   0xc   :  { %p4951_p5 = scmp.lt.s32.totalorder %s4949_s9, %s4945_s8 }
   0xe   :  { %p4952_p6 = por %p4951_p5, %p4950_p4 }
  0x10   :  { %p4953_p7 = pnand %p4952_p6, %p4946_p3 }
  0x12   :  { %4956 = shalt.err (!%p4953_p7)
}
  0x13   :  { %39 = dma.hbm_to_vmem [thread:$0]  %s6776_s3, 16, %s37_s22, [#allocation5]  }
  0x14   :  { %s4957_s14 = scalar_lea.hbm %s6775_s2, 1152 }
  0x15   :  { %p4958_p8 = scmp.ne.s32.totalorder %s6775_s2, %s4957_s14  ;;  %p4961_p9 = scmp.lt.u32.totalorder %s4957_s14, %s6775_s2 }
  0x17   :  { %p4963_p10 = pnand %p4961_p9, %p4958_p8 }
  0x19   :  { %4966 = shalt.err (!%p4963_p10)
}
  0x1a   :  { %s4967_s19 = scalar_lea.vmem %s5073_s24, 1152  ;;  %p4972_p12 = scmp.lt.s32.totalorder %s5073_s24, %s5073_s24 }
  0x1b   :  { %p4968_p11 = scmp.ne.s32.totalorder %s5073_s24, %s4967_s19  ;;  %p4973_p13 = scmp.lt.s32.totalorder %s4967_s19, %s4967_s19 }
  0x1d   :  { %p4974_p0 = por %p4973_p13, %p4972_p12 }
  0x1f   :  { %p4975_p1 = pnand %p4974_p0, %p4968_p11 }
  0x21   :  { %4978 = shalt.err (!%p4975_p1)
}
  0x22   :  { %s5031_s3 = smov 128   ;;  %s5032_s20 = smov 8  }
  0x23   :  { %29 = dma.hbm_to_vmem [thread:$0]  %s6775_s2, 1152, %s5073_s24, [#allocation3], %s5031_s3, %s5031_s3, %s5032_s20  }
  0x24   :  { %s5033_s23 = smov [#allocation6]   ;;  %s5034_s26 = smov [#allocation7]  }
  0x25   :  { %s45_s25 = sshll.u32 %s5033_s23, 4  ;;  %s58_s27 = sshll.u32 %s5034_s26, 4  ;;  %s46_s25 = int_to_ptr.vmem [resolvable:$true] %s45_s25  ;;  %s59_s27 = int_to_ptr.vmem [resolvable:$true] %s58_s27 }
  0x26   :  { %s4979_s30 = scalar_lea.hbm %s6777_s4, 1152 }
  0x27   :  { %p4980_p2 = scmp.ne.s32.totalorder %s6777_s4, %s4979_s30  ;;  %p4983_p3 = scmp.lt.u32.totalorder %s4979_s30, %s6777_s4 }
  0x29   :  { %p4985_p4 = pnand %p4983_p3, %p4980_p2 }
  0x2b   :  { %4988 = shalt.err (!%p4985_p4)
}
  0x2c   :  { %s4989_s2 = scalar_lea.vmem %s46_s25, 1152  ;;  %p4994_p6 = scmp.lt.s32.totalorder %s46_s25, %s46_s25 }
  0x2d   :  { %p4990_p5 = scmp.ne.s32.totalorder %s46_s25, %s4989_s2  ;;  %p4995_p7 = scmp.lt.s32.totalorder %s4989_s2, %s4989_s2 }
  0x2f   :  { %p4996_p8 = por %p4995_p7, %p4994_p6 }
  0x31   :  { %p4997_p9 = pnand %p4996_p8, %p4990_p5 }
  0x33   :  { %5000 = shalt.err (!%p4997_p9)
}
  0x34   :  { %51 = dma.hbm_to_vmem [thread:$0]  %s6777_s4, 1152, %s46_s25, [#allocation5], %s5031_s3, %s5031_s3, %s5032_s20  }
  0x35   :  { %s5001_s14 = scalar_lea.hbm %s6778_s5, 16 }
  0x36   :  { %p5002_p10 = scmp.ne.s32.totalorder %s6778_s5, %s5001_s14  ;;  %p5005_p11 = scmp.lt.u32.totalorder %s5001_s14, %s6778_s5 }
  0x38   :  { %p5007_p12 = pnand %p5005_p11, %p5002_p10 }
  0x3a   :  { %5010 = shalt.err (!%p5007_p12)
}
  0x3b   :  { %s5011_s19 = scalar_lea.vmem %s59_s27, 16  ;;  %s5015_s21 = scalar_lea.vmem %s59_s27, 32 }
  0x3c   :  { %p5012_p13 = scmp.ne.s32.totalorder %s59_s27, %s5011_s19  ;;  %p5016_p0 = scmp.lt.s32.totalorder %s59_s27, %s59_s27 }
  0x3d   :  { %p5017_p1 = scmp.lt.s32.totalorder %s5015_s21, %s5011_s19 }
  0x3f   :  { %p5018_p2 = por %p5017_p1, %p5016_p0 }
  0x41   :  { %p5019_p3 = pnand %p5018_p2, %p5012_p13 }
  0x43   :  { %5022 = shalt.err (!%p5019_p3)
}
  0x44   :  { %61 = dma.hbm_to_vmem [thread:$0]  %s6778_s5, 16, %s59_s27, [#allocation8]  }
  0x45   :  { %5023 = dma.done.wait [#allocation3], 1152  }
  0x46   :  { %5024 = vsyncadd [#allocation3], 4294966144 }
  0x47   :  { %5025 = dma.done.wait [#allocation5], 1168  }
  0x48   :  { %5026 = vsyncadd [#allocation5], 4294966128 }
  0x49   :  { %5027 = dma.done.wait [#allocation8], 16  }
  0x4a   :  { %5028 = vsyncadd [#allocation8], 4294967280  ;;  %v5035_v0 = vmov 0.0|0.0   ;;  %vm5036_vm0 = vmmov 0   ;;  %v5037_v1 = vmov 0.0   ;;  %v74_v2 = vld [vmem:[#allocation2] sm:$0xff] }
  0x4b   :  { %4668 = vmatprep.subr.bf16.mxu0 %v5035_v0  ;;  %3710 = vmatprep.mubr.msk.f32.mxu0 %vm5036_vm0, %v5037_v1  ;;  %v75_v3 = vld [vmem:[#allocation2 + $0x8] sm:$0xff]  ;;  %v76_v4 = vld [vmem:[#allocation2 + $0x10] sm:$0xff]  ;;  %v77_v6 = vld [vmem:[#allocation2 + $0x18] sm:$0xff]  ;;  %vm160_vm1 = vcmask 1040384   ;;  %vm120_vm2 = vcmask 531456   ;;  %vm340_vm3 = vcmask 1043456  }
  0x4c   :  { %4680 = vmatprep.subr.bf16.mxu1 %v5035_v0  ;;  %3775 = vmatprep.mubr.msk.f32.mxu1 %vm5036_vm0, %v5037_v1  ;;  %v5134_v5 = vpack.c.bf16 %v75_v3, %v74_v2  ;;  %v5137_v7 = vpack.c.bf16 %v77_v6, %v76_v4  ;;  %v78_v8 = vld [vmem:[#allocation2 + $0x20] sm:$0xff]  ;;  %v79_v9 = vld [vmem:[#allocation2 + $0x28] sm:$0xff]  ;;  %v80_v11 = vld [vmem:[#allocation2 + $0x30] sm:$0xff]  ;;  %vm300_vm4 = vcmask 818176   ;;  %vm823_vm5 = vcmask 527360  }
  0x4d   :  { %v5141_v10 = vpack.c.bf16 %v79_v9, %v78_v8  ;;  %v81_v12 = vld [vmem:[#allocation2 + $0x38] sm:$0xff]  ;;  %v5150_v14 = vld [vmem:[#allocation2 + $0x40] sm:$0x1]  ;;  %v95_v16 = vld [vmem:[%s6773_s0 + $0x8] sm:$0xff] }
  0x4e   :  { %4670 = vmatpush3.bf16.msra.mxu0 %v5134_v5  ;;  %v5145_v13 = vpack.c.bf16 %v81_v12, %v80_v11  ;;  %v94_v15 = vld [vmem:[%s6773_s0] sm:$0xff]  ;;  %v96_v17 = vld [vmem:[%s6773_s0 + $0x10] sm:$0xff]  ;;  %v97_v18 = vld [vmem:[%s6773_s0 + $0x18] sm:$0xff] }
  0x4f   :  { %4671 = vmatprep.subr.bf16.mxu0 %v5035_v0  ;;  %v98_v19 = vld [vmem:[%s6773_s0 + $0x20] sm:$0xff]  ;;  %v99_v20 = vld [vmem:[%s6773_s0 + $0x28] sm:$0xff]  ;;  %v100_v21 = vld [vmem:[%s6773_s0 + $0x30] sm:$0xff] }
  0x50   :  { %v101_v22 = vld [vmem:[%s6773_s0 + $0x38] sm:$0xff]  ;;  %v102_v23 = vld [vmem:[%s6773_s0 + $0x40] sm:$0xff]  ;;  %v103_v24 = vld [vmem:[%s6773_s0 + $0x48] sm:$0xff] }
  0x51   :  { %v104_v25 = vld [vmem:[%s6773_s0 + $0x50] sm:$0xff]  ;;  %v105_v26 = vld [vmem:[%s6773_s0 + $0x58] sm:$0xff]  ;;  %v106_v27 = vld [vmem:[%s6773_s0 + $0x60] sm:$0xf] }
  0x52   :  { %4673 = vmatpush3.bf16.msra.mxu0 %v5137_v7  ;;  %v83_v28 = vld [vmem:[#allocation6] sm:$0xff]  ;;  %v84_v29 = vld [vmem:[#allocation6 + $0x8] sm:$0xff]  ;;  %v85_v30 = vld [vmem:[#allocation6 + $0x10] sm:$0xff] }
  0x53   :  { %4674 = vmatprep.subr.bf16.mxu0 %v5035_v0  ;;  %v5233_v31 = vpack.c.bf16 %v84_v29, %v83_v28  ;;  %v86_v32 = vld [vmem:[#allocation6 + $0x18] sm:$0xff]  ;;  %v87_v34 = vld [vmem:[#allocation6 + $0x20] sm:$0xff]  ;;  %v88_v35 = vld [vmem:[#allocation6 + $0x28] sm:$0xff] }
  0x54   :  { %v5236_v33 = vpack.c.bf16 %v86_v32, %v85_v30  ;;  %v5240_v36 = vpack.c.bf16 %v88_v35, %v87_v34  ;;  %v89_v37 = vld [vmem:[#allocation6 + $0x30] sm:$0xff]  ;;  %v90_v38 = vld [vmem:[#allocation6 + $0x38] sm:$0xff]  ;;  %v5374_v28 = vld [vmem:[#allocation6 + $0x40] sm:$0x1] }
  0x55   :  { %v5244_v39 = vpack.c.bf16 %v90_v38, %v89_v37  ;;  %v5379_v29 = vld [vmem:[#allocation4] ss:$0 sm:$0xff] }
  0x56   :  { %4676 = vmatpush3.bf16.msra.mxu0 %v5141_v10 }
  0x57   :  { %4677 = vmatprep.subr.bf16.mxu0 %v5035_v0 }
  0x5a   :  { %4679 = vmatpush3.bf16.msra.mxu0 %v5145_v13 }
  0x5b   :  { %3708 = vmatprep.subr.mxu0 %v5037_v1 }
  0x5e   :  { %3709 = vmatpush3.msk.msra.mxu0 %vm160_vm1, %v5150_v14 }
  0x5f   :  { %3711 = vmatmul.mubr.msk.f32.vlgmr.msra.gmra.mrb[0].mxu0 %vm120_vm2, %v94_v15  ;;  %4698 = vmatprep.subr.bf16.mxu0 %v5035_v0  ;;  %v5258_v15 = vld [vmem:[%s6774_s1] sm:$0xff] }
  0x60   :  { %3713 = vmatprep.mubr.msk.f32.mxu0 %vm5036_vm0, %v5037_v1  ;;  %4700 = vmatpush3.bf16.msra.mxu0 %v5233_v31 }
  0x61   :  { %4701 = vmatprep.subr.bf16.mxu0 %v5035_v0 }
  0x63   :  { %3714 = vmatmul.mubr.msk.f32.gmra.mrb[2].mxu0 %vm120_vm2, %v95_v16  ;;  %v5269_v16 = vld [vmem:[%s6774_s1 + $0x8] sm:$0xff] }
  0x64   :  { %3716 = vmatprep.mubr.msk.f32.mxu0 %vm5036_vm0, %v5037_v1  ;;  %4703 = vmatpush3.bf16.msra.mxu0 %v5236_v33 }
  0x65   :  { %4704 = vmatprep.subr.bf16.mxu0 %v5035_v0 }
  0x67   :  { %3717 = vmatmul.mubr.msk.f32.gmra.mrb[4].mxu0 %vm120_vm2, %v96_v17  ;;  %v5278_v17 = vld [vmem:[%s6774_s1 + $0x10] sm:$0xff] }
  0x68   :  { %3719 = vmatprep.mubr.msk.f32.mxu0 %vm5036_vm0, %v5037_v1  ;;  %4706 = vmatpush3.bf16.msra.mxu0 %v5240_v36 }
  0x69   :  { %4707 = vmatprep.subr.bf16.mxu0 %v5035_v0 }
  0x6b   :  { %3720 = vmatmul.mubr.msk.f32.gmra.mrb[6].mxu0 %vm120_vm2, %v97_v18  ;;  %v5287_v18 = vld [vmem:[%s6774_s1 + $0x18] sm:$0xff] }
  0x6c   :  { %3722 = vmatprep.mubr.msk.f32.mxu0 %vm5036_vm0, %v5037_v1  ;;  %4709 = vmatpush3.bf16.msra.mxu0 %v5244_v39 }
  0x6d   :  { %3830 = vmatprep.subr.mxu0 %v5037_v1 }
  0x6f   :  { %3723 = vmatmul.mubr.msk.f32.gmra.mrb[8].mxu0 %vm120_vm2, %v98_v19  ;;  %v5296_v19 = vld [vmem:[%s6774_s1 + $0x20] sm:$0xff] }
  0x70   :  { %3725 = vmatprep.mubr.msk.f32.mxu0 %vm5036_vm0, %v5037_v1  ;;  %3831 = vmatpush3.msk.msra.mxu0 %vm160_vm1, %v5374_v28 }
  0x71   :  { %4728 = vmatprep.subr.bf16.mxu0 %v5035_v0 }
  0x73   :  { %3726 = vmatmul.mubr.msk.f32.gmra.mrb[10].mxu0 %vm120_vm2, %v99_v20  ;;  %v5305_v20 = vld [vmem:[%s6774_s1 + $0x28] sm:$0xff] }
  0x74   :  { %3728 = vmatprep.mubr.msk.f32.mxu0 %vm5036_vm0, %v5037_v1 }
  0x77   :  { %3729 = vmatmul.mubr.msk.f32.gmra.mrb[12].mxu0 %vm120_vm2, %v100_v21  ;;  %v5314_v21 = vld [vmem:[%s6774_s1 + $0x30] sm:$0xff] }
  0x78   :  { %3731 = vmatprep.mubr.msk.f32.mxu0 %vm5036_vm0, %v5037_v1 }
  0x7b   :  { %3732 = vmatmul.mubr.msk.f32.gmra.mrb[14].mxu0 %vm120_vm2, %v101_v22  ;;  %v5323_v22 = vld [vmem:[%s6774_s1 + $0x38] sm:$0xff] }
  0x7c   :  { %3734 = vmatprep.mubr.msk.f32.mxu0 %vm5036_vm0, %v5037_v1 }
  0x7f   :  { %3735 = vmatmul.mubr.msk.f32.gmra.mrb[16].mxu0 %vm120_vm2, %v102_v23  ;;  %v5332_v23 = vld [vmem:[%s6774_s1 + $0x40] sm:$0xff] }
  0x80   :  { %3737 = vmatprep.mubr.msk.f32.mxu0 %vm5036_vm0, %v5037_v1 }
  0x83   :  { %3738 = vmatmul.mubr.msk.f32.gmra.mrb[18].mxu0 %vm120_vm2, %v103_v24  ;;  %v5341_v24 = vld [vmem:[%s6774_s1 + $0x48] sm:$0xff] }
  0x84   :  { %3740 = vmatprep.mubr.msk.f32.mxu0 %vm5036_vm0, %v5037_v1 }
  0x87   :  { %3741 = vmatmul.mubr.msk.f32.gmra.mrb[20].mxu0 %vm120_vm2, %v104_v25  ;;  %v5350_v25 = vld [vmem:[%s6774_s1 + $0x50] sm:$0xff] }
  0x88   :  { %3743 = vmatprep.mubr.msk.f32.mxu0 %vm5036_vm0, %v5037_v1 }
  0x8b   :  { %3744 = vmatmul.mubr.msk.f32.gmra.mrb[22].mxu0 %vm120_vm2, %v105_v26  ;;  %v5359_v26 = vld [vmem:[%s6774_s1 + $0x58] sm:$0xff] }
  0x8c   :  { %3746 = vmatprep.mubr.msk.f32.mxu0 %vm5036_vm0, %v5037_v1 }
  0x8f   :  { %3747 = vmatmul.mubr.msk.f32.gmra.mrb[24].mxu0 %vm120_vm2, %v106_v27  ;;  %v5368_v27 = vld [vmem:[%s6774_s1 + $0x60] sm:$0xf] }
  0x90   :  { %3832 = vmatprep.mubr.msk.f32.mxu0 %vm5036_vm0, %v5037_v1 }
 0x132   :  { %v230_v40 = vpop.f32.mrb[0].mxu0 }
 0x133   :  { %v3712_v41 = vpop.f32.mrb[1].mxu0 }
 0x136   :  { %v235_v42 = vpop.f32.mrb[2].mxu0 }
 0x137   :  { %v4681_v43 = vpack.c.bf16 %v235_v42, %v230_v40  ;;  %v3715_v44 = vpop.f32.mrb[3].mxu0 }
 0x139   :  { %4682 = vmatpush3.bf16.msra.mxu1 %v4681_v43 }
 0x13a   :  { %v240_v45 = vpop.f32.mrb[4].mxu0  ;;  %4683 = vmatprep.subr.bf16.mxu1 %v5035_v0 }
 0x13b   :  { %v3718_v46 = vpop.f32.mrb[5].mxu0 }
 0x13e   :  { %v245_v47 = vpop.f32.mrb[6].mxu0 }
 0x13f   :  { %v4684_v48 = vpack.c.bf16 %v245_v47, %v240_v45  ;;  %v3721_v49 = vpop.f32.mrb[7].mxu0 }
 0x141   :  { %4685 = vmatpush3.bf16.msra.mxu1 %v4684_v48 }
 0x142   :  { %v250_v50 = vpop.f32.mrb[8].mxu0  ;;  %4686 = vmatprep.subr.bf16.mxu1 %v5035_v0 }
 0x143   :  { %v3724_v51 = vpop.f32.mrb[9].mxu0 }
 0x146   :  { %v255_v52 = vpop.f32.mrb[10].mxu0 }
 0x147   :  { %v4687_v53 = vpack.c.bf16 %v255_v52, %v250_v50  ;;  %v3727_v54 = vpop.f32.mrb[11].mxu0 }
 0x149   :  { %4688 = vmatpush3.bf16.msra.mxu1 %v4687_v53 }
 0x14a   :  { %v260_v55 = vpop.f32.mrb[12].mxu0  ;;  %4689 = vmatprep.subr.bf16.mxu1 %v5035_v0 }
 0x14b   :  { %v3730_v56 = vpop.f32.mrb[13].mxu0 }
 0x14e   :  { %v265_v57 = vpop.f32.mrb[14].mxu0 }
 0x14f   :  { %v4690_v58 = vpack.c.bf16 %v265_v57, %v260_v55  ;;  %v3733_v59 = vpop.f32.mrb[15].mxu0 }
 0x151   :  { %4691 = vmatpush3.bf16.msra.mxu1 %v4690_v58 }
 0x152   :  { %v270_v60 = vpop.f32.mrb[16].mxu0  ;;  %4692 = vmatprep.subr.bf16.mxu1 %v5035_v0 }
 0x153   :  { %v3736_v61 = vpop.f32.mrb[17].mxu0 }
 0x156   :  { %v275_v62 = vpop.f32.mrb[18].mxu0 }
 0x157   :  { %v4693_v63 = vpack.c.bf16 %v275_v62, %v270_v60  ;;  %v3739_v2 = vpop.f32.mrb[19].mxu0 }
 0x159   :  { %4694 = vmatpush3.bf16.msra.mxu1 %v4693_v63 }
 0x15a   :  { %v280_v3 = vpop.f32.mrb[20].mxu0  ;;  %4695 = vmatprep.subr.bf16.mxu1 %v5035_v0 }
 0x15b   :  { %v3742_v4 = vpop.f32.mrb[21].mxu0 }
 0x15e   :  { %v285_v6 = vpop.f32.mrb[22].mxu0 }
 0x15f   :  { %v4696_v8 = vpack.c.bf16 %v285_v6, %v280_v3  ;;  %v3745_v9 = vpop.f32.mrb[23].mxu0 }
 0x161   :  { %4697 = vmatpush3.bf16.msra.mxu1 %v4696_v8 }
 0x162   :  { %v290_v11 = vpop.f32.mrb[24].mxu0  ;;  %3773 = vmatprep.subr.mxu1 %v5037_v1 }
 0x163   :  { %v3748_v12 = vpop.f32.mrb[25].mxu0 }
 0x165   :  { %3774 = vmatpush3.msk.msra.mxu1 %vm340_vm3, %v290_v11 }
 0x166   :  { %3776 = vmatmul.mubr.msk.f32.vlgmr.msra.gmra.mrb[0].mxu1 %vm300_vm4, %v5258_v15  ;;  %4710 = vmatprep.subr.bf16.mxu1 %v5035_v0 }
 0x167   :  { %3778 = vmatprep.mubr.msk.f32.mxu1 %vm5036_vm0, %v5037_v1 }
 0x16a   :  { %3779 = vmatmul.mubr.msk.f32.gmra.mrb[2].mxu1 %vm300_vm4, %v5269_v16 }
 0x16b   :  { %3781 = vmatprep.mubr.msk.f32.mxu1 %vm5036_vm0, %v5037_v1 }
 0x16e   :  { %3782 = vmatmul.mubr.msk.f32.gmra.mrb[4].mxu1 %vm300_vm4, %v5278_v17 }
 0x16f   :  { %3784 = vmatprep.mubr.msk.f32.mxu1 %vm5036_vm0, %v5037_v1 }
 0x172   :  { %3785 = vmatmul.mubr.msk.f32.gmra.mrb[6].mxu1 %vm300_vm4, %v5287_v18 }
 0x173   :  { %3787 = vmatprep.mubr.msk.f32.mxu1 %vm5036_vm0, %v5037_v1 }
 0x176   :  { %3788 = vmatmul.mubr.msk.f32.gmra.mrb[8].mxu1 %vm300_vm4, %v5296_v19 }
 0x177   :  { %3790 = vmatprep.mubr.msk.f32.mxu1 %vm5036_vm0, %v5037_v1 }
 0x17a   :  { %3791 = vmatmul.mubr.msk.f32.gmra.mrb[10].mxu1 %vm300_vm4, %v5305_v20 }
 0x17b   :  { %3793 = vmatprep.mubr.msk.f32.mxu1 %vm5036_vm0, %v5037_v1 }
 0x17e   :  { %3794 = vmatmul.mubr.msk.f32.gmra.mrb[12].mxu1 %vm300_vm4, %v5314_v21 }
 0x17f   :  { %3796 = vmatprep.mubr.msk.f32.mxu1 %vm5036_vm0, %v5037_v1 }
 0x182   :  { %3797 = vmatmul.mubr.msk.f32.gmra.mrb[14].mxu1 %vm300_vm4, %v5323_v22 }
 0x183   :  { %3799 = vmatprep.mubr.msk.f32.mxu1 %vm5036_vm0, %v5037_v1 }
 0x186   :  { %3800 = vmatmul.mubr.msk.f32.gmra.mrb[16].mxu1 %vm300_vm4, %v5332_v23 }
 0x187   :  { %3802 = vmatprep.mubr.msk.f32.mxu1 %vm5036_vm0, %v5037_v1 }
 0x18a   :  { %3803 = vmatmul.mubr.msk.f32.gmra.mrb[18].mxu1 %vm300_vm4, %v5341_v24 }
 0x18b   :  { %3805 = vmatprep.mubr.msk.f32.mxu1 %vm5036_vm0, %v5037_v1 }
 0x18e   :  { %3806 = vmatmul.mubr.msk.f32.gmra.mrb[20].mxu1 %vm300_vm4, %v5350_v25 }
 0x18f   :  { %3808 = vmatprep.mubr.msk.f32.mxu1 %vm5036_vm0, %v5037_v1 }
 0x192   :  { %3809 = vmatmul.mubr.msk.f32.gmra.mrb[22].mxu1 %vm300_vm4, %v5359_v26 }
 0x193   :  { %3811 = vmatprep.mubr.msk.f32.mxu1 %vm5036_vm0, %v5037_v1 }
 0x196   :  { %3812 = vmatmul.mubr.msk.f32.gmra.mrb[24].mxu1 %vm300_vm4, %v5368_v27 }
 0x197   :  { %3897 = vmatprep.mubr.msk.f32.mxu1 %vm5036_vm0, %v5037_v1 }
 0x239   :  { %v410_v30 = vpop.f32.mrb[0].mxu1 }
 0x23a   :  { %v411_v32 = vadd.f32 %v5379_v29, %v410_v30  ;;  %v3777_v34 = vpop.f32.mrb[1].mxu1 }
 0x23c   :  { %v474_v35 = vmax.f32 %v411_v32, 0.0 }
 0x23d   :  { %v415_v37 = vpop.f32.mrb[2].mxu1 }
 0x23e   :  { %v416_v38 = vadd.f32 %v5379_v29, %v415_v37  ;;  %v3780_v40 = vpop.f32.mrb[3].mxu1  ;;  %3833 = vmatmul.mubr.msk.f32.vlgmr.msra.gmra.mrb[26].mxu0 %vm120_vm2, %v474_v35 }
 0x23f   :  { %3835 = vmatprep.mubr.msk.f32.mxu0 %vm5036_vm0, %v5037_v1  ;;  %4730 = vmatpush3.bf16.msra.mxu0 %v5134_v5 }
 0x240   :  { %v475_v41 = vmax.f32 %v416_v38, 0.0  ;;  %4731 = vmatprep.subr.bf16.mxu0 %v5035_v0 }
 0x241   :  { %v420_v42 = vpop.f32.mrb[4].mxu1 }
 0x242   :  { %v421_v43 = vadd.f32 %v5379_v29, %v420_v42  ;;  %v3783_v44 = vpop.f32.mrb[5].mxu1  ;;  %3836 = vmatmul.mubr.msk.f32.gmra.mrb[28].mxu0 %vm120_vm2, %v475_v41 }
 0x243   :  { %3838 = vmatprep.mubr.msk.f32.mxu0 %vm5036_vm0, %v5037_v1  ;;  %4733 = vmatpush3.bf16.msra.mxu0 %v5137_v7 }
 0x244   :  { %v476_v45 = vmax.f32 %v421_v43, 0.0  ;;  %4734 = vmatprep.subr.bf16.mxu0 %v5035_v0 }
 0x245   :  { %v425_v46 = vpop.f32.mrb[6].mxu1 }
 0x246   :  { %v426_v47 = vadd.f32 %v5379_v29, %v425_v46  ;;  %v3786_v48 = vpop.f32.mrb[7].mxu1  ;;  %3839 = vmatmul.mubr.msk.f32.gmra.mrb[30].mxu0 %vm120_vm2, %v476_v45 }
 0x247   :  { %3841 = vmatprep.mubr.msk.f32.mxu0 %vm5036_vm0, %v5037_v1  ;;  %4736 = vmatpush3.bf16.msra.mxu0 %v5141_v10  ;;  %v3024_v48 = vld [vmem:[%s6773_s0 + $0x70] sm:$0xff] }
 0x248   :  { %v477_v49 = vmax.f32 %v426_v47, 0.0  ;;  %4737 = vmatprep.subr.bf16.mxu0 %v5035_v0  ;;  %v3023_v47 = vld [vmem:[%s6773_s0 + $0x68] sm:$0xff] }
 0x249   :  { %v430_v50 = vpop.f32.mrb[8].mxu1 }
 0x24a   :  { %v431_v51 = vadd.f32 %v5379_v29, %v430_v50  ;;  %v3789_v52 = vpop.f32.mrb[9].mxu1  ;;  %3842 = vmatmul.mubr.msk.f32.gmra.mrb[32].mxu0 %vm120_vm2, %v477_v49  ;;  %v3025_v49 = vld [vmem:[%s6773_s0 + $0x78] sm:$0xff]  ;;  %v3026_v50 = vld [vmem:[%s6773_s0 + $0x80] sm:$0xff] }
 0x24b   :  { %3844 = vmatprep.mubr.msk.f32.mxu0 %vm5036_vm0, %v5037_v1  ;;  %4739 = vmatpush3.bf16.msra.mxu0 %v5145_v13  ;;  %v3028_v52 = vld [vmem:[%s6773_s0 + $0x90] sm:$0xff] }
 0x24c   :  { %v478_v53 = vmax.f32 %v431_v51, 0.0  ;;  %3952 = vmatprep.subr.mxu0 %v5037_v1  ;;  %v3027_v51 = vld [vmem:[%s6773_s0 + $0x88] sm:$0xff] }
 0x24d   :  { %v435_v54 = vpop.f32.mrb[10].mxu1 }
 0x24e   :  { %v436_v55 = vadd.f32 %v5379_v29, %v435_v54  ;;  %v3792_v56 = vpop.f32.mrb[11].mxu1  ;;  %3845 = vmatmul.mubr.msk.f32.gmra.mrb[34].mxu0 %vm120_vm2, %v478_v53  ;;  %v3029_v53 = vld [vmem:[%s6773_s0 + $0x98] sm:$0xff]  ;;  %v3030_v54 = vld [vmem:[%s6773_s0 + $0xa0] sm:$0xff] }
 0x24f   :  { %3847 = vmatprep.mubr.msk.f32.mxu0 %vm5036_vm0, %v5037_v1  ;;  %3953 = vmatpush3.msk.msra.mxu0 %vm160_vm1, %v5150_v14  ;;  %v3032_v56 = vld [vmem:[%s6773_s0 + $0xb0] sm:$0xff] }
 0x250   :  { %v479_v57 = vmax.f32 %v436_v55, 0.0  ;;  %4758 = vmatprep.subr.bf16.mxu0 %v5035_v0  ;;  %v3031_v55 = vld [vmem:[%s6773_s0 + $0xa8] sm:$0xff] }
 0x251   :  { %v440_v58 = vpop.f32.mrb[12].mxu1 }
 0x252   :  { %v441_v59 = vadd.f32 %v5379_v29, %v440_v58  ;;  %v3795_v60 = vpop.f32.mrb[13].mxu1  ;;  %3848 = vmatmul.mubr.msk.f32.gmra.mrb[36].mxu0 %vm120_vm2, %v479_v57  ;;  %v3033_v57 = vld [vmem:[%s6773_s0 + $0xb8] sm:$0xff]  ;;  %v3034_v58 = vld [vmem:[%s6773_s0 + $0xc0] sm:$0xff] }
 0x253   :  { %3850 = vmatprep.mubr.msk.f32.mxu0 %vm5036_vm0, %v5037_v1 }
 0x254   :  { %v480_v61 = vmax.f32 %v441_v59, 0.0  ;;  %v3035_v59 = vld [vmem:[%s6773_s0 + $0xc8] sm:$0xf] }
 0x255   :  { %v445_v62 = vpop.f32.mrb[14].mxu1 }
 0x256   :  { %v446_v63 = vadd.f32 %v5379_v29, %v445_v62  ;;  %v3798_v2 = vpop.f32.mrb[15].mxu1  ;;  %3851 = vmatmul.mubr.msk.f32.gmra.mrb[38].mxu0 %vm120_vm2, %v480_v61 }
 0x257   :  { %3853 = vmatprep.mubr.msk.f32.mxu0 %vm5036_vm0, %v5037_v1 }
 0x258   :  { %v481_v14 = vmax.f32 %v446_v63, 0.0 }
 0x259   :  { %v450_v3 = vpop.f32.mrb[16].mxu1 }
 0x25a   :  { %v451_v4 = vadd.f32 %v5379_v29, %v450_v3  ;;  %v3801_v6 = vpop.f32.mrb[17].mxu1  ;;  %3854 = vmatmul.mubr.msk.f32.gmra.mrb[40].mxu0 %vm120_vm2, %v481_v14 }
 0x25b   :  { %3856 = vmatprep.mubr.msk.f32.mxu0 %vm5036_vm0, %v5037_v1 }
 0x25c   :  { %v482_v8 = vmax.f32 %v451_v4, 0.0 }
 0x25d   :  { %v455_v9 = vpop.f32.mrb[18].mxu1 }
 0x25e   :  { %v456_v11 = vadd.f32 %v5379_v29, %v455_v9  ;;  %v3804_v12 = vpop.f32.mrb[19].mxu1  ;;  %3857 = vmatmul.mubr.msk.f32.gmra.mrb[42].mxu0 %vm120_vm2, %v482_v8 }
 0x25f   :  { %3859 = vmatprep.mubr.msk.f32.mxu0 %vm5036_vm0, %v5037_v1 }
 0x260   :  { %v483_v30 = vmax.f32 %v456_v11, 0.0 }
 0x261   :  { %v460_v32 = vpop.f32.mrb[20].mxu1 }
 0x262   :  { %v461_v34 = vadd.f32 %v5379_v29, %v460_v32  ;;  %v3807_v35 = vpop.f32.mrb[21].mxu1  ;;  %3860 = vmatmul.mubr.msk.f32.gmra.mrb[44].mxu0 %vm120_vm2, %v483_v30 }
 0x263   :  { %3862 = vmatprep.mubr.msk.f32.mxu0 %vm5036_vm0, %v5037_v1 }
 0x264   :  { %v484_v37 = vmax.f32 %v461_v34, 0.0 }
 0x265   :  { %v465_v38 = vpop.f32.mrb[22].mxu1 }
 0x266   :  { %v466_v40 = vadd.f32 %v5379_v29, %v465_v38  ;;  %v3810_v41 = vpop.f32.mrb[23].mxu1  ;;  %3863 = vmatmul.mubr.msk.f32.gmra.mrb[46].mxu0 %vm120_vm2, %v484_v37 }
 0x267   :  { %3865 = vmatprep.mubr.msk.f32.mxu0 %vm5036_vm0, %v5037_v1 }
 0x268   :  { %v485_v42 = vmax.f32 %v466_v40, 0.0 }
 0x269   :  { %v470_v43 = vpop.f32.mrb[24].mxu1 }
 0x26a   :  { %v471_v44 = vadd.f32 %v5379_v29, %v470_v43  ;;  %v3813_v45 = vpop.f32.mrb[25].mxu1  ;;  %3866 = vmatmul.mubr.msk.f32.gmra.mrb[48].mxu0 %vm120_vm2, %v485_v42 }
 0x26b   :  { %3868 = vmatprep.mubr.msk.f32.mxu0 %vm5036_vm0, %v5037_v1 }
 0x26c   :  { %v486_v46 = vmax.f32 %v471_v44, 0.0 }
 0x26e   :  { %3869 = vmatmul.mubr.msk.f32.gmra.mrb[50].mxu0 %vm120_vm2, %v486_v46 }
 0x26f   :  { %3954 = vmatprep.mubr.msk.f32.mxu0 %vm5036_vm0, %v5037_v1 }
 0x272   :  { %3955 = vmatmul.mubr.msk.f32.vlgmr.msra.gmra.mrb[52].mxu0 %vm120_vm2, %v3023_v47 }
 0x273   :  { %3957 = vmatprep.mubr.msk.f32.mxu0 %vm5036_vm0, %v5037_v1  ;;  %4760 = vmatpush3.bf16.msra.mxu0 %v5233_v31 }
 0x274   :  { %4761 = vmatprep.subr.bf16.mxu0 %v5035_v0 }
 0x276   :  { %3958 = vmatmul.mubr.msk.f32.gmra.mrb[54].mxu0 %vm120_vm2, %v3024_v48 }
 0x277   :  { %3960 = vmatprep.mubr.msk.f32.mxu0 %vm5036_vm0, %v5037_v1  ;;  %4763 = vmatpush3.bf16.msra.mxu0 %v5236_v33 }
 0x278   :  { %4764 = vmatprep.subr.bf16.mxu0 %v5035_v0 }
 0x27a   :  { %3961 = vmatmul.mubr.msk.f32.gmra.mrb[56].mxu0 %vm120_vm2, %v3025_v49 }
 0x27b   :  { %3963 = vmatprep.mubr.msk.f32.mxu0 %vm5036_vm0, %v5037_v1  ;;  %4766 = vmatpush3.bf16.msra.mxu0 %v5240_v36 }
 0x27c   :  { %4767 = vmatprep.subr.bf16.mxu0 %v5035_v0 }
 0x27e   :  { %3964 = vmatmul.mubr.msk.f32.gmra.mrb[58].mxu0 %vm120_vm2, %v3026_v50 }
 0x27f   :  { %3966 = vmatprep.mubr.msk.f32.mxu0 %vm5036_vm0, %v5037_v1  ;;  %4769 = vmatpush3.bf16.msra.mxu0 %v5244_v39 }
 0x280   :  { %4074 = vmatprep.subr.mxu0 %v5037_v1 }
 0x282   :  { %3967 = vmatmul.mubr.msk.f32.gmra.mrb[60].mxu0 %vm120_vm2, %v3027_v51 }
 0x283   :  { %3969 = vmatprep.mubr.msk.f32.mxu0 %vm5036_vm0, %v5037_v1  ;;  %4075 = vmatpush3.msk.msra.mxu0 %vm160_vm1, %v5374_v28 }
 0x284   :  { %4788 = vmatprep.subr.bf16.mxu0 %v5035_v0 }
 0x286   :  { %3970 = vmatmul.mubr.msk.f32.gmra.mrb[62].mxu0 %vm120_vm2, %v3028_v52 }
 0x287   :  { %3972 = vmatprep.mubr.msk.f32.mxu0 %vm5036_vm0, %v5037_v1 }
 0x28a   :  { %3973 = vmatmul.mubr.msk.f32.gmra.mrb[64].mxu0 %vm120_vm2, %v3029_v53 }
 0x28b   :  { %3975 = vmatprep.mubr.msk.f32.mxu0 %vm5036_vm0, %v5037_v1 }
 0x28e   :  { %3976 = vmatmul.mubr.msk.f32.gmra.mrb[66].mxu0 %vm120_vm2, %v3030_v54 }
 0x28f   :  { %3978 = vmatprep.mubr.msk.f32.mxu0 %vm5036_vm0, %v5037_v1 }
 0x292   :  { %3979 = vmatmul.mubr.msk.f32.gmra.mrb[68].mxu0 %vm120_vm2, %v3031_v55 }
 0x293   :  { %3981 = vmatprep.mubr.msk.f32.mxu0 %vm5036_vm0, %v5037_v1 }
 0x296   :  { %3982 = vmatmul.mubr.msk.f32.gmra.mrb[70].mxu0 %vm120_vm2, %v3032_v56 }
 0x297   :  { %3984 = vmatprep.mubr.msk.f32.mxu0 %vm5036_vm0, %v5037_v1 }
 0x29a   :  { %3985 = vmatmul.mubr.msk.f32.gmra.mrb[72].mxu0 %vm120_vm2, %v3033_v57 }
 0x29b   :  { %3987 = vmatprep.mubr.msk.f32.mxu0 %vm5036_vm0, %v5037_v1 }
 0x29e   :  { %3988 = vmatmul.mubr.msk.f32.gmra.mrb[74].mxu0 %vm120_vm2, %v3034_v58 }
 0x29f   :  { %3990 = vmatprep.mubr.msk.f32.mxu0 %vm5036_vm0, %v5037_v1 }
 0x2a2   :  { %3991 = vmatmul.mubr.msk.f32.gmra.mrb[76].mxu0 %vm120_vm2, %v3035_v59 }
 0x2a3   :  { %4076 = vmatprep.mubr.msk.f32.mxu0 %vm5036_vm0, %v5037_v1 }
 0x311   :  { %v595_v60 = vpop.f32.mrb[26].mxu0 }
 0x312   :  { %v3834_v61 = vpop.f32.mrb[27].mxu0 }
 0x315   :  { %v600_v62 = vpop.f32.mrb[28].mxu0 }
 0x316   :  { %v4711_v63 = vpack.c.bf16 %v600_v62, %v595_v60  ;;  %v3837_v2 = vpop.f32.mrb[29].mxu0 }
 0x318   :  { %4712 = vmatpush3.bf16.msra.mxu1 %v4711_v63 }
 0x319   :  { %v605_v14 = vpop.f32.mrb[30].mxu0  ;;  %4713 = vmatprep.subr.bf16.mxu1 %v5035_v0 }
 0x31a   :  { %v3840_v3 = vpop.f32.mrb[31].mxu0 }
 0x31d   :  { %v610_v4 = vpop.f32.mrb[32].mxu0 }
 0x31e   :  { %v4714_v6 = vpack.c.bf16 %v610_v4, %v605_v14  ;;  %v3843_v8 = vpop.f32.mrb[33].mxu0 }
 0x320   :  { %4715 = vmatpush3.bf16.msra.mxu1 %v4714_v6 }
 0x321   :  { %v615_v9 = vpop.f32.mrb[34].mxu0  ;;  %4716 = vmatprep.subr.bf16.mxu1 %v5035_v0 }
 0x322   :  { %v3846_v11 = vpop.f32.mrb[35].mxu0 }
 0x325   :  { %v620_v12 = vpop.f32.mrb[36].mxu0 }
 0x326   :  { %v4717_v30 = vpack.c.bf16 %v620_v12, %v615_v9  ;;  %v3849_v32 = vpop.f32.mrb[37].mxu0 }
 0x327   :  { %v5622_v32 = vld [vmem:[%s6774_s1 + $0x78] sm:$0xff] }
 0x328   :  { %4718 = vmatpush3.bf16.msra.mxu1 %v4717_v30 }
 0x329   :  { %v625_v34 = vpop.f32.mrb[38].mxu0  ;;  %4719 = vmatprep.subr.bf16.mxu1 %v5035_v0 }
 0x32a   :  { %v3852_v35 = vpop.f32.mrb[39].mxu0 }
 0x32b   :  { %v5640_v35 = vld [vmem:[%s6774_s1 + $0x88] sm:$0xff] }
 0x32d   :  { %v630_v37 = vpop.f32.mrb[40].mxu0 }
 0x32e   :  { %v4720_v38 = vpack.c.bf16 %v630_v37, %v625_v34  ;;  %v3855_v40 = vpop.f32.mrb[41].mxu0  ;;  %v5631_v34 = vld [vmem:[%s6774_s1 + $0x80] sm:$0xff]  ;;  %v5649_v37 = vld [vmem:[%s6774_s1 + $0x90] sm:$0xff] }
 0x32f   :  { %v5667_v40 = vld [vmem:[%s6774_s1 + $0xa0] sm:$0xff] }
 0x330   :  { %4721 = vmatpush3.bf16.msra.mxu1 %v4720_v38  ;;  %v5658_v38 = vld [vmem:[%s6774_s1 + $0x98] sm:$0xff] }
 0x331   :  { %v635_v41 = vpop.f32.mrb[42].mxu0  ;;  %4722 = vmatprep.subr.bf16.mxu1 %v5035_v0 }
 0x332   :  { %v3858_v42 = vpop.f32.mrb[43].mxu0 }
 0x333   :  { %v5685_v42 = vld [vmem:[%s6774_s1 + $0xb0] sm:$0xff] }
 0x335   :  { %v640_v43 = vpop.f32.mrb[44].mxu0 }
 0x336   :  { %v4723_v44 = vpack.c.bf16 %v640_v43, %v635_v41  ;;  %v3861_v45 = vpop.f32.mrb[45].mxu0  ;;  %v5676_v41 = vld [vmem:[%s6774_s1 + $0xa8] sm:$0xff]  ;;  %v5694_v43 = vld [vmem:[%s6774_s1 + $0xb8] sm:$0xff] }
 0x337   :  { %v5712_v45 = vld [vmem:[%s6774_s1 + $0xc8] sm:$0xf] }
 0x338   :  { %4724 = vmatpush3.bf16.msra.mxu1 %v4723_v44  ;;  %v5703_v44 = vld [vmem:[%s6774_s1 + $0xc0] sm:$0xff] }
 0x339   :  { %v645_v46 = vpop.f32.mrb[46].mxu0  ;;  %4725 = vmatprep.subr.bf16.mxu1 %v5035_v0 }
 0x33a   :  { %v3864_v47 = vpop.f32.mrb[47].mxu0 }
 0x33d   :  { %v650_v48 = vpop.f32.mrb[48].mxu0 }
 0x33e   :  { %v4726_v49 = vpack.c.bf16 %v650_v48, %v645_v46  ;;  %v3867_v50 = vpop.f32.mrb[49].mxu0  ;;  %v5718_v46 = vld [vmem:[#allocation7] ss:$0 sm:$0xff] }
 0x340   :  { %4727 = vmatpush3.bf16.msra.mxu1 %v4726_v49 }
 0x341   :  { %v655_v51 = vpop.f32.mrb[50].mxu0  ;;  %3895 = vmatprep.subr.mxu1 %v5037_v1 }
 0x342   :  { %v3870_v52 = vpop.f32.mrb[51].mxu0 }
 0x344   :  { %3896 = vmatpush3.msk.msra.mxu1 %vm340_vm3, %v655_v51 }
 0x345   :  { %3898 = vmatmul.mubr.msk.f32.vlgmr.msra.gmra.mrb[26].mxu1 %vm300_vm4, %v5258_v15  ;;  %v958_v53 = vpop.f32.mrb[52].mxu0  ;;  %4740 = vmatprep.subr.bf16.mxu1 %v5035_v0 }
 0x346   :  { %v3956_v54 = vpop.f32.mrb[53].mxu0  ;;  %3900 = vmatprep.mubr.msk.f32.mxu1 %vm5036_vm0, %v5037_v1 }
 0x349   :  { %3901 = vmatmul.mubr.msk.f32.gmra.mrb[28].mxu1 %vm300_vm4, %v5269_v16  ;;  %v963_v55 = vpop.f32.mrb[54].mxu0 }
 0x34a   :  { %v4741_v56 = vpack.c.bf16 %v963_v55, %v958_v53  ;;  %v3959_v57 = vpop.f32.mrb[55].mxu0  ;;  %3903 = vmatprep.mubr.msk.f32.mxu1 %vm5036_vm0, %v5037_v1 }
 0x34c   :  { %4742 = vmatpush3.bf16.msra.mxu1 %v4741_v56 }
 0x34d   :  { %3904 = vmatmul.mubr.msk.f32.gmra.mrb[30].mxu1 %vm300_vm4, %v5278_v17  ;;  %v968_v15 = vpop.f32.mrb[56].mxu0  ;;  %4743 = vmatprep.subr.bf16.mxu1 %v5035_v0 }
 0x34e   :  { %v3962_v58 = vpop.f32.mrb[57].mxu0  ;;  %3906 = vmatprep.mubr.msk.f32.mxu1 %vm5036_vm0, %v5037_v1 }
 0x351   :  { %3907 = vmatmul.mubr.msk.f32.gmra.mrb[32].mxu1 %vm300_vm4, %v5287_v18  ;;  %v973_v16 = vpop.f32.mrb[58].mxu0 }
 0x352   :  { %v4744_v59 = vpack.c.bf16 %v973_v16, %v968_v15  ;;  %v3965_v60 = vpop.f32.mrb[59].mxu0  ;;  %3909 = vmatprep.mubr.msk.f32.mxu1 %vm5036_vm0, %v5037_v1 }
 0x354   :  { %4745 = vmatpush3.bf16.msra.mxu1 %v4744_v59 }
 0x355   :  { %3910 = vmatmul.mubr.msk.f32.gmra.mrb[34].mxu1 %vm300_vm4, %v5296_v19  ;;  %v978_v17 = vpop.f32.mrb[60].mxu0  ;;  %4746 = vmatprep.subr.bf16.mxu1 %v5035_v0 }
 0x356   :  { %v3968_v61 = vpop.f32.mrb[61].mxu0  ;;  %3912 = vmatprep.mubr.msk.f32.mxu1 %vm5036_vm0, %v5037_v1 }
 0x359   :  { %3913 = vmatmul.mubr.msk.f32.gmra.mrb[36].mxu1 %vm300_vm4, %v5305_v20  ;;  %v983_v18 = vpop.f32.mrb[62].mxu0 }
 0x35a   :  { %v4747_v62 = vpack.c.bf16 %v983_v18, %v978_v17  ;;  %v3971_v63 = vpop.f32.mrb[63].mxu0  ;;  %3915 = vmatprep.mubr.msk.f32.mxu1 %vm5036_vm0, %v5037_v1 }
 0x35c   :  { %4748 = vmatpush3.bf16.msra.mxu1 %v4747_v62 }
 0x35d   :  { %3916 = vmatmul.mubr.msk.f32.gmra.mrb[38].mxu1 %vm300_vm4, %v5314_v21  ;;  %v988_v19 = vpop.f32.mrb[64].mxu0  ;;  %4749 = vmatprep.subr.bf16.mxu1 %v5035_v0 }
 0x35e   :  { %v3974_v2 = vpop.f32.mrb[65].mxu0  ;;  %3918 = vmatprep.mubr.msk.f32.mxu1 %vm5036_vm0, %v5037_v1 }
 0x361   :  { %3919 = vmatmul.mubr.msk.f32.gmra.mrb[40].mxu1 %vm300_vm4, %v5323_v22  ;;  %v993_v20 = vpop.f32.mrb[66].mxu0 }
 0x362   :  { %v4750_v14 = vpack.c.bf16 %v993_v20, %v988_v19  ;;  %v3977_v3 = vpop.f32.mrb[67].mxu0  ;;  %3921 = vmatprep.mubr.msk.f32.mxu1 %vm5036_vm0, %v5037_v1 }
 0x364   :  { %4751 = vmatpush3.bf16.msra.mxu1 %v4750_v14 }
 0x365   :  { %3922 = vmatmul.mubr.msk.f32.gmra.mrb[42].mxu1 %vm300_vm4, %v5332_v23  ;;  %v998_v21 = vpop.f32.mrb[68].mxu0  ;;  %4752 = vmatprep.subr.bf16.mxu1 %v5035_v0 }
 0x366   :  { %v3980_v4 = vpop.f32.mrb[69].mxu0  ;;  %3924 = vmatprep.mubr.msk.f32.mxu1 %vm5036_vm0, %v5037_v1 }
 0x369   :  { %3925 = vmatmul.mubr.msk.f32.gmra.mrb[44].mxu1 %vm300_vm4, %v5341_v24  ;;  %v1003_v22 = vpop.f32.mrb[70].mxu0 }
 0x36a   :  { %v4753_v6 = vpack.c.bf16 %v1003_v22, %v998_v21  ;;  %v3983_v8 = vpop.f32.mrb[71].mxu0  ;;  %3927 = vmatprep.mubr.msk.f32.mxu1 %vm5036_vm0, %v5037_v1 }
 0x36c   :  { %4754 = vmatpush3.bf16.msra.mxu1 %v4753_v6 }
 0x36d   :  { %3928 = vmatmul.mubr.msk.f32.gmra.mrb[46].mxu1 %vm300_vm4, %v5350_v25  ;;  %v1008_v23 = vpop.f32.mrb[72].mxu0  ;;  %4755 = vmatprep.subr.bf16.mxu1 %v5035_v0 }
 0x36e   :  { %v3986_v9 = vpop.f32.mrb[73].mxu0  ;;  %3930 = vmatprep.mubr.msk.f32.mxu1 %vm5036_vm0, %v5037_v1 }
 0x371   :  { %3931 = vmatmul.mubr.msk.f32.gmra.mrb[48].mxu1 %vm300_vm4, %v5359_v26  ;;  %v1013_v24 = vpop.f32.mrb[74].mxu0  ;;  %v5602_v26 = vld [vmem:[%s6774_s1 + $0x68] sm:$0xff] }
 0x372   :  { %v4756_v11 = vpack.c.bf16 %v1013_v24, %v1008_v23  ;;  %v3989_v12 = vpop.f32.mrb[75].mxu0  ;;  %3933 = vmatprep.mubr.msk.f32.mxu1 %vm5036_vm0, %v5037_v1 }
 0x374   :  { %4757 = vmatpush3.bf16.msra.mxu1 %v4756_v11 }
 0x375   :  { %3934 = vmatmul.mubr.msk.f32.gmra.mrb[50].mxu1 %vm300_vm4, %v5368_v27  ;;  %v1018_v25 = vpop.f32.mrb[76].mxu0  ;;  %4017 = vmatprep.subr.mxu1 %v5037_v1  ;;  %v5613_v27 = vld [vmem:[%s6774_s1 + $0x70] sm:$0xff] }
 0x376   :  { %v3992_v30 = vpop.f32.mrb[77].mxu0  ;;  %4019 = vmatprep.mubr.msk.f32.mxu1 %vm5036_vm0, %v5037_v1 }
 0x378   :  { %4018 = vmatpush3.msk.msra.mxu1 %vm340_vm3, %v1018_v25 }
 0x379   :  { %4020 = vmatmul.mubr.msk.f32.vlgmr.msra.gmra.mrb[52].mxu1 %vm300_vm4, %v5602_v26  ;;  %4770 = vmatprep.subr.bf16.mxu1 %v5035_v0 }
 0x37a   :  { %4022 = vmatprep.mubr.msk.f32.mxu1 %vm5036_vm0, %v5037_v1 }
 0x37d   :  { %4023 = vmatmul.mubr.msk.f32.gmra.mrb[54].mxu1 %vm300_vm4, %v5613_v27 }
 0x37e   :  { %4025 = vmatprep.mubr.msk.f32.mxu1 %vm5036_vm0, %v5037_v1 }
 0x381   :  { %4026 = vmatmul.mubr.msk.f32.gmra.mrb[56].mxu1 %vm300_vm4, %v5622_v32 }
 0x382   :  { %4028 = vmatprep.mubr.msk.f32.mxu1 %vm5036_vm0, %v5037_v1 }
 0x385   :  { %4029 = vmatmul.mubr.msk.f32.gmra.mrb[58].mxu1 %vm300_vm4, %v5631_v34 }
 0x386   :  { %4031 = vmatprep.mubr.msk.f32.mxu1 %vm5036_vm0, %v5037_v1 }
 0x389   :  { %4032 = vmatmul.mubr.msk.f32.gmra.mrb[60].mxu1 %vm300_vm4, %v5640_v35 }
 0x38a   :  { %4034 = vmatprep.mubr.msk.f32.mxu1 %vm5036_vm0, %v5037_v1 }
 0x38d   :  { %4035 = vmatmul.mubr.msk.f32.gmra.mrb[62].mxu1 %vm300_vm4, %v5649_v37 }
 0x38e   :  { %4037 = vmatprep.mubr.msk.f32.mxu1 %vm5036_vm0, %v5037_v1 }
 0x391   :  { %4038 = vmatmul.mubr.msk.f32.gmra.mrb[64].mxu1 %vm300_vm4, %v5658_v38 }
 0x392   :  { %4040 = vmatprep.mubr.msk.f32.mxu1 %vm5036_vm0, %v5037_v1 }
 0x395   :  { %4041 = vmatmul.mubr.msk.f32.gmra.mrb[66].mxu1 %vm300_vm4, %v5667_v40 }
 0x396   :  { %4043 = vmatprep.mubr.msk.f32.mxu1 %vm5036_vm0, %v5037_v1 }
 0x399   :  { %4044 = vmatmul.mubr.msk.f32.gmra.mrb[68].mxu1 %vm300_vm4, %v5676_v41 }
 0x39a   :  { %4046 = vmatprep.mubr.msk.f32.mxu1 %vm5036_vm0, %v5037_v1 }
 0x39d   :  { %4047 = vmatmul.mubr.msk.f32.gmra.mrb[70].mxu1 %vm300_vm4, %v5685_v42 }
 0x39e   :  { %4049 = vmatprep.mubr.msk.f32.mxu1 %vm5036_vm0, %v5037_v1 }
 0x3a1   :  { %4050 = vmatmul.mubr.msk.f32.gmra.mrb[72].mxu1 %vm300_vm4, %v5694_v43 }
 0x3a2   :  { %4052 = vmatprep.mubr.msk.f32.mxu1 %vm5036_vm0, %v5037_v1 }
 0x3a5   :  { %4053 = vmatmul.mubr.msk.f32.gmra.mrb[74].mxu1 %vm300_vm4, %v5703_v44 }
 0x3a6   :  { %4055 = vmatprep.mubr.msk.f32.mxu1 %vm5036_vm0, %v5037_v1 }
 0x3a9   :  { %4056 = vmatmul.mubr.msk.f32.gmra.mrb[76].mxu1 %vm300_vm4, %v5712_v45 }
 0x3aa   :  { %4141 = vmatprep.mubr.msk.f32.mxu1 %vm5036_vm0, %v5037_v1 }
 0x418   :  { %v734_v47 = vpop.f32.mrb[26].mxu1 }
 0x419   :  { %v735_v48 = vadd.f32 %v5718_v46, %v734_v47  ;;  %v3899_v49 = vpop.f32.mrb[27].mxu1 }
 0x41b   :  { %v798_v50 = vmax.f32 %v735_v48, 0.0 }
 0x41c   :  { %v739_v51 = vpop.f32.mrb[28].mxu1 }
 0x41d   :  { %811 = vst.msk [vmem:[%s6779_s6] sm:$0xff] %vm120_vm2, %v798_v50  ;;  %v740_v52 = vadd.f32 %v5718_v46, %v739_v51  ;;  %v3902_v53 = vpop.f32.mrb[29].mxu1 }
 0x41f   :  { %v799_v54 = vmax.f32 %v740_v52, 0.0 }
 0x420   :  { %v744_v55 = vpop.f32.mrb[30].mxu1 }
 0x421   :  { %812 = vst.msk [vmem:[%s6779_s6 + $0x8] sm:$0xff] %vm120_vm2, %v799_v54  ;;  %v745_v56 = vadd.f32 %v5718_v46, %v744_v55  ;;  %v3905_v57 = vpop.f32.mrb[31].mxu1 }
 0x423   :  { %v800_v15 = vmax.f32 %v745_v56, 0.0 }
 0x424   :  { %v749_v58 = vpop.f32.mrb[32].mxu1 }
 0x425   :  { %813 = vst.msk [vmem:[%s6779_s6 + $0x10] sm:$0xff] %vm120_vm2, %v800_v15  ;;  %v750_v16 = vadd.f32 %v5718_v46, %v749_v58  ;;  %v3908_v59 = vpop.f32.mrb[33].mxu1 }
 0x427   :  { %v801_v60 = vmax.f32 %v750_v16, 0.0 }
 0x428   :  { %v754_v17 = vpop.f32.mrb[34].mxu1 }
 0x429   :  { %814 = vst.msk [vmem:[%s6779_s6 + $0x18] sm:$0xff] %vm120_vm2, %v801_v60  ;;  %v755_v61 = vadd.f32 %v5718_v46, %v754_v17  ;;  %v3911_v18 = vpop.f32.mrb[35].mxu1 }
 0x42b   :  { %v802_v62 = vmax.f32 %v755_v61, 0.0 }
 0x42c   :  { %v759_v63 = vpop.f32.mrb[36].mxu1 }
 0x42d   :  { %815 = vst.msk [vmem:[%s6779_s6 + $0x20] sm:$0xff] %vm120_vm2, %v802_v62  ;;  %v760_v19 = vadd.f32 %v5718_v46, %v759_v63  ;;  %v3914_v2 = vpop.f32.mrb[37].mxu1 }
 0x42f   :  { %v803_v20 = vmax.f32 %v760_v19, 0.0 }
 0x430   :  { %v764_v14 = vpop.f32.mrb[38].mxu1 }
 0x431   :  { %816 = vst.msk [vmem:[%s6779_s6 + $0x28] sm:$0xff] %vm120_vm2, %v803_v20  ;;  %v765_v3 = vadd.f32 %v5718_v46, %v764_v14  ;;  %v3917_v21 = vpop.f32.mrb[39].mxu1 }
 0x433   :  { %v804_v4 = vmax.f32 %v765_v3, 0.0 }
 0x434   :  { %v769_v22 = vpop.f32.mrb[40].mxu1 }
 0x435   :  { %817 = vst.msk [vmem:[%s6779_s6 + $0x30] sm:$0xff] %vm120_vm2, %v804_v4  ;;  %v770_v6 = vadd.f32 %v5718_v46, %v769_v22  ;;  %v3920_v8 = vpop.f32.mrb[41].mxu1 }
 0x437   :  { %v805_v23 = vmax.f32 %v770_v6, 0.0 }
 0x438   :  { %v774_v9 = vpop.f32.mrb[42].mxu1 }
 0x439   :  { %818 = vst.msk [vmem:[%s6779_s6 + $0x38] sm:$0xff] %vm120_vm2, %v805_v23  ;;  %v775_v24 = vadd.f32 %v5718_v46, %v774_v9  ;;  %v3923_v11 = vpop.f32.mrb[43].mxu1 }
 0x43b   :  { %v806_v12 = vmax.f32 %v775_v24, 0.0 }
 0x43c   :  { %v779_v25 = vpop.f32.mrb[44].mxu1 }
 0x43d   :  { %819 = vst.msk [vmem:[%s6779_s6 + $0x40] sm:$0xff] %vm120_vm2, %v806_v12  ;;  %v780_v30 = vadd.f32 %v5718_v46, %v779_v25  ;;  %v3926_v47 = vpop.f32.mrb[45].mxu1 }
 0x43f   :  { %v807_v48 = vmax.f32 %v780_v30, 0.0  ;;  %v5814_v30 = vld [vmem:[#allocation2 + $0x40] sm:$0x1] }
 0x440   :  { %v784_v49 = vpop.f32.mrb[46].mxu1 }
 0x441   :  { %820 = vst.msk [vmem:[%s6779_s6 + $0x48] sm:$0xff] %vm120_vm2, %v807_v48  ;;  %v785_v50 = vadd.f32 %v5718_v46, %v784_v49  ;;  %v3929_v51 = vpop.f32.mrb[47].mxu1 }
 0x443   :  { %v808_v52 = vmax.f32 %v785_v50, 0.0 }
 0x444   :  { %v789_v53 = vpop.f32.mrb[48].mxu1 }
 0x445   :  { %821 = vst.msk [vmem:[%s6779_s6 + $0x50] sm:$0xff] %vm120_vm2, %v808_v52  ;;  %v790_v54 = vadd.f32 %v5718_v46, %v789_v53  ;;  %v3932_v55 = vpop.f32.mrb[49].mxu1 }
 0x447   :  { %v809_v56 = vmax.f32 %v790_v54, 0.0 }
 0x448   :  { %v794_v57 = vpop.f32.mrb[50].mxu1 }
 0x449   :  { %822 = vst.msk [vmem:[%s6779_s6 + $0x58] sm:$0xff] %vm120_vm2, %v809_v56  ;;  %v795_v15 = vadd.f32 %v5718_v46, %v794_v57  ;;  %v3935_v58 = vpop.f32.mrb[51].mxu1 }
 0x44b   :  { %v810_v16 = vmax.f32 %v795_v15, 0.0 }
 0x44c   :  { %v1130_v59 = vpop.f32.mrb[52].mxu1 }
 0x44d   :  { %824 = vst.msk [vmem:[%s6779_s6 + $0x60] sm:$0xf] %vm823_vm5, %v810_v16  ;;  %v1131_v60 = vadd.f32 %v5379_v29, %v1130_v59  ;;  %v4021_v17 = vpop.f32.mrb[53].mxu1 }
 0x44f   :  { %v1194_v61 = vmax.f32 %v1131_v60, 0.0 }
 0x450   :  { %v1135_v18 = vpop.f32.mrb[54].mxu1 }
 0x451   :  { %v1136_v62 = vadd.f32 %v5379_v29, %v1135_v18  ;;  %v4024_v63 = vpop.f32.mrb[55].mxu1  ;;  %4077 = vmatmul.mubr.msk.f32.vlgmr.msra.gmra.mrb[78].mxu0 %vm120_vm2, %v1194_v61 }
 0x452   :  { %4079 = vmatprep.mubr.msk.f32.mxu0 %vm5036_vm0, %v5037_v1  ;;  %4790 = vmatpush3.bf16.msra.mxu0 %v5134_v5 }
 0x453   :  { %v1195_v19 = vmax.f32 %v1136_v62, 0.0  ;;  %4791 = vmatprep.subr.bf16.mxu0 %v5035_v0 }
 0x454   :  { %v1140_v2 = vpop.f32.mrb[56].mxu1 }
 0x455   :  { %v1141_v20 = vadd.f32 %v5379_v29, %v1140_v2  ;;  %v4027_v14 = vpop.f32.mrb[57].mxu1  ;;  %4080 = vmatmul.mubr.msk.f32.gmra.mrb[80].mxu0 %vm120_vm2, %v1195_v19 }
 0x456   :  { %4082 = vmatprep.mubr.msk.f32.mxu0 %vm5036_vm0, %v5037_v1  ;;  %4793 = vmatpush3.bf16.msra.mxu0 %v5137_v7 }
 0x457   :  { %v1196_v3 = vmax.f32 %v1141_v20, 0.0  ;;  %4794 = vmatprep.subr.bf16.mxu0 %v5035_v0 }
 0x458   :  { %v1145_v21 = vpop.f32.mrb[58].mxu1 }
 0x459   :  { %v1146_v4 = vadd.f32 %v5379_v29, %v1145_v21  ;;  %v4030_v22 = vpop.f32.mrb[59].mxu1  ;;  %4083 = vmatmul.mubr.msk.f32.gmra.mrb[82].mxu0 %vm120_vm2, %v1196_v3 }
 0x45a   :  { %4085 = vmatprep.mubr.msk.f32.mxu0 %vm5036_vm0, %v5037_v1  ;;  %4796 = vmatpush3.bf16.msra.mxu0 %v5141_v10 }
 0x45b   :  { %v1197_v6 = vmax.f32 %v1146_v4, 0.0  ;;  %4797 = vmatprep.subr.bf16.mxu0 %v5035_v0 }
 0x45c   :  { %v1150_v8 = vpop.f32.mrb[60].mxu1 }
 0x45d   :  { %v1151_v23 = vadd.f32 %v5379_v29, %v1150_v8  ;;  %v4033_v9 = vpop.f32.mrb[61].mxu1  ;;  %4086 = vmatmul.mubr.msk.f32.gmra.mrb[84].mxu0 %vm120_vm2, %v1197_v6  ;;  %v3118_v6 = vld [vmem:[%s6773_s0 + $0xd0] sm:$0xff]  ;;  %v3120_v8 = vld [vmem:[%s6773_s0 + $0xe0] sm:$0xff] }
 0x45e   :  { %4088 = vmatprep.mubr.msk.f32.mxu0 %vm5036_vm0, %v5037_v1  ;;  %4799 = vmatpush3.bf16.msra.mxu0 %v5145_v13  ;;  %v3122_v9 = vld [vmem:[%s6773_s0 + $0xf0] sm:$0xff] }
 0x45f   :  { %v1198_v24 = vmax.f32 %v1151_v23, 0.0  ;;  %4196 = vmatprep.subr.mxu0 %v5037_v1  ;;  %v3121_v23 = vld [vmem:[%s6773_s0 + $0xe8] sm:$0xff] }
 0x460   :  { %v1155_v11 = vpop.f32.mrb[62].mxu1 }
 0x461   :  { %v1156_v12 = vadd.f32 %v5379_v29, %v1155_v11  ;;  %v4036_v25 = vpop.f32.mrb[63].mxu1  ;;  %4089 = vmatmul.mubr.msk.f32.gmra.mrb[86].mxu0 %vm120_vm2, %v1198_v24  ;;  %v3123_v24 = vld [vmem:[%s6773_s0 + $0xf8] sm:$0xff]  ;;  %v3124_v11 = vld [vmem:[%s6773_s0 + $0x100] sm:$0xff] }
 0x462   :  { %4091 = vmatprep.mubr.msk.f32.mxu0 %vm5036_vm0, %v5037_v1  ;;  %4197 = vmatpush3.msk.msra.mxu0 %vm160_vm1, %v5814_v30  ;;  %v3127_v25 = vld [vmem:[%s6773_s0 + $0x118] sm:$0xff] }
 0x463   :  { %v1199_v47 = vmax.f32 %v1156_v12, 0.0  ;;  %4818 = vmatprep.subr.bf16.mxu0 %v5035_v0  ;;  %v3126_v12 = vld [vmem:[%s6773_s0 + $0x110] sm:$0xff] }
 0x464   :  { %v1160_v48 = vpop.f32.mrb[64].mxu1 }
 0x465   :  { %v1161_v49 = vadd.f32 %v5379_v29, %v1160_v48  ;;  %v4039_v50 = vpop.f32.mrb[65].mxu1  ;;  %4092 = vmatmul.mubr.msk.f32.gmra.mrb[88].mxu0 %vm120_vm2, %v1199_v47  ;;  %v3128_v47 = vld [vmem:[%s6773_s0 + $0x120] sm:$0xff]  ;;  %v3129_v48 = vld [vmem:[%s6773_s0 + $0x128] sm:$0xff] }
 0x466   :  { %4094 = vmatprep.mubr.msk.f32.mxu0 %vm5036_vm0, %v5037_v1 }
 0x467   :  { %v1200_v51 = vmax.f32 %v1161_v49, 0.0  ;;  %v3130_v49 = vld [vmem:[%s6773_s0 + $0x130] sm:$0xf] }
 0x468   :  { %v1165_v52 = vpop.f32.mrb[66].mxu1 }
 0x469   :  { %v1166_v53 = vadd.f32 %v5379_v29, %v1165_v52  ;;  %v4042_v54 = vpop.f32.mrb[67].mxu1  ;;  %4095 = vmatmul.mubr.msk.f32.gmra.mrb[90].mxu0 %vm120_vm2, %v1200_v51 }
 0x46a   :  { %4097 = vmatprep.mubr.msk.f32.mxu0 %vm5036_vm0, %v5037_v1 }
 0x46b   :  { %v1201_v55 = vmax.f32 %v1166_v53, 0.0 }
 0x46c   :  { %v1170_v56 = vpop.f32.mrb[68].mxu1 }
 0x46d   :  { %v1171_v57 = vadd.f32 %v5379_v29, %v1170_v56  ;;  %v4045_v15 = vpop.f32.mrb[69].mxu1  ;;  %4098 = vmatmul.mubr.msk.f32.gmra.mrb[92].mxu0 %vm120_vm2, %v1201_v55 }
 0x46e   :  { %4100 = vmatprep.mubr.msk.f32.mxu0 %vm5036_vm0, %v5037_v1 }
 0x46f   :  { %v1202_v58 = vmax.f32 %v1171_v57, 0.0 }
 0x470   :  { %v1175_v16 = vpop.f32.mrb[70].mxu1 }
 0x471   :  { %v1176_v59 = vadd.f32 %v5379_v29, %v1175_v16  ;;  %v4048_v60 = vpop.f32.mrb[71].mxu1  ;;  %4101 = vmatmul.mubr.msk.f32.gmra.mrb[94].mxu0 %vm120_vm2, %v1202_v58 }
 0x472   :  { %4103 = vmatprep.mubr.msk.f32.mxu0 %vm5036_vm0, %v5037_v1 }
 0x473   :  { %v1203_v17 = vmax.f32 %v1176_v59, 0.0 }
 0x474   :  { %v1180_v61 = vpop.f32.mrb[72].mxu1 }
 0x475   :  { %v1181_v18 = vadd.f32 %v5379_v29, %v1180_v61  ;;  %v4051_v62 = vpop.f32.mrb[73].mxu1  ;;  %4104 = vmatmul.mubr.msk.f32.gmra.mrb[96].mxu0 %vm120_vm2, %v1203_v17 }
 0x476   :  { %4106 = vmatprep.mubr.msk.f32.mxu0 %vm5036_vm0, %v5037_v1 }
 0x477   :  { %v1204_v63 = vmax.f32 %v1181_v18, 0.0 }
 0x478   :  { %v1185_v19 = vpop.f32.mrb[74].mxu1 }
 0x479   :  { %v1186_v2 = vadd.f32 %v5379_v29, %v1185_v19  ;;  %v4054_v20 = vpop.f32.mrb[75].mxu1  ;;  %4107 = vmatmul.mubr.msk.f32.gmra.mrb[98].mxu0 %vm120_vm2, %v1204_v63 }
 0x47a   :  { %4109 = vmatprep.mubr.msk.f32.mxu0 %vm5036_vm0, %v5037_v1 }
 0x47b   :  { %v1205_v14 = vmax.f32 %v1186_v2, 0.0 }
 0x47c   :  { %v1190_v3 = vpop.f32.mrb[76].mxu1 }
 0x47d   :  { %v1191_v21 = vadd.f32 %v5379_v29, %v1190_v3  ;;  %v4057_v4 = vpop.f32.mrb[77].mxu1  ;;  %4110 = vmatmul.mubr.msk.f32.gmra.mrb[100].mxu0 %vm120_vm2, %v1205_v14  ;;  %v3119_v29 = vld [vmem:[%s6773_s0 + $0xd8] sm:$0xff] }
 0x47e   :  { %4112 = vmatprep.mubr.msk.f32.mxu0 %vm5036_vm0, %v5037_v1 }
 0x47f   :  { %v1206_v22 = vmax.f32 %v1191_v21, 0.0 }
 0x481   :  { %4113 = vmatmul.mubr.msk.f32.gmra.mrb[102].mxu0 %vm120_vm2, %v1206_v22 }
 0x482   :  { %4198 = vmatprep.mubr.msk.f32.mxu0 %vm5036_vm0, %v5037_v1 }
 0x485   :  { %4199 = vmatmul.mubr.msk.f32.vlgmr.msra.gmra.mrb[104].mxu0 %vm120_vm2, %v3118_v6 }
 0x486   :  { %4201 = vmatprep.mubr.msk.f32.mxu0 %vm5036_vm0, %v5037_v1  ;;  %4820 = vmatpush3.bf16.msra.mxu0 %v5233_v31 }
 0x487   :  { %4821 = vmatprep.subr.bf16.mxu0 %v5035_v0 }
 0x489   :  { %4202 = vmatmul.mubr.msk.f32.gmra.mrb[106].mxu0 %vm120_vm2, %v3119_v29 }
 0x48a   :  { %4204 = vmatprep.mubr.msk.f32.mxu0 %vm5036_vm0, %v5037_v1  ;;  %4823 = vmatpush3.bf16.msra.mxu0 %v5236_v33 }
 0x48b   :  { %4824 = vmatprep.subr.bf16.mxu0 %v5035_v0 }
 0x48d   :  { %4205 = vmatmul.mubr.msk.f32.gmra.mrb[108].mxu0 %vm120_vm2, %v3120_v8 }
 0x48e   :  { %4207 = vmatprep.mubr.msk.f32.mxu0 %vm5036_vm0, %v5037_v1  ;;  %4826 = vmatpush3.bf16.msra.mxu0 %v5240_v36 }
 0x48f   :  { %4827 = vmatprep.subr.bf16.mxu0 %v5035_v0 }
 0x491   :  { %4208 = vmatmul.mubr.msk.f32.gmra.mrb[110].mxu0 %vm120_vm2, %v3121_v23 }
 0x492   :  { %4210 = vmatprep.mubr.msk.f32.mxu0 %vm5036_vm0, %v5037_v1  ;;  %4829 = vmatpush3.bf16.msra.mxu0 %v5244_v39 }
 0x493   :  { %4318 = vmatprep.subr.mxu0 %v5037_v1 }
 0x495   :  { %4211 = vmatmul.mubr.msk.f32.gmra.mrb[112].mxu0 %vm120_vm2, %v3122_v9 }
 0x496   :  { %4213 = vmatprep.mubr.msk.f32.mxu0 %vm5036_vm0, %v5037_v1  ;;  %4319 = vmatpush3.msk.msra.mxu0 %vm160_vm1, %v5374_v28  ;;  %v3125_v28 = vld [vmem:[%s6773_s0 + $0x108] sm:$0xff] }
 0x497   :  { %4848 = vmatprep.subr.bf16.mxu0 %v5035_v0 }
 0x499   :  { %4214 = vmatmul.mubr.msk.f32.gmra.mrb[114].mxu0 %vm120_vm2, %v3123_v24 }
 0x49a   :  { %4216 = vmatprep.mubr.msk.f32.mxu0 %vm5036_vm0, %v5037_v1 }
 0x49d   :  { %4217 = vmatmul.mubr.msk.f32.gmra.mrb[116].mxu0 %vm120_vm2, %v3124_v11 }
 0x49e   :  { %4219 = vmatprep.mubr.msk.f32.mxu0 %vm5036_vm0, %v5037_v1 }
 0x4a1   :  { %4220 = vmatmul.mubr.msk.f32.gmra.mrb[118].mxu0 %vm120_vm2, %v3125_v28 }
 0x4a2   :  { %4222 = vmatprep.mubr.msk.f32.mxu0 %vm5036_vm0, %v5037_v1 }
 0x4a5   :  { %4223 = vmatmul.mubr.msk.f32.gmra.mrb[120].mxu0 %vm120_vm2, %v3126_v12 }
 0x4a6   :  { %4225 = vmatprep.mubr.msk.f32.mxu0 %vm5036_vm0, %v5037_v1 }
 0x4a9   :  { %4226 = vmatmul.mubr.msk.f32.gmra.mrb[122].mxu0 %vm120_vm2, %v3127_v25 }
 0x4aa   :  { %4228 = vmatprep.mubr.msk.f32.mxu0 %vm5036_vm0, %v5037_v1 }
 0x4ad   :  { %4229 = vmatmul.mubr.msk.f32.gmra.mrb[124].mxu0 %vm120_vm2, %v3128_v47 }
 0x4ae   :  { %4231 = vmatprep.mubr.msk.f32.mxu0 %vm5036_vm0, %v5037_v1 }
 0x4b1   :  { %4232 = vmatmul.mubr.msk.f32.gmra.mrb[126].mxu0 %vm120_vm2, %v3129_v48 }
 0x4b2   :  { %4234 = vmatprep.mubr.msk.f32.mxu0 %vm5036_vm0, %v5037_v1 }
 0x4b5   :  { %4235 = vmatmul.mubr.msk.f32.gmra.mrb[128].mxu0 %vm120_vm2, %v3130_v49 }
 0x4b6   :  { %4320 = vmatprep.mubr.msk.f32.mxu0 %vm5036_vm0, %v5037_v1 }
 0x524   :  { %v1312_v50 = vpop.f32.mrb[78].mxu0 }
 0x525   :  { %v4078_v51 = vpop.f32.mrb[79].mxu0 }
 0x528   :  { %v1317_v52 = vpop.f32.mrb[80].mxu0 }
 0x529   :  { %v4771_v53 = vpack.c.bf16 %v1317_v52, %v1312_v50  ;;  %v4081_v54 = vpop.f32.mrb[81].mxu0 }
 0x52b   :  { %4772 = vmatpush3.bf16.msra.mxu1 %v4771_v53 }
 0x52c   :  { %v1322_v55 = vpop.f32.mrb[82].mxu0  ;;  %4773 = vmatprep.subr.bf16.mxu1 %v5035_v0 }
 0x52d   :  { %v4084_v56 = vpop.f32.mrb[83].mxu0 }
 0x530   :  { %v1327_v57 = vpop.f32.mrb[84].mxu0 }
 0x531   :  { %v4774_v15 = vpack.c.bf16 %v1327_v57, %v1322_v55  ;;  %v4087_v58 = vpop.f32.mrb[85].mxu0 }
 0x533   :  { %4775 = vmatpush3.bf16.msra.mxu1 %v4774_v15 }
 0x534   :  { %v1332_v16 = vpop.f32.mrb[86].mxu0  ;;  %4776 = vmatprep.subr.bf16.mxu1 %v5035_v0 }
 0x535   :  { %v4090_v59 = vpop.f32.mrb[87].mxu0 }
 0x538   :  { %v1337_v60 = vpop.f32.mrb[88].mxu0 }
 0x539   :  { %v4777_v17 = vpack.c.bf16 %v1337_v60, %v1332_v16  ;;  %v4093_v61 = vpop.f32.mrb[89].mxu0 }
 0x53a   :  { %v6028_v61 = vld [vmem:[%s6774_s1 + $0xe0] sm:$0xff] }
 0x53b   :  { %4778 = vmatpush3.bf16.msra.mxu1 %v4777_v17 }
 0x53c   :  { %v1342_v18 = vpop.f32.mrb[90].mxu0  ;;  %4779 = vmatprep.subr.bf16.mxu1 %v5035_v0 }
 0x53d   :  { %v4096_v62 = vpop.f32.mrb[91].mxu0 }
 0x53e   :  { %v6046_v62 = vld [vmem:[%s6774_s1 + $0xf0] sm:$0xff] }
 0x540   :  { %v1347_v63 = vpop.f32.mrb[92].mxu0 }
 0x541   :  { %v4780_v19 = vpack.c.bf16 %v1347_v63, %v1342_v18  ;;  %v4099_v2 = vpop.f32.mrb[93].mxu0  ;;  %v6037_v18 = vld [vmem:[%s6774_s1 + $0xe8] sm:$0xff]  ;;  %v6055_v63 = vld [vmem:[%s6774_s1 + $0xf8] sm:$0xff] }
 0x542   :  { %v6073_v2 = vld [vmem:[%s6774_s1 + $0x108] sm:$0xff] }
 0x543   :  { %4781 = vmatpush3.bf16.msra.mxu1 %v4780_v19  ;;  %v6064_v19 = vld [vmem:[%s6774_s1 + $0x100] sm:$0xff] }
 0x544   :  { %v1352_v20 = vpop.f32.mrb[94].mxu0  ;;  %4782 = vmatprep.subr.bf16.mxu1 %v5035_v0 }
 0x545   :  { %v4102_v14 = vpop.f32.mrb[95].mxu0 }
 0x546   :  { %v6091_v14 = vld [vmem:[%s6774_s1 + $0x118] sm:$0xff] }
 0x548   :  { %v1357_v3 = vpop.f32.mrb[96].mxu0 }
 0x549   :  { %v4783_v21 = vpack.c.bf16 %v1357_v3, %v1352_v20  ;;  %v4105_v4 = vpop.f32.mrb[97].mxu0  ;;  %v6082_v20 = vld [vmem:[%s6774_s1 + $0x110] sm:$0xff]  ;;  %v6100_v3 = vld [vmem:[%s6774_s1 + $0x120] sm:$0xff] }
 0x54a   :  { %v6118_v4 = vld [vmem:[%s6774_s1 + $0x130] sm:$0xf] }
 0x54b   :  { %4784 = vmatpush3.bf16.msra.mxu1 %v4783_v21  ;;  %v6109_v21 = vld [vmem:[%s6774_s1 + $0x128] sm:$0xff] }
 0x54c   :  { %v1362_v22 = vpop.f32.mrb[98].mxu0  ;;  %4785 = vmatprep.subr.bf16.mxu1 %v5035_v0 }
 0x54d   :  { %v4108_v6 = vpop.f32.mrb[99].mxu0 }
 0x550   :  { %v1367_v29 = vpop.f32.mrb[100].mxu0 }
 0x551   :  { %v4786_v8 = vpack.c.bf16 %v1367_v29, %v1362_v22  ;;  %v4111_v23 = vpop.f32.mrb[101].mxu0 }
 0x553   :  { %4787 = vmatpush3.bf16.msra.mxu1 %v4786_v8 }
 0x554   :  { %v1372_v9 = vpop.f32.mrb[102].mxu0  ;;  %4139 = vmatprep.subr.mxu1 %v5037_v1 }
 0x555   :  { %v4114_v24 = vpop.f32.mrb[103].mxu0 }
 0x557   :  { %4140 = vmatpush3.msk.msra.mxu1 %vm340_vm3, %v1372_v9 }
 0x558   :  { %4142 = vmatmul.mubr.msk.f32.vlgmr.msra.gmra.mrb[78].mxu1 %vm300_vm4, %v5602_v26  ;;  %v1669_v11 = vpop.f32.mrb[104].mxu0  ;;  %4800 = vmatprep.subr.bf16.mxu1 %v5035_v0 }
 0x559   :  { %v4200_v28 = vpop.f32.mrb[105].mxu0  ;;  %4144 = vmatprep.mubr.msk.f32.mxu1 %vm5036_vm0, %v5037_v1 }
 0x55c   :  { %4145 = vmatmul.mubr.msk.f32.gmra.mrb[80].mxu1 %vm300_vm4, %v5613_v27  ;;  %v1674_v12 = vpop.f32.mrb[106].mxu0 }
 0x55d   :  { %v4801_v25 = vpack.c.bf16 %v1674_v12, %v1669_v11  ;;  %v4203_v47 = vpop.f32.mrb[107].mxu0  ;;  %4147 = vmatprep.mubr.msk.f32.mxu1 %vm5036_vm0, %v5037_v1 }
 0x55f   :  { %4802 = vmatpush3.bf16.msra.mxu1 %v4801_v25 }
 0x560   :  { %4148 = vmatmul.mubr.msk.f32.gmra.mrb[82].mxu1 %vm300_vm4, %v5622_v32  ;;  %v1679_v26 = vpop.f32.mrb[108].mxu0  ;;  %4803 = vmatprep.subr.bf16.mxu1 %v5035_v0 }
 0x561   :  { %v4206_v48 = vpop.f32.mrb[109].mxu0  ;;  %4150 = vmatprep.mubr.msk.f32.mxu1 %vm5036_vm0, %v5037_v1 }
 0x564   :  { %4151 = vmatmul.mubr.msk.f32.gmra.mrb[84].mxu1 %vm300_vm4, %v5631_v34  ;;  %v1684_v27 = vpop.f32.mrb[110].mxu0 }
 0x565   :  { %v4804_v49 = vpack.c.bf16 %v1684_v27, %v1679_v26  ;;  %v4209_v50 = vpop.f32.mrb[111].mxu0  ;;  %4153 = vmatprep.mubr.msk.f32.mxu1 %vm5036_vm0, %v5037_v1 }
 0x567   :  { %4805 = vmatpush3.bf16.msra.mxu1 %v4804_v49 }
 0x568   :  { %4154 = vmatmul.mubr.msk.f32.gmra.mrb[86].mxu1 %vm300_vm4, %v5640_v35  ;;  %v1689_v32 = vpop.f32.mrb[112].mxu0  ;;  %4806 = vmatprep.subr.bf16.mxu1 %v5035_v0 }
 0x569   :  { %v4212_v51 = vpop.f32.mrb[113].mxu0  ;;  %4156 = vmatprep.mubr.msk.f32.mxu1 %vm5036_vm0, %v5037_v1 }
 0x56c   :  { %4157 = vmatmul.mubr.msk.f32.gmra.mrb[88].mxu1 %vm300_vm4, %v5649_v37  ;;  %v1694_v34 = vpop.f32.mrb[114].mxu0 }
 0x56d   :  { %v4807_v52 = vpack.c.bf16 %v1694_v34, %v1689_v32  ;;  %v4215_v53 = vpop.f32.mrb[115].mxu0  ;;  %4159 = vmatprep.mubr.msk.f32.mxu1 %vm5036_vm0, %v5037_v1 }
 0x56f   :  { %4808 = vmatpush3.bf16.msra.mxu1 %v4807_v52 }
 0x570   :  { %4160 = vmatmul.mubr.msk.f32.gmra.mrb[90].mxu1 %vm300_vm4, %v5658_v38  ;;  %v1699_v35 = vpop.f32.mrb[116].mxu0  ;;  %4809 = vmatprep.subr.bf16.mxu1 %v5035_v0 }
 0x571   :  { %v4218_v54 = vpop.f32.mrb[117].mxu0  ;;  %4162 = vmatprep.mubr.msk.f32.mxu1 %vm5036_vm0, %v5037_v1 }
 0x574   :  { %4163 = vmatmul.mubr.msk.f32.gmra.mrb[92].mxu1 %vm300_vm4, %v5667_v40  ;;  %v1704_v37 = vpop.f32.mrb[118].mxu0 }
 0x575   :  { %v4810_v55 = vpack.c.bf16 %v1704_v37, %v1699_v35  ;;  %v4221_v56 = vpop.f32.mrb[119].mxu0  ;;  %4165 = vmatprep.mubr.msk.f32.mxu1 %vm5036_vm0, %v5037_v1 }
 0x577   :  { %4811 = vmatpush3.bf16.msra.mxu1 %v4810_v55 }
 0x578   :  { %4166 = vmatmul.mubr.msk.f32.gmra.mrb[94].mxu1 %vm300_vm4, %v5676_v41  ;;  %v1709_v38 = vpop.f32.mrb[120].mxu0  ;;  %4812 = vmatprep.subr.bf16.mxu1 %v5035_v0 }
 0x579   :  { %v4224_v57 = vpop.f32.mrb[121].mxu0  ;;  %4168 = vmatprep.mubr.msk.f32.mxu1 %vm5036_vm0, %v5037_v1 }
 0x57c   :  { %4169 = vmatmul.mubr.msk.f32.gmra.mrb[96].mxu1 %vm300_vm4, %v5685_v42  ;;  %v1714_v40 = vpop.f32.mrb[122].mxu0 }
 0x57d   :  { %v4813_v15 = vpack.c.bf16 %v1714_v40, %v1709_v38  ;;  %v4227_v58 = vpop.f32.mrb[123].mxu0  ;;  %4171 = vmatprep.mubr.msk.f32.mxu1 %vm5036_vm0, %v5037_v1 }
 0x57f   :  { %4814 = vmatpush3.bf16.msra.mxu1 %v4813_v15 }
 0x580   :  { %4172 = vmatmul.mubr.msk.f32.gmra.mrb[98].mxu1 %vm300_vm4, %v5694_v43  ;;  %v1719_v41 = vpop.f32.mrb[124].mxu0  ;;  %4815 = vmatprep.subr.bf16.mxu1 %v5035_v0 }
 0x581   :  { %v4230_v16 = vpop.f32.mrb[125].mxu0  ;;  %4174 = vmatprep.mubr.msk.f32.mxu1 %vm5036_vm0, %v5037_v1 }
 0x584   :  { %4175 = vmatmul.mubr.msk.f32.gmra.mrb[100].mxu1 %vm300_vm4, %v5703_v44  ;;  %v1724_v42 = vpop.f32.mrb[126].mxu0  ;;  %v6008_v44 = vld [vmem:[%s6774_s1 + $0xd0] sm:$0xff] }
 0x585   :  { %v4816_v59 = vpack.c.bf16 %v1724_v42, %v1719_v41  ;;  %v4233_v60 = vpop.f32.mrb[127].mxu0  ;;  %4177 = vmatprep.mubr.msk.f32.mxu1 %vm5036_vm0, %v5037_v1 }
 0x587   :  { %4817 = vmatpush3.bf16.msra.mxu1 %v4816_v59 }
 0x588   :  { %4178 = vmatmul.mubr.msk.f32.gmra.mrb[102].mxu1 %vm300_vm4, %v5712_v45  ;;  %v1729_v43 = vpop.f32.mrb[128].mxu0  ;;  %4261 = vmatprep.subr.mxu1 %v5037_v1  ;;  %v6019_v45 = vld [vmem:[%s6774_s1 + $0xd8] sm:$0xff] }
 0x589   :  { %v4236_v17 = vpop.f32.mrb[129].mxu0  ;;  %4263 = vmatprep.mubr.msk.f32.mxu1 %vm5036_vm0, %v5037_v1 }
 0x58b   :  { %4262 = vmatpush3.msk.msra.mxu1 %vm340_vm3, %v1729_v43 }
 0x58c   :  { %4264 = vmatmul.mubr.msk.f32.vlgmr.msra.gmra.mrb[104].mxu1 %vm300_vm4, %v6008_v44  ;;  %4830 = vmatprep.subr.bf16.mxu1 %v5035_v0 }
 0x58d   :  { %4266 = vmatprep.mubr.msk.f32.mxu1 %vm5036_vm0, %v5037_v1 }
 0x590   :  { %4267 = vmatmul.mubr.msk.f32.gmra.mrb[106].mxu1 %vm300_vm4, %v6019_v45 }
 0x591   :  { %4269 = vmatprep.mubr.msk.f32.mxu1 %vm5036_vm0, %v5037_v1 }
 0x594   :  { %4270 = vmatmul.mubr.msk.f32.gmra.mrb[108].mxu1 %vm300_vm4, %v6028_v61 }
 0x595   :  { %4272 = vmatprep.mubr.msk.f32.mxu1 %vm5036_vm0, %v5037_v1 }
 0x598   :  { %4273 = vmatmul.mubr.msk.f32.gmra.mrb[110].mxu1 %vm300_vm4, %v6037_v18 }
 0x599   :  { %4275 = vmatprep.mubr.msk.f32.mxu1 %vm5036_vm0, %v5037_v1 }
 0x59c   :  { %4276 = vmatmul.mubr.msk.f32.gmra.mrb[112].mxu1 %vm300_vm4, %v6046_v62 }
 0x59d   :  { %4278 = vmatprep.mubr.msk.f32.mxu1 %vm5036_vm0, %v5037_v1 }
 0x5a0   :  { %4279 = vmatmul.mubr.msk.f32.gmra.mrb[114].mxu1 %vm300_vm4, %v6055_v63 }
 0x5a1   :  { %4281 = vmatprep.mubr.msk.f32.mxu1 %vm5036_vm0, %v5037_v1 }
 0x5a4   :  { %4282 = vmatmul.mubr.msk.f32.gmra.mrb[116].mxu1 %vm300_vm4, %v6064_v19 }
 0x5a5   :  { %4284 = vmatprep.mubr.msk.f32.mxu1 %vm5036_vm0, %v5037_v1 }
 0x5a8   :  { %4285 = vmatmul.mubr.msk.f32.gmra.mrb[118].mxu1 %vm300_vm4, %v6073_v2 }
 0x5a9   :  { %4287 = vmatprep.mubr.msk.f32.mxu1 %vm5036_vm0, %v5037_v1 }
 0x5ac   :  { %4288 = vmatmul.mubr.msk.f32.gmra.mrb[120].mxu1 %vm300_vm4, %v6082_v20 }
 0x5ad   :  { %4290 = vmatprep.mubr.msk.f32.mxu1 %vm5036_vm0, %v5037_v1 }
 0x5b0   :  { %4291 = vmatmul.mubr.msk.f32.gmra.mrb[122].mxu1 %vm300_vm4, %v6091_v14 }
 0x5b1   :  { %4293 = vmatprep.mubr.msk.f32.mxu1 %vm5036_vm0, %v5037_v1 }
 0x5b4   :  { %4294 = vmatmul.mubr.msk.f32.gmra.mrb[124].mxu1 %vm300_vm4, %v6100_v3 }
 0x5b5   :  { %4296 = vmatprep.mubr.msk.f32.mxu1 %vm5036_vm0, %v5037_v1 }
 0x5b8   :  { %4297 = vmatmul.mubr.msk.f32.gmra.mrb[126].mxu1 %vm300_vm4, %v6109_v21 }
 0x5b9   :  { %4299 = vmatprep.mubr.msk.f32.mxu1 %vm5036_vm0, %v5037_v1 }
 0x5bc   :  { %4300 = vmatmul.mubr.msk.f32.gmra.mrb[128].mxu1 %vm300_vm4, %v6118_v4 }
 0x5bd   :  { %4385 = vmatprep.mubr.msk.f32.mxu1 %vm5036_vm0, %v5037_v1 }
 0x62b   :  { %v1445_v22 = vpop.f32.mrb[78].mxu1 }
 0x62c   :  { %v1446_v6 = vadd.f32 %v5718_v46, %v1445_v22  ;;  %v4143_v29 = vpop.f32.mrb[79].mxu1 }
 0x62e   :  { %v1509_v8 = vmax.f32 %v1446_v6, 0.0 }
 0x62f   :  { %v1450_v23 = vpop.f32.mrb[80].mxu1 }
 0x630   :  { %3105 = vst.msk [vmem:[%s6779_s6 + $0x68] sm:$0xff] %vm120_vm2, %v1509_v8  ;;  %v1451_v9 = vadd.f32 %v5718_v46, %v1450_v23  ;;  %v4146_v24 = vpop.f32.mrb[81].mxu1 }
 0x632   :  { %v1510_v11 = vmax.f32 %v1451_v9, 0.0 }
 0x633   :  { %v1455_v28 = vpop.f32.mrb[82].mxu1 }
 0x634   :  { %3106 = vst.msk [vmem:[%s6779_s6 + $0x70] sm:$0xff] %vm120_vm2, %v1510_v11  ;;  %v1456_v12 = vadd.f32 %v5718_v46, %v1455_v28  ;;  %v4149_v25 = vpop.f32.mrb[83].mxu1 }
 0x636   :  { %v1511_v47 = vmax.f32 %v1456_v12, 0.0 }
 0x637   :  { %v1460_v26 = vpop.f32.mrb[84].mxu1 }
 0x638   :  { %3107 = vst.msk [vmem:[%s6779_s6 + $0x78] sm:$0xff] %vm120_vm2, %v1511_v47  ;;  %v1461_v48 = vadd.f32 %v5718_v46, %v1460_v26  ;;  %v4152_v27 = vpop.f32.mrb[85].mxu1 }
 0x639   :  { %v6189_v27 = vld [vmem:[#allocation4] ss:$0 sm:$0xff] }
 0x63a   :  { %v1512_v49 = vmax.f32 %v1461_v48, 0.0 }
 0x63b   :  { %v1465_v50 = vpop.f32.mrb[86].mxu1 }
 0x63c   :  { %3108 = vst.msk [vmem:[%s6779_s6 + $0x80] sm:$0xff] %vm120_vm2, %v1512_v49  ;;  %v1466_v32 = vadd.f32 %v5718_v46, %v1465_v50  ;;  %v4155_v51 = vpop.f32.mrb[87].mxu1 }
 0x63e   :  { %v1513_v34 = vmax.f32 %v1466_v32, 0.0 }
 0x63f   :  { %v1470_v52 = vpop.f32.mrb[88].mxu1 }
 0x640   :  { %3109 = vst.msk [vmem:[%s6779_s6 + $0x88] sm:$0xff] %vm120_vm2, %v1513_v34  ;;  %v1471_v53 = vadd.f32 %v5718_v46, %v1470_v52  ;;  %v4158_v35 = vpop.f32.mrb[89].mxu1 }
 0x642   :  { %v1514_v54 = vmax.f32 %v1471_v53, 0.0 }
 0x643   :  { %v1475_v37 = vpop.f32.mrb[90].mxu1 }
 0x644   :  { %3110 = vst.msk [vmem:[%s6779_s6 + $0x90] sm:$0xff] %vm120_vm2, %v1514_v54  ;;  %v1476_v55 = vadd.f32 %v5718_v46, %v1475_v37  ;;  %v4161_v56 = vpop.f32.mrb[91].mxu1 }
 0x646   :  { %v1515_v38 = vmax.f32 %v1476_v55, 0.0 }
 0x647   :  { %v1480_v57 = vpop.f32.mrb[92].mxu1 }
 0x648   :  { %3111 = vst.msk [vmem:[%s6779_s6 + $0x98] sm:$0xff] %vm120_vm2, %v1515_v38  ;;  %v1481_v40 = vadd.f32 %v5718_v46, %v1480_v57  ;;  %v4164_v15 = vpop.f32.mrb[93].mxu1 }
 0x64a   :  { %v1516_v58 = vmax.f32 %v1481_v40, 0.0 }
 0x64b   :  { %v1485_v41 = vpop.f32.mrb[94].mxu1 }
 0x64c   :  { %3112 = vst.msk [vmem:[%s6779_s6 + $0xa0] sm:$0xff] %vm120_vm2, %v1516_v58  ;;  %v1486_v16 = vadd.f32 %v5718_v46, %v1485_v41  ;;  %v4167_v42 = vpop.f32.mrb[95].mxu1 }
 0x64e   :  { %v1517_v59 = vmax.f32 %v1486_v16, 0.0 }
 0x64f   :  { %v1490_v60 = vpop.f32.mrb[96].mxu1 }
 0x650   :  { %3113 = vst.msk [vmem:[%s6779_s6 + $0xa8] sm:$0xff] %vm120_vm2, %v1517_v59  ;;  %v1491_v43 = vadd.f32 %v5718_v46, %v1490_v60  ;;  %v4170_v17 = vpop.f32.mrb[97].mxu1 }
 0x652   :  { %v1518_v22 = vmax.f32 %v1491_v43, 0.0 }
 0x653   :  { %v1495_v6 = vpop.f32.mrb[98].mxu1 }
 0x654   :  { %3114 = vst.msk [vmem:[%s6779_s6 + $0xb0] sm:$0xff] %vm120_vm2, %v1518_v22  ;;  %v1496_v29 = vadd.f32 %v5718_v46, %v1495_v6  ;;  %v4173_v8 = vpop.f32.mrb[99].mxu1 }
 0x656   :  { %v1519_v23 = vmax.f32 %v1496_v29, 0.0 }
 0x657   :  { %v1500_v9 = vpop.f32.mrb[100].mxu1 }
 0x658   :  { %3115 = vst.msk [vmem:[%s6779_s6 + $0xb8] sm:$0xff] %vm120_vm2, %v1519_v23  ;;  %v1501_v24 = vadd.f32 %v5718_v46, %v1500_v9  ;;  %v4176_v11 = vpop.f32.mrb[101].mxu1 }
 0x65a   :  { %v1520_v28 = vmax.f32 %v1501_v24, 0.0 }
 0x65b   :  { %v1505_v12 = vpop.f32.mrb[102].mxu1 }
 0x65c   :  { %3116 = vst.msk [vmem:[%s6779_s6 + $0xc0] sm:$0xff] %vm120_vm2, %v1520_v28  ;;  %v1506_v25 = vadd.f32 %v5718_v46, %v1505_v12  ;;  %v4179_v47 = vpop.f32.mrb[103].mxu1 }
 0x65e   :  { %v1521_v26 = vmax.f32 %v1506_v25, 0.0 }
 0x65f   :  { %v1841_v48 = vpop.f32.mrb[104].mxu1 }
 0x660   :  { %3117 = vst.msk [vmem:[%s6779_s6 + $0xc8] sm:$0xf] %vm823_vm5, %v1521_v26  ;;  %v1842_v49 = vadd.f32 %v6189_v27, %v1841_v48  ;;  %v4265_v50 = vpop.f32.mrb[105].mxu1 }
 0x662   :  { %v1905_v32 = vmax.f32 %v1842_v49, 0.0 }
 0x663   :  { %v1846_v51 = vpop.f32.mrb[106].mxu1 }
 0x664   :  { %v1847_v34 = vadd.f32 %v6189_v27, %v1846_v51  ;;  %v4268_v52 = vpop.f32.mrb[107].mxu1  ;;  %4321 = vmatmul.mubr.msk.f32.vlgmr.msra.gmra.mrb[130].mxu0 %vm120_vm2, %v1905_v32 }
 0x665   :  { %4323 = vmatprep.mubr.msk.f32.mxu0 %vm5036_vm0, %v5037_v1  ;;  %4850 = vmatpush3.bf16.msra.mxu0 %v5134_v5 }
 0x666   :  { %v1906_v46 = vmax.f32 %v1847_v34, 0.0  ;;  %4851 = vmatprep.subr.bf16.mxu0 %v5035_v0 }
 0x667   :  { %v1851_v53 = vpop.f32.mrb[108].mxu1 }
 0x668   :  { %v1852_v35 = vadd.f32 %v6189_v27, %v1851_v53  ;;  %v4271_v54 = vpop.f32.mrb[109].mxu1  ;;  %4324 = vmatmul.mubr.msk.f32.gmra.mrb[132].mxu0 %vm120_vm2, %v1906_v46  ;;  %v3213_v53 = vld [vmem:[%s6773_s0 + $0x138] sm:$0xff] }
 0x669   :  { %4326 = vmatprep.mubr.msk.f32.mxu0 %vm5036_vm0, %v5037_v1  ;;  %4853 = vmatpush3.bf16.msra.mxu0 %v5137_v7  ;;  %v3215_v54 = vld [vmem:[%s6773_s0 + $0x148] sm:$0xff] }
 0x66a   :  { %v1907_v37 = vmax.f32 %v1852_v35, 0.0  ;;  %4854 = vmatprep.subr.bf16.mxu0 %v5035_v0  ;;  %v3214_v35 = vld [vmem:[%s6773_s0 + $0x140] sm:$0xff] }
 0x66b   :  { %v1856_v55 = vpop.f32.mrb[110].mxu1 }
 0x66c   :  { %v1857_v5 = vadd.f32 %v6189_v27, %v1856_v55  ;;  %v4274_v56 = vpop.f32.mrb[111].mxu1  ;;  %4327 = vmatmul.mubr.msk.f32.gmra.mrb[134].mxu0 %vm120_vm2, %v1907_v37  ;;  %v4933_v37 = vld [vmem:[#allocation6 + $0x40] sm:$0x1]  ;;  %v3220_v55 = vld [vmem:[%s6773_s0 + $0x170] sm:$0xff] }
 0x66d   :  { %4329 = vmatprep.mubr.msk.f32.mxu0 %vm5036_vm0, %v5037_v1  ;;  %4856 = vmatpush3.bf16.msra.mxu0 %v5141_v10  ;;  %v3222_v56 = vld [vmem:[%s6773_s0 + $0x180] sm:$0xff] }
 0x66e   :  { %v1908_v38 = vmax.f32 %v1857_v5, 0.0  ;;  %4857 = vmatprep.subr.bf16.mxu0 %v5035_v0  ;;  %v3221_v5 = vld [vmem:[%s6773_s0 + $0x178] sm:$0xff] }
 0x66f   :  { %v1861_v57 = vpop.f32.mrb[112].mxu1 }
 0x670   :  { %v1862_v7 = vadd.f32 %v6189_v27, %v1861_v57  ;;  %v4277_v40 = vpop.f32.mrb[113].mxu1  ;;  %4330 = vmatmul.mubr.msk.f32.gmra.mrb[136].mxu0 %vm120_vm2, %v1908_v38  ;;  %v3223_v38 = vld [vmem:[%s6773_s0 + $0x188] sm:$0xff]  ;;  %v3224_v57 = vld [vmem:[%s6773_s0 + $0x190] sm:$0xff] }
 0x671   :  { %4332 = vmatprep.mubr.msk.f32.mxu0 %vm5036_vm0, %v5037_v1  ;;  %4859 = vmatpush3.bf16.msra.mxu0 %v5145_v13 }
 0x672   :  { %v1909_v15 = vmax.f32 %v1862_v7, 0.0  ;;  %4440 = vmatprep.subr.mxu0 %v5037_v1  ;;  %v3225_v7 = vld [vmem:[%s6773_s0 + $0x198] sm:$0xf] }
 0x673   :  { %v1866_v58 = vpop.f32.mrb[114].mxu1 }
 0x674   :  { %v1867_v10 = vadd.f32 %v6189_v27, %v1866_v58  ;;  %v4280_v41 = vpop.f32.mrb[115].mxu1  ;;  %4333 = vmatmul.mubr.msk.f32.gmra.mrb[138].mxu0 %vm120_vm2, %v1909_v15 }
 0x675   :  { %4335 = vmatprep.mubr.msk.f32.mxu0 %vm5036_vm0, %v5037_v1  ;;  %4441 = vmatpush3.msk.msra.mxu0 %vm160_vm1, %v5814_v30 }
 0x676   :  { %v1910_v16 = vmax.f32 %v1867_v10, 0.0  ;;  %4878 = vmatprep.subr.bf16.mxu0 %v5035_v0 }
 0x677   :  { %v1871_v42 = vpop.f32.mrb[116].mxu1 }
 0x678   :  { %v1872_v13 = vadd.f32 %v6189_v27, %v1871_v42  ;;  %v4283_v59 = vpop.f32.mrb[117].mxu1  ;;  %4336 = vmatmul.mubr.msk.f32.gmra.mrb[140].mxu0 %vm120_vm2, %v1910_v16 }
 0x679   :  { %4338 = vmatprep.mubr.msk.f32.mxu0 %vm5036_vm0, %v5037_v1 }
 0x67a   :  { %v1911_v60 = vmax.f32 %v1872_v13, 0.0 }
 0x67b   :  { %v1876_v43 = vpop.f32.mrb[118].mxu1 }
 0x67c   :  { %v1877_v17 = vadd.f32 %v6189_v27, %v1876_v43  ;;  %v4286_v22 = vpop.f32.mrb[119].mxu1  ;;  %4339 = vmatmul.mubr.msk.f32.gmra.mrb[142].mxu0 %vm120_vm2, %v1911_v60 }
 0x67d   :  { %4341 = vmatprep.mubr.msk.f32.mxu0 %vm5036_vm0, %v5037_v1 }
 0x67e   :  { %v1912_v30 = vmax.f32 %v1877_v17, 0.0 }
 0x67f   :  { %v1881_v6 = vpop.f32.mrb[120].mxu1 }
 0x680   :  { %v1882_v29 = vadd.f32 %v6189_v27, %v1881_v6  ;;  %v4289_v8 = vpop.f32.mrb[121].mxu1  ;;  %4342 = vmatmul.mubr.msk.f32.gmra.mrb[144].mxu0 %vm120_vm2, %v1912_v30 }
 0x681   :  { %4344 = vmatprep.mubr.msk.f32.mxu0 %vm5036_vm0, %v5037_v1 }
 0x682   :  { %v1913_v23 = vmax.f32 %v1882_v29, 0.0 }
 0x683   :  { %v1886_v9 = vpop.f32.mrb[122].mxu1 }
 0x684   :  { %v1887_v24 = vadd.f32 %v6189_v27, %v1886_v9  ;;  %v4292_v11 = vpop.f32.mrb[123].mxu1  ;;  %4345 = vmatmul.mubr.msk.f32.gmra.mrb[146].mxu0 %vm120_vm2, %v1913_v23 }
 0x685   :  { %4347 = vmatprep.mubr.msk.f32.mxu0 %vm5036_vm0, %v5037_v1 }
 0x686   :  { %v1914_v28 = vmax.f32 %v1887_v24, 0.0 }
 0x687   :  { %v1891_v12 = vpop.f32.mrb[124].mxu1 }
 0x688   :  { %v1892_v25 = vadd.f32 %v6189_v27, %v1891_v12  ;;  %v4295_v47 = vpop.f32.mrb[125].mxu1  ;;  %4348 = vmatmul.mubr.msk.f32.gmra.mrb[148].mxu0 %vm120_vm2, %v1914_v28 }
 0x689   :  { %4350 = vmatprep.mubr.msk.f32.mxu0 %vm5036_vm0, %v5037_v1 }
 0x68a   :  { %v1915_v26 = vmax.f32 %v1892_v25, 0.0 }
 0x68b   :  { %v1896_v48 = vpop.f32.mrb[126].mxu1 }
 0x68c   :  { %v1897_v49 = vadd.f32 %v6189_v27, %v1896_v48  ;;  %v4298_v50 = vpop.f32.mrb[127].mxu1  ;;  %4351 = vmatmul.mubr.msk.f32.gmra.mrb[150].mxu0 %vm120_vm2, %v1915_v26 }
 0x68d   :  { %4353 = vmatprep.mubr.msk.f32.mxu0 %vm5036_vm0, %v5037_v1 }
 0x68e   :  { %v1916_v32 = vmax.f32 %v1897_v49, 0.0 }
 0x68f   :  { %v1901_v51 = vpop.f32.mrb[128].mxu1 }
 0x690   :  { %v1902_v34 = vadd.f32 %v6189_v27, %v1901_v51  ;;  %v4301_v52 = vpop.f32.mrb[129].mxu1  ;;  %4354 = vmatmul.mubr.msk.f32.gmra.mrb[152].mxu0 %vm120_vm2, %v1916_v32 }
 0x691   :  { %4356 = vmatprep.mubr.msk.f32.mxu0 %vm5036_vm0, %v5037_v1 }
 0x692   :  { %v1917_v46 = vmax.f32 %v1902_v34, 0.0 }
 0x694   :  { %4357 = vmatmul.mubr.msk.f32.gmra.mrb[154].mxu0 %vm120_vm2, %v1917_v46 }
 0x695   :  { %4442 = vmatprep.mubr.msk.f32.mxu0 %vm5036_vm0, %v5037_v1 }
 0x698   :  { %4443 = vmatmul.mubr.msk.f32.vlgmr.msra.gmra.mrb[156].mxu0 %vm120_vm2, %v3213_v53 }
 0x699   :  { %4445 = vmatprep.mubr.msk.f32.mxu0 %vm5036_vm0, %v5037_v1  ;;  %4880 = vmatpush3.bf16.msra.mxu0 %v5233_v31  ;;  %v3216_v31 = vld [vmem:[%s6773_s0 + $0x150] sm:$0xff] }
 0x69a   :  { %4881 = vmatprep.subr.bf16.mxu0 %v5035_v0 }
 0x69c   :  { %4446 = vmatmul.mubr.msk.f32.gmra.mrb[158].mxu0 %vm120_vm2, %v3214_v35 }
 0x69d   :  { %4448 = vmatprep.mubr.msk.f32.mxu0 %vm5036_vm0, %v5037_v1  ;;  %4883 = vmatpush3.bf16.msra.mxu0 %v5236_v33  ;;  %v3217_v33 = vld [vmem:[%s6773_s0 + $0x158] sm:$0xff] }
 0x69e   :  { %4884 = vmatprep.subr.bf16.mxu0 %v5035_v0 }
 0x6a0   :  { %4449 = vmatmul.mubr.msk.f32.gmra.mrb[160].mxu0 %vm120_vm2, %v3215_v54 }
 0x6a1   :  { %4451 = vmatprep.mubr.msk.f32.mxu0 %vm5036_vm0, %v5037_v1  ;;  %4886 = vmatpush3.bf16.msra.mxu0 %v5240_v36  ;;  %v3218_v36 = vld [vmem:[%s6773_s0 + $0x160] sm:$0xff] }
 0x6a2   :  { %4887 = vmatprep.subr.bf16.mxu0 %v5035_v0 }
 0x6a4   :  { %4452 = vmatmul.mubr.msk.f32.gmra.mrb[162].mxu0 %vm120_vm2, %v3216_v31 }
 0x6a5   :  { %4454 = vmatprep.mubr.msk.f32.mxu0 %vm5036_vm0, %v5037_v1  ;;  %4889 = vmatpush3.bf16.msra.mxu0 %v5244_v39  ;;  %v3219_v39 = vld [vmem:[%s6773_s0 + $0x168] sm:$0xff] }
 0x6a6   :  { %4562 = vmatprep.subr.mxu0 %v5037_v1 }
 0x6a8   :  { %4455 = vmatmul.mubr.msk.f32.gmra.mrb[164].mxu0 %vm120_vm2, %v3217_v33 }
 0x6a9   :  { %4457 = vmatprep.mubr.msk.f32.mxu0 %vm5036_vm0, %v5037_v1  ;;  %4563 = vmatpush3.msk.msra.mxu0 %vm160_vm1, %v4933_v37 }
 0x6aa   :  { %4890 = vmatprep.subr.bf16.mxu0 %v5035_v0 }
 0x6ac   :  { %4458 = vmatmul.mubr.msk.f32.gmra.mrb[166].mxu0 %vm120_vm2, %v3218_v36 }
 0x6ad   :  { %4460 = vmatprep.mubr.msk.f32.mxu0 %vm5036_vm0, %v5037_v1 }
 0x6b0   :  { %4461 = vmatmul.mubr.msk.f32.gmra.mrb[168].mxu0 %vm120_vm2, %v3219_v39 }
 0x6b1   :  { %4463 = vmatprep.mubr.msk.f32.mxu0 %vm5036_vm0, %v5037_v1 }
 0x6b4   :  { %4464 = vmatmul.mubr.msk.f32.gmra.mrb[170].mxu0 %vm120_vm2, %v3220_v55 }
 0x6b5   :  { %4466 = vmatprep.mubr.msk.f32.mxu0 %vm5036_vm0, %v5037_v1 }
 0x6b8   :  { %4467 = vmatmul.mubr.msk.f32.gmra.mrb[172].mxu0 %vm120_vm2, %v3221_v5 }
 0x6b9   :  { %4469 = vmatprep.mubr.msk.f32.mxu0 %vm5036_vm0, %v5037_v1 }
 0x6bc   :  { %4470 = vmatmul.mubr.msk.f32.gmra.mrb[174].mxu0 %vm120_vm2, %v3222_v56 }
 0x6bd   :  { %4472 = vmatprep.mubr.msk.f32.mxu0 %vm5036_vm0, %v5037_v1 }
 0x6c0   :  { %4473 = vmatmul.mubr.msk.f32.gmra.mrb[176].mxu0 %vm120_vm2, %v3223_v38 }
 0x6c1   :  { %4475 = vmatprep.mubr.msk.f32.mxu0 %vm5036_vm0, %v5037_v1 }
 0x6c4   :  { %4476 = vmatmul.mubr.msk.f32.gmra.mrb[178].mxu0 %vm120_vm2, %v3224_v57 }
 0x6c5   :  { %4478 = vmatprep.mubr.msk.f32.mxu0 %vm5036_vm0, %v5037_v1 }
 0x6c8   :  { %4479 = vmatmul.mubr.msk.f32.gmra.mrb[180].mxu0 %vm120_vm2, %v3225_v7 }
 0x6c9   :  { %4564 = vmatprep.mubr.msk.f32.mxu0 %vm5036_vm0, %v5037_v1 }
 0x737   :  { %v2023_v40 = vpop.f32.mrb[130].mxu0 }
 0x738   :  { %v4322_v15 = vpop.f32.mrb[131].mxu0 }
 0x73b   :  { %v2028_v58 = vpop.f32.mrb[132].mxu0 }
 0x73c   :  { %v4831_v10 = vpack.c.bf16 %v2028_v58, %v2023_v40  ;;  %v4325_v41 = vpop.f32.mrb[133].mxu0 }
 0x73e   :  { %4832 = vmatpush3.bf16.msra.mxu1 %v4831_v10 }
 0x73f   :  { %v2033_v16 = vpop.f32.mrb[134].mxu0  ;;  %4833 = vmatprep.subr.bf16.mxu1 %v5035_v0 }
 0x740   :  { %v4328_v42 = vpop.f32.mrb[135].mxu0 }
 0x741   :  { %v6440_v42 = vld [vmem:[%s6774_s1 + $0x150] sm:$0xff] }
 0x743   :  { %v2038_v13 = vpop.f32.mrb[136].mxu0 }
 0x744   :  { %v4834_v59 = vpack.c.bf16 %v2038_v13, %v2033_v16  ;;  %v4331_v60 = vpop.f32.mrb[137].mxu0  ;;  %v6431_v16 = vld [vmem:[%s6774_s1 + $0x148] sm:$0xff]  ;;  %v6449_v13 = vld [vmem:[%s6774_s1 + $0x158] sm:$0xff] }
 0x745   :  { %v6467_v60 = vld [vmem:[%s6774_s1 + $0x168] sm:$0xff] }
 0x746   :  { %4835 = vmatpush3.bf16.msra.mxu1 %v4834_v59  ;;  %v6458_v59 = vld [vmem:[%s6774_s1 + $0x160] sm:$0xff] }
 0x747   :  { %v2043_v43 = vpop.f32.mrb[138].mxu0  ;;  %4836 = vmatprep.subr.bf16.mxu1 %v5035_v0 }
 0x748   :  { %v4334_v17 = vpop.f32.mrb[139].mxu0 }
 0x749   :  { %v6485_v17 = vld [vmem:[%s6774_s1 + $0x178] sm:$0xff] }
 0x74b   :  { %v2048_v22 = vpop.f32.mrb[140].mxu0 }
 0x74c   :  { %v4837_v30 = vpack.c.bf16 %v2048_v22, %v2043_v43  ;;  %v4337_v6 = vpop.f32.mrb[141].mxu0  ;;  %v6476_v43 = vld [vmem:[%s6774_s1 + $0x170] sm:$0xff]  ;;  %v6494_v22 = vld [vmem:[%s6774_s1 + $0x180] sm:$0xff] }
 0x74d   :  { %v6512_v6 = vld [vmem:[%s6774_s1 + $0x190] sm:$0xff] }
 0x74e   :  { %4838 = vmatpush3.bf16.msra.mxu1 %v4837_v30  ;;  %v6503_v30 = vld [vmem:[%s6774_s1 + $0x188] sm:$0xff] }
 0x74f   :  { %v2053_v29 = vpop.f32.mrb[142].mxu0  ;;  %4839 = vmatprep.subr.bf16.mxu1 %v5035_v0 }
 0x750   :  { %v4340_v8 = vpop.f32.mrb[143].mxu0 }
 0x753   :  { %v2058_v23 = vpop.f32.mrb[144].mxu0 }
 0x754   :  { %v4840_v9 = vpack.c.bf16 %v2058_v23, %v2053_v29  ;;  %v4343_v24 = vpop.f32.mrb[145].mxu0  ;;  %v6521_v29 = vld [vmem:[%s6774_s1 + $0x198] sm:$0xf]  ;;  %v6527_v23 = vld [vmem:[#allocation7] ss:$0 sm:$0xff] }
 0x756   :  { %4841 = vmatpush3.bf16.msra.mxu1 %v4840_v9 }
 0x757   :  { %v2063_v11 = vpop.f32.mrb[146].mxu0  ;;  %4842 = vmatprep.subr.bf16.mxu1 %v5035_v0 }
 0x758   :  { %v4346_v28 = vpop.f32.mrb[147].mxu0 }
 0x75b   :  { %v2068_v12 = vpop.f32.mrb[148].mxu0 }
 0x75c   :  { %v4843_v25 = vpack.c.bf16 %v2068_v12, %v2063_v11  ;;  %v4349_v47 = vpop.f32.mrb[149].mxu0 }
 0x75e   :  { %4844 = vmatpush3.bf16.msra.mxu1 %v4843_v25 }
 0x75f   :  { %v2073_v26 = vpop.f32.mrb[150].mxu0  ;;  %4845 = vmatprep.subr.bf16.mxu1 %v5035_v0 }
 0x760   :  { %v4352_v48 = vpop.f32.mrb[151].mxu0 }
 0x763   :  { %v2078_v49 = vpop.f32.mrb[152].mxu0 }
 0x764   :  { %v4846_v50 = vpack.c.bf16 %v2078_v49, %v2073_v26  ;;  %v4355_v32 = vpop.f32.mrb[153].mxu0 }
 0x766   :  { %4847 = vmatpush3.bf16.msra.mxu1 %v4846_v50 }
 0x767   :  { %v2083_v51 = vpop.f32.mrb[154].mxu0  ;;  %4383 = vmatprep.subr.mxu1 %v5037_v1 }
 0x768   :  { %v4358_v34 = vpop.f32.mrb[155].mxu0 }
 0x76a   :  { %4384 = vmatpush3.msk.msra.mxu1 %vm340_vm3, %v2083_v51 }
 0x76b   :  { %4386 = vmatmul.mubr.msk.f32.vlgmr.msra.gmra.mrb[130].mxu1 %vm300_vm4, %v6008_v44  ;;  %v2380_v52 = vpop.f32.mrb[156].mxu0  ;;  %4860 = vmatprep.subr.bf16.mxu1 %v5035_v0 }
 0x76c   :  { %v4444_v46 = vpop.f32.mrb[157].mxu0  ;;  %4388 = vmatprep.mubr.msk.f32.mxu1 %vm5036_vm0, %v5037_v1 }
 0x76f   :  { %4389 = vmatmul.mubr.msk.f32.gmra.mrb[132].mxu1 %vm300_vm4, %v6019_v45  ;;  %v2385_v53 = vpop.f32.mrb[158].mxu0 }
 0x770   :  { %v4861_v35 = vpack.c.bf16 %v2385_v53, %v2380_v52  ;;  %v4447_v54 = vpop.f32.mrb[159].mxu0  ;;  %4391 = vmatprep.mubr.msk.f32.mxu1 %vm5036_vm0, %v5037_v1 }
 0x772   :  { %4862 = vmatpush3.bf16.msra.mxu1 %v4861_v35 }
 0x773   :  { %4392 = vmatmul.mubr.msk.f32.gmra.mrb[134].mxu1 %vm300_vm4, %v6028_v61  ;;  %v2390_v44 = vpop.f32.mrb[160].mxu0  ;;  %4863 = vmatprep.subr.bf16.mxu1 %v5035_v0 }
 0x774   :  { %v4450_v31 = vpop.f32.mrb[161].mxu0  ;;  %4394 = vmatprep.mubr.msk.f32.mxu1 %vm5036_vm0, %v5037_v1 }
 0x777   :  { %4395 = vmatmul.mubr.msk.f32.gmra.mrb[136].mxu1 %vm300_vm4, %v6037_v18  ;;  %v2395_v45 = vpop.f32.mrb[162].mxu0 }
 0x778   :  { %v4864_v33 = vpack.c.bf16 %v2395_v45, %v2390_v44  ;;  %v4453_v36 = vpop.f32.mrb[163].mxu0  ;;  %4397 = vmatprep.mubr.msk.f32.mxu1 %vm5036_vm0, %v5037_v1 }
 0x77a   :  { %4865 = vmatpush3.bf16.msra.mxu1 %v4864_v33 }
 0x77b   :  { %4398 = vmatmul.mubr.msk.f32.gmra.mrb[138].mxu1 %vm300_vm4, %v6046_v62  ;;  %v2400_v61 = vpop.f32.mrb[164].mxu0  ;;  %4866 = vmatprep.subr.bf16.mxu1 %v5035_v0 }
 0x77c   :  { %v4456_v37 = vpop.f32.mrb[165].mxu0  ;;  %4400 = vmatprep.mubr.msk.f32.mxu1 %vm5036_vm0, %v5037_v1 }
 0x77f   :  { %4401 = vmatmul.mubr.msk.f32.gmra.mrb[140].mxu1 %vm300_vm4, %v6055_v63  ;;  %v2405_v18 = vpop.f32.mrb[166].mxu0 }
 0x780   :  { %v4867_v39 = vpack.c.bf16 %v2405_v18, %v2400_v61  ;;  %v4459_v55 = vpop.f32.mrb[167].mxu0  ;;  %4403 = vmatprep.mubr.msk.f32.mxu1 %vm5036_vm0, %v5037_v1 }
 0x782   :  { %4868 = vmatpush3.bf16.msra.mxu1 %v4867_v39 }
 0x783   :  { %4404 = vmatmul.mubr.msk.f32.gmra.mrb[142].mxu1 %vm300_vm4, %v6064_v19  ;;  %v2410_v62 = vpop.f32.mrb[168].mxu0  ;;  %4869 = vmatprep.subr.bf16.mxu1 %v5035_v0 }
 0x784   :  { %v4462_v5 = vpop.f32.mrb[169].mxu0  ;;  %4406 = vmatprep.mubr.msk.f32.mxu1 %vm5036_vm0, %v5037_v1 }
 0x787   :  { %4407 = vmatmul.mubr.msk.f32.gmra.mrb[144].mxu1 %vm300_vm4, %v6073_v2  ;;  %v2415_v63 = vpop.f32.mrb[170].mxu0 }
 0x788   :  { %v4870_v56 = vpack.c.bf16 %v2415_v63, %v2410_v62  ;;  %v4465_v38 = vpop.f32.mrb[171].mxu0  ;;  %4409 = vmatprep.mubr.msk.f32.mxu1 %vm5036_vm0, %v5037_v1 }
 0x78a   :  { %4871 = vmatpush3.bf16.msra.mxu1 %v4870_v56 }
 0x78b   :  { %4410 = vmatmul.mubr.msk.f32.gmra.mrb[146].mxu1 %vm300_vm4, %v6082_v20  ;;  %v2420_v19 = vpop.f32.mrb[172].mxu0  ;;  %4872 = vmatprep.subr.bf16.mxu1 %v5035_v0 }
 0x78c   :  { %v4468_v57 = vpop.f32.mrb[173].mxu0  ;;  %4412 = vmatprep.mubr.msk.f32.mxu1 %vm5036_vm0, %v5037_v1 }
 0x78f   :  { %4413 = vmatmul.mubr.msk.f32.gmra.mrb[148].mxu1 %vm300_vm4, %v6091_v14  ;;  %v2425_v2 = vpop.f32.mrb[174].mxu0 }
 0x790   :  { %v4873_v7 = vpack.c.bf16 %v2425_v2, %v2420_v19  ;;  %v4471_v40 = vpop.f32.mrb[175].mxu0  ;;  %4415 = vmatprep.mubr.msk.f32.mxu1 %vm5036_vm0, %v5037_v1 }
 0x792   :  { %4874 = vmatpush3.bf16.msra.mxu1 %v4873_v7 }
 0x793   :  { %4416 = vmatmul.mubr.msk.f32.gmra.mrb[150].mxu1 %vm300_vm4, %v6100_v3  ;;  %v2430_v20 = vpop.f32.mrb[176].mxu0  ;;  %4875 = vmatprep.subr.bf16.mxu1 %v5035_v0 }
 0x794   :  { %v4474_v15 = vpop.f32.mrb[177].mxu0  ;;  %4418 = vmatprep.mubr.msk.f32.mxu1 %vm5036_vm0, %v5037_v1 }
 0x797   :  { %4419 = vmatmul.mubr.msk.f32.gmra.mrb[152].mxu1 %vm300_vm4, %v6109_v21  ;;  %v2435_v14 = vpop.f32.mrb[178].mxu0  ;;  %v6411_v21 = vld [vmem:[%s6774_s1 + $0x138] sm:$0xff] }
 0x798   :  { %v4876_v58 = vpack.c.bf16 %v2435_v14, %v2430_v20  ;;  %v4477_v10 = vpop.f32.mrb[179].mxu0  ;;  %4421 = vmatprep.mubr.msk.f32.mxu1 %vm5036_vm0, %v5037_v1 }
 0x79a   :  { %4877 = vmatpush3.bf16.msra.mxu1 %v4876_v58 }
 0x79b   :  { %4422 = vmatmul.mubr.msk.f32.gmra.mrb[154].mxu1 %vm300_vm4, %v6118_v4  ;;  %v2440_v3 = vpop.f32.mrb[180].mxu0  ;;  %4505 = vmatprep.subr.mxu1 %v5037_v1  ;;  %v6422_v4 = vld [vmem:[%s6774_s1 + $0x140] sm:$0xff] }
 0x79c   :  { %v4480_v41 = vpop.f32.mrb[181].mxu0  ;;  %4507 = vmatprep.mubr.msk.f32.mxu1 %vm5036_vm0, %v5037_v1 }
 0x79e   :  { %4506 = vmatpush3.msk.msra.mxu1 %vm340_vm3, %v2440_v3 }
 0x79f   :  { %4508 = vmatmul.mubr.msk.f32.vlgmr.msra.gmra.mrb[156].mxu1 %vm300_vm4, %v6411_v21  ;;  %4908 = vmatprep.subr.bf16.mxu1 %v5035_v0 }
 0x7a0   :  { %4510 = vmatprep.mubr.msk.f32.mxu1 %vm5036_vm0, %v5037_v1 }
 0x7a3   :  { %4511 = vmatmul.mubr.msk.f32.gmra.mrb[158].mxu1 %vm300_vm4, %v6422_v4 }
 0x7a4   :  { %4513 = vmatprep.mubr.msk.f32.mxu1 %vm5036_vm0, %v5037_v1 }
 0x7a7   :  { %4514 = vmatmul.mubr.msk.f32.gmra.mrb[160].mxu1 %vm300_vm4, %v6431_v16 }
 0x7a8   :  { %4516 = vmatprep.mubr.msk.f32.mxu1 %vm5036_vm0, %v5037_v1 }
 0x7ab   :  { %4517 = vmatmul.mubr.msk.f32.gmra.mrb[162].mxu1 %vm300_vm4, %v6440_v42 }
 0x7ac   :  { %4519 = vmatprep.mubr.msk.f32.mxu1 %vm5036_vm0, %v5037_v1 }
 0x7af   :  { %4520 = vmatmul.mubr.msk.f32.gmra.mrb[164].mxu1 %vm300_vm4, %v6449_v13 }
 0x7b0   :  { %4522 = vmatprep.mubr.msk.f32.mxu1 %vm5036_vm0, %v5037_v1 }
 0x7b3   :  { %4523 = vmatmul.mubr.msk.f32.gmra.mrb[166].mxu1 %vm300_vm4, %v6458_v59 }
 0x7b4   :  { %4525 = vmatprep.mubr.msk.f32.mxu1 %vm5036_vm0, %v5037_v1 }
 0x7b7   :  { %4526 = vmatmul.mubr.msk.f32.gmra.mrb[168].mxu1 %vm300_vm4, %v6467_v60 }
 0x7b8   :  { %4528 = vmatprep.mubr.msk.f32.mxu1 %vm5036_vm0, %v5037_v1 }
 0x7bb   :  { %4529 = vmatmul.mubr.msk.f32.gmra.mrb[170].mxu1 %vm300_vm4, %v6476_v43 }
 0x7bc   :  { %4531 = vmatprep.mubr.msk.f32.mxu1 %vm5036_vm0, %v5037_v1 }
 0x7bf   :  { %4532 = vmatmul.mubr.msk.f32.gmra.mrb[172].mxu1 %vm300_vm4, %v6485_v17 }
 0x7c0   :  { %4534 = vmatprep.mubr.msk.f32.mxu1 %vm5036_vm0, %v5037_v1 }
 0x7c3   :  { %4535 = vmatmul.mubr.msk.f32.gmra.mrb[174].mxu1 %vm300_vm4, %v6494_v22 }
 0x7c4   :  { %4537 = vmatprep.mubr.msk.f32.mxu1 %vm5036_vm0, %v5037_v1 }
 0x7c7   :  { %4538 = vmatmul.mubr.msk.f32.gmra.mrb[176].mxu1 %vm300_vm4, %v6503_v30 }
 0x7c8   :  { %4540 = vmatprep.mubr.msk.f32.mxu1 %vm5036_vm0, %v5037_v1 }
 0x7cb   :  { %4541 = vmatmul.mubr.msk.f32.gmra.mrb[178].mxu1 %vm300_vm4, %v6512_v6 }
 0x7cc   :  { %4543 = vmatprep.mubr.msk.f32.mxu1 %vm5036_vm0, %v5037_v1 }
 0x7cf   :  { %4544 = vmatmul.mubr.msk.f32.gmra.mrb[180].mxu1 %vm300_vm4, %v6521_v29 }
 0x7d0   :  { %4632 = vmatprep.mubr.msk.f32.mxu1 %vm5036_vm0, %v5037_v1 }
 0x83e   :  { %v2156_v8 = vpop.f32.mrb[130].mxu1 }
 0x83f   :  { %v2157_v9 = vadd.f32 %v6527_v23, %v2156_v8  ;;  %v4387_v24 = vpop.f32.mrb[131].mxu1 }
 0x841   :  { %v2220_v11 = vmax.f32 %v2157_v9, 0.0 }
 0x842   :  { %v2161_v28 = vpop.f32.mrb[132].mxu1 }
 0x843   :  { %3200 = vst.msk [vmem:[%s6779_s6 + $0xd0] sm:$0xff] %vm120_vm2, %v2220_v11  ;;  %v2162_v12 = vadd.f32 %v6527_v23, %v2161_v28  ;;  %v4390_v25 = vpop.f32.mrb[133].mxu1 }
 0x845   :  { %v2221_v47 = vmax.f32 %v2162_v12, 0.0 }
 0x846   :  { %v2166_v26 = vpop.f32.mrb[134].mxu1 }
 0x847   :  { %3201 = vst.msk [vmem:[%s6779_s6 + $0xd8] sm:$0xff] %vm120_vm2, %v2221_v47  ;;  %v2167_v48 = vadd.f32 %v6527_v23, %v2166_v26  ;;  %v4393_v49 = vpop.f32.mrb[135].mxu1 }
 0x849   :  { %v2222_v50 = vmax.f32 %v2167_v48, 0.0 }
 0x84a   :  { %v2171_v32 = vpop.f32.mrb[136].mxu1 }
 0x84b   :  { %3202 = vst.msk [vmem:[%s6779_s6 + $0xe0] sm:$0xff] %vm120_vm2, %v2222_v50  ;;  %v2172_v51 = vadd.f32 %v6527_v23, %v2171_v32  ;;  %v4396_v34 = vpop.f32.mrb[137].mxu1 }
 0x84d   :  { %v2223_v52 = vmax.f32 %v2172_v51, 0.0 }
 0x84e   :  { %v2176_v46 = vpop.f32.mrb[138].mxu1 }
 0x84f   :  { %3203 = vst.msk [vmem:[%s6779_s6 + $0xe8] sm:$0xff] %vm120_vm2, %v2223_v52  ;;  %v2177_v53 = vadd.f32 %v6527_v23, %v2176_v46  ;;  %v4399_v35 = vpop.f32.mrb[139].mxu1 }
 0x851   :  { %v2224_v54 = vmax.f32 %v2177_v53, 0.0 }
 0x852   :  { %v2181_v44 = vpop.f32.mrb[140].mxu1 }
 0x853   :  { %3204 = vst.msk [vmem:[%s6779_s6 + $0xf0] sm:$0xff] %vm120_vm2, %v2224_v54  ;;  %v2182_v31 = vadd.f32 %v6527_v23, %v2181_v44  ;;  %v4402_v45 = vpop.f32.mrb[141].mxu1 }
 0x855   :  { %v2225_v33 = vmax.f32 %v2182_v31, 0.0 }
 0x856   :  { %v2186_v36 = vpop.f32.mrb[142].mxu1 }
 0x857   :  { %3205 = vst.msk [vmem:[%s6779_s6 + $0xf8] sm:$0xff] %vm120_vm2, %v2225_v33  ;;  %v2187_v61 = vadd.f32 %v6527_v23, %v2186_v36  ;;  %v4405_v37 = vpop.f32.mrb[143].mxu1 }
 0x859   :  { %v2226_v18 = vmax.f32 %v2187_v61, 0.0 }
 0x85a   :  { %v2191_v39 = vpop.f32.mrb[144].mxu1 }
 0x85b   :  { %3206 = vst.msk [vmem:[%s6779_s6 + $0x100] sm:$0xff] %vm120_vm2, %v2226_v18  ;;  %v2192_v55 = vadd.f32 %v6527_v23, %v2191_v39  ;;  %v4408_v62 = vpop.f32.mrb[145].mxu1 }
 0x85d   :  { %v2227_v5 = vmax.f32 %v2192_v55, 0.0 }
 0x85e   :  { %v2196_v63 = vpop.f32.mrb[146].mxu1 }
 0x85f   :  { %3207 = vst.msk [vmem:[%s6779_s6 + $0x108] sm:$0xff] %vm120_vm2, %v2227_v5  ;;  %v2197_v56 = vadd.f32 %v6527_v23, %v2196_v63  ;;  %v4411_v38 = vpop.f32.mrb[147].mxu1 }
 0x861   :  { %v2228_v19 = vmax.f32 %v2197_v56, 0.0 }
 0x862   :  { %v2201_v57 = vpop.f32.mrb[148].mxu1 }
 0x863   :  { %3208 = vst.msk [vmem:[%s6779_s6 + $0x110] sm:$0xff] %vm120_vm2, %v2228_v19  ;;  %v2202_v2 = vadd.f32 %v6527_v23, %v2201_v57  ;;  %v4414_v7 = vpop.f32.mrb[149].mxu1 }
 0x865   :  { %v2229_v40 = vmax.f32 %v2202_v2, 0.0 }
 0x866   :  { %v2206_v20 = vpop.f32.mrb[150].mxu1 }
 0x867   :  { %3209 = vst.msk [vmem:[%s6779_s6 + $0x118] sm:$0xff] %vm120_vm2, %v2229_v40  ;;  %v2207_v15 = vadd.f32 %v6527_v23, %v2206_v20  ;;  %v4417_v14 = vpop.f32.mrb[151].mxu1 }
 0x869   :  { %v2230_v58 = vmax.f32 %v2207_v15, 0.0 }
 0x86a   :  { %v2211_v10 = vpop.f32.mrb[152].mxu1 }
 0x86b   :  { %3210 = vst.msk [vmem:[%s6779_s6 + $0x120] sm:$0xff] %vm120_vm2, %v2230_v58  ;;  %v2212_v3 = vadd.f32 %v6527_v23, %v2211_v10  ;;  %v4420_v41 = vpop.f32.mrb[153].mxu1 }
 0x86d   :  { %v2231_v8 = vmax.f32 %v2212_v3, 0.0 }
 0x86e   :  { %v2216_v9 = vpop.f32.mrb[154].mxu1 }
 0x86f   :  { %3211 = vst.msk [vmem:[%s6779_s6 + $0x128] sm:$0xff] %vm120_vm2, %v2231_v8  ;;  %v2217_v24 = vadd.f32 %v6527_v23, %v2216_v9  ;;  %v4423_v11 = vpop.f32.mrb[155].mxu1 }
 0x871   :  { %v2232_v28 = vmax.f32 %v2217_v24, 0.0 }
 0x872   :  { %v2552_v12 = vpop.f32.mrb[156].mxu1 }
 0x873   :  { %3212 = vst.msk [vmem:[%s6779_s6 + $0x130] sm:$0xf] %vm823_vm5, %v2232_v28  ;;  %v2553_v25 = vadd.f32 %v6189_v27, %v2552_v12  ;;  %v4509_v47 = vpop.f32.mrb[157].mxu1 }
 0x875   :  { %v2616_v26 = vmax.f32 %v2553_v25, 0.0 }
 0x876   :  { %v2557_v48 = vpop.f32.mrb[158].mxu1 }
 0x877   :  { %v2558_v49 = vadd.f32 %v6189_v27, %v2557_v48  ;;  %v4512_v50 = vpop.f32.mrb[159].mxu1  ;;  %4565 = vmatmul.mubr.msk.f32.vlgmr.msra.gmra.mrb[182].mxu0 %vm120_vm2, %v2616_v26 }
 0x878   :  { %4567 = vmatprep.mubr.msk.f32.mxu0 %vm5036_vm0, %v5037_v1 }
 0x879   :  { %v2617_v32 = vmax.f32 %v2558_v49, 0.0 }
 0x87a   :  { %v2562_v51 = vpop.f32.mrb[160].mxu1 }
 0x87b   :  { %v2563_v34 = vadd.f32 %v6189_v27, %v2562_v51  ;;  %v4515_v52 = vpop.f32.mrb[161].mxu1  ;;  %4568 = vmatmul.mubr.msk.f32.gmra.mrb[184].mxu0 %vm120_vm2, %v2617_v32 }
 0x87c   :  { %4570 = vmatprep.mubr.msk.f32.mxu0 %vm5036_vm0, %v5037_v1 }
 0x87d   :  { %v2618_v46 = vmax.f32 %v2563_v34, 0.0 }
 0x87e   :  { %v2567_v53 = vpop.f32.mrb[162].mxu1 }
 0x87f   :  { %v2568_v35 = vadd.f32 %v6189_v27, %v2567_v53  ;;  %v4518_v54 = vpop.f32.mrb[163].mxu1  ;;  %4571 = vmatmul.mubr.msk.f32.gmra.mrb[186].mxu0 %vm120_vm2, %v2618_v46 }
 0x880   :  { %4573 = vmatprep.mubr.msk.f32.mxu0 %vm5036_vm0, %v5037_v1 }
 0x881   :  { %v2619_v44 = vmax.f32 %v2568_v35, 0.0 }
 0x882   :  { %v2572_v31 = vpop.f32.mrb[164].mxu1 }
 0x883   :  { %v2573_v45 = vadd.f32 %v6189_v27, %v2572_v31  ;;  %v4521_v33 = vpop.f32.mrb[165].mxu1  ;;  %4574 = vmatmul.mubr.msk.f32.gmra.mrb[188].mxu0 %vm120_vm2, %v2619_v44 }
 0x884   :  { %4576 = vmatprep.mubr.msk.f32.mxu0 %vm5036_vm0, %v5037_v1 }
 0x885   :  { %v2620_v36 = vmax.f32 %v2573_v45, 0.0 }
 0x886   :  { %v2577_v61 = vpop.f32.mrb[166].mxu1 }
 0x887   :  { %v2578_v37 = vadd.f32 %v6189_v27, %v2577_v61  ;;  %v4524_v18 = vpop.f32.mrb[167].mxu1  ;;  %4577 = vmatmul.mubr.msk.f32.gmra.mrb[190].mxu0 %vm120_vm2, %v2620_v36 }
 0x888   :  { %4579 = vmatprep.mubr.msk.f32.mxu0 %vm5036_vm0, %v5037_v1 }
 0x889   :  { %v2621_v39 = vmax.f32 %v2578_v37, 0.0 }
 0x88a   :  { %v2582_v55 = vpop.f32.mrb[168].mxu1 }
 0x88b   :  { %v2583_v62 = vadd.f32 %v6189_v27, %v2582_v55  ;;  %v4527_v5 = vpop.f32.mrb[169].mxu1  ;;  %4580 = vmatmul.mubr.msk.f32.gmra.mrb[192].mxu0 %vm120_vm2, %v2621_v39 }
 0x88c   :  { %4582 = vmatprep.mubr.msk.f32.mxu0 %vm5036_vm0, %v5037_v1 }
 0x88d   :  { %v2622_v63 = vmax.f32 %v2583_v62, 0.0 }
 0x88e   :  { %v2587_v56 = vpop.f32.mrb[170].mxu1 }
 0x88f   :  { %v2588_v38 = vadd.f32 %v6189_v27, %v2587_v56  ;;  %v4530_v19 = vpop.f32.mrb[171].mxu1  ;;  %4583 = vmatmul.mubr.msk.f32.gmra.mrb[194].mxu0 %vm120_vm2, %v2622_v63 }
 0x890   :  { %4585 = vmatprep.mubr.msk.f32.mxu0 %vm5036_vm0, %v5037_v1 }
 0x891   :  { %v2623_v57 = vmax.f32 %v2588_v38, 0.0 }
 0x892   :  { %v2592_v2 = vpop.f32.mrb[172].mxu1 }
 0x893   :  { %v2593_v7 = vadd.f32 %v6189_v27, %v2592_v2  ;;  %v4533_v40 = vpop.f32.mrb[173].mxu1  ;;  %4586 = vmatmul.mubr.msk.f32.gmra.mrb[196].mxu0 %vm120_vm2, %v2623_v57 }
 0x894   :  { %4588 = vmatprep.mubr.msk.f32.mxu0 %vm5036_vm0, %v5037_v1 }
 0x895   :  { %v2624_v20 = vmax.f32 %v2593_v7, 0.0 }
 0x896   :  { %v2597_v15 = vpop.f32.mrb[174].mxu1 }
 0x897   :  { %v2598_v14 = vadd.f32 %v6189_v27, %v2597_v15  ;;  %v4536_v58 = vpop.f32.mrb[175].mxu1  ;;  %4589 = vmatmul.mubr.msk.f32.gmra.mrb[198].mxu0 %vm120_vm2, %v2624_v20 }
 0x898   :  { %4591 = vmatprep.mubr.msk.f32.mxu0 %vm5036_vm0, %v5037_v1 }
 0x899   :  { %v2625_v10 = vmax.f32 %v2598_v14, 0.0 }
 0x89a   :  { %v2602_v3 = vpop.f32.mrb[176].mxu1 }
 0x89b   :  { %v2603_v41 = vadd.f32 %v6189_v27, %v2602_v3  ;;  %v4539_v8 = vpop.f32.mrb[177].mxu1  ;;  %4592 = vmatmul.mubr.msk.f32.gmra.mrb[200].mxu0 %vm120_vm2, %v2625_v10 }
 0x89c   :  { %4594 = vmatprep.mubr.msk.f32.mxu0 %vm5036_vm0, %v5037_v1 }
 0x89d   :  { %v2626_v9 = vmax.f32 %v2603_v41, 0.0 }
 0x89e   :  { %v2607_v24 = vpop.f32.mrb[178].mxu1 }
 0x89f   :  { %v2608_v11 = vadd.f32 %v6189_v27, %v2607_v24  ;;  %v4542_v28 = vpop.f32.mrb[179].mxu1  ;;  %4595 = vmatmul.mubr.msk.f32.gmra.mrb[202].mxu0 %vm120_vm2, %v2626_v9 }
 0x8a0   :  { %4597 = vmatprep.mubr.msk.f32.mxu0 %vm5036_vm0, %v5037_v1 }
 0x8a1   :  { %v2627_v12 = vmax.f32 %v2608_v11, 0.0 }
 0x8a2   :  { %v2612_v25 = vpop.f32.mrb[180].mxu1 }
 0x8a3   :  { %4598 = vmatmul.mubr.msk.f32.gmra.mrb[204].mxu0 %vm120_vm2, %v2627_v12  ;;  %v2613_v47 = vadd.f32 %v6189_v27, %v2612_v25  ;;  %v4545_v26 = vpop.f32.mrb[181].mxu1 }
 0x8a4   :  { %4600 = vmatprep.mubr.msk.f32.mxu0 %vm5036_vm0, %v5037_v1 }
 0x8a5   :  { %v2628_v48 = vmax.f32 %v2613_v47, 0.0 }
 0x8a7   :  { %4601 = vmatmul.mubr.msk.f32.gmra.mrb[206].mxu0 %vm120_vm2, %v2628_v48 }
 0x8a8   :  { %4629 = vmatprep.mubr.msk.f32.mxu0 %vm5036_vm0, %v5037_v1 }
 0x94a   :  { %v2734_v49 = vpop.f32.mrb[182].mxu0 }
 0x94b   :  { %v4566_v50 = vpop.f32.mrb[183].mxu0 }
 0x94e   :  { %v2739_v32 = vpop.f32.mrb[184].mxu0 }
 0x94f   :  { %v4891_v51 = vpack.c.bf16 %v2739_v32, %v2734_v49  ;;  %v4569_v34 = vpop.f32.mrb[185].mxu0 }
 0x951   :  { %4892 = vmatpush3.bf16.msra.mxu0 %v4891_v51  ;;  %4915 = vmatpush3.bf16.msra.mxu1 %v4891_v51 }
 0x952   :  { %v2744_v52 = vpop.f32.mrb[186].mxu0  ;;  %4893 = vmatprep.subr.bf16.mxu0 %v5035_v0  ;;  %4909 = vmatprep.subr.bf16.mxu1 %v5035_v0 }
 0x953   :  { %v4572_v27 = vpop.f32.mrb[187].mxu0 }
 0x956   :  { %v2749_v46 = vpop.f32.mrb[188].mxu0 }
 0x957   :  { %v4894_v53 = vpack.c.bf16 %v2749_v46, %v2744_v52  ;;  %v4575_v35 = vpop.f32.mrb[189].mxu0 }
 0x959   :  { %4895 = vmatpush3.bf16.msra.mxu0 %v4894_v53  ;;  %4916 = vmatpush3.bf16.msra.mxu1 %v4894_v53 }
 0x95a   :  { %v2754_v54 = vpop.f32.mrb[190].mxu0  ;;  %4896 = vmatprep.subr.bf16.mxu0 %v5035_v0  ;;  %4910 = vmatprep.subr.bf16.mxu1 %v5035_v0 }
 0x95b   :  { %v4578_v44 = vpop.f32.mrb[191].mxu0 }
 0x95e   :  { %v2759_v31 = vpop.f32.mrb[192].mxu0 }
 0x95f   :  { %v4897_v45 = vpack.c.bf16 %v2759_v31, %v2754_v54  ;;  %v4581_v33 = vpop.f32.mrb[193].mxu0 }
 0x961   :  { %4898 = vmatpush3.bf16.msra.mxu0 %v4897_v45  ;;  %4917 = vmatpush3.bf16.msra.mxu1 %v4897_v45 }
 0x962   :  { %v2764_v36 = vpop.f32.mrb[194].mxu0  ;;  %4899 = vmatprep.subr.bf16.mxu0 %v5035_v0  ;;  %4911 = vmatprep.subr.bf16.mxu1 %v5035_v0 }
 0x963   :  { %v4584_v61 = vpop.f32.mrb[195].mxu0 }
 0x966   :  { %v2769_v37 = vpop.f32.mrb[196].mxu0 }
 0x967   :  { %v4900_v18 = vpack.c.bf16 %v2769_v37, %v2764_v36  ;;  %v4587_v39 = vpop.f32.mrb[197].mxu0 }
 0x969   :  { %4901 = vmatpush3.bf16.msra.mxu0 %v4900_v18  ;;  %4918 = vmatpush3.bf16.msra.mxu1 %v4900_v18 }
 0x96a   :  { %v2774_v55 = vpop.f32.mrb[198].mxu0  ;;  %4902 = vmatprep.subr.bf16.mxu0 %v5035_v0  ;;  %4912 = vmatprep.subr.bf16.mxu1 %v5035_v0 }
 0x96b   :  { %v4590_v62 = vpop.f32.mrb[199].mxu0 }
 0x96e   :  { %v2779_v5 = vpop.f32.mrb[200].mxu0 }
 0x96f   :  { %v4903_v63 = vpack.c.bf16 %v2779_v5, %v2774_v55  ;;  %v4593_v56 = vpop.f32.mrb[201].mxu0 }
 0x971   :  { %4904 = vmatpush3.bf16.msra.mxu0 %v4903_v63  ;;  %4919 = vmatpush3.bf16.msra.mxu1 %v4903_v63 }
 0x972   :  { %v2784_v38 = vpop.f32.mrb[202].mxu0  ;;  %4905 = vmatprep.subr.bf16.mxu0 %v5035_v0  ;;  %4913 = vmatprep.subr.bf16.mxu1 %v5035_v0 }
 0x973   :  { %v4596_v19 = vpop.f32.mrb[203].mxu0 }
 0x976   :  { %v2789_v57 = vpop.f32.mrb[204].mxu0 }
 0x977   :  { %v4906_v2 = vpack.c.bf16 %v2789_v57, %v2784_v38  ;;  %v4599_v7 = vpop.f32.mrb[205].mxu0 }
 0x979   :  { %4907 = vmatpush3.bf16.msra.mxu0 %v4906_v2  ;;  %4920 = vmatpush3.bf16.msra.mxu1 %v4906_v2 }
 0x97a   :  { %v2794_v40 = vpop.f32.mrb[206].mxu0  ;;  %4627 = vmatprep.subr.mxu0 %v5037_v1  ;;  %4914 = vmatprep.subr.mxu1 %v5037_v1 }
 0x97b   :  { %v4602_v20 = vpop.f32.mrb[207].mxu0 }
 0x97d   :  { %4628 = vmatpush3.msk.msra.mxu0 %vm340_vm3, %v2794_v40  ;;  %4921 = vmatpush3.msk.msra.mxu1 %vm340_vm3, %v2794_v40 }
 0x97e   :  { %4633 = vmatmul.mubr.msk.f32.vlgmr.msra.gmra.mrb[182].mxu1 %vm300_vm4, %v6422_v4  ;;  %4630 = vmatmul.mubr.msk.f32.vlgmr.msra.gmra.mrb[208].mxu0 %vm300_vm4, %v6411_v21 }
 0x97f   :  { %4635 = vmatprep.mubr.msk.f32.mxu1 %vm5036_vm0, %v5037_v1 }
 0x982   :  { %4636 = vmatmul.mubr.msk.f32.gmra.mrb[184].mxu1 %vm300_vm4, %v6431_v16 }
 0x983   :  { %4638 = vmatprep.mubr.msk.f32.mxu1 %vm5036_vm0, %v5037_v1 }
 0x986   :  { %4639 = vmatmul.mubr.msk.f32.gmra.mrb[186].mxu1 %vm300_vm4, %v6440_v42 }
 0x987   :  { %4641 = vmatprep.mubr.msk.f32.mxu1 %vm5036_vm0, %v5037_v1 }
 0x98a   :  { %4642 = vmatmul.mubr.msk.f32.gmra.mrb[188].mxu1 %vm300_vm4, %v6449_v13 }
 0x98b   :  { %4644 = vmatprep.mubr.msk.f32.mxu1 %vm5036_vm0, %v5037_v1 }
 0x98e   :  { %4645 = vmatmul.mubr.msk.f32.gmra.mrb[190].mxu1 %vm300_vm4, %v6458_v59 }
 0x98f   :  { %4647 = vmatprep.mubr.msk.f32.mxu1 %vm5036_vm0, %v5037_v1 }
 0x992   :  { %4648 = vmatmul.mubr.msk.f32.gmra.mrb[192].mxu1 %vm300_vm4, %v6467_v60 }
 0x993   :  { %4650 = vmatprep.mubr.msk.f32.mxu1 %vm5036_vm0, %v5037_v1 }
 0x996   :  { %4651 = vmatmul.mubr.msk.f32.gmra.mrb[194].mxu1 %vm300_vm4, %v6476_v43 }
 0x997   :  { %4653 = vmatprep.mubr.msk.f32.mxu1 %vm5036_vm0, %v5037_v1 }
 0x99a   :  { %4654 = vmatmul.mubr.msk.f32.gmra.mrb[196].mxu1 %vm300_vm4, %v6485_v17 }
 0x99b   :  { %4656 = vmatprep.mubr.msk.f32.mxu1 %vm5036_vm0, %v5037_v1 }
 0x99e   :  { %4657 = vmatmul.mubr.msk.f32.gmra.mrb[198].mxu1 %vm300_vm4, %v6494_v22 }
 0x99f   :  { %4659 = vmatprep.mubr.msk.f32.mxu1 %vm5036_vm0, %v5037_v1 }
 0x9a2   :  { %4660 = vmatmul.mubr.msk.f32.gmra.mrb[200].mxu1 %vm300_vm4, %v6503_v30 }
 0x9a3   :  { %4662 = vmatprep.mubr.msk.f32.mxu1 %vm5036_vm0, %v5037_v1 }
 0x9a6   :  { %4663 = vmatmul.mubr.msk.f32.gmra.mrb[202].mxu1 %vm300_vm4, %v6512_v6 }
 0x9a7   :  { %4665 = vmatprep.mubr.msk.f32.mxu1 %vm5036_vm0, %v5037_v1 }
 0x9aa   :  { %4666 = vmatmul.mubr.msk.f32.gmra.mrb[204].mxu1 %vm300_vm4, %v6521_v29 }
 0xa51   :  { %v2872_v0 = vpop.f32.mrb[182].mxu1  ;;  %v2867_v21 = vpop.f32.mrb[208].mxu0 }
 0xa52   :  { %v2873_v4 = vadd.f32 %v6527_v23, %v2872_v0  ;;  %v4634_v16 = vpop.f32.mrb[183].mxu1  ;;  %v2868_v42 = vadd.f32 %v6527_v23, %v2867_v21  ;;  %v4631_v13 = vpop.f32.mrb[209].mxu0 }
 0xa54   :  { %v2932_v59 = vmax.f32 %v2873_v4, 0.0  ;;  %v2931_v60 = vmax.f32 %v2868_v42, 0.0 }
 0xa55   :  { %v2877_v43 = vpop.f32.mrb[184].mxu1 }
 0xa56   :  { %3296 = vst.msk [vmem:[%s6779_s6 + $0x140] sm:$0xff] %vm120_vm2, %v2932_v59  ;;  %v2878_v1 = vadd.f32 %v6527_v23, %v2877_v43  ;;  %v4637_v17 = vpop.f32.mrb[185].mxu1  ;;  %3295 = vst.msk [vmem:[%s6779_s6 + $0x138] sm:$0xff] %vm120_vm2, %v2931_v60 }
 0xa58   :  { %v2933_v22 = vmax.f32 %v2878_v1, 0.0 }
 0xa59   :  { %v2882_v30 = vpop.f32.mrb[186].mxu1 }
 0xa5a   :  { %3297 = vst.msk [vmem:[%s6779_s6 + $0x148] sm:$0xff] %vm120_vm2, %v2933_v22  ;;  %v2883_v6 = vadd.f32 %v6527_v23, %v2882_v30  ;;  %v4640_v29 = vpop.f32.mrb[187].mxu1 }
 0xa5c   :  { %v2934_v15 = vmax.f32 %v2883_v6, 0.0 }
 0xa5d   :  { %v2887_v14 = vpop.f32.mrb[188].mxu1 }
 0xa5e   :  { %3298 = vst.msk [vmem:[%s6779_s6 + $0x150] sm:$0xff] %vm120_vm2, %v2934_v15  ;;  %v2888_v58 = vadd.f32 %v6527_v23, %v2887_v14  ;;  %v4643_v10 = vpop.f32.mrb[189].mxu1 }
 0xa60   :  { %v2935_v3 = vmax.f32 %v2888_v58, 0.0 }
 0xa61   :  { %v2892_v41 = vpop.f32.mrb[190].mxu1 }
 0xa62   :  { %3299 = vst.msk [vmem:[%s6779_s6 + $0x158] sm:$0xff] %vm120_vm2, %v2935_v3  ;;  %v2893_v8 = vadd.f32 %v6527_v23, %v2892_v41  ;;  %v4646_v9 = vpop.f32.mrb[191].mxu1 }
 0xa64   :  { %v2936_v24 = vmax.f32 %v2893_v8, 0.0 }
 0xa65   :  { %v2897_v11 = vpop.f32.mrb[192].mxu1 }
 0xa66   :  { %3300 = vst.msk [vmem:[%s6779_s6 + $0x160] sm:$0xff] %vm120_vm2, %v2936_v24  ;;  %v2898_v28 = vadd.f32 %v6527_v23, %v2897_v11  ;;  %v4649_v12 = vpop.f32.mrb[193].mxu1 }
 0xa68   :  { %v2937_v25 = vmax.f32 %v2898_v28, 0.0 }
 0xa69   :  { %v2902_v47 = vpop.f32.mrb[194].mxu1 }
 0xa6a   :  { %3301 = vst.msk [vmem:[%s6779_s6 + $0x168] sm:$0xff] %vm120_vm2, %v2937_v25  ;;  %v2903_v26 = vadd.f32 %v6527_v23, %v2902_v47  ;;  %v4652_v48 = vpop.f32.mrb[195].mxu1 }
 0xa6c   :  { %v2938_v49 = vmax.f32 %v2903_v26, 0.0 }
 0xa6d   :  { %v2907_v50 = vpop.f32.mrb[196].mxu1 }
 0xa6e   :  { %3302 = vst.msk [vmem:[%s6779_s6 + $0x170] sm:$0xff] %vm120_vm2, %v2938_v49  ;;  %v2908_v32 = vadd.f32 %v6527_v23, %v2907_v50  ;;  %v4655_v51 = vpop.f32.mrb[197].mxu1 }
 0xa70   :  { %v2939_v34 = vmax.f32 %v2908_v32, 0.0 }
 0xa71   :  { %v2912_v52 = vpop.f32.mrb[198].mxu1 }
 0xa72   :  { %3303 = vst.msk [vmem:[%s6779_s6 + $0x178] sm:$0xff] %vm120_vm2, %v2939_v34  ;;  %v2913_v27 = vadd.f32 %v6527_v23, %v2912_v52  ;;  %v4658_v46 = vpop.f32.mrb[199].mxu1 }
 0xa74   :  { %v2940_v53 = vmax.f32 %v2913_v27, 0.0 }
 0xa75   :  { %v2917_v35 = vpop.f32.mrb[200].mxu1 }
 0xa76   :  { %3304 = vst.msk [vmem:[%s6779_s6 + $0x180] sm:$0xff] %vm120_vm2, %v2940_v53  ;;  %v2918_v54 = vadd.f32 %v6527_v23, %v2917_v35  ;;  %v4661_v44 = vpop.f32.mrb[201].mxu1 }
 0xa78   :  { %v2941_v31 = vmax.f32 %v2918_v54, 0.0 }
 0xa79   :  { %v2922_v45 = vpop.f32.mrb[202].mxu1 }
 0xa7a   :  { %3305 = vst.msk [vmem:[%s6779_s6 + $0x188] sm:$0xff] %vm120_vm2, %v2941_v31  ;;  %v2923_v33 = vadd.f32 %v6527_v23, %v2922_v45  ;;  %v4664_v36 = vpop.f32.mrb[203].mxu1 }
 0xa7c   :  { %v2942_v61 = vmax.f32 %v2923_v33, 0.0 }
 0xa7d   :  { %v2927_v37 = vpop.f32.mrb[204].mxu1 }
 0xa7e   :  { %3306 = vst.msk [vmem:[%s6779_s6 + $0x190] sm:$0xff] %vm120_vm2, %v2942_v61  ;;  %v2928_v18 = vadd.f32 %v6527_v23, %v2927_v37  ;;  %v4667_v39 = vpop.f32.mrb[205].mxu1 }
 0xa80   :  { %v2943_v55 = vmax.f32 %v2928_v18, 0.0 }
 0xa82   :  { %3307 = vst.msk [vmem:[%s6779_s6 + $0x198] sm:$0xf] %vm823_vm5, %v2943_v55 }
 0xa83   :  { %2962 = vsyncpa [#allocation3], 1 }
 0xa84   :  { %2963 = vsyncpa [#allocation5], 1 }
 0xa85   :  { %2964 = vsyncpa [#allocation8], 1 }

// kernel: my_model_forward.4
= control target key start
LH: loop header
LB: loop body
LE: loop exit
PB: predicated region body
PF: predicated region fallthrough
CT: control target
= control target key end

     0   :  { %s10697_s0 = inlined_call_operand.vmem [shape: f32[4,6656], index: 0, kind: input, shape index: {}]   ;;  %s10698_s1 = inlined_call_operand.hbm [shape: bf16[6656,1024], index: 1, kind: input, shape index: {}]   ;;  %s10699_s2 = inlined_call_operand.hbm [shape: f32[1,1024], index: 2, kind: input, shape index: {}]   ;;  %s10700_s3 = inlined_call_operand.hbm [shape: f32[1,1024], index: 3, kind: input, shape index: {}]   ;;  %s10701_s4 = inlined_call_operand.hbm [shape: f32[1,1024], index: 4, kind: input, shape index: {}]   ;;  %s10702_s5 = inlined_call_operand.vmem [shape: f32[4,1024], index: 5, kind: output, shape index: {}]  }
   0x1   :  { %10714 = sst [smem:[#allocation19_spill]] %s10697_s0 }
   0x2   :  { %10715 = sst [smem:[#allocation20_spill]] %s10699_s2 }
   0x3   :  { %10716 = sst [smem:[#allocation21_spill]] %s10702_s5 }
   0x4   :  { %10 = vsyncpa [#allocation3], 0 }
   0x5   :  { %12 = vsyncpa [#allocation3 + $0x1], 0 }
   0x6   :  { %13 = vsyncpa [#allocation5], 0 }
   0x7   :  { %15 = vsyncpa [#allocation5 + $0x1], 0 }
   0x8   :  { %16 = vsyncpa [#allocation8], 0 }
   0x9   :  { %18 = vsyncpa [#allocation8 + $0x1], 0  ;;  %s9383_s18 = smov 0   ;;  %s9385_s19 = smov 0  }
   0xa   :  { %s9387_s20 = smov 0   ;;  %s9389_s21 = smov 0  }
   0xb   :  { %s9391_s22 = smov 0   ;;  %s9393_s23 = smov 0  }
   0xc   :  { %s9395_s24 = smov 0   ;;  %s9397_s25 = smov 0  }
   0xd   :  { %s9399_s26 = smov 0   ;;  %s9401_s27 = smov 0  }
   0xe   :  { %s9403_s28 = smov 0  }
   0xf LB: > { %10717 = sst [smem:[#allocation12_spill]] %s9327_s24  ;;  %s10703_s29 = sadd.s32 4294967295, %s9343_s28   ;;  %s9343_s28 = sphi %s9403_s28, %s24_s28   ;;  %s9339_s27 = sphi %s9401_s27, %s10753_s27   ;;  %s9335_s26 = sphi %s9399_s26, %s10761_s26   ;;  %s9331_s25 = sphi %s9397_s25, %s10751_s25   ;;  %s9327_s24 = sphi %s9395_s24, %s10760_s24   ;;  %s9323_s23 = sphi %s9393_s23, %s10759_s23   ;;  %s9319_s22 = sphi %s9391_s22, %s10758_s22   ;;  %s9315_s21 = sphi %s9389_s21, %s10757_s21   ;;  %s9311_s20 = sphi %s9387_s20, %s10756_s20   ;;  %s9307_s19 = sphi %s9385_s19, %s10755_s19   ;;  %s9303_s18 = sphi %s9383_s18, %s10754_s18  }
  0x10   : > { %10718 = sst [smem:[#allocation13_spill]] %s9331_s25  ;;  %s33_s30 = sadd.s32 1, %s9335_s26 }
  0x11   : > { %10719 = sst [smem:[#allocation14_spill]] %s9339_s27  ;;  %p34_p0 = scmp.ge.s32.totalorder %s33_s30, 2 }
  0x12   : > { %s36_s6 = sadd.s32 1, %s9339_s27  ;;  %s71_s7 = sadd.s32 1, %s9323_s23 }
  0x13   : > { %p78_p1 = scmp.ne.s32.totalorder %s9323_s23, %s9319_s22  ;;  %s10763_s30 = smov (%p34_p0, %s33_s30), 0 }
  0x14   : > { %10720 = sst [smem:[#allocation15_spill]] %s10763_s30  ;;  %s10765_s6 = smov (!%p34_p0, %s36_s6), %s9339_s27 }
  0x15   : > { %s66_s8 = ssub.s32 %s9335_s26, %s10763_s30  ;;  %p79_p2 = scmp.eq.s32.totalorder %s9343_s28, 0 }
  0x16   : > { %p38_p3 = scmp.ge.s32.totalorder %s10765_s6, 2  ;;  %p84_p4 = scmp.ne.s32.totalorder %s9319_s22, %s9315_s21 }
  0x17   : > { %p9451_p5 = por %p79_p2, %p78_p1  ;;  %p9457_p6 = scmp.eq.s32.totalorder %s10703_s29, 0 }
  0x18   : > { %s10767_s6 = smov (%p38_p3, %s10765_s6), 0  ;;  %s97_s12 = sadd.s32 1, %s9311_s20 }
  0x19   : > { %10723 = sst [smem:[#allocation16_spill]] %s10767_s6  ;;  %p9465_p7 = por %p9457_p6, %p84_p4 }
  0x1a   : > { %s67_s13 = ssub.s32 %s9339_s27, %s10767_s6  ;;  %p104_p8 = scmp.ne.s32.totalorder %s9311_s20, %s9307_s19 }
  0x1b   : > { %s10724_s11 = scalar_select %p9465_p7, 1, 0 }
  0x1c   : > { %s68_s14 = sor.u32 %s67_s13, %s66_s8  ;;  %p95_p9 = scmp.eq.s32.totalorder %s67_s13, 0 }
  0x1d   : > { %p69_p10 = scmp.eq.s32.totalorder %s68_s14, 0  ;;  %p9476_p11 = por %p104_p8, %p79_p2 }
  0x1e   : > { %s9481_s16 = scalar_select %p95_p9, %s9311_s20, %s97_s12  }
  0x1f   : > { %s9484_s17 = scalar_select %p69_p10, %s9323_s23, %s71_s7  }
  0x20   : > { %10726 = sst [smem:[#allocation17_spill]] %s9481_s16  ;;  %p110_p12 = scmp.ne.s32.totalorder %s9307_s19, %s9303_s18 }
  0x21   : > { %10727 = sst [smem:[#allocation18_spill]] %s9484_s17  ;;  %p7763_p13 = scmp.lt.s32.totalorder %s9343_s28, 4 }
  0x22   : > { %s245_s21 = sand.u32 1, %s9343_s28   ;;  %p9492_p0 = por %p110_p12, %p9457_p6 }
  0x23   : > { %p9498_p1 = pnand %p7763_p13, %p9451_p5  ;;  %s10705_s14 = sand.u32 1, %s9311_s20  }
  0x24   : > { %s10728_s8 = scalar_select %p9492_p0, 1, 0 }
  0x25   : > { %s10729_s13 = scalar_select %p9498_p1, 1, 0 }
  0x26   : > { %s9505_s12 = sshll.u32 %s10705_s14, 2  ;;  %s9508_s7 = sshll.u32 %s9339_s27, 6 }
  0x27   : > { %s10730_s2 = sld [smem:[#allocation20_spill]]  ;;  %s249_s9 = scalar_lea.vmem [#allocation4], %s9505_s12 }
  0x28   : > { %s257_s6 = sshll.u32 %s249_s9, 4  ;;  %p9521_p2 = pnand %p7763_p13, %p9476_p11  ;;  %s9517_s6 = int_to_ptr.vmem [resolvable:$true] %s257_s6 }
  0x29   : > { %s9527_s30 = scalar_lea.sflag [#allocation5], %s245_s21 }
  0x2a   : > { %s10731_s14 = scalar_select %p9521_p2, 1, 0 }
  0x2b   : > { %p9533_p6 = pneg %p9521_p2 }
  0x2d   : > { %s9514_s10 = scalar_lea.hbm %s10730_s2, %s9508_s7  ;;  %s9130_s17 = scalar_lea.hbm %s10730_s2, 128 }
  0x2e   : > { %s9125_s29 = scalar_lea.hbm %s9514_s10, 64  ;;  %p9131_p10 = scmp.lt.u32.totalorder %s9514_s10, %s10730_s2 }
  0x2f   : > { %p9126_p5 = scmp.ne.s32.totalorder %s9514_s10, %s9125_s29  ;;  %p9132_p11 = scmp.lt.u32.totalorder %s9130_s17, %s9125_s29 }
  0x30   : > { %p9134_p13 = scmp.lt.u32.totalorder %s9125_s29, %s9514_s10 }
  0x31   : > { %p9128_p8 = pnand %p9533_p6, %p9126_p5  ;;  %p9133_p12 = por %p9132_p11, %p9131_p10 }
  0x33   : > { %p9129_p9 = pneg %p9128_p8  ;;  %p9135_p3 = por %p9134_p13, %p9133_p12 }
  0x35   : > { %p9136_p4 = pnand %p9135_p3, %p9129_p9 }
  0x37   : > { %9139 = shalt.err (!%p9136_p4)
}
  0x38   : > { %s9140_s21 = scalar_lea.vmem %s9517_s6, 64  ;;  %s9345_s15 = smov [#allocation4]  }
  0x39   : > { %p9141_p5 = scmp.ne.s32.totalorder %s9517_s6, %s9140_s21  ;;  %s9145_s9 = sshll.u32 %s9345_s15, 4  ;;  %s9146_s9 = int_to_ptr.vmem [resolvable:$false] %s9145_s9 }
  0x3a   : > { %s9147_s0 = scalar_lea.vmem %s9146_s9, 128  ;;  %p9148_p7 = scmp.lt.s32.totalorder %s9517_s6, %s9146_s9 }
  0x3b   : > { %p9143_p8 = pnand %p9141_p5, %p9533_p6  ;;  %p9149_p1 = scmp.lt.s32.totalorder %s9147_s0, %s9140_s21 }
  0x3d   : > { %p9144_p0 = pneg %p9143_p8  ;;  %p9150_p10 = por %p9149_p1, %p9148_p7 }
  0x3f   : > { %p9151_p11 = pnand %p9150_p10, %p9144_p0 }
  0x41   : > { %9154 = shalt.err (!%p9151_p11)
}
  0x42   : > { %7756 = dma.hbm_to_vmem [thread:$0]  (!%p9521_p2), %s9514_s10, 64, %s9517_s6, %s9527_s30  }
  0x43   : > { %p10733_p3 = scmp.lt.s32.totalorder %s9343_s28, 5  ;;  %p10734_p4 = scmp.ge.s32.totalorder %s9343_s28, 1 }
  0x44   : > { %s221_s17 = sand.u32 1, %s9323_s23   ;;  %s5169_s29 = sshll.u32 %s9339_s27, 2 }
  0x45   : > { %p9561_p9 = pnand %p10734_p4, %p10733_p3  ;;  %s7740_s21 = smul.u32 6656, %s221_s17 }
  0x46   : > { %s5192_s15 = smul.u32 3328, %s9335_s26  ;;  %s9575_s10 = scalar_lea.sflag [#allocation3], %s221_s17 }
  0x47   : > { %s10735_s16 = scalar_select %p9561_p9, 1, 0 }
  0x48   : > { %s232_s9 = sadd.s32 %s5192_s15, %s5169_s29  ;;  %s225_s0 = scalar_lea.vmem [#allocation2], %s7740_s21 }
  0x49   : > { %s235_s2 = sshll.u32 %s225_s0, 4  ;;  %s5171_s5 = sshll.u32 %s232_s9, 6  ;;  %s9568_s2 = int_to_ptr.vmem [resolvable:$true] %s235_s2 }
  0x4a   : > { %s9573_s6 = scalar_lea.hbm %s10698_s1, %s5171_s5  ;;  %p10736_p0 = scmp.ne.s32.totalorder %s10729_s13, 0 }
  0x4b   : > { %s9155_s27 = scalar_lea.hbm %s9573_s6, 106496  ;;  %s9160_s24 = scalar_lea.hbm %s10698_s1, 425984 }
  0x4c   : > { %p9156_p7 = scmp.ne.s32.totalorder %s9573_s6, %s9155_s27  ;;  %p9157_p1 = pneg %p10736_p0 }
  0x4d   : > { %p9161_p5 = scmp.lt.u32.totalorder %s9573_s6, %s10698_s1  ;;  %p9162_p8 = scmp.lt.u32.totalorder %s9160_s24, %s9155_s27 }
  0x4e   : > { %p9158_p12 = pnand %p9157_p1, %p9156_p7  ;;  %p9164_p11 = scmp.lt.u32.totalorder %s9155_s27, %s9573_s6 }
  0x4f   : > { %p9163_p10 = por %p9162_p8, %p9161_p5 }
  0x50   : > { %p9159_p13 = pneg %p9158_p12 }
  0x51   : > { %p9165_p3 = por %p9164_p11, %p9163_p10 }
  0x53   : > { %p9166_p4 = pnand %p9165_p3, %p9159_p13 }
  0x55   : > { %9169 = shalt.err (!%p9166_p4)
}
  0x56   : > { %s9170_s17 = scalar_lea.vmem %s9568_s2, 106496  ;;  %s9346_s15 = smov [#allocation2]  }
  0x57   : > { %p9171_p7 = scmp.ne.s32.totalorder %s9568_s2, %s9170_s17  ;;  %s9175_s9 = sshll.u32 %s9346_s15, 4  ;;  %s9176_s9 = int_to_ptr.vmem [resolvable:$false] %s9175_s9 }
  0x58   : > { %s9177_s0 = scalar_lea.vmem %s9176_s9, 212992  ;;  %p9178_p2 = scmp.lt.s32.totalorder %s9568_s2, %s9176_s9 }
  0x59   : > { %p9173_p12 = pnand %p9171_p7, %p9157_p1  ;;  %p9179_p5 = scmp.lt.s32.totalorder %s9177_s0, %s9170_s17 }
  0x5b   : > { %p9174_p9 = pneg %p9173_p12  ;;  %p9180_p8 = por %p9179_p5, %p9178_p2 }
  0x5d   : > { %p9181_p10 = pnand %p9180_p8, %p9174_p9 }
  0x5f   : > { %9184 = shalt.err (!%p9181_p10)
}
  0x60   : > { %s9347_s27 = smov 512   ;;  %s9348_s29 = smov 256  }
  0x61   : > { %s9349_s21 = smov 16   ;;  %s9607_s25 = scalar_lea.hbm %s10700_s3, %s9508_s7 }
  0x62   : > { %7753 = dma.hbm_to_vmem [thread:$0]  (!%p10736_p0), %s9573_s6, 106496, %s9568_s2, %s9575_s10, %s9347_s27, %s9348_s29, %s9349_s21  }
  0x63   : > { %s268_s17 = scalar_lea.vmem [#allocation6], %s9505_s12  ;;  %s9185_s9 = scalar_lea.hbm %s9607_s25, 64 }
  0x64   : > { %s276_s15 = sshll.u32 %s268_s17, 4  ;;  %p9186_p2 = scmp.ne.s32.totalorder %s9607_s25, %s9185_s9  ;;  %s277_s15 = int_to_ptr.vmem [resolvable:$true] %s276_s15 }
  0x65   : > { %s9190_s2 = scalar_lea.hbm %s10700_s3, 128  ;;  %p9191_p0 = scmp.lt.u32.totalorder %s9607_s25, %s10700_s3 }
  0x66   : > { %p9188_p9 = pnand %p9186_p2, %p9533_p6  ;;  %p9192_p13 = scmp.lt.u32.totalorder %s9190_s2, %s9185_s9 }
  0x67   : > { %p9194_p3 = scmp.lt.u32.totalorder %s9185_s9, %s9607_s25 }
  0x68   : > { %p9189_p1 = pneg %p9188_p9  ;;  %p9193_p11 = por %p9192_p13, %p9191_p0 }
  0x6a   : > { %p9195_p4 = por %p9194_p3, %p9193_p11 }
  0x6c   : > { %p9196_p7 = pnand %p9195_p4, %p9189_p1 }
  0x6e   : > { %9199 = shalt.err (!%p9196_p7)
}
  0x6f   : > { %s9200_s27 = scalar_lea.vmem %s277_s15, 64  ;;  %s9350_s29 = smov [#allocation6]  }
  0x70   : > { %p9201_p12 = scmp.ne.s32.totalorder %s277_s15, %s9200_s27  ;;  %s9205_s21 = sshll.u32 %s9350_s29, 4  ;;  %s9206_s21 = int_to_ptr.vmem [resolvable:$false] %s9205_s21 }
  0x71   : > { %s9207_s24 = scalar_lea.vmem %s9206_s21, 128  ;;  %p9208_p10 = scmp.lt.s32.totalorder %s277_s15, %s9206_s21 }
  0x72   : > { %p9203_p5 = pnand %p9201_p12, %p9533_p6  ;;  %p9209_p2 = scmp.lt.s32.totalorder %s9207_s24, %s9200_s27 }
  0x74   : > { %p9204_p8 = pneg %p9203_p5  ;;  %p9210_p9 = por %p9209_p2, %p9208_p10 }
  0x76   : > { %p9211_p0 = pnand %p9210_p9, %p9204_p8 }
  0x78   : > { %9214 = shalt.err (!%p9211_p0)
}
  0x79   : > { %p10737_p13 = scmp.ne.s32.totalorder %s10731_s14, 0  ;;  %s9632_s9 = scalar_lea.hbm %s10701_s4, %s9508_s7 }
  0x7a   : > { %s287_s0 = scalar_lea.vmem [#allocation7], %s9505_s12  ;;  %s10738_s2 = sand.u32 1, %s9311_s20  }
  0x7b   : > { %7759 = dma.hbm_to_vmem [thread:$0]  (!%p10737_p13), %s9607_s25, 64, %s277_s15, %s9527_s30  }
  0x7c   : > { %s295_s13 = sshll.u32 %s287_s0, 4  ;;  %s284_s6 = scalar_lea.sflag [#allocation8], %s10738_s2  ;;  %s296_s13 = int_to_ptr.vmem [resolvable:$true] %s295_s13 }
  0x7d   : > { %s9215_s10 = scalar_lea.hbm %s9632_s9, 64  ;;  %s9220_s15 = scalar_lea.hbm %s10701_s4, 128 }
  0x7e   : > { %p9216_p1 = scmp.ne.s32.totalorder %s9632_s9, %s9215_s10  ;;  %p9221_p4 = scmp.lt.u32.totalorder %s9632_s9, %s10701_s4 }
  0x7f   : > { %p9222_p7 = scmp.lt.u32.totalorder %s9220_s15, %s9215_s10  ;;  %p9224_p5 = scmp.lt.u32.totalorder %s9215_s10, %s9632_s9 }
  0x80   : > { %p9218_p11 = pnand %p9216_p1, %p9533_p6 }
  0x81   : > { %p9223_p12 = por %p9222_p7, %p9221_p4 }
  0x82   : > { %p9219_p3 = pneg %p9218_p11 }
  0x83   : > { %p9225_p8 = por %p9224_p5, %p9223_p12 }
  0x85   : > { %p9226_p10 = pnand %p9225_p8, %p9219_p3 }
  0x87   : > { %9229 = shalt.err (!%p9226_p10)
}
  0x88   : > { %s9230_s12 = scalar_lea.vmem %s296_s13, 64  ;;  %s9351_s29 = smov [#allocation7]  }
  0x89   : > { %p9231_p2 = scmp.ne.s32.totalorder %s296_s13, %s9230_s12  ;;  %s9235_s21 = sshll.u32 %s9351_s29, 4  ;;  %s9236_s21 = int_to_ptr.vmem [resolvable:$false] %s9235_s21 }
  0x8a   : > { %s9237_s24 = scalar_lea.vmem %s9236_s21, 128  ;;  %p9238_p1 = scmp.lt.s32.totalorder %s296_s13, %s9236_s21 }
  0x8b   : > { %p9233_p9 = pnand %p9231_p2, %p9533_p6  ;;  %p9239_p11 = scmp.lt.s32.totalorder %s9237_s24, %s9230_s12 }
  0x8d   : > { %p9234_p0 = pneg %p9233_p9  ;;  %p9240_p13 = por %p9239_p11, %p9238_p1 }
  0x8f   : > { %p9241_p4 = pnand %p9240_p13, %p9234_p0 }
  0x91   : > { %9244 = shalt.err (!%p9241_p4)
}
  0x92   : > { %p10739_p7 = scmp.ne.s32.totalorder %s10731_s14, 0  ;;  %p10740_p3 = scmp.ne.s32.totalorder %s10735_s16, 0 }
  0x93   : > { %s306_s18 = sand.u32 (!%p10740_p3), 1, %s9319_s22   ;;  %p10741_p6 = scmp.ne.s32.totalorder (!%p10740_p3), %s10724_s11, 0 }
  0x94   : > { %7762 = dma.hbm_to_vmem [thread:$0]  (!%p10739_p7), %s9632_s9, 64, %s296_s13, %s284_s6  }
  0x95   : > { %304 = sbr.rel (%p10740_p3) target bundleno = 1307 (0x51b), region = 40  ;;  %s307_s17 = scalar_lea.sflag (!%p10740_p3), [#allocation3], %s306_s18 }
  0x96   : > { %s7741_s5 = smul.u32 (!%p10740_p3), 6656, %s306_s18 }
  0x98   : > { %s9657_s0 = scalar_lea.vmem (!%p10740_p3), [#allocation2], %s7741_s5 }
  0x9c   : > { %9290 = dma.done.wait (%p10741_p6), %s307_s17, 106496  }
  0x9d   : > { %9292 = vsyncadd (%p10741_p6), %s307_s17, 4294860800  ;;  %s10742_s2 = sadd.s32 4294967295, %s9343_s28   ;;  %s317_s9 = sand.u32 1, %s9307_s19  }
  0x9e   : > { %s315_s14 = sand.u32 1, %s10742_s2   ;;  %s9666_s16 = sshll.u32 %s317_s9, 2 }
  0x9f   : > { %s316_s13 = scalar_lea.sflag [#allocation5], %s315_s14  ;;  %s319_s6 = scalar_lea.vmem [#allocation4], %s9666_s16 }
  0xa0   : > { %p10743_p13 = scmp.ne.s32.totalorder %s10728_s8, 0 }
  0xa2   : > { %9294 = dma.done.wait (%p10743_p13), %s316_s13, 128  }
  0xa3   : > { %9296 = vsyncadd (%p10743_p13), %s316_s13, 4294967168  ;;  %s328_s11 = scalar_lea.vmem [#allocation6], %s9666_s16  ;;  %s334_s10 = scalar_lea.sflag [#allocation8], %s317_s9 }
  0xa4   : > { %s337_s30 = scalar_lea.vmem [#allocation7], %s9666_s16 }
  0xa5   : > { %9298 = dma.done.wait (%p10743_p13), %s334_s10, 64  }
  0xa6   : > { %9300 = vsyncadd (%p10743_p13), %s334_s10, 4294967232  ;;  %s10744_s25 = sld [smem:[#allocation12_spill]]  ;;  %s10745_s15 = sld [smem:[#allocation13_spill]] }
  0xa7   : > { %s10746_s18 = sld [smem:[#allocation21_spill]]  ;;  %s10747_s14 = sld [smem:[#allocation19_spill]] }
  0xac   : > { %s384_s7 = smul.u32 26, %s10744_s25  ;;  %s5186_s27 = sshll.u32 %s10745_s15, 2 }
  0xad   : > { %p396_p12 = scmp.lt.s32.totalorder %s5186_s27, 7  ;;  %p5188_p8 = scmp.ne.s32.totalorder %s10744_s25, 0 }
  0xae   : > { %p385_p5 = scmp.lt.s32.totalorder %s384_s7, 51  ;;  %v9352_v0 = vmov (!%p5188_p8), 0.0  }
  0xaf   : > { %s10769_s27 = smov (!%p396_p12, %s5186_s27), 7  ;;  %404 = sbr.rel (%p5188_p8) target bundleno = 182 (0xb6), region = 60 }
  0xb0   : > { %s10771_s7 = smov (!%p385_p5, %s384_s7), 51  ;;  %s5187_s12 = sshll.u32 %s10769_s27, 2 }
  0xb1   : > { %s5185_s29 = sshll.u32 %s10771_s7, 2  ;;  %s9684_s5 = scalar_lea.vmem %s10746_s18, %s5187_s12 }
  0xb2   : > { %s9689_s8 = scalar_lea.vmem %s10747_s14, %s5185_s29  ;;  %405 = vst [vmem:[%s9684_s5] sm:$0xff] (!%p5188_p8), %v9352_v0  ;;  %406 = vst [vmem:[%s9684_s5 + $0x8] sm:$0xff] (!%p5188_p8), %v9352_v0 }
  0xb6 PF: > { %v7856_v1 = vld [vmem:[%s9657_s0 + $0x4] ss:$16 sps:$4 sm:$0xff]   ;;  %v7858_v2 = vld [vmem:[%s9657_s0 + $0xc] ss:$16 sps:$4 sm:$0xff]   ;;  %v7860_v3 = vld [vmem:[%s9657_s0] ss:$16 sps:$4 sm:$0xff]  }
  0xb7   : > { %5197 = vmatprep.subr.bf16.mxu0 %v7856_v1  ;;  %v7861_v4 = vld [vmem:[%s9657_s0 + $0x8] ss:$16 sps:$4 sm:$0xff]   ;;  %6029 = vmatprep.subr.bf16.mxu1 %v7858_v2  ;;  %v7862_v5 = vld [vmem:[%s9657_s0 + $0x24] ss:$16 sps:$4 sm:$0xff]   ;;  %v7864_v6 = vld [vmem:[%s9657_s0 + $0x2c] ss:$16 sps:$4 sm:$0xff]  }
  0xb8   : > { %5199 = vmatpush1.bf16.msra.mxu0 %v7860_v3  ;;  %6031 = vmatpush1.bf16.msra.mxu1 %v7861_v4  ;;  %v7866_v7 = vld [vmem:[%s9657_s0 + $0x20] ss:$16 sps:$4 sm:$0xff]   ;;  %v7867_v8 = vld [vmem:[%s9657_s0 + $0x28] ss:$16 sps:$4 sm:$0xff]   ;;  %v7868_v9 = vld [vmem:[%s9657_s0 + $0x44] ss:$16 sps:$4 sm:$0xff]  }
  0xb9   : > { %5201 = vmatprep.subr.bf16.mxu0 %v7862_v5  ;;  %6033 = vmatprep.subr.bf16.mxu1 %v7864_v6  ;;  %v7870_v10 = vld [vmem:[%s9657_s0 + $0x4c] ss:$16 sps:$4 sm:$0xff]   ;;  %v7872_v11 = vld [vmem:[%s9657_s0 + $0x40] ss:$16 sps:$4 sm:$0xff]   ;;  %v7873_v12 = vld [vmem:[%s9657_s0 + $0x48] ss:$16 sps:$4 sm:$0xff]  }
  0xba   : > { %v7874_v13 = vld [vmem:[%s9657_s0 + $0x64] ss:$16 sps:$4 sm:$0xff]   ;;  %v7876_v14 = vld [vmem:[%s9657_s0 + $0x6c] ss:$16 sps:$4 sm:$0xff]   ;;  %v7878_v15 = vld [vmem:[%s9657_s0 + $0x60] ss:$16 sps:$4 sm:$0xff]  }
  0xbb   : > { %v7879_v16 = vld [vmem:[%s9657_s0 + $0x68] ss:$16 sps:$4 sm:$0xff]   ;;  %v7880_v17 = vld [vmem:[%s9657_s0 + $0x84] ss:$16 sps:$4 sm:$0xff]   ;;  %v7882_v18 = vld [vmem:[%s9657_s0 + $0x8c] ss:$16 sps:$4 sm:$0xff]  }
  0xbc   : > { %5203 = vmatpush1.bf16.msra.mxu0 %v7866_v7  ;;  %6035 = vmatpush1.bf16.msra.mxu1 %v7867_v8  ;;  %v7884_v19 = vld [vmem:[%s9657_s0 + $0x80] ss:$16 sps:$4 sm:$0xff]   ;;  %v7885_v20 = vld [vmem:[%s9657_s0 + $0x88] ss:$16 sps:$4 sm:$0xff]   ;;  %v7886_v21 = vld [vmem:[%s9657_s0 + $0xa4] ss:$16 sps:$4 sm:$0xff]  }
  0xbd   : > { %5205 = vmatprep.subr.bf16.mxu0 %v7868_v9  ;;  %6037 = vmatprep.subr.bf16.mxu1 %v7870_v10  ;;  %v7888_v22 = vld [vmem:[%s9657_s0 + $0xac] ss:$16 sps:$4 sm:$0xff]   ;;  %v7890_v23 = vld [vmem:[%s9657_s0 + $0xa0] ss:$16 sps:$4 sm:$0xff]   ;;  %v7891_v24 = vld [vmem:[%s9657_s0 + $0xa8] ss:$16 sps:$4 sm:$0xff]  }
  0xbe   : > { %v7892_v25 = vld [vmem:[%s9657_s0 + $0xc4] ss:$16 sps:$4 sm:$0xff]   ;;  %v7894_v26 = vld [vmem:[%s9657_s0 + $0xcc] ss:$16 sps:$4 sm:$0xff]   ;;  %v7896_v27 = vld [vmem:[%s9657_s0 + $0xc0] ss:$16 sps:$4 sm:$0xff]  }
  0xbf   : > { %v7897_v28 = vld [vmem:[%s9657_s0 + $0xc8] ss:$16 sps:$4 sm:$0xff]   ;;  %v7898_v29 = vld [vmem:[%s9657_s0 + $0xe4] ss:$16 sps:$4 sm:$0xff]   ;;  %v7900_v30 = vld [vmem:[%s9657_s0 + $0xec] ss:$16 sps:$4 sm:$0xff]  }
  0xc0   : > { %5207 = vmatpush1.bf16.msra.mxu0 %v7872_v11  ;;  %6039 = vmatpush1.bf16.msra.mxu1 %v7873_v12  ;;  %v7902_v31 = vld [vmem:[%s9657_s0 + $0xe0] ss:$16 sps:$4 sm:$0xff]   ;;  %v7903_v32 = vld [vmem:[%s9657_s0 + $0xe8] ss:$16 sps:$4 sm:$0xff]   ;;  %v7904_v33 = vld [vmem:[%s9657_s0 + $0x104] ss:$16 sps:$4 sm:$0xff]  }
  0xc1   : > { %5209 = vmatprep.subr.bf16.mxu0 %v7874_v13  ;;  %6041 = vmatprep.subr.bf16.mxu1 %v7876_v14  ;;  %v7906_v34 = vld [vmem:[%s9657_s0 + $0x10c] ss:$16 sps:$4 sm:$0xff]   ;;  %v7908_v35 = vld [vmem:[%s9657_s0 + $0x100] ss:$16 sps:$4 sm:$0xff]   ;;  %v7909_v36 = vld [vmem:[%s9657_s0 + $0x108] ss:$16 sps:$4 sm:$0xff]  }
  0xc2   : > { %v7910_v37 = vld [vmem:[%s9657_s0 + $0x124] ss:$16 sps:$4 sm:$0xff]   ;;  %v7912_v38 = vld [vmem:[%s9657_s0 + $0x12c] ss:$16 sps:$4 sm:$0xff]   ;;  %v7914_v39 = vld [vmem:[%s9657_s0 + $0x120] ss:$16 sps:$4 sm:$0xff]  }
  0xc3   : > { %v7915_v40 = vld [vmem:[%s9657_s0 + $0x128] ss:$16 sps:$4 sm:$0xff]   ;;  %v7916_v41 = vld [vmem:[%s9657_s0 + $0x144] ss:$16 sps:$4 sm:$0xff]   ;;  %v7918_v42 = vld [vmem:[%s9657_s0 + $0x14c] ss:$16 sps:$4 sm:$0xff]  }
  0xc4   : > { %5211 = vmatpush1.bf16.msra.mxu0 %v7878_v15  ;;  %6043 = vmatpush1.bf16.msra.mxu1 %v7879_v16  ;;  %v7920_v43 = vld [vmem:[%s9657_s0 + $0x140] ss:$16 sps:$4 sm:$0xff]   ;;  %v7921_v44 = vld [vmem:[%s9657_s0 + $0x148] ss:$16 sps:$4 sm:$0xff]   ;;  %v7922_v45 = vld [vmem:[%s9657_s0 + $0x164] ss:$16 sps:$4 sm:$0xff]  }
  0xc5   : > { %5213 = vmatprep.subr.bf16.mxu0 %v7880_v17  ;;  %6045 = vmatprep.subr.bf16.mxu1 %v7882_v18  ;;  %v7924_v46 = vld [vmem:[%s9657_s0 + $0x16c] ss:$16 sps:$4 sm:$0xff]   ;;  %v2905_v47 = vld [vmem:[%s9689_s8] sm:$0xff]  ;;  %v7927_v50 = vld [vmem:[%s9657_s0 + $0x168] ss:$16 sps:$4 sm:$0xff]  }
  0xc6   : > { %v7926_v48 = vld [vmem:[%s9657_s0 + $0x160] ss:$16 sps:$4 sm:$0xff]   ;;  %v2931_v49 = vcombine.high %v2905_v47, %v2905_v47  ;;  %v7928_v51 = vld [vmem:[%s9657_s0 + $0x184] ss:$16 sps:$4 sm:$0xff]   ;;  %v7930_v52 = vld [vmem:[%s9657_s0 + $0x18c] ss:$16 sps:$4 sm:$0xff]  }
  0xc7   : > { %v7932_v53 = vld [vmem:[%s9657_s0 + $0x180] ss:$16 sps:$4 sm:$0xff]   ;;  %v7933_v54 = vld [vmem:[%s9657_s0 + $0x188] ss:$16 sps:$4 sm:$0xff]   ;;  %v7934_v55 = vld [vmem:[%s9657_s0 + $0x1a4] ss:$16 sps:$4 sm:$0xff]  }
  0xc8   : > { %5215 = vmatpush1.bf16.msra.mxu0 %v7884_v19  ;;  %6047 = vmatpush1.bf16.msra.mxu1 %v7885_v20  ;;  %v7936_v56 = vld [vmem:[%s9657_s0 + $0x1ac] ss:$16 sps:$4 sm:$0xff]   ;;  %v7938_v57 = vld [vmem:[%s9657_s0 + $0x1a0] ss:$16 sps:$4 sm:$0xff]   ;;  %v7939_v58 = vld [vmem:[%s9657_s0 + $0x1a8] ss:$16 sps:$4 sm:$0xff]  }
  0xc9   : > { %5217 = vmatprep.subr.bf16.mxu0 %v7886_v21  ;;  %6049 = vmatprep.subr.bf16.mxu1 %v7888_v22  ;;  %v7940_v59 = vld [vmem:[%s9657_s0 + $0x1c4] ss:$16 sps:$4 sm:$0xff]   ;;  %v7942_v60 = vld [vmem:[%s9657_s0 + $0x1cc] ss:$16 sps:$4 sm:$0xff]   ;;  %v7944_v61 = vld [vmem:[%s9657_s0 + $0x1c0] ss:$16 sps:$4 sm:$0xff]  }
  0xca   : > { %3021 = vmatprep.mubr.f32.mxu0 %v2931_v49  ;;  %3944 = vmatprep.mubr.f32.mxu1 %v2931_v49  ;;  %v7945_v62 = vld [vmem:[%s9657_s0 + $0x1c8] ss:$16 sps:$4 sm:$0xff]   ;;  %v7946_v63 = vld [vmem:[%s9657_s0 + $0x1e4] ss:$16 sps:$4 sm:$0xff]   ;;  %v7948_v0 = vld [vmem:[%s9657_s0 + $0x1ec] ss:$16 sps:$4 sm:$0xff]  }
  0xcb   : > { %v7950_v1 = vld [vmem:[%s9657_s0 + $0x1e0] ss:$16 sps:$4 sm:$0xff]   ;;  %v7951_v2 = vld [vmem:[%s9657_s0 + $0x1e8] ss:$16 sps:$4 sm:$0xff]   ;;  %v7953_v3 = vld [vmem:[%s9657_s0 + $0x204] ss:$16 sps:$4 sm:$0xff]  }
  0xcc   : > { %5219 = vmatpush1.bf16.msra.mxu0 %v7890_v23  ;;  %6051 = vmatpush1.bf16.msra.mxu1 %v7891_v24  ;;  %v7956_v4 = vld [vmem:[%s9657_s0 + $0x20c] ss:$16 sps:$4 sm:$0xff]   ;;  %v7955_v5 = vld [vmem:[%s9657_s0 + $0x200] ss:$16 sps:$4 sm:$0xff]   ;;  %v7958_v6 = vld [vmem:[%s9657_s0 + $0x208] ss:$16 sps:$4 sm:$0xff]  }
  0xcd   : > { %5221 = vmatprep.subr.bf16.mxu0 %v7892_v25  ;;  %6053 = vmatprep.subr.bf16.mxu1 %v7894_v26  ;;  %v7959_v7 = vld [vmem:[%s9657_s0 + $0x224] ss:$16 sps:$4 sm:$0xff]   ;;  %v7962_v8 = vld [vmem:[%s9657_s0 + $0x22c] ss:$16 sps:$4 sm:$0xff]   ;;  %v7961_v9 = vld [vmem:[%s9657_s0 + $0x220] ss:$16 sps:$4 sm:$0xff]  }
  0xce   : > { %v7964_v10 = vld [vmem:[%s9657_s0 + $0x228] ss:$16 sps:$4 sm:$0xff]   ;;  %v7965_v11 = vld [vmem:[%s9657_s0 + $0x244] ss:$16 sps:$4 sm:$0xff]   ;;  %v7968_v12 = vld [vmem:[%s9657_s0 + $0x24c] ss:$16 sps:$4 sm:$0xff]  }
  0xcf   : > { %v7967_v13 = vld [vmem:[%s9657_s0 + $0x240] ss:$16 sps:$4 sm:$0xff]   ;;  %v7970_v14 = vld [vmem:[%s9657_s0 + $0x248] ss:$16 sps:$4 sm:$0xff]   ;;  %v7971_v15 = vld [vmem:[%s9657_s0 + $0x264] ss:$16 sps:$4 sm:$0xff]  }
  0xd0   : > { %5223 = vmatpush1.bf16.msra.mxu0 %v7896_v27  ;;  %6055 = vmatpush1.bf16.msra.mxu1 %v7897_v28  ;;  %v7974_v16 = vld [vmem:[%s9657_s0 + $0x26c] ss:$16 sps:$4 sm:$0xff]   ;;  %v7973_v17 = vld [vmem:[%s9657_s0 + $0x260] ss:$16 sps:$4 sm:$0xff]   ;;  %v7976_v18 = vld [vmem:[%s9657_s0 + $0x268] ss:$16 sps:$4 sm:$0xff]  }
  0xd1   : > { %5225 = vmatprep.subr.bf16.mxu0 %v7898_v29  ;;  %6057 = vmatprep.subr.bf16.mxu1 %v7900_v30  ;;  %v7977_v19 = vld [vmem:[%s9657_s0 + $0x284] ss:$16 sps:$4 sm:$0xff]   ;;  %v7980_v20 = vld [vmem:[%s9657_s0 + $0x28c] ss:$16 sps:$4 sm:$0xff]   ;;  %v7979_v21 = vld [vmem:[%s9657_s0 + $0x280] ss:$16 sps:$4 sm:$0xff]  }
  0xd2   : > { %v7982_v22 = vld [vmem:[%s9657_s0 + $0x288] ss:$16 sps:$4 sm:$0xff]   ;;  %v7983_v23 = vld [vmem:[%s9657_s0 + $0x2a4] ss:$16 sps:$4 sm:$0xff]   ;;  %v7986_v24 = vld [vmem:[%s9657_s0 + $0x2ac] ss:$16 sps:$4 sm:$0xff]  }
  0xd3   : > { %v7985_v25 = vld [vmem:[%s9657_s0 + $0x2a0] ss:$16 sps:$4 sm:$0xff]   ;;  %v7988_v26 = vld [vmem:[%s9657_s0 + $0x2a8] ss:$16 sps:$4 sm:$0xff]   ;;  %v7989_v27 = vld [vmem:[%s9657_s0 + $0x2c4] ss:$16 sps:$4 sm:$0xff]  }
  0xd4   : > { %5227 = vmatpush1.bf16.msra.mxu0 %v7902_v31  ;;  %6059 = vmatpush1.bf16.msra.mxu1 %v7903_v32  ;;  %v7992_v28 = vld [vmem:[%s9657_s0 + $0x2cc] ss:$16 sps:$4 sm:$0xff]   ;;  %v7991_v31 = vld [vmem:[%s9657_s0 + $0x2c0] ss:$16 sps:$4 sm:$0xff]   ;;  %v7994_v32 = vld [vmem:[%s9657_s0 + $0x2c8] ss:$16 sps:$4 sm:$0xff]  }
  0xd5   : > { %5229 = vmatprep.subr.bf16.mxu0 %v7904_v33  ;;  %6061 = vmatprep.subr.bf16.mxu1 %v7906_v34  ;;  %v9786_v29 = vld [vmem:[%s9689_s8 + $0x8] sm:$0xff]  ;;  %v7995_v33 = vld [vmem:[%s9657_s0 + $0x2e4] ss:$16 sps:$4 sm:$0xff]  }
  0xd6   : > { %v2932_v30 = vcombine.high %v9786_v29, %v9786_v29  ;;  %v7998_v34 = vld [vmem:[%s9657_s0 + $0x2ec] ss:$16 sps:$4 sm:$0xff]   ;;  %v8019_v49 = vld [vmem:[%s9657_s0 + $0x364] ss:$16 sps:$4 sm:$0xff]  }
  0xd8   : > { %5231 = vmatpush1.bf16.msra.mxu0 %v7908_v35  ;;  %6063 = vmatpush1.bf16.msra.mxu1 %v7909_v36  ;;  %v7997_v35 = vld [vmem:[%s9657_s0 + $0x2e0] ss:$16 sps:$4 sm:$0xff]   ;;  %v8000_v36 = vld [vmem:[%s9657_s0 + $0x2e8] ss:$16 sps:$4 sm:$0xff]  }
  0xd9   : > { %5233 = vmatprep.subr.bf16.mxu0 %v7910_v37  ;;  %6065 = vmatprep.subr.bf16.mxu1 %v7912_v38  ;;  %v8001_v37 = vld [vmem:[%s9657_s0 + $0x304] ss:$16 sps:$4 sm:$0xff]   ;;  %v8004_v38 = vld [vmem:[%s9657_s0 + $0x30c] ss:$16 sps:$4 sm:$0xff]  }
  0xdc   : > { %5235 = vmatpush1.bf16.msra.mxu0 %v7914_v39  ;;  %6067 = vmatpush1.bf16.msra.mxu1 %v7915_v40  ;;  %v8003_v39 = vld [vmem:[%s9657_s0 + $0x300] ss:$16 sps:$4 sm:$0xff]   ;;  %v8006_v40 = vld [vmem:[%s9657_s0 + $0x308] ss:$16 sps:$4 sm:$0xff]  }
  0xdd   : > { %5237 = vmatprep.subr.bf16.mxu0 %v7916_v41  ;;  %6069 = vmatprep.subr.bf16.mxu1 %v7918_v42  ;;  %v8007_v41 = vld [vmem:[%s9657_s0 + $0x324] ss:$16 sps:$4 sm:$0xff]   ;;  %v8010_v42 = vld [vmem:[%s9657_s0 + $0x32c] ss:$16 sps:$4 sm:$0xff]  }
  0xe0   : > { %5239 = vmatpush1.bf16.msra.mxu0 %v7920_v43  ;;  %6071 = vmatpush1.bf16.msra.mxu1 %v7921_v44  ;;  %v8009_v43 = vld [vmem:[%s9657_s0 + $0x320] ss:$16 sps:$4 sm:$0xff]   ;;  %v8012_v44 = vld [vmem:[%s9657_s0 + $0x328] ss:$16 sps:$4 sm:$0xff]  }
  0xe1   : > { %5241 = vmatprep.subr.bf16.mxu0 %v7922_v45  ;;  %6073 = vmatprep.subr.bf16.mxu1 %v7924_v46  ;;  %v8013_v45 = vld [vmem:[%s9657_s0 + $0x344] ss:$16 sps:$4 sm:$0xff]   ;;  %v8016_v46 = vld [vmem:[%s9657_s0 + $0x34c] ss:$16 sps:$4 sm:$0xff]  }
  0xe4   : > { %5243 = vmatpush1.bf16.msra.mxu0 %v7926_v48  ;;  %6075 = vmatpush1.bf16.msra.mxu1 %v7927_v50  ;;  %v8018_v48 = vld [vmem:[%s9657_s0 + $0x348] ss:$16 sps:$4 sm:$0xff]   ;;  %v8022_v50 = vld [vmem:[%s9657_s0 + $0x36c] ss:$16 sps:$4 sm:$0xff]  }
  0xe5   : > { %5245 = vmatprep.subr.bf16.mxu0 %v7928_v51  ;;  %6077 = vmatprep.subr.bf16.mxu1 %v7930_v52  ;;  %v8021_v51 = vld [vmem:[%s9657_s0 + $0x360] ss:$16 sps:$4 sm:$0xff]   ;;  %v8024_v52 = vld [vmem:[%s9657_s0 + $0x368] ss:$16 sps:$4 sm:$0xff]  }
  0xe8   : > { %5247 = vmatpush1.bf16.msra.mxu0 %v7932_v53  ;;  %6079 = vmatpush1.bf16.msra.mxu1 %v7933_v54  ;;  %v8025_v53 = vld [vmem:[%s9657_s0 + $0x384] ss:$16 sps:$4 sm:$0xff]   ;;  %v8028_v54 = vld [vmem:[%s9657_s0 + $0x38c] ss:$16 sps:$4 sm:$0xff]  }
  0xe9   : > { %5249 = vmatprep.subr.bf16.mxu0 %v7934_v55  ;;  %6081 = vmatprep.subr.bf16.mxu1 %v7936_v56  ;;  %v8027_v55 = vld [vmem:[%s9657_s0 + $0x380] ss:$16 sps:$4 sm:$0xff]   ;;  %v8030_v56 = vld [vmem:[%s9657_s0 + $0x388] ss:$16 sps:$4 sm:$0xff]  }
  0xec   : > { %5251 = vmatpush1.bf16.msra.mxu0 %v7938_v57  ;;  %6083 = vmatpush1.bf16.msra.mxu1 %v7939_v58  ;;  %v8031_v57 = vld [vmem:[%s9657_s0 + $0x3a4] ss:$16 sps:$4 sm:$0xff]   ;;  %v8034_v58 = vld [vmem:[%s9657_s0 + $0x3ac] ss:$16 sps:$4 sm:$0xff]  }
  0xed   : > { %5253 = vmatprep.subr.bf16.mxu0 %v7940_v59  ;;  %6085 = vmatprep.subr.bf16.mxu1 %v7942_v60  ;;  %v8033_v59 = vld [vmem:[%s9657_s0 + $0x3a0] ss:$16 sps:$4 sm:$0xff]   ;;  %v8036_v60 = vld [vmem:[%s9657_s0 + $0x3a8] ss:$16 sps:$4 sm:$0xff]  }
  0xf0   : > { %5255 = vmatpush1.bf16.msra.mxu0 %v7944_v61  ;;  %6087 = vmatpush1.bf16.msra.mxu1 %v7945_v62  ;;  %v8037_v61 = vld [vmem:[%s9657_s0 + $0x3c4] ss:$16 sps:$4 sm:$0xff]   ;;  %v8040_v62 = vld [vmem:[%s9657_s0 + $0x3cc] ss:$16 sps:$4 sm:$0xff]  }
  0xf1   : > { %5257 = vmatprep.subr.bf16.mxu0 %v7946_v63  ;;  %6089 = vmatprep.subr.bf16.mxu1 %v7948_v0  ;;  %v8039_v63 = vld [vmem:[%s9657_s0 + $0x3c0] ss:$16 sps:$4 sm:$0xff]   ;;  %v8042_v0 = vld [vmem:[%s9657_s0 + $0x3c8] ss:$16 sps:$4 sm:$0xff]  }
  0xf4   : > { %5259 = vmatpush1.bf16.msra.mxu0 %v7950_v1  ;;  %6091 = vmatpush1.bf16.msra.mxu1 %v7951_v2  ;;  %v8043_v1 = vld [vmem:[%s9657_s0 + $0x3e4] ss:$16 sps:$4 sm:$0xff]   ;;  %v8046_v2 = vld [vmem:[%s9657_s0 + $0x3ec] ss:$16 sps:$4 sm:$0xff]  }
  0xf5   : > { %5261 = vmatprep.subr.bf16.mxu0 %v7953_v3  ;;  %6093 = vmatprep.subr.bf16.mxu1 %v7956_v4  ;;  %v8045_v3 = vld [vmem:[%s9657_s0 + $0x3e0] ss:$16 sps:$4 sm:$0xff]   ;;  %v8048_v4 = vld [vmem:[%s9657_s0 + $0x3e8] ss:$16 sps:$4 sm:$0xff]  }
  0xf7   : > { %3022 = vmatmul.mubr.f32.vlgmr.msra.gmra.mrb[0].mxu0 %v2905_v47  ;;  %3945 = vmatmul.mubr.f32.vlgmr.msra.gmra.mrb[0].mxu1 %v2905_v47  ;;  %v8015_v47 = vld [vmem:[%s9657_s0 + $0x340] ss:$16 sps:$4 sm:$0xff]  }
  0xf8   : > { %5263 = vmatpush1.bf16.msra.mxu0 %v7955_v5  ;;  %6095 = vmatpush1.bf16.msra.mxu1 %v7958_v6  ;;  %v8050_v5 = vld [vmem:[%s9657_s0 + $0x404] ss:$16 sps:$4 sm:$0xff]   ;;  %v8053_v6 = vld [vmem:[%s9657_s0 + $0x40c] ss:$16 sps:$4 sm:$0xff]  }
  0xf9   : > { %5265 = vmatprep.subr.bf16.mxu0 %v7959_v7  ;;  %6097 = vmatprep.subr.bf16.mxu1 %v7962_v8  ;;  %v8052_v7 = vld [vmem:[%s9657_s0 + $0x400] ss:$16 sps:$4 sm:$0xff]   ;;  %v8055_v8 = vld [vmem:[%s9657_s0 + $0x408] ss:$16 sps:$4 sm:$0xff]  }
  0xfa   : > { %3092 = vmatprep.mubr.f32.mxu0 %v2932_v30  ;;  %4015 = vmatprep.mubr.f32.mxu1 %v2932_v30  ;;  %v8085_v30 = vld [vmem:[%s9657_s0 + $0x4a8] ss:$16 sps:$4 sm:$0xff]  }
  0xfc   : > { %5267 = vmatpush1.bf16.msra.mxu0 %v7961_v9  ;;  %6099 = vmatpush1.bf16.msra.mxu1 %v7964_v10  ;;  %v8056_v9 = vld [vmem:[%s9657_s0 + $0x424] ss:$16 sps:$4 sm:$0xff]  }
  0xfd   : > { %5269 = vmatprep.subr.bf16.mxu0 %v7965_v11  ;;  %6101 = vmatprep.subr.bf16.mxu1 %v7968_v12  ;;  %v9834_v10 = vld [vmem:[%s9689_s8 + $0x10] sm:$0xff]  ;;  %v8059_v11 = vld [vmem:[%s9657_s0 + $0x42c] ss:$16 sps:$4 sm:$0xff]  }
  0xfe   : > { %v2933_v12 = vcombine.high %v9834_v10, %v9834_v10 }
 0x100   : > { %5271 = vmatpush1.bf16.msra.mxu0 %v7967_v13  ;;  %6103 = vmatpush1.bf16.msra.mxu1 %v7970_v14  ;;  %v8058_v13 = vld [vmem:[%s9657_s0 + $0x420] ss:$16 sps:$4 sm:$0xff]   ;;  %v8061_v14 = vld [vmem:[%s9657_s0 + $0x428] ss:$16 sps:$4 sm:$0xff]  }
 0x101   : > { %5273 = vmatprep.subr.bf16.mxu0 %v7971_v15  ;;  %6105 = vmatprep.subr.bf16.mxu1 %v7974_v16  ;;  %v8062_v15 = vld [vmem:[%s9657_s0 + $0x444] ss:$16 sps:$4 sm:$0xff]   ;;  %v8065_v16 = vld [vmem:[%s9657_s0 + $0x44c] ss:$16 sps:$4 sm:$0xff]  }
 0x104   : > { %5275 = vmatpush1.bf16.msra.mxu0 %v7973_v17  ;;  %6107 = vmatpush1.bf16.msra.mxu1 %v7976_v18  ;;  %v8064_v17 = vld [vmem:[%s9657_s0 + $0x440] ss:$16 sps:$4 sm:$0xff]   ;;  %v8067_v18 = vld [vmem:[%s9657_s0 + $0x448] ss:$16 sps:$4 sm:$0xff]  }
 0x105   : > { %5277 = vmatprep.subr.bf16.mxu0 %v7977_v19  ;;  %6109 = vmatprep.subr.bf16.mxu1 %v7980_v20  ;;  %v8068_v19 = vld [vmem:[%s9657_s0 + $0x464] ss:$16 sps:$4 sm:$0xff]   ;;  %v8071_v20 = vld [vmem:[%s9657_s0 + $0x46c] ss:$16 sps:$4 sm:$0xff]  }
 0x108   : > { %5279 = vmatpush1.bf16.msra.mxu0 %v7979_v21  ;;  %6111 = vmatpush1.bf16.msra.mxu1 %v7982_v22  ;;  %v8070_v21 = vld [vmem:[%s9657_s0 + $0x460] ss:$16 sps:$4 sm:$0xff]   ;;  %v8073_v22 = vld [vmem:[%s9657_s0 + $0x468] ss:$16 sps:$4 sm:$0xff]  }
 0x109   : > { %5281 = vmatprep.subr.bf16.mxu0 %v7983_v23  ;;  %6113 = vmatprep.subr.bf16.mxu1 %v7986_v24  ;;  %v8074_v23 = vld [vmem:[%s9657_s0 + $0x484] ss:$16 sps:$4 sm:$0xff]   ;;  %v8077_v24 = vld [vmem:[%s9657_s0 + $0x48c] ss:$16 sps:$4 sm:$0xff]  }
 0x10c   : > { %5283 = vmatpush1.bf16.msra.mxu0 %v7985_v25  ;;  %6115 = vmatpush1.bf16.msra.mxu1 %v7988_v26  ;;  %v8076_v25 = vld [vmem:[%s9657_s0 + $0x480] ss:$16 sps:$4 sm:$0xff]   ;;  %v8079_v26 = vld [vmem:[%s9657_s0 + $0x488] ss:$16 sps:$4 sm:$0xff]  }
 0x10d   : > { %5285 = vmatprep.subr.bf16.mxu0 %v7989_v27  ;;  %6117 = vmatprep.subr.bf16.mxu1 %v7992_v28  ;;  %v8080_v27 = vld [vmem:[%s9657_s0 + $0x4a4] ss:$16 sps:$4 sm:$0xff]   ;;  %v8083_v28 = vld [vmem:[%s9657_s0 + $0x4ac] ss:$16 sps:$4 sm:$0xff]  }
 0x110   : > { %5287 = vmatpush1.bf16.msra.mxu0 %v7991_v31  ;;  %6119 = vmatpush1.bf16.msra.mxu1 %v7994_v32  ;;  %v8086_v31 = vld [vmem:[%s9657_s0 + $0x4c4] ss:$16 sps:$4 sm:$0xff]   ;;  %v8089_v32 = vld [vmem:[%s9657_s0 + $0x4cc] ss:$16 sps:$4 sm:$0xff]  }
 0x111   : > { %5289 = vmatprep.subr.bf16.mxu0 %v7995_v33  ;;  %6121 = vmatprep.subr.bf16.mxu1 %v7998_v34  ;;  %v8088_v33 = vld [vmem:[%s9657_s0 + $0x4c0] ss:$16 sps:$4 sm:$0xff]   ;;  %v8091_v34 = vld [vmem:[%s9657_s0 + $0x4c8] ss:$16 sps:$4 sm:$0xff]  }
 0x114   : > { %5291 = vmatpush1.bf16.msra.mxu0 %v7997_v35  ;;  %6123 = vmatpush1.bf16.msra.mxu1 %v8000_v36  ;;  %v8092_v35 = vld [vmem:[%s9657_s0 + $0x4e4] ss:$16 sps:$4 sm:$0xff]   ;;  %v8095_v36 = vld [vmem:[%s9657_s0 + $0x4ec] ss:$16 sps:$4 sm:$0xff]  }
 0x115   : > { %5293 = vmatprep.subr.bf16.mxu0 %v8001_v37  ;;  %6125 = vmatprep.subr.bf16.mxu1 %v8004_v38  ;;  %v8094_v37 = vld [vmem:[%s9657_s0 + $0x4e0] ss:$16 sps:$4 sm:$0xff]   ;;  %v8097_v38 = vld [vmem:[%s9657_s0 + $0x4e8] ss:$16 sps:$4 sm:$0xff]  }
 0x118   : > { %5295 = vmatpush1.bf16.msra.mxu0 %v8003_v39  ;;  %6127 = vmatpush1.bf16.msra.mxu1 %v8006_v40  ;;  %v8098_v39 = vld [vmem:[%s9657_s0 + $0x504] ss:$16 sps:$4 sm:$0xff]   ;;  %v8101_v40 = vld [vmem:[%s9657_s0 + $0x50c] ss:$16 sps:$4 sm:$0xff]  }
 0x119   : > { %5297 = vmatprep.subr.bf16.mxu0 %v8007_v41  ;;  %6129 = vmatprep.subr.bf16.mxu1 %v8010_v42  ;;  %v8100_v41 = vld [vmem:[%s9657_s0 + $0x500] ss:$16 sps:$4 sm:$0xff]   ;;  %v8103_v42 = vld [vmem:[%s9657_s0 + $0x508] ss:$16 sps:$4 sm:$0xff]  }
 0x11c   : > { %5299 = vmatpush1.bf16.msra.mxu0 %v8009_v43  ;;  %6131 = vmatpush1.bf16.msra.mxu1 %v8012_v44  ;;  %v8104_v43 = vld [vmem:[%s9657_s0 + $0x524] ss:$16 sps:$4 sm:$0xff]   ;;  %v8107_v44 = vld [vmem:[%s9657_s0 + $0x52c] ss:$16 sps:$4 sm:$0xff]  }
 0x11d   : > { %5301 = vmatprep.subr.bf16.mxu0 %v8013_v45  ;;  %6133 = vmatprep.subr.bf16.mxu1 %v8016_v46  ;;  %v8106_v45 = vld [vmem:[%s9657_s0 + $0x520] ss:$16 sps:$4 sm:$0xff]   ;;  %v8109_v46 = vld [vmem:[%s9657_s0 + $0x528] ss:$16 sps:$4 sm:$0xff]  }
 0x120   : > { %5303 = vmatpush1.bf16.msra.mxu0 %v8015_v47  ;;  %6135 = vmatpush1.bf16.msra.mxu1 %v8018_v48  ;;  %v8110_v47 = vld [vmem:[%s9657_s0 + $0x544] ss:$16 sps:$4 sm:$0xff]   ;;  %v8113_v48 = vld [vmem:[%s9657_s0 + $0x54c] ss:$16 sps:$4 sm:$0xff]  }
 0x121   : > { %5305 = vmatprep.subr.bf16.mxu0 %v8019_v49  ;;  %6137 = vmatprep.subr.bf16.mxu1 %v8022_v50  ;;  %v8112_v49 = vld [vmem:[%s9657_s0 + $0x540] ss:$16 sps:$4 sm:$0xff]   ;;  %v8115_v50 = vld [vmem:[%s9657_s0 + $0x548] ss:$16 sps:$4 sm:$0xff]  }
 0x124   : > { %5307 = vmatpush1.bf16.msra.mxu0 %v8021_v51  ;;  %6139 = vmatpush1.bf16.msra.mxu1 %v8024_v52  ;;  %v8116_v51 = vld [vmem:[%s9657_s0 + $0x564] ss:$16 sps:$4 sm:$0xff]   ;;  %v8119_v52 = vld [vmem:[%s9657_s0 + $0x56c] ss:$16 sps:$4 sm:$0xff]  }
 0x125   : > { %5309 = vmatprep.subr.bf16.mxu0 %v8025_v53  ;;  %6141 = vmatprep.subr.bf16.mxu1 %v8028_v54  ;;  %v8118_v53 = vld [vmem:[%s9657_s0 + $0x560] ss:$16 sps:$4 sm:$0xff]   ;;  %v8121_v54 = vld [vmem:[%s9657_s0 + $0x568] ss:$16 sps:$4 sm:$0xff]  }
 0x128   : > { %5311 = vmatpush1.bf16.msra.mxu0 %v8027_v55  ;;  %6143 = vmatpush1.bf16.msra.mxu1 %v8030_v56  ;;  %v8122_v55 = vld [vmem:[%s9657_s0 + $0x584] ss:$16 sps:$4 sm:$0xff]   ;;  %v8125_v56 = vld [vmem:[%s9657_s0 + $0x58c] ss:$16 sps:$4 sm:$0xff]  }
 0x129   : > { %5313 = vmatprep.subr.bf16.mxu0 %v8031_v57  ;;  %6145 = vmatprep.subr.bf16.mxu1 %v8034_v58  ;;  %v8124_v57 = vld [vmem:[%s9657_s0 + $0x580] ss:$16 sps:$4 sm:$0xff]   ;;  %v8127_v58 = vld [vmem:[%s9657_s0 + $0x588] ss:$16 sps:$4 sm:$0xff]  }
 0x12c   : > { %5315 = vmatpush1.bf16.msra.mxu0 %v8033_v59  ;;  %6147 = vmatpush1.bf16.msra.mxu1 %v8036_v60  ;;  %v8128_v59 = vld [vmem:[%s9657_s0 + $0x5a4] ss:$16 sps:$4 sm:$0xff]   ;;  %v8131_v60 = vld [vmem:[%s9657_s0 + $0x5ac] ss:$16 sps:$4 sm:$0xff]  }
 0x12d   : > { %5317 = vmatprep.subr.bf16.mxu0 %v8037_v61  ;;  %6149 = vmatprep.subr.bf16.mxu1 %v8040_v62  ;;  %v8130_v61 = vld [vmem:[%s9657_s0 + $0x5a0] ss:$16 sps:$4 sm:$0xff]   ;;  %v8133_v62 = vld [vmem:[%s9657_s0 + $0x5a8] ss:$16 sps:$4 sm:$0xff]  }
 0x130   : > { %5319 = vmatpush1.bf16.msra.mxu0 %v8039_v63  ;;  %6151 = vmatpush1.bf16.msra.mxu1 %v8042_v0  ;;  %v8134_v63 = vld [vmem:[%s9657_s0 + $0x5c4] ss:$16 sps:$4 sm:$0xff]   ;;  %v8137_v0 = vld [vmem:[%s9657_s0 + $0x5cc] ss:$16 sps:$4 sm:$0xff]  }
 0x131   : > { %5321 = vmatprep.subr.bf16.mxu0 %v8043_v1  ;;  %6153 = vmatprep.subr.bf16.mxu1 %v8046_v2  ;;  %v8136_v1 = vld [vmem:[%s9657_s0 + $0x5c0] ss:$16 sps:$4 sm:$0xff]   ;;  %v8139_v2 = vld [vmem:[%s9657_s0 + $0x5c8] ss:$16 sps:$4 sm:$0xff]  }
 0x134   : > { %5323 = vmatpush1.bf16.msra.mxu0 %v8045_v3  ;;  %6155 = vmatpush1.bf16.msra.mxu1 %v8048_v4  ;;  %v8140_v3 = vld [vmem:[%s9657_s0 + $0x5e4] ss:$16 sps:$4 sm:$0xff]   ;;  %v8143_v4 = vld [vmem:[%s9657_s0 + $0x5ec] ss:$16 sps:$4 sm:$0xff]  }
 0x135   : > { %5325 = vmatprep.subr.bf16.mxu0 %v8050_v5  ;;  %6157 = vmatprep.subr.bf16.mxu1 %v8053_v6  ;;  %v8142_v5 = vld [vmem:[%s9657_s0 + $0x5e0] ss:$16 sps:$4 sm:$0xff]   ;;  %v8145_v6 = vld [vmem:[%s9657_s0 + $0x5e8] ss:$16 sps:$4 sm:$0xff]  }
 0x137   : > { %3093 = vmatmul.mubr.f32.vlgmr.msra.gmra.mrb[0].mxu0 %v9786_v29  ;;  %4016 = vmatmul.mubr.f32.vlgmr.msra.gmra.mrb[0].mxu1 %v9786_v29  ;;  %v8082_v29 = vld [vmem:[%s9657_s0 + $0x4a0] ss:$16 sps:$4 sm:$0xff]  }
 0x138   : > { %5327 = vmatpush1.bf16.msra.mxu0 %v8052_v7  ;;  %6159 = vmatpush1.bf16.msra.mxu1 %v8055_v8  ;;  %v8147_v7 = vld [vmem:[%s9657_s0 + $0x604] ss:$16 sps:$4 sm:$0xff]   ;;  %v8150_v8 = vld [vmem:[%s9657_s0 + $0x60c] ss:$16 sps:$4 sm:$0xff]  }
 0x139   : > { %5329 = vmatprep.subr.bf16.mxu0 %v8056_v9  ;;  %6161 = vmatprep.subr.bf16.mxu1 %v8059_v11  ;;  %v8149_v9 = vld [vmem:[%s9657_s0 + $0x600] ss:$16 sps:$4 sm:$0xff]   ;;  %v8152_v11 = vld [vmem:[%s9657_s0 + $0x608] ss:$16 sps:$4 sm:$0xff]  }
 0x13a   : > { %3163 = vmatprep.mubr.f32.mxu0 %v2933_v12  ;;  %4086 = vmatprep.mubr.f32.mxu1 %v2933_v12  ;;  %v9904_v12 = vld [vmem:[%s9689_s8 + $0x18] sm:$0xff] }
 0x13c   : > { %5331 = vmatpush1.bf16.msra.mxu0 %v8058_v13  ;;  %6163 = vmatpush1.bf16.msra.mxu1 %v8061_v14  ;;  %v8153_v13 = vld [vmem:[%s9657_s0 + $0x624] ss:$16 sps:$4 sm:$0xff]   ;;  %v8156_v14 = vld [vmem:[%s9657_s0 + $0x62c] ss:$16 sps:$4 sm:$0xff]  }
 0x13d   : > { %5333 = vmatprep.subr.bf16.mxu0 %v8062_v15  ;;  %6165 = vmatprep.subr.bf16.mxu1 %v8065_v16  ;;  %v2934_v15 = vcombine.high %v9904_v12, %v9904_v12  ;;  %v8155_v16 = vld [vmem:[%s9657_s0 + $0x620] ss:$16 sps:$4 sm:$0xff]  }
 0x140   : > { %5335 = vmatpush1.bf16.msra.mxu0 %v8064_v17  ;;  %6167 = vmatpush1.bf16.msra.mxu1 %v8067_v18  ;;  %v8158_v17 = vld [vmem:[%s9657_s0 + $0x628] ss:$16 sps:$4 sm:$0xff]   ;;  %v8159_v18 = vld [vmem:[%s9657_s0 + $0x644] ss:$16 sps:$4 sm:$0xff]  }
 0x141   : > { %5337 = vmatprep.subr.bf16.mxu0 %v8068_v19  ;;  %6169 = vmatprep.subr.bf16.mxu1 %v8071_v20  ;;  %v8162_v19 = vld [vmem:[%s9657_s0 + $0x64c] ss:$16 sps:$4 sm:$0xff]   ;;  %v8161_v20 = vld [vmem:[%s9657_s0 + $0x640] ss:$16 sps:$4 sm:$0xff]  }
 0x144   : > { %5339 = vmatpush1.bf16.msra.mxu0 %v8070_v21  ;;  %6171 = vmatpush1.bf16.msra.mxu1 %v8073_v22  ;;  %v8164_v21 = vld [vmem:[%s9657_s0 + $0x648] ss:$16 sps:$4 sm:$0xff]   ;;  %v8168_v22 = vld [vmem:[%s9657_s0 + $0x66c] ss:$16 sps:$4 sm:$0xff]  }
 0x145   : > { %5341 = vmatprep.subr.bf16.mxu0 %v8074_v23  ;;  %6173 = vmatprep.subr.bf16.mxu1 %v8077_v24  ;;  %v8167_v23 = vld [vmem:[%s9657_s0 + $0x660] ss:$16 sps:$4 sm:$0xff]   ;;  %v8170_v24 = vld [vmem:[%s9657_s0 + $0x668] ss:$16 sps:$4 sm:$0xff]  }
 0x148   : > { %5343 = vmatpush1.bf16.msra.mxu0 %v8076_v25  ;;  %6175 = vmatpush1.bf16.msra.mxu1 %v8079_v26  ;;  %v8171_v25 = vld [vmem:[%s9657_s0 + $0x684] ss:$16 sps:$4 sm:$0xff]   ;;  %v8174_v26 = vld [vmem:[%s9657_s0 + $0x68c] ss:$16 sps:$4 sm:$0xff]  }
 0x149   : > { %5345 = vmatprep.subr.bf16.mxu0 %v8080_v27  ;;  %6177 = vmatprep.subr.bf16.mxu1 %v8083_v28  ;;  %v8173_v27 = vld [vmem:[%s9657_s0 + $0x680] ss:$16 sps:$4 sm:$0xff]   ;;  %v8176_v28 = vld [vmem:[%s9657_s0 + $0x688] ss:$16 sps:$4 sm:$0xff]  }
 0x14c   : > { %5347 = vmatpush1.bf16.msra.mxu0 %v8082_v29  ;;  %6179 = vmatpush1.bf16.msra.mxu1 %v8085_v30  ;;  %v8177_v29 = vld [vmem:[%s9657_s0 + $0x6a4] ss:$16 sps:$4 sm:$0xff]   ;;  %v8180_v30 = vld [vmem:[%s9657_s0 + $0x6ac] ss:$16 sps:$4 sm:$0xff]  }
 0x14d   : > { %5349 = vmatprep.subr.bf16.mxu0 %v8086_v31  ;;  %6181 = vmatprep.subr.bf16.mxu1 %v8089_v32  ;;  %v8179_v31 = vld [vmem:[%s9657_s0 + $0x6a0] ss:$16 sps:$4 sm:$0xff]   ;;  %v8182_v32 = vld [vmem:[%s9657_s0 + $0x6a8] ss:$16 sps:$4 sm:$0xff]  }
 0x150   : > { %5351 = vmatpush1.bf16.msra.mxu0 %v8088_v33  ;;  %6183 = vmatpush1.bf16.msra.mxu1 %v8091_v34  ;;  %v8183_v33 = vld [vmem:[%s9657_s0 + $0x6c4] ss:$16 sps:$4 sm:$0xff]   ;;  %v8186_v34 = vld [vmem:[%s9657_s0 + $0x6cc] ss:$16 sps:$4 sm:$0xff]  }
 0x151   : > { %5353 = vmatprep.subr.bf16.mxu0 %v8092_v35  ;;  %6185 = vmatprep.subr.bf16.mxu1 %v8095_v36  ;;  %v8185_v35 = vld [vmem:[%s9657_s0 + $0x6c0] ss:$16 sps:$4 sm:$0xff]   ;;  %v8188_v36 = vld [vmem:[%s9657_s0 + $0x6c8] ss:$16 sps:$4 sm:$0xff]  }
 0x154   : > { %5355 = vmatpush1.bf16.msra.mxu0 %v8094_v37  ;;  %6187 = vmatpush1.bf16.msra.mxu1 %v8097_v38  ;;  %v8189_v37 = vld [vmem:[%s9657_s0 + $0x6e4] ss:$16 sps:$4 sm:$0xff]   ;;  %v8192_v38 = vld [vmem:[%s9657_s0 + $0x6ec] ss:$16 sps:$4 sm:$0xff]  }
 0x155   : > { %5357 = vmatprep.subr.bf16.mxu0 %v8098_v39  ;;  %6189 = vmatprep.subr.bf16.mxu1 %v8101_v40  ;;  %v8191_v39 = vld [vmem:[%s9657_s0 + $0x6e0] ss:$16 sps:$4 sm:$0xff]   ;;  %v8194_v40 = vld [vmem:[%s9657_s0 + $0x6e8] ss:$16 sps:$4 sm:$0xff]  }
 0x158   : > { %5359 = vmatpush1.bf16.msra.mxu0 %v8100_v41  ;;  %6191 = vmatpush1.bf16.msra.mxu1 %v8103_v42  ;;  %v8195_v41 = vld [vmem:[%s9657_s0 + $0x704] ss:$16 sps:$4 sm:$0xff]   ;;  %v8198_v42 = vld [vmem:[%s9657_s0 + $0x70c] ss:$16 sps:$4 sm:$0xff]  }
 0x159   : > { %5361 = vmatprep.subr.bf16.mxu0 %v8104_v43  ;;  %6193 = vmatprep.subr.bf16.mxu1 %v8107_v44  ;;  %v8197_v43 = vld [vmem:[%s9657_s0 + $0x700] ss:$16 sps:$4 sm:$0xff]   ;;  %v8200_v44 = vld [vmem:[%s9657_s0 + $0x708] ss:$16 sps:$4 sm:$0xff]  }
 0x15c   : > { %5363 = vmatpush1.bf16.msra.mxu0 %v8106_v45  ;;  %6195 = vmatpush1.bf16.msra.mxu1 %v8109_v46  ;;  %v8201_v45 = vld [vmem:[%s9657_s0 + $0x724] ss:$16 sps:$4 sm:$0xff]   ;;  %v8204_v46 = vld [vmem:[%s9657_s0 + $0x72c] ss:$16 sps:$4 sm:$0xff]  }
 0x15d   : > { %5365 = vmatprep.subr.bf16.mxu0 %v8110_v47  ;;  %6197 = vmatprep.subr.bf16.mxu1 %v8113_v48  ;;  %v8203_v47 = vld [vmem:[%s9657_s0 + $0x720] ss:$16 sps:$4 sm:$0xff]   ;;  %v8206_v48 = vld [vmem:[%s9657_s0 + $0x728] ss:$16 sps:$4 sm:$0xff]  }
 0x160   : > { %5367 = vmatpush1.bf16.msra.mxu0 %v8112_v49  ;;  %6199 = vmatpush1.bf16.msra.mxu1 %v8115_v50  ;;  %v8207_v49 = vld [vmem:[%s9657_s0 + $0x744] ss:$16 sps:$4 sm:$0xff]   ;;  %v8210_v50 = vld [vmem:[%s9657_s0 + $0x74c] ss:$16 sps:$4 sm:$0xff]  }
 0x161   : > { %5369 = vmatprep.subr.bf16.mxu0 %v8116_v51  ;;  %6201 = vmatprep.subr.bf16.mxu1 %v8119_v52  ;;  %v8209_v51 = vld [vmem:[%s9657_s0 + $0x740] ss:$16 sps:$4 sm:$0xff]   ;;  %v8212_v52 = vld [vmem:[%s9657_s0 + $0x748] ss:$16 sps:$4 sm:$0xff]  }
 0x164   : > { %5371 = vmatpush1.bf16.msra.mxu0 %v8118_v53  ;;  %6203 = vmatpush1.bf16.msra.mxu1 %v8121_v54  ;;  %v8213_v53 = vld [vmem:[%s9657_s0 + $0x764] ss:$16 sps:$4 sm:$0xff]   ;;  %v8216_v54 = vld [vmem:[%s9657_s0 + $0x76c] ss:$16 sps:$4 sm:$0xff]  }
 0x165   : > { %5373 = vmatprep.subr.bf16.mxu0 %v8122_v55  ;;  %6205 = vmatprep.subr.bf16.mxu1 %v8125_v56  ;;  %v8215_v55 = vld [vmem:[%s9657_s0 + $0x760] ss:$16 sps:$4 sm:$0xff]   ;;  %v8218_v56 = vld [vmem:[%s9657_s0 + $0x768] ss:$16 sps:$4 sm:$0xff]  }
 0x168   : > { %5375 = vmatpush1.bf16.msra.mxu0 %v8124_v57  ;;  %6207 = vmatpush1.bf16.msra.mxu1 %v8127_v58  ;;  %v8219_v57 = vld [vmem:[%s9657_s0 + $0x784] ss:$16 sps:$4 sm:$0xff]   ;;  %v8222_v58 = vld [vmem:[%s9657_s0 + $0x78c] ss:$16 sps:$4 sm:$0xff]  }
 0x169   : > { %5377 = vmatprep.subr.bf16.mxu0 %v8128_v59  ;;  %6209 = vmatprep.subr.bf16.mxu1 %v8131_v60  ;;  %v8221_v59 = vld [vmem:[%s9657_s0 + $0x780] ss:$16 sps:$4 sm:$0xff]   ;;  %v8224_v60 = vld [vmem:[%s9657_s0 + $0x788] ss:$16 sps:$4 sm:$0xff]  }
 0x16c   : > { %5379 = vmatpush1.bf16.msra.mxu0 %v8130_v61  ;;  %6211 = vmatpush1.bf16.msra.mxu1 %v8133_v62  ;;  %v8225_v61 = vld [vmem:[%s9657_s0 + $0x7a4] ss:$16 sps:$4 sm:$0xff]   ;;  %v8228_v62 = vld [vmem:[%s9657_s0 + $0x7ac] ss:$16 sps:$4 sm:$0xff]  }
 0x16d   : > { %5381 = vmatprep.subr.bf16.mxu0 %v8134_v63  ;;  %6213 = vmatprep.subr.bf16.mxu1 %v8137_v0  ;;  %v8227_v63 = vld [vmem:[%s9657_s0 + $0x7a0] ss:$16 sps:$4 sm:$0xff]   ;;  %v8230_v0 = vld [vmem:[%s9657_s0 + $0x7a8] ss:$16 sps:$4 sm:$0xff]  }
 0x170   : > { %5383 = vmatpush1.bf16.msra.mxu0 %v8136_v1  ;;  %6215 = vmatpush1.bf16.msra.mxu1 %v8139_v2  ;;  %v8231_v1 = vld [vmem:[%s9657_s0 + $0x7c4] ss:$16 sps:$4 sm:$0xff]   ;;  %v8234_v2 = vld [vmem:[%s9657_s0 + $0x7cc] ss:$16 sps:$4 sm:$0xff]  }
 0x171   : > { %5385 = vmatprep.subr.bf16.mxu0 %v8140_v3  ;;  %6217 = vmatprep.subr.bf16.mxu1 %v8143_v4  ;;  %v8233_v3 = vld [vmem:[%s9657_s0 + $0x7c0] ss:$16 sps:$4 sm:$0xff]   ;;  %v8236_v4 = vld [vmem:[%s9657_s0 + $0x7c8] ss:$16 sps:$4 sm:$0xff]  }
 0x174   : > { %5387 = vmatpush1.bf16.msra.mxu0 %v8142_v5  ;;  %6219 = vmatpush1.bf16.msra.mxu1 %v8145_v6  ;;  %v8237_v5 = vld [vmem:[%s9657_s0 + $0x7e4] ss:$16 sps:$4 sm:$0xff]   ;;  %v8240_v6 = vld [vmem:[%s9657_s0 + $0x7ec] ss:$16 sps:$4 sm:$0xff]  }
 0x175   : > { %5389 = vmatprep.subr.bf16.mxu0 %v8147_v7  ;;  %6221 = vmatprep.subr.bf16.mxu1 %v8150_v8  ;;  %v8239_v7 = vld [vmem:[%s9657_s0 + $0x7e0] ss:$16 sps:$4 sm:$0xff]   ;;  %v8242_v8 = vld [vmem:[%s9657_s0 + $0x7e8] ss:$16 sps:$4 sm:$0xff]  }
 0x177   : > { %3164 = vmatmul.mubr.f32.vlgmr.msra.gmra.mrb[0].mxu0 %v9834_v10  ;;  %4087 = vmatmul.mubr.f32.vlgmr.msra.gmra.mrb[0].mxu1 %v9834_v10  ;;  %v8165_v10 = vld [vmem:[%s9657_s0 + $0x664] ss:$16 sps:$4 sm:$0xff]  }
 0x178   : > { %5391 = vmatpush1.bf16.msra.mxu0 %v8149_v9  ;;  %6223 = vmatpush1.bf16.msra.mxu1 %v8152_v11  ;;  %v8244_v9 = vld [vmem:[%s9657_s0 + $0x804] ss:$16 sps:$4 sm:$0xff]   ;;  %v8247_v11 = vld [vmem:[%s9657_s0 + $0x80c] ss:$16 sps:$4 sm:$0xff]  }
 0x179   : > { %5393 = vmatprep.subr.bf16.mxu0 %v8153_v13  ;;  %6225 = vmatprep.subr.bf16.mxu1 %v8156_v14  ;;  %v8246_v13 = vld [vmem:[%s9657_s0 + $0x800] ss:$16 sps:$4 sm:$0xff]  }
 0x17a   : > { %3234 = vmatprep.mubr.f32.mxu0 %v2934_v15  ;;  %4157 = vmatprep.mubr.f32.mxu1 %v2934_v15  ;;  %v9974_v14 = vld [vmem:[%s9689_s8 + $0x20] sm:$0xff]  ;;  %v8249_v15 = vld [vmem:[%s9657_s0 + $0x808] ss:$16 sps:$4 sm:$0xff]  }
 0x17c   : > { %5395 = vmatpush1.bf16.msra.mxu0 %v8155_v16  ;;  %6227 = vmatpush1.bf16.msra.mxu1 %v8158_v17  ;;  %v8250_v16 = vld [vmem:[%s9657_s0 + $0x824] ss:$16 sps:$4 sm:$0xff]   ;;  %v8253_v17 = vld [vmem:[%s9657_s0 + $0x82c] ss:$16 sps:$4 sm:$0xff]  }
 0x17d   : > { %5397 = vmatprep.subr.bf16.mxu0 %v8159_v18  ;;  %6229 = vmatprep.subr.bf16.mxu1 %v8162_v19  ;;  %v2935_v18 = vcombine.high %v9974_v14, %v9974_v14  ;;  %v8252_v19 = vld [vmem:[%s9657_s0 + $0x820] ss:$16 sps:$4 sm:$0xff]  }
 0x180   : > { %5399 = vmatpush1.bf16.msra.mxu0 %v8161_v20  ;;  %6231 = vmatpush1.bf16.msra.mxu1 %v8164_v21  ;;  %v8255_v20 = vld [vmem:[%s9657_s0 + $0x828] ss:$16 sps:$4 sm:$0xff]   ;;  %v8256_v21 = vld [vmem:[%s9657_s0 + $0x844] ss:$16 sps:$4 sm:$0xff]  }
 0x181   : > { %5401 = vmatprep.subr.bf16.mxu0 %v8165_v10  ;;  %6233 = vmatprep.subr.bf16.mxu1 %v8168_v22  ;;  %v8259_v10 = vld [vmem:[%s9657_s0 + $0x84c] ss:$16 sps:$4 sm:$0xff]   ;;  %v8258_v22 = vld [vmem:[%s9657_s0 + $0x840] ss:$16 sps:$4 sm:$0xff]  }
 0x184   : > { %5403 = vmatpush1.bf16.msra.mxu0 %v8167_v23  ;;  %6235 = vmatpush1.bf16.msra.mxu1 %v8170_v24  ;;  %v8262_v23 = vld [vmem:[%s9657_s0 + $0x864] ss:$16 sps:$4 sm:$0xff]   ;;  %v8265_v24 = vld [vmem:[%s9657_s0 + $0x86c] ss:$16 sps:$4 sm:$0xff]  }
 0x185   : > { %5405 = vmatprep.subr.bf16.mxu0 %v8171_v25  ;;  %6237 = vmatprep.subr.bf16.mxu1 %v8174_v26  ;;  %v8264_v25 = vld [vmem:[%s9657_s0 + $0x860] ss:$16 sps:$4 sm:$0xff]   ;;  %v8267_v26 = vld [vmem:[%s9657_s0 + $0x868] ss:$16 sps:$4 sm:$0xff]  }
 0x188   : > { %5407 = vmatpush1.bf16.msra.mxu0 %v8173_v27  ;;  %6239 = vmatpush1.bf16.msra.mxu1 %v8176_v28  ;;  %v8268_v27 = vld [vmem:[%s9657_s0 + $0x884] ss:$16 sps:$4 sm:$0xff]   ;;  %v8271_v28 = vld [vmem:[%s9657_s0 + $0x88c] ss:$16 sps:$4 sm:$0xff]  }
 0x189   : > { %5409 = vmatprep.subr.bf16.mxu0 %v8177_v29  ;;  %6241 = vmatprep.subr.bf16.mxu1 %v8180_v30  ;;  %v8270_v29 = vld [vmem:[%s9657_s0 + $0x880] ss:$16 sps:$4 sm:$0xff]   ;;  %v8273_v30 = vld [vmem:[%s9657_s0 + $0x888] ss:$16 sps:$4 sm:$0xff]  }
 0x18c   : > { %5411 = vmatpush1.bf16.msra.mxu0 %v8179_v31  ;;  %6243 = vmatpush1.bf16.msra.mxu1 %v8182_v32  ;;  %v8274_v31 = vld [vmem:[%s9657_s0 + $0x8a4] ss:$16 sps:$4 sm:$0xff]   ;;  %v8277_v32 = vld [vmem:[%s9657_s0 + $0x8ac] ss:$16 sps:$4 sm:$0xff]  }
 0x18d   : > { %5413 = vmatprep.subr.bf16.mxu0 %v8183_v33  ;;  %6245 = vmatprep.subr.bf16.mxu1 %v8186_v34  ;;  %v8276_v33 = vld [vmem:[%s9657_s0 + $0x8a0] ss:$16 sps:$4 sm:$0xff]   ;;  %v8279_v34 = vld [vmem:[%s9657_s0 + $0x8a8] ss:$16 sps:$4 sm:$0xff]  }
 0x190   : > { %5415 = vmatpush1.bf16.msra.mxu0 %v8185_v35  ;;  %6247 = vmatpush1.bf16.msra.mxu1 %v8188_v36  ;;  %v8280_v35 = vld [vmem:[%s9657_s0 + $0x8c4] ss:$16 sps:$4 sm:$0xff]   ;;  %v8283_v36 = vld [vmem:[%s9657_s0 + $0x8cc] ss:$16 sps:$4 sm:$0xff]  }
 0x191   : > { %5417 = vmatprep.subr.bf16.mxu0 %v8189_v37  ;;  %6249 = vmatprep.subr.bf16.mxu1 %v8192_v38  ;;  %v8282_v37 = vld [vmem:[%s9657_s0 + $0x8c0] ss:$16 sps:$4 sm:$0xff]   ;;  %v8285_v38 = vld [vmem:[%s9657_s0 + $0x8c8] ss:$16 sps:$4 sm:$0xff]  }
 0x194   : > { %5419 = vmatpush1.bf16.msra.mxu0 %v8191_v39  ;;  %6251 = vmatpush1.bf16.msra.mxu1 %v8194_v40  ;;  %v8286_v39 = vld [vmem:[%s9657_s0 + $0x8e4] ss:$16 sps:$4 sm:$0xff]   ;;  %v8289_v40 = vld [vmem:[%s9657_s0 + $0x8ec] ss:$16 sps:$4 sm:$0xff]  }
 0x195   : > { %5421 = vmatprep.subr.bf16.mxu0 %v8195_v41  ;;  %6253 = vmatprep.subr.bf16.mxu1 %v8198_v42  ;;  %v8288_v41 = vld [vmem:[%s9657_s0 + $0x8e0] ss:$16 sps:$4 sm:$0xff]   ;;  %v8291_v42 = vld [vmem:[%s9657_s0 + $0x8e8] ss:$16 sps:$4 sm:$0xff]  }
 0x198   : > { %5423 = vmatpush1.bf16.msra.mxu0 %v8197_v43  ;;  %6255 = vmatpush1.bf16.msra.mxu1 %v8200_v44  ;;  %v8292_v43 = vld [vmem:[%s9657_s0 + $0x904] ss:$16 sps:$4 sm:$0xff]   ;;  %v8295_v44 = vld [vmem:[%s9657_s0 + $0x90c] ss:$16 sps:$4 sm:$0xff]  }
 0x199   : > { %5425 = vmatprep.subr.bf16.mxu0 %v8201_v45  ;;  %6257 = vmatprep.subr.bf16.mxu1 %v8204_v46  ;;  %v8294_v45 = vld [vmem:[%s9657_s0 + $0x900] ss:$16 sps:$4 sm:$0xff]   ;;  %v8297_v46 = vld [vmem:[%s9657_s0 + $0x908] ss:$16 sps:$4 sm:$0xff]  }
 0x19c   : > { %5427 = vmatpush1.bf16.msra.mxu0 %v8203_v47  ;;  %6259 = vmatpush1.bf16.msra.mxu1 %v8206_v48  ;;  %v8298_v47 = vld [vmem:[%s9657_s0 + $0x924] ss:$16 sps:$4 sm:$0xff]   ;;  %v8301_v48 = vld [vmem:[%s9657_s0 + $0x92c] ss:$16 sps:$4 sm:$0xff]  }
 0x19d   : > { %5429 = vmatprep.subr.bf16.mxu0 %v8207_v49  ;;  %6261 = vmatprep.subr.bf16.mxu1 %v8210_v50  ;;  %v8300_v49 = vld [vmem:[%s9657_s0 + $0x920] ss:$16 sps:$4 sm:$0xff]   ;;  %v8303_v50 = vld [vmem:[%s9657_s0 + $0x928] ss:$16 sps:$4 sm:$0xff]  }
 0x1a0   : > { %5431 = vmatpush1.bf16.msra.mxu0 %v8209_v51  ;;  %6263 = vmatpush1.bf16.msra.mxu1 %v8212_v52  ;;  %v8304_v51 = vld [vmem:[%s9657_s0 + $0x944] ss:$16 sps:$4 sm:$0xff]   ;;  %v8307_v52 = vld [vmem:[%s9657_s0 + $0x94c] ss:$16 sps:$4 sm:$0xff]  }
 0x1a1   : > { %5433 = vmatprep.subr.bf16.mxu0 %v8213_v53  ;;  %6265 = vmatprep.subr.bf16.mxu1 %v8216_v54  ;;  %v8306_v53 = vld [vmem:[%s9657_s0 + $0x940] ss:$16 sps:$4 sm:$0xff]   ;;  %v8309_v54 = vld [vmem:[%s9657_s0 + $0x948] ss:$16 sps:$4 sm:$0xff]  }
 0x1a4   : > { %5435 = vmatpush1.bf16.msra.mxu0 %v8215_v55  ;;  %6267 = vmatpush1.bf16.msra.mxu1 %v8218_v56  ;;  %v8310_v55 = vld [vmem:[%s9657_s0 + $0x964] ss:$16 sps:$4 sm:$0xff]   ;;  %v8313_v56 = vld [vmem:[%s9657_s0 + $0x96c] ss:$16 sps:$4 sm:$0xff]  }
 0x1a5   : > { %5437 = vmatprep.subr.bf16.mxu0 %v8219_v57  ;;  %6269 = vmatprep.subr.bf16.mxu1 %v8222_v58  ;;  %v8312_v57 = vld [vmem:[%s9657_s0 + $0x960] ss:$16 sps:$4 sm:$0xff]   ;;  %v8315_v58 = vld [vmem:[%s9657_s0 + $0x968] ss:$16 sps:$4 sm:$0xff]  }
 0x1a8   : > { %5439 = vmatpush1.bf16.msra.mxu0 %v8221_v59  ;;  %6271 = vmatpush1.bf16.msra.mxu1 %v8224_v60  ;;  %v8316_v59 = vld [vmem:[%s9657_s0 + $0x984] ss:$16 sps:$4 sm:$0xff]   ;;  %v8319_v60 = vld [vmem:[%s9657_s0 + $0x98c] ss:$16 sps:$4 sm:$0xff]  }
 0x1a9   : > { %5441 = vmatprep.subr.bf16.mxu0 %v8225_v61  ;;  %6273 = vmatprep.subr.bf16.mxu1 %v8228_v62  ;;  %v8318_v61 = vld [vmem:[%s9657_s0 + $0x980] ss:$16 sps:$4 sm:$0xff]   ;;  %v8321_v62 = vld [vmem:[%s9657_s0 + $0x988] ss:$16 sps:$4 sm:$0xff]  }
 0x1ac   : > { %5443 = vmatpush1.bf16.msra.mxu0 %v8227_v63  ;;  %6275 = vmatpush1.bf16.msra.mxu1 %v8230_v0  ;;  %v8322_v63 = vld [vmem:[%s9657_s0 + $0x9a4] ss:$16 sps:$4 sm:$0xff]   ;;  %v8325_v0 = vld [vmem:[%s9657_s0 + $0x9ac] ss:$16 sps:$4 sm:$0xff]  }
 0x1ad   : > { %5445 = vmatprep.subr.bf16.mxu0 %v8231_v1  ;;  %6277 = vmatprep.subr.bf16.mxu1 %v8234_v2  ;;  %v8324_v1 = vld [vmem:[%s9657_s0 + $0x9a0] ss:$16 sps:$4 sm:$0xff]   ;;  %v8327_v2 = vld [vmem:[%s9657_s0 + $0x9a8] ss:$16 sps:$4 sm:$0xff]  }
 0x1b0   : > { %5447 = vmatpush1.bf16.msra.mxu0 %v8233_v3  ;;  %6279 = vmatpush1.bf16.msra.mxu1 %v8236_v4  ;;  %v8328_v3 = vld [vmem:[%s9657_s0 + $0x9c4] ss:$16 sps:$4 sm:$0xff]   ;;  %v8331_v4 = vld [vmem:[%s9657_s0 + $0x9cc] ss:$16 sps:$4 sm:$0xff]  }
 0x1b1   : > { %5449 = vmatprep.subr.bf16.mxu0 %v8237_v5  ;;  %6281 = vmatprep.subr.bf16.mxu1 %v8240_v6  ;;  %v8330_v5 = vld [vmem:[%s9657_s0 + $0x9c0] ss:$16 sps:$4 sm:$0xff]   ;;  %v8333_v6 = vld [vmem:[%s9657_s0 + $0x9c8] ss:$16 sps:$4 sm:$0xff]  }
 0x1b4   : > { %5451 = vmatpush1.bf16.msra.mxu0 %v8239_v7  ;;  %6283 = vmatpush1.bf16.msra.mxu1 %v8242_v8  ;;  %v8334_v7 = vld [vmem:[%s9657_s0 + $0x9e4] ss:$16 sps:$4 sm:$0xff]   ;;  %v8337_v8 = vld [vmem:[%s9657_s0 + $0x9ec] ss:$16 sps:$4 sm:$0xff]  }
 0x1b5   : > { %5453 = vmatprep.subr.bf16.mxu0 %v8244_v9  ;;  %6285 = vmatprep.subr.bf16.mxu1 %v8247_v11  ;;  %v8336_v9 = vld [vmem:[%s9657_s0 + $0x9e0] ss:$16 sps:$4 sm:$0xff]   ;;  %v8339_v11 = vld [vmem:[%s9657_s0 + $0x9e8] ss:$16 sps:$4 sm:$0xff]  }
 0x1b7   : > { %3235 = vmatmul.mubr.f32.vlgmr.msra.gmra.mrb[0].mxu0 %v9904_v12  ;;  %4158 = vmatmul.mubr.f32.vlgmr.msra.gmra.mrb[0].mxu1 %v9904_v12  ;;  %v8261_v12 = vld [vmem:[%s9657_s0 + $0x848] ss:$16 sps:$4 sm:$0xff]  }
 0x1b8   : > { %5455 = vmatpush1.bf16.msra.mxu0 %v8246_v13  ;;  %6287 = vmatpush1.bf16.msra.mxu1 %v8249_v15  ;;  %v8341_v13 = vld [vmem:[%s9657_s0 + $0xa04] ss:$16 sps:$4 sm:$0xff]   ;;  %v8344_v15 = vld [vmem:[%s9657_s0 + $0xa0c] ss:$16 sps:$4 sm:$0xff]  }
 0x1b9   : > { %5457 = vmatprep.subr.bf16.mxu0 %v8250_v16  ;;  %6289 = vmatprep.subr.bf16.mxu1 %v8253_v17  ;;  %v10044_v16 = vld [vmem:[%s9689_s8 + $0x28] sm:$0xff]  ;;  %v8343_v17 = vld [vmem:[%s9657_s0 + $0xa00] ss:$16 sps:$4 sm:$0xff]  }
 0x1ba   : > { %3305 = vmatprep.mubr.f32.mxu0 %v2935_v18  ;;  %4228 = vmatprep.mubr.f32.mxu1 %v2935_v18  ;;  %v8346_v18 = vld [vmem:[%s9657_s0 + $0xa08] ss:$16 sps:$4 sm:$0xff]  }
 0x1bc   : > { %5459 = vmatpush1.bf16.msra.mxu0 %v8252_v19  ;;  %6291 = vmatpush1.bf16.msra.mxu1 %v8255_v20  ;;  %v8347_v19 = vld [vmem:[%s9657_s0 + $0xa24] ss:$16 sps:$4 sm:$0xff]   ;;  %v8350_v20 = vld [vmem:[%s9657_s0 + $0xa2c] ss:$16 sps:$4 sm:$0xff]  }
 0x1bd   : > { %5461 = vmatprep.subr.bf16.mxu0 %v8256_v21  ;;  %6293 = vmatprep.subr.bf16.mxu1 %v8259_v10  ;;  %v8349_v21 = vld [vmem:[%s9657_s0 + $0xa20] ss:$16 sps:$4 sm:$0xff]   ;;  %v2936_v10 = vcombine.high %v10044_v16, %v10044_v16 }
 0x1c0   : > { %5463 = vmatpush1.bf16.msra.mxu0 %v8258_v22  ;;  %6295 = vmatpush1.bf16.msra.mxu1 %v8261_v12  ;;  %v8352_v22 = vld [vmem:[%s9657_s0 + $0xa28] ss:$16 sps:$4 sm:$0xff]   ;;  %v8353_v12 = vld [vmem:[%s9657_s0 + $0xa44] ss:$16 sps:$4 sm:$0xff]  }
 0x1c1   : > { %5465 = vmatprep.subr.bf16.mxu0 %v8262_v23  ;;  %6297 = vmatprep.subr.bf16.mxu1 %v8265_v24  ;;  %v8356_v23 = vld [vmem:[%s9657_s0 + $0xa4c] ss:$16 sps:$4 sm:$0xff]   ;;  %v8355_v24 = vld [vmem:[%s9657_s0 + $0xa40] ss:$16 sps:$4 sm:$0xff]  }
 0x1c4   : > { %5467 = vmatpush1.bf16.msra.mxu0 %v8264_v25  ;;  %6299 = vmatpush1.bf16.msra.mxu1 %v8267_v26  ;;  %v8359_v25 = vld [vmem:[%s9657_s0 + $0xa64] ss:$16 sps:$4 sm:$0xff]   ;;  %v8362_v26 = vld [vmem:[%s9657_s0 + $0xa6c] ss:$16 sps:$4 sm:$0xff]  }
 0x1c5   : > { %5469 = vmatprep.subr.bf16.mxu0 %v8268_v27  ;;  %6301 = vmatprep.subr.bf16.mxu1 %v8271_v28  ;;  %v8361_v27 = vld [vmem:[%s9657_s0 + $0xa60] ss:$16 sps:$4 sm:$0xff]   ;;  %v8364_v28 = vld [vmem:[%s9657_s0 + $0xa68] ss:$16 sps:$4 sm:$0xff]  }
 0x1c8   : > { %5471 = vmatpush1.bf16.msra.mxu0 %v8270_v29  ;;  %6303 = vmatpush1.bf16.msra.mxu1 %v8273_v30  ;;  %v8365_v29 = vld [vmem:[%s9657_s0 + $0xa84] ss:$16 sps:$4 sm:$0xff]   ;;  %v8368_v30 = vld [vmem:[%s9657_s0 + $0xa8c] ss:$16 sps:$4 sm:$0xff]  }
 0x1c9   : > { %5473 = vmatprep.subr.bf16.mxu0 %v8274_v31  ;;  %6305 = vmatprep.subr.bf16.mxu1 %v8277_v32  ;;  %v8367_v31 = vld [vmem:[%s9657_s0 + $0xa80] ss:$16 sps:$4 sm:$0xff]   ;;  %v8370_v32 = vld [vmem:[%s9657_s0 + $0xa88] ss:$16 sps:$4 sm:$0xff]  }
 0x1cc   : > { %5475 = vmatpush1.bf16.msra.mxu0 %v8276_v33  ;;  %6307 = vmatpush1.bf16.msra.mxu1 %v8279_v34  ;;  %v8371_v33 = vld [vmem:[%s9657_s0 + $0xaa4] ss:$16 sps:$4 sm:$0xff]   ;;  %v8374_v34 = vld [vmem:[%s9657_s0 + $0xaac] ss:$16 sps:$4 sm:$0xff]  }
 0x1cd   : > { %5477 = vmatprep.subr.bf16.mxu0 %v8280_v35  ;;  %6309 = vmatprep.subr.bf16.mxu1 %v8283_v36  ;;  %v8373_v35 = vld [vmem:[%s9657_s0 + $0xaa0] ss:$16 sps:$4 sm:$0xff]   ;;  %v8376_v36 = vld [vmem:[%s9657_s0 + $0xaa8] ss:$16 sps:$4 sm:$0xff]  }
 0x1d0   : > { %5479 = vmatpush1.bf16.msra.mxu0 %v8282_v37  ;;  %6311 = vmatpush1.bf16.msra.mxu1 %v8285_v38  ;;  %v8377_v37 = vld [vmem:[%s9657_s0 + $0xac4] ss:$16 sps:$4 sm:$0xff]   ;;  %v8380_v38 = vld [vmem:[%s9657_s0 + $0xacc] ss:$16 sps:$4 sm:$0xff]  }
 0x1d1   : > { %5481 = vmatprep.subr.bf16.mxu0 %v8286_v39  ;;  %6313 = vmatprep.subr.bf16.mxu1 %v8289_v40  ;;  %v8379_v39 = vld [vmem:[%s9657_s0 + $0xac0] ss:$16 sps:$4 sm:$0xff]   ;;  %v8382_v40 = vld [vmem:[%s9657_s0 + $0xac8] ss:$16 sps:$4 sm:$0xff]  }
 0x1d4   : > { %5483 = vmatpush1.bf16.msra.mxu0 %v8288_v41  ;;  %6315 = vmatpush1.bf16.msra.mxu1 %v8291_v42  ;;  %v8383_v41 = vld [vmem:[%s9657_s0 + $0xae4] ss:$16 sps:$4 sm:$0xff]   ;;  %v8386_v42 = vld [vmem:[%s9657_s0 + $0xaec] ss:$16 sps:$4 sm:$0xff]  }
 0x1d5   : > { %5485 = vmatprep.subr.bf16.mxu0 %v8292_v43  ;;  %6317 = vmatprep.subr.bf16.mxu1 %v8295_v44  ;;  %v8385_v43 = vld [vmem:[%s9657_s0 + $0xae0] ss:$16 sps:$4 sm:$0xff]   ;;  %v8388_v44 = vld [vmem:[%s9657_s0 + $0xae8] ss:$16 sps:$4 sm:$0xff]  }
 0x1d8   : > { %5487 = vmatpush1.bf16.msra.mxu0 %v8294_v45  ;;  %6319 = vmatpush1.bf16.msra.mxu1 %v8297_v46  ;;  %v8389_v45 = vld [vmem:[%s9657_s0 + $0xb04] ss:$16 sps:$4 sm:$0xff]   ;;  %v8392_v46 = vld [vmem:[%s9657_s0 + $0xb0c] ss:$16 sps:$4 sm:$0xff]  }
 0x1d9   : > { %5489 = vmatprep.subr.bf16.mxu0 %v8298_v47  ;;  %6321 = vmatprep.subr.bf16.mxu1 %v8301_v48  ;;  %v8391_v47 = vld [vmem:[%s9657_s0 + $0xb00] ss:$16 sps:$4 sm:$0xff]   ;;  %v8394_v48 = vld [vmem:[%s9657_s0 + $0xb08] ss:$16 sps:$4 sm:$0xff]  }
 0x1dc   : > { %5491 = vmatpush1.bf16.msra.mxu0 %v8300_v49  ;;  %6323 = vmatpush1.bf16.msra.mxu1 %v8303_v50  ;;  %v8395_v49 = vld [vmem:[%s9657_s0 + $0xb24] ss:$16 sps:$4 sm:$0xff]   ;;  %v8398_v50 = vld [vmem:[%s9657_s0 + $0xb2c] ss:$16 sps:$4 sm:$0xff]  }
 0x1dd   : > { %5493 = vmatprep.subr.bf16.mxu0 %v8304_v51  ;;  %6325 = vmatprep.subr.bf16.mxu1 %v8307_v52  ;;  %v8397_v51 = vld [vmem:[%s9657_s0 + $0xb20] ss:$16 sps:$4 sm:$0xff]   ;;  %v8400_v52 = vld [vmem:[%s9657_s0 + $0xb28] ss:$16 sps:$4 sm:$0xff]  }
 0x1e0   : > { %5495 = vmatpush1.bf16.msra.mxu0 %v8306_v53  ;;  %6327 = vmatpush1.bf16.msra.mxu1 %v8309_v54  ;;  %v8401_v53 = vld [vmem:[%s9657_s0 + $0xb44] ss:$16 sps:$4 sm:$0xff]   ;;  %v8404_v54 = vld [vmem:[%s9657_s0 + $0xb4c] ss:$16 sps:$4 sm:$0xff]  }
 0x1e1   : > { %5497 = vmatprep.subr.bf16.mxu0 %v8310_v55  ;;  %6329 = vmatprep.subr.bf16.mxu1 %v8313_v56  ;;  %v8403_v55 = vld [vmem:[%s9657_s0 + $0xb40] ss:$16 sps:$4 sm:$0xff]   ;;  %v8406_v56 = vld [vmem:[%s9657_s0 + $0xb48] ss:$16 sps:$4 sm:$0xff]  }
 0x1e4   : > { %5499 = vmatpush1.bf16.msra.mxu0 %v8312_v57  ;;  %6331 = vmatpush1.bf16.msra.mxu1 %v8315_v58  ;;  %v8407_v57 = vld [vmem:[%s9657_s0 + $0xb64] ss:$16 sps:$4 sm:$0xff]   ;;  %v8410_v58 = vld [vmem:[%s9657_s0 + $0xb6c] ss:$16 sps:$4 sm:$0xff]  }
 0x1e5   : > { %5501 = vmatprep.subr.bf16.mxu0 %v8316_v59  ;;  %6333 = vmatprep.subr.bf16.mxu1 %v8319_v60  ;;  %v8409_v59 = vld [vmem:[%s9657_s0 + $0xb60] ss:$16 sps:$4 sm:$0xff]   ;;  %v8412_v60 = vld [vmem:[%s9657_s0 + $0xb68] ss:$16 sps:$4 sm:$0xff]  }
 0x1e8   : > { %5503 = vmatpush1.bf16.msra.mxu0 %v8318_v61  ;;  %6335 = vmatpush1.bf16.msra.mxu1 %v8321_v62  ;;  %v8413_v61 = vld [vmem:[%s9657_s0 + $0xb84] ss:$16 sps:$4 sm:$0xff]   ;;  %v8416_v62 = vld [vmem:[%s9657_s0 + $0xb8c] ss:$16 sps:$4 sm:$0xff]  }
 0x1e9   : > { %5505 = vmatprep.subr.bf16.mxu0 %v8322_v63  ;;  %6337 = vmatprep.subr.bf16.mxu1 %v8325_v0  ;;  %v8415_v63 = vld [vmem:[%s9657_s0 + $0xb80] ss:$16 sps:$4 sm:$0xff]   ;;  %v8418_v0 = vld [vmem:[%s9657_s0 + $0xb88] ss:$16 sps:$4 sm:$0xff]  }
 0x1ec   : > { %5507 = vmatpush1.bf16.msra.mxu0 %v8324_v1  ;;  %6339 = vmatpush1.bf16.msra.mxu1 %v8327_v2  ;;  %v8419_v1 = vld [vmem:[%s9657_s0 + $0xba4] ss:$16 sps:$4 sm:$0xff]   ;;  %v8422_v2 = vld [vmem:[%s9657_s0 + $0xbac] ss:$16 sps:$4 sm:$0xff]  }
 0x1ed   : > { %5509 = vmatprep.subr.bf16.mxu0 %v8328_v3  ;;  %6341 = vmatprep.subr.bf16.mxu1 %v8331_v4  ;;  %v8421_v3 = vld [vmem:[%s9657_s0 + $0xba0] ss:$16 sps:$4 sm:$0xff]   ;;  %v8424_v4 = vld [vmem:[%s9657_s0 + $0xba8] ss:$16 sps:$4 sm:$0xff]  }
 0x1f0   : > { %5511 = vmatpush1.bf16.msra.mxu0 %v8330_v5  ;;  %6343 = vmatpush1.bf16.msra.mxu1 %v8333_v6  ;;  %v8425_v5 = vld [vmem:[%s9657_s0 + $0xbc4] ss:$16 sps:$4 sm:$0xff]   ;;  %v8428_v6 = vld [vmem:[%s9657_s0 + $0xbcc] ss:$16 sps:$4 sm:$0xff]  }
 0x1f1   : > { %5513 = vmatprep.subr.bf16.mxu0 %v8334_v7  ;;  %6345 = vmatprep.subr.bf16.mxu1 %v8337_v8  ;;  %v8427_v7 = vld [vmem:[%s9657_s0 + $0xbc0] ss:$16 sps:$4 sm:$0xff]   ;;  %v8430_v8 = vld [vmem:[%s9657_s0 + $0xbc8] ss:$16 sps:$4 sm:$0xff]  }
 0x1f4   : > { %5515 = vmatpush1.bf16.msra.mxu0 %v8336_v9  ;;  %6347 = vmatpush1.bf16.msra.mxu1 %v8339_v11  ;;  %v8431_v9 = vld [vmem:[%s9657_s0 + $0xbe4] ss:$16 sps:$4 sm:$0xff]   ;;  %v8434_v11 = vld [vmem:[%s9657_s0 + $0xbec] ss:$16 sps:$4 sm:$0xff]  }
 0x1f5   : > { %5517 = vmatprep.subr.bf16.mxu0 %v8341_v13  ;;  %6349 = vmatprep.subr.bf16.mxu1 %v8344_v15  ;;  %v8433_v13 = vld [vmem:[%s9657_s0 + $0xbe0] ss:$16 sps:$4 sm:$0xff]   ;;  %v8436_v15 = vld [vmem:[%s9657_s0 + $0xbe8] ss:$16 sps:$4 sm:$0xff]  }
 0x1f7   : > { %3306 = vmatmul.mubr.f32.vlgmr.msra.gmra.mrb[0].mxu0 %v9974_v14  ;;  %4229 = vmatmul.mubr.f32.vlgmr.msra.gmra.mrb[0].mxu1 %v9974_v14  ;;  %v8358_v14 = vld [vmem:[%s9657_s0 + $0xa48] ss:$16 sps:$4 sm:$0xff]  }
 0x1f8   : > { %5519 = vmatpush1.bf16.msra.mxu0 %v8343_v17  ;;  %6351 = vmatpush1.bf16.msra.mxu1 %v8346_v18  ;;  %v8438_v17 = vld [vmem:[%s9657_s0 + $0xc04] ss:$16 sps:$4 sm:$0xff]   ;;  %v8441_v18 = vld [vmem:[%s9657_s0 + $0xc0c] ss:$16 sps:$4 sm:$0xff]  }
 0x1f9   : > { %5521 = vmatprep.subr.bf16.mxu0 %v8347_v19  ;;  %6353 = vmatprep.subr.bf16.mxu1 %v8350_v20  ;;  %v10115_v19 = vld [vmem:[%s9689_s8 + $0x30] sm:$0xff] }
 0x1fa   : > { %3376 = vmatprep.mubr.f32.mxu0 %v2936_v10  ;;  %4299 = vmatprep.mubr.f32.mxu1 %v2936_v10  ;;  %v8440_v20 = vld [vmem:[%s9657_s0 + $0xc00] ss:$16 sps:$4 sm:$0xff]   ;;  %v8444_v10 = vld [vmem:[%s9657_s0 + $0xc24] ss:$16 sps:$4 sm:$0xff]  }
 0x1fc   : > { %5523 = vmatpush1.bf16.msra.mxu0 %v8349_v21  ;;  %6355 = vmatpush1.bf16.msra.mxu1 %v8352_v22  ;;  %v8443_v21 = vld [vmem:[%s9657_s0 + $0xc08] ss:$16 sps:$4 sm:$0xff]   ;;  %v8447_v22 = vld [vmem:[%s9657_s0 + $0xc2c] ss:$16 sps:$4 sm:$0xff]  }
 0x1fd   : > { %5525 = vmatprep.subr.bf16.mxu0 %v8353_v12  ;;  %6357 = vmatprep.subr.bf16.mxu1 %v8356_v23  ;;  %v8446_v12 = vld [vmem:[%s9657_s0 + $0xc20] ss:$16 sps:$4 sm:$0xff]   ;;  %v2937_v23 = vcombine.high %v10115_v19, %v10115_v19 }
 0x200   : > { %5527 = vmatpush1.bf16.msra.mxu0 %v8355_v24  ;;  %6359 = vmatpush1.bf16.msra.mxu1 %v8358_v14  ;;  %v8449_v24 = vld [vmem:[%s9657_s0 + $0xc28] ss:$16 sps:$4 sm:$0xff]   ;;  %v8450_v14 = vld [vmem:[%s9657_s0 + $0xc44] ss:$16 sps:$4 sm:$0xff]  }
 0x201   : > { %5529 = vmatprep.subr.bf16.mxu0 %v8359_v25  ;;  %6361 = vmatprep.subr.bf16.mxu1 %v8362_v26  ;;  %v8453_v25 = vld [vmem:[%s9657_s0 + $0xc4c] ss:$16 sps:$4 sm:$0xff]   ;;  %v8452_v26 = vld [vmem:[%s9657_s0 + $0xc40] ss:$16 sps:$4 sm:$0xff]  }
 0x204   : > { %5531 = vmatpush1.bf16.msra.mxu0 %v8361_v27  ;;  %6363 = vmatpush1.bf16.msra.mxu1 %v8364_v28  ;;  %v8456_v27 = vld [vmem:[%s9657_s0 + $0xc64] ss:$16 sps:$4 sm:$0xff]   ;;  %v8459_v28 = vld [vmem:[%s9657_s0 + $0xc6c] ss:$16 sps:$4 sm:$0xff]  }
 0x205   : > { %5533 = vmatprep.subr.bf16.mxu0 %v8365_v29  ;;  %6365 = vmatprep.subr.bf16.mxu1 %v8368_v30  ;;  %v8458_v29 = vld [vmem:[%s9657_s0 + $0xc60] ss:$16 sps:$4 sm:$0xff]   ;;  %v8461_v30 = vld [vmem:[%s9657_s0 + $0xc68] ss:$16 sps:$4 sm:$0xff]  }
 0x208   : > { %5535 = vmatpush1.bf16.msra.mxu0 %v8367_v31  ;;  %6367 = vmatpush1.bf16.msra.mxu1 %v8370_v32  ;;  %v8462_v31 = vld [vmem:[%s9657_s0 + $0xc84] ss:$16 sps:$4 sm:$0xff]   ;;  %v8465_v32 = vld [vmem:[%s9657_s0 + $0xc8c] ss:$16 sps:$4 sm:$0xff]  }
 0x209   : > { %5537 = vmatprep.subr.bf16.mxu0 %v8371_v33  ;;  %6369 = vmatprep.subr.bf16.mxu1 %v8374_v34  ;;  %v8464_v33 = vld [vmem:[%s9657_s0 + $0xc80] ss:$16 sps:$4 sm:$0xff]   ;;  %v8467_v34 = vld [vmem:[%s9657_s0 + $0xc88] ss:$16 sps:$4 sm:$0xff]  }
 0x20c   : > { %5539 = vmatpush1.bf16.msra.mxu0 %v8373_v35  ;;  %6371 = vmatpush1.bf16.msra.mxu1 %v8376_v36  ;;  %v8468_v35 = vld [vmem:[%s9657_s0 + $0xca4] ss:$16 sps:$4 sm:$0xff]   ;;  %v8471_v36 = vld [vmem:[%s9657_s0 + $0xcac] ss:$16 sps:$4 sm:$0xff]  }
 0x20d   : > { %5541 = vmatprep.subr.bf16.mxu0 %v8377_v37  ;;  %6373 = vmatprep.subr.bf16.mxu1 %v8380_v38  ;;  %v8470_v37 = vld [vmem:[%s9657_s0 + $0xca0] ss:$16 sps:$4 sm:$0xff]   ;;  %v8473_v38 = vld [vmem:[%s9657_s0 + $0xca8] ss:$16 sps:$4 sm:$0xff]  }
 0x210   : > { %5543 = vmatpush1.bf16.msra.mxu0 %v8379_v39  ;;  %6375 = vmatpush1.bf16.msra.mxu1 %v8382_v40  ;;  %v8474_v39 = vld [vmem:[%s9657_s0 + $0xcc4] ss:$16 sps:$4 sm:$0xff]   ;;  %v8477_v40 = vld [vmem:[%s9657_s0 + $0xccc] ss:$16 sps:$4 sm:$0xff]  }
 0x211   : > { %5545 = vmatprep.subr.bf16.mxu0 %v8383_v41  ;;  %6377 = vmatprep.subr.bf16.mxu1 %v8386_v42  ;;  %v8476_v41 = vld [vmem:[%s9657_s0 + $0xcc0] ss:$16 sps:$4 sm:$0xff]   ;;  %v8479_v42 = vld [vmem:[%s9657_s0 + $0xcc8] ss:$16 sps:$4 sm:$0xff]  }
 0x214   : > { %5547 = vmatpush1.bf16.msra.mxu0 %v8385_v43  ;;  %6379 = vmatpush1.bf16.msra.mxu1 %v8388_v44  ;;  %v8480_v43 = vld [vmem:[%s9657_s0 + $0xce4] ss:$16 sps:$4 sm:$0xff]   ;;  %v8483_v44 = vld [vmem:[%s9657_s0 + $0xcec] ss:$16 sps:$4 sm:$0xff]  }
 0x215   : > { %5549 = vmatprep.subr.bf16.mxu0 %v8389_v45  ;;  %6381 = vmatprep.subr.bf16.mxu1 %v8392_v46  ;;  %v8482_v45 = vld [vmem:[%s9657_s0 + $0xce0] ss:$16 sps:$4 sm:$0xff]   ;;  %v8485_v46 = vld [vmem:[%s9657_s0 + $0xce8] ss:$16 sps:$4 sm:$0xff]  }
 0x218   : > { %5551 = vmatpush1.bf16.msra.mxu0 %v8391_v47  ;;  %6383 = vmatpush1.bf16.msra.mxu1 %v8394_v48  ;;  %v8486_v47 = vld [vmem:[%s9657_s0 + $0xd04] ss:$16 sps:$4 sm:$0xff]   ;;  %v8489_v48 = vld [vmem:[%s9657_s0 + $0xd0c] ss:$16 sps:$4 sm:$0xff]  }
 0x219   : > { %5553 = vmatprep.subr.bf16.mxu0 %v8395_v49  ;;  %6385 = vmatprep.subr.bf16.mxu1 %v8398_v50  ;;  %v8488_v49 = vld [vmem:[%s9657_s0 + $0xd00] ss:$16 sps:$4 sm:$0xff]   ;;  %v8491_v50 = vld [vmem:[%s9657_s0 + $0xd08] ss:$16 sps:$4 sm:$0xff]  }
 0x21c   : > { %5555 = vmatpush1.bf16.msra.mxu0 %v8397_v51  ;;  %6387 = vmatpush1.bf16.msra.mxu1 %v8400_v52  ;;  %v8492_v51 = vld [vmem:[%s9657_s0 + $0xd24] ss:$16 sps:$4 sm:$0xff]   ;;  %v8495_v52 = vld [vmem:[%s9657_s0 + $0xd2c] ss:$16 sps:$4 sm:$0xff]  }
 0x21d   : > { %5557 = vmatprep.subr.bf16.mxu0 %v8401_v53  ;;  %6389 = vmatprep.subr.bf16.mxu1 %v8404_v54  ;;  %v8494_v53 = vld [vmem:[%s9657_s0 + $0xd20] ss:$16 sps:$4 sm:$0xff]   ;;  %v8497_v54 = vld [vmem:[%s9657_s0 + $0xd28] ss:$16 sps:$4 sm:$0xff]  }
 0x220   : > { %5559 = vmatpush1.bf16.msra.mxu0 %v8403_v55  ;;  %6391 = vmatpush1.bf16.msra.mxu1 %v8406_v56  ;;  %v8498_v55 = vld [vmem:[%s9657_s0 + $0xd44] ss:$16 sps:$4 sm:$0xff]   ;;  %v8501_v56 = vld [vmem:[%s9657_s0 + $0xd4c] ss:$16 sps:$4 sm:$0xff]  }
 0x221   : > { %5561 = vmatprep.subr.bf16.mxu0 %v8407_v57  ;;  %6393 = vmatprep.subr.bf16.mxu1 %v8410_v58  ;;  %v8500_v57 = vld [vmem:[%s9657_s0 + $0xd40] ss:$16 sps:$4 sm:$0xff]   ;;  %v8503_v58 = vld [vmem:[%s9657_s0 + $0xd48] ss:$16 sps:$4 sm:$0xff]  }
 0x224   : > { %5563 = vmatpush1.bf16.msra.mxu0 %v8409_v59  ;;  %6395 = vmatpush1.bf16.msra.mxu1 %v8412_v60  ;;  %v8504_v59 = vld [vmem:[%s9657_s0 + $0xd64] ss:$16 sps:$4 sm:$0xff]   ;;  %v8507_v60 = vld [vmem:[%s9657_s0 + $0xd6c] ss:$16 sps:$4 sm:$0xff]  }
 0x225   : > { %5565 = vmatprep.subr.bf16.mxu0 %v8413_v61  ;;  %6397 = vmatprep.subr.bf16.mxu1 %v8416_v62  ;;  %v8506_v61 = vld [vmem:[%s9657_s0 + $0xd60] ss:$16 sps:$4 sm:$0xff]   ;;  %v8509_v62 = vld [vmem:[%s9657_s0 + $0xd68] ss:$16 sps:$4 sm:$0xff]  }
 0x228   : > { %5567 = vmatpush1.bf16.msra.mxu0 %v8415_v63  ;;  %6399 = vmatpush1.bf16.msra.mxu1 %v8418_v0  ;;  %v8510_v63 = vld [vmem:[%s9657_s0 + $0xd84] ss:$16 sps:$4 sm:$0xff]   ;;  %v8513_v0 = vld [vmem:[%s9657_s0 + $0xd8c] ss:$16 sps:$4 sm:$0xff]  }
 0x229   : > { %5569 = vmatprep.subr.bf16.mxu0 %v8419_v1  ;;  %6401 = vmatprep.subr.bf16.mxu1 %v8422_v2  ;;  %v8512_v1 = vld [vmem:[%s9657_s0 + $0xd80] ss:$16 sps:$4 sm:$0xff]   ;;  %v8515_v2 = vld [vmem:[%s9657_s0 + $0xd88] ss:$16 sps:$4 sm:$0xff]  }
 0x22c   : > { %5571 = vmatpush1.bf16.msra.mxu0 %v8421_v3  ;;  %6403 = vmatpush1.bf16.msra.mxu1 %v8424_v4  ;;  %v8516_v3 = vld [vmem:[%s9657_s0 + $0xda4] ss:$16 sps:$4 sm:$0xff]   ;;  %v8519_v4 = vld [vmem:[%s9657_s0 + $0xdac] ss:$16 sps:$4 sm:$0xff]  }
 0x22d   : > { %5573 = vmatprep.subr.bf16.mxu0 %v8425_v5  ;;  %6405 = vmatprep.subr.bf16.mxu1 %v8428_v6  ;;  %v8518_v5 = vld [vmem:[%s9657_s0 + $0xda0] ss:$16 sps:$4 sm:$0xff]   ;;  %v8521_v6 = vld [vmem:[%s9657_s0 + $0xda8] ss:$16 sps:$4 sm:$0xff]  }
 0x230   : > { %5575 = vmatpush1.bf16.msra.mxu0 %v8427_v7  ;;  %6407 = vmatpush1.bf16.msra.mxu1 %v8430_v8  ;;  %v8522_v7 = vld [vmem:[%s9657_s0 + $0xdc4] ss:$16 sps:$4 sm:$0xff]   ;;  %v8525_v8 = vld [vmem:[%s9657_s0 + $0xdcc] ss:$16 sps:$4 sm:$0xff]  }
 0x231   : > { %5577 = vmatprep.subr.bf16.mxu0 %v8431_v9  ;;  %6409 = vmatprep.subr.bf16.mxu1 %v8434_v11  ;;  %v8524_v9 = vld [vmem:[%s9657_s0 + $0xdc0] ss:$16 sps:$4 sm:$0xff]   ;;  %v8527_v11 = vld [vmem:[%s9657_s0 + $0xdc8] ss:$16 sps:$4 sm:$0xff]  }
 0x234   : > { %5579 = vmatpush1.bf16.msra.mxu0 %v8433_v13  ;;  %6411 = vmatpush1.bf16.msra.mxu1 %v8436_v15  ;;  %v8528_v13 = vld [vmem:[%s9657_s0 + $0xde4] ss:$16 sps:$4 sm:$0xff]   ;;  %v8531_v15 = vld [vmem:[%s9657_s0 + $0xdec] ss:$16 sps:$4 sm:$0xff]  }
 0x235   : > { %5581 = vmatprep.subr.bf16.mxu0 %v8438_v17  ;;  %6413 = vmatprep.subr.bf16.mxu1 %v8441_v18  ;;  %v8530_v17 = vld [vmem:[%s9657_s0 + $0xde0] ss:$16 sps:$4 sm:$0xff]   ;;  %v8533_v18 = vld [vmem:[%s9657_s0 + $0xde8] ss:$16 sps:$4 sm:$0xff]  }
 0x237   : > { %3377 = vmatmul.mubr.f32.vlgmr.msra.gmra.mrb[0].mxu0 %v10044_v16  ;;  %4300 = vmatmul.mubr.f32.vlgmr.msra.gmra.mrb[0].mxu1 %v10044_v16  ;;  %v8455_v16 = vld [vmem:[%s9657_s0 + $0xc48] ss:$16 sps:$4 sm:$0xff]  }
 0x238   : > { %5583 = vmatpush1.bf16.msra.mxu0 %v8440_v20  ;;  %6415 = vmatpush1.bf16.msra.mxu1 %v8443_v21  ;;  %v8535_v20 = vld [vmem:[%s9657_s0 + $0xe04] ss:$16 sps:$4 sm:$0xff]   ;;  %v8538_v21 = vld [vmem:[%s9657_s0 + $0xe0c] ss:$16 sps:$4 sm:$0xff]  }
 0x239   : > { %5585 = vmatprep.subr.bf16.mxu0 %v8444_v10  ;;  %6417 = vmatprep.subr.bf16.mxu1 %v8447_v22  ;;  %v10186_v10 = vld [vmem:[%s9689_s8 + $0x38] sm:$0xff]  ;;  %v8537_v22 = vld [vmem:[%s9657_s0 + $0xe00] ss:$16 sps:$4 sm:$0xff]  }
 0x23a   : > { %3447 = vmatprep.mubr.f32.mxu0 %v2937_v23  ;;  %4370 = vmatprep.mubr.f32.mxu1 %v2937_v23  ;;  %v8541_v23 = vld [vmem:[%s9657_s0 + $0xe24] ss:$16 sps:$4 sm:$0xff]  }
 0x23c   : > { %5587 = vmatpush1.bf16.msra.mxu0 %v8446_v12  ;;  %6419 = vmatpush1.bf16.msra.mxu1 %v8449_v24  ;;  %v8540_v12 = vld [vmem:[%s9657_s0 + $0xe08] ss:$16 sps:$4 sm:$0xff]   ;;  %v8544_v24 = vld [vmem:[%s9657_s0 + $0xe2c] ss:$16 sps:$4 sm:$0xff]  }
 0x23d   : > { %5589 = vmatprep.subr.bf16.mxu0 %v8450_v14  ;;  %6421 = vmatprep.subr.bf16.mxu1 %v8453_v25  ;;  %v8543_v14 = vld [vmem:[%s9657_s0 + $0xe20] ss:$16 sps:$4 sm:$0xff]   ;;  %v2938_v25 = vcombine.high %v10186_v10, %v10186_v10 }
 0x240   : > { %5591 = vmatpush1.bf16.msra.mxu0 %v8452_v26  ;;  %6423 = vmatpush1.bf16.msra.mxu1 %v8455_v16  ;;  %v8546_v26 = vld [vmem:[%s9657_s0 + $0xe28] ss:$16 sps:$4 sm:$0xff]   ;;  %v8547_v16 = vld [vmem:[%s9657_s0 + $0xe44] ss:$16 sps:$4 sm:$0xff]  }
 0x241   : > { %5593 = vmatprep.subr.bf16.mxu0 %v8456_v27  ;;  %6425 = vmatprep.subr.bf16.mxu1 %v8459_v28  ;;  %v8550_v27 = vld [vmem:[%s9657_s0 + $0xe4c] ss:$16 sps:$4 sm:$0xff]   ;;  %v8549_v28 = vld [vmem:[%s9657_s0 + $0xe40] ss:$16 sps:$4 sm:$0xff]  }
 0x244   : > { %5595 = vmatpush1.bf16.msra.mxu0 %v8458_v29  ;;  %6427 = vmatpush1.bf16.msra.mxu1 %v8461_v30  ;;  %v8553_v29 = vld [vmem:[%s9657_s0 + $0xe64] ss:$16 sps:$4 sm:$0xff]   ;;  %v8556_v30 = vld [vmem:[%s9657_s0 + $0xe6c] ss:$16 sps:$4 sm:$0xff]  }
 0x245   : > { %5597 = vmatprep.subr.bf16.mxu0 %v8462_v31  ;;  %6429 = vmatprep.subr.bf16.mxu1 %v8465_v32  ;;  %v8555_v31 = vld [vmem:[%s9657_s0 + $0xe60] ss:$16 sps:$4 sm:$0xff]   ;;  %v8558_v32 = vld [vmem:[%s9657_s0 + $0xe68] ss:$16 sps:$4 sm:$0xff]  }
 0x248   : > { %5599 = vmatpush1.bf16.msra.mxu0 %v8464_v33  ;;  %6431 = vmatpush1.bf16.msra.mxu1 %v8467_v34  ;;  %v8559_v33 = vld [vmem:[%s9657_s0 + $0xe84] ss:$16 sps:$4 sm:$0xff]   ;;  %v8562_v34 = vld [vmem:[%s9657_s0 + $0xe8c] ss:$16 sps:$4 sm:$0xff]  }
 0x249   : > { %5601 = vmatprep.subr.bf16.mxu0 %v8468_v35  ;;  %6433 = vmatprep.subr.bf16.mxu1 %v8471_v36  ;;  %v8561_v35 = vld [vmem:[%s9657_s0 + $0xe80] ss:$16 sps:$4 sm:$0xff]   ;;  %v8564_v36 = vld [vmem:[%s9657_s0 + $0xe88] ss:$16 sps:$4 sm:$0xff]  }
 0x24c   : > { %5603 = vmatpush1.bf16.msra.mxu0 %v8470_v37  ;;  %6435 = vmatpush1.bf16.msra.mxu1 %v8473_v38  ;;  %v8565_v37 = vld [vmem:[%s9657_s0 + $0xea4] ss:$16 sps:$4 sm:$0xff]   ;;  %v8568_v38 = vld [vmem:[%s9657_s0 + $0xeac] ss:$16 sps:$4 sm:$0xff]  }
 0x24d   : > { %5605 = vmatprep.subr.bf16.mxu0 %v8474_v39  ;;  %6437 = vmatprep.subr.bf16.mxu1 %v8477_v40  ;;  %v8567_v39 = vld [vmem:[%s9657_s0 + $0xea0] ss:$16 sps:$4 sm:$0xff]   ;;  %v8570_v40 = vld [vmem:[%s9657_s0 + $0xea8] ss:$16 sps:$4 sm:$0xff]  }
 0x250   : > { %5607 = vmatpush1.bf16.msra.mxu0 %v8476_v41  ;;  %6439 = vmatpush1.bf16.msra.mxu1 %v8479_v42  ;;  %v8571_v41 = vld [vmem:[%s9657_s0 + $0xec4] ss:$16 sps:$4 sm:$0xff]   ;;  %v8574_v42 = vld [vmem:[%s9657_s0 + $0xecc] ss:$16 sps:$4 sm:$0xff]  }
 0x251   : > { %5609 = vmatprep.subr.bf16.mxu0 %v8480_v43  ;;  %6441 = vmatprep.subr.bf16.mxu1 %v8483_v44  ;;  %v8573_v43 = vld [vmem:[%s9657_s0 + $0xec0] ss:$16 sps:$4 sm:$0xff]   ;;  %v8576_v44 = vld [vmem:[%s9657_s0 + $0xec8] ss:$16 sps:$4 sm:$0xff]  }
 0x254   : > { %5611 = vmatpush1.bf16.msra.mxu0 %v8482_v45  ;;  %6443 = vmatpush1.bf16.msra.mxu1 %v8485_v46  ;;  %v8577_v45 = vld [vmem:[%s9657_s0 + $0xee4] ss:$16 sps:$4 sm:$0xff]   ;;  %v8580_v46 = vld [vmem:[%s9657_s0 + $0xeec] ss:$16 sps:$4 sm:$0xff]  }
 0x255   : > { %5613 = vmatprep.subr.bf16.mxu0 %v8486_v47  ;;  %6445 = vmatprep.subr.bf16.mxu1 %v8489_v48  ;;  %v8579_v47 = vld [vmem:[%s9657_s0 + $0xee0] ss:$16 sps:$4 sm:$0xff]   ;;  %v8582_v48 = vld [vmem:[%s9657_s0 + $0xee8] ss:$16 sps:$4 sm:$0xff]  }
 0x258   : > { %5615 = vmatpush1.bf16.msra.mxu0 %v8488_v49  ;;  %6447 = vmatpush1.bf16.msra.mxu1 %v8491_v50  ;;  %v8583_v49 = vld [vmem:[%s9657_s0 + $0xf04] ss:$16 sps:$4 sm:$0xff]   ;;  %v8586_v50 = vld [vmem:[%s9657_s0 + $0xf0c] ss:$16 sps:$4 sm:$0xff]  }
 0x259   : > { %5617 = vmatprep.subr.bf16.mxu0 %v8492_v51  ;;  %6449 = vmatprep.subr.bf16.mxu1 %v8495_v52  ;;  %v8585_v51 = vld [vmem:[%s9657_s0 + $0xf00] ss:$16 sps:$4 sm:$0xff]   ;;  %v8588_v52 = vld [vmem:[%s9657_s0 + $0xf08] ss:$16 sps:$4 sm:$0xff]  }
 0x25c   : > { %5619 = vmatpush1.bf16.msra.mxu0 %v8494_v53  ;;  %6451 = vmatpush1.bf16.msra.mxu1 %v8497_v54  ;;  %v8589_v53 = vld [vmem:[%s9657_s0 + $0xf24] ss:$16 sps:$4 sm:$0xff]   ;;  %v8592_v54 = vld [vmem:[%s9657_s0 + $0xf2c] ss:$16 sps:$4 sm:$0xff]  }
 0x25d   : > { %5621 = vmatprep.subr.bf16.mxu0 %v8498_v55  ;;  %6453 = vmatprep.subr.bf16.mxu1 %v8501_v56  ;;  %v8591_v55 = vld [vmem:[%s9657_s0 + $0xf20] ss:$16 sps:$4 sm:$0xff]   ;;  %v8594_v56 = vld [vmem:[%s9657_s0 + $0xf28] ss:$16 sps:$4 sm:$0xff]  }
 0x260   : > { %5623 = vmatpush1.bf16.msra.mxu0 %v8500_v57  ;;  %6455 = vmatpush1.bf16.msra.mxu1 %v8503_v58  ;;  %v8595_v57 = vld [vmem:[%s9657_s0 + $0xf44] ss:$16 sps:$4 sm:$0xff]   ;;  %v8598_v58 = vld [vmem:[%s9657_s0 + $0xf4c] ss:$16 sps:$4 sm:$0xff]  }
 0x261   : > { %5625 = vmatprep.subr.bf16.mxu0 %v8504_v59  ;;  %6457 = vmatprep.subr.bf16.mxu1 %v8507_v60  ;;  %v8597_v59 = vld [vmem:[%s9657_s0 + $0xf40] ss:$16 sps:$4 sm:$0xff]   ;;  %v8600_v60 = vld [vmem:[%s9657_s0 + $0xf48] ss:$16 sps:$4 sm:$0xff]  }
 0x264   : > { %5627 = vmatpush1.bf16.msra.mxu0 %v8506_v61  ;;  %6459 = vmatpush1.bf16.msra.mxu1 %v8509_v62  ;;  %v8601_v61 = vld [vmem:[%s9657_s0 + $0xf64] ss:$16 sps:$4 sm:$0xff]   ;;  %v8604_v62 = vld [vmem:[%s9657_s0 + $0xf6c] ss:$16 sps:$4 sm:$0xff]  }
 0x265   : > { %5629 = vmatprep.subr.bf16.mxu0 %v8510_v63  ;;  %6461 = vmatprep.subr.bf16.mxu1 %v8513_v0  ;;  %v8603_v63 = vld [vmem:[%s9657_s0 + $0xf60] ss:$16 sps:$4 sm:$0xff]   ;;  %v8606_v0 = vld [vmem:[%s9657_s0 + $0xf68] ss:$16 sps:$4 sm:$0xff]  }
 0x268   : > { %5631 = vmatpush1.bf16.msra.mxu0 %v8512_v1  ;;  %6463 = vmatpush1.bf16.msra.mxu1 %v8515_v2  ;;  %v8607_v1 = vld [vmem:[%s9657_s0 + $0xf84] ss:$16 sps:$4 sm:$0xff]   ;;  %v8610_v2 = vld [vmem:[%s9657_s0 + $0xf8c] ss:$16 sps:$4 sm:$0xff]  }
 0x269   : > { %5633 = vmatprep.subr.bf16.mxu0 %v8516_v3  ;;  %6465 = vmatprep.subr.bf16.mxu1 %v8519_v4  ;;  %v8609_v3 = vld [vmem:[%s9657_s0 + $0xf80] ss:$16 sps:$4 sm:$0xff]   ;;  %v8612_v4 = vld [vmem:[%s9657_s0 + $0xf88] ss:$16 sps:$4 sm:$0xff]  }
 0x26c   : > { %5635 = vmatpush1.bf16.msra.mxu0 %v8518_v5  ;;  %6467 = vmatpush1.bf16.msra.mxu1 %v8521_v6  ;;  %v8613_v5 = vld [vmem:[%s9657_s0 + $0xfa4] ss:$16 sps:$4 sm:$0xff]   ;;  %v8616_v6 = vld [vmem:[%s9657_s0 + $0xfac] ss:$16 sps:$4 sm:$0xff]  }
 0x26d   : > { %5637 = vmatprep.subr.bf16.mxu0 %v8522_v7  ;;  %6469 = vmatprep.subr.bf16.mxu1 %v8525_v8  ;;  %v8615_v7 = vld [vmem:[%s9657_s0 + $0xfa0] ss:$16 sps:$4 sm:$0xff]   ;;  %v8618_v8 = vld [vmem:[%s9657_s0 + $0xfa8] ss:$16 sps:$4 sm:$0xff]  }
 0x270   : > { %5639 = vmatpush1.bf16.msra.mxu0 %v8524_v9  ;;  %6471 = vmatpush1.bf16.msra.mxu1 %v8527_v11  ;;  %v8619_v9 = vld [vmem:[%s9657_s0 + $0xfc4] ss:$16 sps:$4 sm:$0xff]   ;;  %v8622_v11 = vld [vmem:[%s9657_s0 + $0xfcc] ss:$16 sps:$4 sm:$0xff]  }
 0x271   : > { %5641 = vmatprep.subr.bf16.mxu0 %v8528_v13  ;;  %6473 = vmatprep.subr.bf16.mxu1 %v8531_v15  ;;  %v8621_v13 = vld [vmem:[%s9657_s0 + $0xfc0] ss:$16 sps:$4 sm:$0xff]   ;;  %v8624_v15 = vld [vmem:[%s9657_s0 + $0xfc8] ss:$16 sps:$4 sm:$0xff]  }
 0x274   : > { %5643 = vmatpush1.bf16.msra.mxu0 %v8530_v17  ;;  %6475 = vmatpush1.bf16.msra.mxu1 %v8533_v18  ;;  %v8625_v17 = vld [vmem:[%s9657_s0 + $0xfe4] ss:$16 sps:$4 sm:$0xff]   ;;  %v8628_v18 = vld [vmem:[%s9657_s0 + $0xfec] ss:$16 sps:$4 sm:$0xff]  }
 0x275   : > { %5645 = vmatprep.subr.bf16.mxu0 %v8535_v20  ;;  %6477 = vmatprep.subr.bf16.mxu1 %v8538_v21  ;;  %v8627_v20 = vld [vmem:[%s9657_s0 + $0xfe0] ss:$16 sps:$4 sm:$0xff]   ;;  %v8630_v21 = vld [vmem:[%s9657_s0 + $0xfe8] ss:$16 sps:$4 sm:$0xff]  }
 0x277   : > { %3448 = vmatmul.mubr.f32.vlgmr.msra.gmra.mrb[0].mxu0 %v10115_v19  ;;  %4371 = vmatmul.mubr.f32.vlgmr.msra.gmra.mrb[0].mxu1 %v10115_v19  ;;  %v8552_v19 = vld [vmem:[%s9657_s0 + $0xe48] ss:$16 sps:$4 sm:$0xff]  }
 0x278   : > { %5647 = vmatpush1.bf16.msra.mxu0 %v8537_v22  ;;  %6479 = vmatpush1.bf16.msra.mxu1 %v8540_v12  ;;  %v8632_v22 = vld [vmem:[%s9657_s0 + $0x1004] ss:$16 sps:$4 sm:$0xff]   ;;  %v8635_v12 = vld [vmem:[%s9657_s0 + $0x100c] ss:$16 sps:$4 sm:$0xff]  }
 0x279   : > { %5649 = vmatprep.subr.bf16.mxu0 %v8541_v23  ;;  %6481 = vmatprep.subr.bf16.mxu1 %v8544_v24  ;;  %v10257_v23 = vld [vmem:[%s9689_s8 + $0x40] sm:$0xff] }
 0x27a   : > { %3518 = vmatprep.mubr.f32.mxu0 %v2938_v25  ;;  %4441 = vmatprep.mubr.f32.mxu1 %v2938_v25  ;;  %v8634_v24 = vld [vmem:[%s9657_s0 + $0x1000] ss:$16 sps:$4 sm:$0xff]   ;;  %v8638_v25 = vld [vmem:[%s9657_s0 + $0x1024] ss:$16 sps:$4 sm:$0xff]  }
 0x27c   : > { %5651 = vmatpush1.bf16.msra.mxu0 %v8543_v14  ;;  %6483 = vmatpush1.bf16.msra.mxu1 %v8546_v26  ;;  %v8637_v14 = vld [vmem:[%s9657_s0 + $0x1008] ss:$16 sps:$4 sm:$0xff]   ;;  %v8641_v26 = vld [vmem:[%s9657_s0 + $0x102c] ss:$16 sps:$4 sm:$0xff]  }
 0x27d   : > { %5653 = vmatprep.subr.bf16.mxu0 %v8547_v16  ;;  %6485 = vmatprep.subr.bf16.mxu1 %v8550_v27  ;;  %v2939_v16 = vcombine.high %v10257_v23, %v10257_v23  ;;  %v8640_v27 = vld [vmem:[%s9657_s0 + $0x1020] ss:$16 sps:$4 sm:$0xff]  }
 0x280   : > { %5655 = vmatpush1.bf16.msra.mxu0 %v8549_v28  ;;  %6487 = vmatpush1.bf16.msra.mxu1 %v8552_v19  ;;  %v8643_v28 = vld [vmem:[%s9657_s0 + $0x1028] ss:$16 sps:$4 sm:$0xff]   ;;  %v8644_v19 = vld [vmem:[%s9657_s0 + $0x1044] ss:$16 sps:$4 sm:$0xff]  }
 0x281   : > { %5657 = vmatprep.subr.bf16.mxu0 %v8553_v29  ;;  %6489 = vmatprep.subr.bf16.mxu1 %v8556_v30  ;;  %v8647_v29 = vld [vmem:[%s9657_s0 + $0x104c] ss:$16 sps:$4 sm:$0xff]   ;;  %v8646_v30 = vld [vmem:[%s9657_s0 + $0x1040] ss:$16 sps:$4 sm:$0xff]  }
 0x284   : > { %5659 = vmatpush1.bf16.msra.mxu0 %v8555_v31  ;;  %6491 = vmatpush1.bf16.msra.mxu1 %v8558_v32  ;;  %v8650_v31 = vld [vmem:[%s9657_s0 + $0x1064] ss:$16 sps:$4 sm:$0xff]   ;;  %v8653_v32 = vld [vmem:[%s9657_s0 + $0x106c] ss:$16 sps:$4 sm:$0xff]  }
 0x285   : > { %5661 = vmatprep.subr.bf16.mxu0 %v8559_v33  ;;  %6493 = vmatprep.subr.bf16.mxu1 %v8562_v34  ;;  %v8652_v33 = vld [vmem:[%s9657_s0 + $0x1060] ss:$16 sps:$4 sm:$0xff]   ;;  %v8655_v34 = vld [vmem:[%s9657_s0 + $0x1068] ss:$16 sps:$4 sm:$0xff]  }
 0x288   : > { %5663 = vmatpush1.bf16.msra.mxu0 %v8561_v35  ;;  %6495 = vmatpush1.bf16.msra.mxu1 %v8564_v36  ;;  %v8656_v35 = vld [vmem:[%s9657_s0 + $0x1084] ss:$16 sps:$4 sm:$0xff]   ;;  %v8659_v36 = vld [vmem:[%s9657_s0 + $0x108c] ss:$16 sps:$4 sm:$0xff]  }
 0x289   : > { %5665 = vmatprep.subr.bf16.mxu0 %v8565_v37  ;;  %6497 = vmatprep.subr.bf16.mxu1 %v8568_v38  ;;  %v8658_v37 = vld [vmem:[%s9657_s0 + $0x1080] ss:$16 sps:$4 sm:$0xff]   ;;  %v8661_v38 = vld [vmem:[%s9657_s0 + $0x1088] ss:$16 sps:$4 sm:$0xff]  }
 0x28c   : > { %5667 = vmatpush1.bf16.msra.mxu0 %v8567_v39  ;;  %6499 = vmatpush1.bf16.msra.mxu1 %v8570_v40  ;;  %v8662_v39 = vld [vmem:[%s9657_s0 + $0x10a4] ss:$16 sps:$4 sm:$0xff]   ;;  %v8665_v40 = vld [vmem:[%s9657_s0 + $0x10ac] ss:$16 sps:$4 sm:$0xff]  }
 0x28d   : > { %5669 = vmatprep.subr.bf16.mxu0 %v8571_v41  ;;  %6501 = vmatprep.subr.bf16.mxu1 %v8574_v42  ;;  %v8664_v41 = vld [vmem:[%s9657_s0 + $0x10a0] ss:$16 sps:$4 sm:$0xff]   ;;  %v8667_v42 = vld [vmem:[%s9657_s0 + $0x10a8] ss:$16 sps:$4 sm:$0xff]  }
 0x290   : > { %5671 = vmatpush1.bf16.msra.mxu0 %v8573_v43  ;;  %6503 = vmatpush1.bf16.msra.mxu1 %v8576_v44  ;;  %v8668_v43 = vld [vmem:[%s9657_s0 + $0x10c4] ss:$16 sps:$4 sm:$0xff]   ;;  %v8671_v44 = vld [vmem:[%s9657_s0 + $0x10cc] ss:$16 sps:$4 sm:$0xff]  }
 0x291   : > { %5673 = vmatprep.subr.bf16.mxu0 %v8577_v45  ;;  %6505 = vmatprep.subr.bf16.mxu1 %v8580_v46  ;;  %v8670_v45 = vld [vmem:[%s9657_s0 + $0x10c0] ss:$16 sps:$4 sm:$0xff]   ;;  %v8673_v46 = vld [vmem:[%s9657_s0 + $0x10c8] ss:$16 sps:$4 sm:$0xff]  }
 0x294   : > { %5675 = vmatpush1.bf16.msra.mxu0 %v8579_v47  ;;  %6507 = vmatpush1.bf16.msra.mxu1 %v8582_v48  ;;  %v8674_v47 = vld [vmem:[%s9657_s0 + $0x10e4] ss:$16 sps:$4 sm:$0xff]   ;;  %v8677_v48 = vld [vmem:[%s9657_s0 + $0x10ec] ss:$16 sps:$4 sm:$0xff]  }
 0x295   : > { %5677 = vmatprep.subr.bf16.mxu0 %v8583_v49  ;;  %6509 = vmatprep.subr.bf16.mxu1 %v8586_v50  ;;  %v8676_v49 = vld [vmem:[%s9657_s0 + $0x10e0] ss:$16 sps:$4 sm:$0xff]   ;;  %v8679_v50 = vld [vmem:[%s9657_s0 + $0x10e8] ss:$16 sps:$4 sm:$0xff]  }
 0x298   : > { %5679 = vmatpush1.bf16.msra.mxu0 %v8585_v51  ;;  %6511 = vmatpush1.bf16.msra.mxu1 %v8588_v52  ;;  %v8680_v51 = vld [vmem:[%s9657_s0 + $0x1104] ss:$16 sps:$4 sm:$0xff]   ;;  %v8683_v52 = vld [vmem:[%s9657_s0 + $0x110c] ss:$16 sps:$4 sm:$0xff]  }
 0x299   : > { %5681 = vmatprep.subr.bf16.mxu0 %v8589_v53  ;;  %6513 = vmatprep.subr.bf16.mxu1 %v8592_v54  ;;  %v8682_v53 = vld [vmem:[%s9657_s0 + $0x1100] ss:$16 sps:$4 sm:$0xff]   ;;  %v8685_v54 = vld [vmem:[%s9657_s0 + $0x1108] ss:$16 sps:$4 sm:$0xff]  }
 0x29c   : > { %5683 = vmatpush1.bf16.msra.mxu0 %v8591_v55  ;;  %6515 = vmatpush1.bf16.msra.mxu1 %v8594_v56  ;;  %v8686_v55 = vld [vmem:[%s9657_s0 + $0x1124] ss:$16 sps:$4 sm:$0xff]   ;;  %v8689_v56 = vld [vmem:[%s9657_s0 + $0x112c] ss:$16 sps:$4 sm:$0xff]  }
 0x29d   : > { %5685 = vmatprep.subr.bf16.mxu0 %v8595_v57  ;;  %6517 = vmatprep.subr.bf16.mxu1 %v8598_v58  ;;  %v8688_v57 = vld [vmem:[%s9657_s0 + $0x1120] ss:$16 sps:$4 sm:$0xff]   ;;  %v8691_v58 = vld [vmem:[%s9657_s0 + $0x1128] ss:$16 sps:$4 sm:$0xff]  }
 0x2a0   : > { %5687 = vmatpush1.bf16.msra.mxu0 %v8597_v59  ;;  %6519 = vmatpush1.bf16.msra.mxu1 %v8600_v60  ;;  %v8692_v59 = vld [vmem:[%s9657_s0 + $0x1144] ss:$16 sps:$4 sm:$0xff]   ;;  %v8695_v60 = vld [vmem:[%s9657_s0 + $0x114c] ss:$16 sps:$4 sm:$0xff]  }
 0x2a1   : > { %5689 = vmatprep.subr.bf16.mxu0 %v8601_v61  ;;  %6521 = vmatprep.subr.bf16.mxu1 %v8604_v62  ;;  %v8694_v61 = vld [vmem:[%s9657_s0 + $0x1140] ss:$16 sps:$4 sm:$0xff]   ;;  %v8697_v62 = vld [vmem:[%s9657_s0 + $0x1148] ss:$16 sps:$4 sm:$0xff]  }
 0x2a4   : > { %5691 = vmatpush1.bf16.msra.mxu0 %v8603_v63  ;;  %6523 = vmatpush1.bf16.msra.mxu1 %v8606_v0  ;;  %v8698_v63 = vld [vmem:[%s9657_s0 + $0x1164] ss:$16 sps:$4 sm:$0xff]   ;;  %v8701_v0 = vld [vmem:[%s9657_s0 + $0x116c] ss:$16 sps:$4 sm:$0xff]  }
 0x2a5   : > { %5693 = vmatprep.subr.bf16.mxu0 %v8607_v1  ;;  %6525 = vmatprep.subr.bf16.mxu1 %v8610_v2  ;;  %v8700_v1 = vld [vmem:[%s9657_s0 + $0x1160] ss:$16 sps:$4 sm:$0xff]   ;;  %v8703_v2 = vld [vmem:[%s9657_s0 + $0x1168] ss:$16 sps:$4 sm:$0xff]  }
 0x2a8   : > { %5695 = vmatpush1.bf16.msra.mxu0 %v8609_v3  ;;  %6527 = vmatpush1.bf16.msra.mxu1 %v8612_v4  ;;  %v8704_v3 = vld [vmem:[%s9657_s0 + $0x1184] ss:$16 sps:$4 sm:$0xff]   ;;  %v8707_v4 = vld [vmem:[%s9657_s0 + $0x118c] ss:$16 sps:$4 sm:$0xff]  }
 0x2a9   : > { %5697 = vmatprep.subr.bf16.mxu0 %v8613_v5  ;;  %6529 = vmatprep.subr.bf16.mxu1 %v8616_v6  ;;  %v8706_v5 = vld [vmem:[%s9657_s0 + $0x1180] ss:$16 sps:$4 sm:$0xff]   ;;  %v8709_v6 = vld [vmem:[%s9657_s0 + $0x1188] ss:$16 sps:$4 sm:$0xff]  }
 0x2ac   : > { %5699 = vmatpush1.bf16.msra.mxu0 %v8615_v7  ;;  %6531 = vmatpush1.bf16.msra.mxu1 %v8618_v8  ;;  %v8710_v7 = vld [vmem:[%s9657_s0 + $0x11a4] ss:$16 sps:$4 sm:$0xff]   ;;  %v8713_v8 = vld [vmem:[%s9657_s0 + $0x11ac] ss:$16 sps:$4 sm:$0xff]  }
 0x2ad   : > { %5701 = vmatprep.subr.bf16.mxu0 %v8619_v9  ;;  %6533 = vmatprep.subr.bf16.mxu1 %v8622_v11  ;;  %v8712_v9 = vld [vmem:[%s9657_s0 + $0x11a0] ss:$16 sps:$4 sm:$0xff]   ;;  %v8715_v11 = vld [vmem:[%s9657_s0 + $0x11a8] ss:$16 sps:$4 sm:$0xff]  }
 0x2b0   : > { %5703 = vmatpush1.bf16.msra.mxu0 %v8621_v13  ;;  %6535 = vmatpush1.bf16.msra.mxu1 %v8624_v15  ;;  %v8716_v13 = vld [vmem:[%s9657_s0 + $0x11c4] ss:$16 sps:$4 sm:$0xff]   ;;  %v8719_v15 = vld [vmem:[%s9657_s0 + $0x11cc] ss:$16 sps:$4 sm:$0xff]  }
 0x2b1   : > { %5705 = vmatprep.subr.bf16.mxu0 %v8625_v17  ;;  %6537 = vmatprep.subr.bf16.mxu1 %v8628_v18  ;;  %v8718_v17 = vld [vmem:[%s9657_s0 + $0x11c0] ss:$16 sps:$4 sm:$0xff]   ;;  %v8721_v18 = vld [vmem:[%s9657_s0 + $0x11c8] ss:$16 sps:$4 sm:$0xff]  }
 0x2b4   : > { %5707 = vmatpush1.bf16.msra.mxu0 %v8627_v20  ;;  %6539 = vmatpush1.bf16.msra.mxu1 %v8630_v21  ;;  %v8722_v20 = vld [vmem:[%s9657_s0 + $0x11e4] ss:$16 sps:$4 sm:$0xff]   ;;  %v8725_v21 = vld [vmem:[%s9657_s0 + $0x11ec] ss:$16 sps:$4 sm:$0xff]  }
 0x2b5   : > { %5709 = vmatprep.subr.bf16.mxu0 %v8632_v22  ;;  %6541 = vmatprep.subr.bf16.mxu1 %v8635_v12  ;;  %v8724_v22 = vld [vmem:[%s9657_s0 + $0x11e0] ss:$16 sps:$4 sm:$0xff]   ;;  %v8727_v12 = vld [vmem:[%s9657_s0 + $0x11e8] ss:$16 sps:$4 sm:$0xff]  }
 0x2b7   : > { %3519 = vmatmul.mubr.f32.vlgmr.msra.gmra.mrb[0].mxu0 %v10186_v10  ;;  %4442 = vmatmul.mubr.f32.vlgmr.msra.gmra.mrb[0].mxu1 %v10186_v10  ;;  %v8649_v10 = vld [vmem:[%s9657_s0 + $0x1048] ss:$16 sps:$4 sm:$0xff]  }
 0x2b8   : > { %5711 = vmatpush1.bf16.msra.mxu0 %v8634_v24  ;;  %6543 = vmatpush1.bf16.msra.mxu1 %v8637_v14  ;;  %v8729_v24 = vld [vmem:[%s9657_s0 + $0x1204] ss:$16 sps:$4 sm:$0xff]   ;;  %v8732_v14 = vld [vmem:[%s9657_s0 + $0x120c] ss:$16 sps:$4 sm:$0xff]  }
 0x2b9   : > { %5713 = vmatprep.subr.bf16.mxu0 %v8638_v25  ;;  %6545 = vmatprep.subr.bf16.mxu1 %v8641_v26  ;;  %v10328_v25 = vld [vmem:[%s9689_s8 + $0x48] sm:$0xff]  ;;  %v8731_v26 = vld [vmem:[%s9657_s0 + $0x1200] ss:$16 sps:$4 sm:$0xff]  }
 0x2ba   : > { %3589 = vmatprep.mubr.f32.mxu0 %v2939_v16  ;;  %4512 = vmatprep.mubr.f32.mxu1 %v2939_v16  ;;  %v8734_v16 = vld [vmem:[%s9657_s0 + $0x1208] ss:$16 sps:$4 sm:$0xff]  }
 0x2bc   : > { %5715 = vmatpush1.bf16.msra.mxu0 %v8640_v27  ;;  %6547 = vmatpush1.bf16.msra.mxu1 %v8643_v28  ;;  %v8735_v27 = vld [vmem:[%s9657_s0 + $0x1224] ss:$16 sps:$4 sm:$0xff]   ;;  %v8738_v28 = vld [vmem:[%s9657_s0 + $0x122c] ss:$16 sps:$4 sm:$0xff]  }
 0x2bd   : > { %5717 = vmatprep.subr.bf16.mxu0 %v8644_v19  ;;  %6549 = vmatprep.subr.bf16.mxu1 %v8647_v29  ;;  %v2940_v19 = vcombine.high %v10328_v25, %v10328_v25  ;;  %v8737_v29 = vld [vmem:[%s9657_s0 + $0x1220] ss:$16 sps:$4 sm:$0xff]  }
 0x2c0   : > { %5719 = vmatpush1.bf16.msra.mxu0 %v8646_v30  ;;  %6551 = vmatpush1.bf16.msra.mxu1 %v8649_v10  ;;  %v8740_v30 = vld [vmem:[%s9657_s0 + $0x1228] ss:$16 sps:$4 sm:$0xff]   ;;  %v8741_v10 = vld [vmem:[%s9657_s0 + $0x1244] ss:$16 sps:$4 sm:$0xff]  }
 0x2c1   : > { %5721 = vmatprep.subr.bf16.mxu0 %v8650_v31  ;;  %6553 = vmatprep.subr.bf16.mxu1 %v8653_v32  ;;  %v8744_v31 = vld [vmem:[%s9657_s0 + $0x124c] ss:$16 sps:$4 sm:$0xff]   ;;  %v8743_v32 = vld [vmem:[%s9657_s0 + $0x1240] ss:$16 sps:$4 sm:$0xff]  }
 0x2c4   : > { %5723 = vmatpush1.bf16.msra.mxu0 %v8652_v33  ;;  %6555 = vmatpush1.bf16.msra.mxu1 %v8655_v34  ;;  %v8747_v33 = vld [vmem:[%s9657_s0 + $0x1264] ss:$16 sps:$4 sm:$0xff]   ;;  %v8750_v34 = vld [vmem:[%s9657_s0 + $0x126c] ss:$16 sps:$4 sm:$0xff]  }
 0x2c5   : > { %5725 = vmatprep.subr.bf16.mxu0 %v8656_v35  ;;  %6557 = vmatprep.subr.bf16.mxu1 %v8659_v36  ;;  %v8749_v35 = vld [vmem:[%s9657_s0 + $0x1260] ss:$16 sps:$4 sm:$0xff]   ;;  %v8752_v36 = vld [vmem:[%s9657_s0 + $0x1268] ss:$16 sps:$4 sm:$0xff]  }
 0x2c8   : > { %5727 = vmatpush1.bf16.msra.mxu0 %v8658_v37  ;;  %6559 = vmatpush1.bf16.msra.mxu1 %v8661_v38  ;;  %v8753_v37 = vld [vmem:[%s9657_s0 + $0x1284] ss:$16 sps:$4 sm:$0xff]   ;;  %v8756_v38 = vld [vmem:[%s9657_s0 + $0x128c] ss:$16 sps:$4 sm:$0xff]  }
 0x2c9   : > { %5729 = vmatprep.subr.bf16.mxu0 %v8662_v39  ;;  %6561 = vmatprep.subr.bf16.mxu1 %v8665_v40  ;;  %v8755_v39 = vld [vmem:[%s9657_s0 + $0x1280] ss:$16 sps:$4 sm:$0xff]   ;;  %v8758_v40 = vld [vmem:[%s9657_s0 + $0x1288] ss:$16 sps:$4 sm:$0xff]  }
 0x2cc   : > { %5731 = vmatpush1.bf16.msra.mxu0 %v8664_v41  ;;  %6563 = vmatpush1.bf16.msra.mxu1 %v8667_v42  ;;  %v8759_v41 = vld [vmem:[%s9657_s0 + $0x12a4] ss:$16 sps:$4 sm:$0xff]   ;;  %v8762_v42 = vld [vmem:[%s9657_s0 + $0x12ac] ss:$16 sps:$4 sm:$0xff]  }
 0x2cd   : > { %5733 = vmatprep.subr.bf16.mxu0 %v8668_v43  ;;  %6565 = vmatprep.subr.bf16.mxu1 %v8671_v44  ;;  %v8761_v43 = vld [vmem:[%s9657_s0 + $0x12a0] ss:$16 sps:$4 sm:$0xff]   ;;  %v8764_v44 = vld [vmem:[%s9657_s0 + $0x12a8] ss:$16 sps:$4 sm:$0xff]  }
 0x2d0   : > { %5735 = vmatpush1.bf16.msra.mxu0 %v8670_v45  ;;  %6567 = vmatpush1.bf16.msra.mxu1 %v8673_v46  ;;  %v8765_v45 = vld [vmem:[%s9657_s0 + $0x12c4] ss:$16 sps:$4 sm:$0xff]   ;;  %v8768_v46 = vld [vmem:[%s9657_s0 + $0x12cc] ss:$16 sps:$4 sm:$0xff]  }
 0x2d1   : > { %5737 = vmatprep.subr.bf16.mxu0 %v8674_v47  ;;  %6569 = vmatprep.subr.bf16.mxu1 %v8677_v48  ;;  %v8767_v47 = vld [vmem:[%s9657_s0 + $0x12c0] ss:$16 sps:$4 sm:$0xff]   ;;  %v8770_v48 = vld [vmem:[%s9657_s0 + $0x12c8] ss:$16 sps:$4 sm:$0xff]  }
 0x2d4   : > { %5739 = vmatpush1.bf16.msra.mxu0 %v8676_v49  ;;  %6571 = vmatpush1.bf16.msra.mxu1 %v8679_v50  ;;  %v8771_v49 = vld [vmem:[%s9657_s0 + $0x12e4] ss:$16 sps:$4 sm:$0xff]   ;;  %v8774_v50 = vld [vmem:[%s9657_s0 + $0x12ec] ss:$16 sps:$4 sm:$0xff]  }
 0x2d5   : > { %5741 = vmatprep.subr.bf16.mxu0 %v8680_v51  ;;  %6573 = vmatprep.subr.bf16.mxu1 %v8683_v52  ;;  %v8773_v51 = vld [vmem:[%s9657_s0 + $0x12e0] ss:$16 sps:$4 sm:$0xff]   ;;  %v8776_v52 = vld [vmem:[%s9657_s0 + $0x12e8] ss:$16 sps:$4 sm:$0xff]  }
 0x2d8   : > { %5743 = vmatpush1.bf16.msra.mxu0 %v8682_v53  ;;  %6575 = vmatpush1.bf16.msra.mxu1 %v8685_v54  ;;  %v8777_v53 = vld [vmem:[%s9657_s0 + $0x1304] ss:$16 sps:$4 sm:$0xff]   ;;  %v8780_v54 = vld [vmem:[%s9657_s0 + $0x130c] ss:$16 sps:$4 sm:$0xff]  }
 0x2d9   : > { %5745 = vmatprep.subr.bf16.mxu0 %v8686_v55  ;;  %6577 = vmatprep.subr.bf16.mxu1 %v8689_v56  ;;  %v8779_v55 = vld [vmem:[%s9657_s0 + $0x1300] ss:$16 sps:$4 sm:$0xff]   ;;  %v8782_v56 = vld [vmem:[%s9657_s0 + $0x1308] ss:$16 sps:$4 sm:$0xff]  }
 0x2dc   : > { %5747 = vmatpush1.bf16.msra.mxu0 %v8688_v57  ;;  %6579 = vmatpush1.bf16.msra.mxu1 %v8691_v58  ;;  %v8783_v57 = vld [vmem:[%s9657_s0 + $0x1324] ss:$16 sps:$4 sm:$0xff]   ;;  %v8786_v58 = vld [vmem:[%s9657_s0 + $0x132c] ss:$16 sps:$4 sm:$0xff]  }
 0x2dd   : > { %5749 = vmatprep.subr.bf16.mxu0 %v8692_v59  ;;  %6581 = vmatprep.subr.bf16.mxu1 %v8695_v60  ;;  %v8785_v59 = vld [vmem:[%s9657_s0 + $0x1320] ss:$16 sps:$4 sm:$0xff]   ;;  %v8788_v60 = vld [vmem:[%s9657_s0 + $0x1328] ss:$16 sps:$4 sm:$0xff]  }
 0x2e0   : > { %5751 = vmatpush1.bf16.msra.mxu0 %v8694_v61  ;;  %6583 = vmatpush1.bf16.msra.mxu1 %v8697_v62  ;;  %v8789_v61 = vld [vmem:[%s9657_s0 + $0x1344] ss:$16 sps:$4 sm:$0xff]   ;;  %v8792_v62 = vld [vmem:[%s9657_s0 + $0x134c] ss:$16 sps:$4 sm:$0xff]  }
 0x2e1   : > { %5753 = vmatprep.subr.bf16.mxu0 %v8698_v63  ;;  %6585 = vmatprep.subr.bf16.mxu1 %v8701_v0  ;;  %v8791_v63 = vld [vmem:[%s9657_s0 + $0x1340] ss:$16 sps:$4 sm:$0xff]   ;;  %v8794_v0 = vld [vmem:[%s9657_s0 + $0x1348] ss:$16 sps:$4 sm:$0xff]  }
 0x2e4   : > { %5755 = vmatpush1.bf16.msra.mxu0 %v8700_v1  ;;  %6587 = vmatpush1.bf16.msra.mxu1 %v8703_v2  ;;  %v8795_v1 = vld [vmem:[%s9657_s0 + $0x1364] ss:$16 sps:$4 sm:$0xff]   ;;  %v8798_v2 = vld [vmem:[%s9657_s0 + $0x136c] ss:$16 sps:$4 sm:$0xff]  }
 0x2e5   : > { %5757 = vmatprep.subr.bf16.mxu0 %v8704_v3  ;;  %6589 = vmatprep.subr.bf16.mxu1 %v8707_v4  ;;  %v8797_v3 = vld [vmem:[%s9657_s0 + $0x1360] ss:$16 sps:$4 sm:$0xff]   ;;  %v8800_v4 = vld [vmem:[%s9657_s0 + $0x1368] ss:$16 sps:$4 sm:$0xff]  }
 0x2e8   : > { %5759 = vmatpush1.bf16.msra.mxu0 %v8706_v5  ;;  %6591 = vmatpush1.bf16.msra.mxu1 %v8709_v6  ;;  %v8801_v5 = vld [vmem:[%s9657_s0 + $0x1384] ss:$16 sps:$4 sm:$0xff]   ;;  %v8804_v6 = vld [vmem:[%s9657_s0 + $0x138c] ss:$16 sps:$4 sm:$0xff]  }
 0x2e9   : > { %5761 = vmatprep.subr.bf16.mxu0 %v8710_v7  ;;  %6593 = vmatprep.subr.bf16.mxu1 %v8713_v8  ;;  %v8803_v7 = vld [vmem:[%s9657_s0 + $0x1380] ss:$16 sps:$4 sm:$0xff]   ;;  %v8806_v8 = vld [vmem:[%s9657_s0 + $0x1388] ss:$16 sps:$4 sm:$0xff]  }
 0x2ec   : > { %5763 = vmatpush1.bf16.msra.mxu0 %v8712_v9  ;;  %6595 = vmatpush1.bf16.msra.mxu1 %v8715_v11  ;;  %v8807_v9 = vld [vmem:[%s9657_s0 + $0x13a4] ss:$16 sps:$4 sm:$0xff]   ;;  %v8810_v11 = vld [vmem:[%s9657_s0 + $0x13ac] ss:$16 sps:$4 sm:$0xff]  }
 0x2ed   : > { %5765 = vmatprep.subr.bf16.mxu0 %v8716_v13  ;;  %6597 = vmatprep.subr.bf16.mxu1 %v8719_v15  ;;  %v8809_v13 = vld [vmem:[%s9657_s0 + $0x13a0] ss:$16 sps:$4 sm:$0xff]   ;;  %v8812_v15 = vld [vmem:[%s9657_s0 + $0x13a8] ss:$16 sps:$4 sm:$0xff]  }
 0x2f0   : > { %5767 = vmatpush1.bf16.msra.mxu0 %v8718_v17  ;;  %6599 = vmatpush1.bf16.msra.mxu1 %v8721_v18  ;;  %v8813_v17 = vld [vmem:[%s9657_s0 + $0x13c4] ss:$16 sps:$4 sm:$0xff]   ;;  %v8816_v18 = vld [vmem:[%s9657_s0 + $0x13cc] ss:$16 sps:$4 sm:$0xff]  }
 0x2f1   : > { %5769 = vmatprep.subr.bf16.mxu0 %v8722_v20  ;;  %6601 = vmatprep.subr.bf16.mxu1 %v8725_v21  ;;  %v8815_v20 = vld [vmem:[%s9657_s0 + $0x13c0] ss:$16 sps:$4 sm:$0xff]   ;;  %v8818_v21 = vld [vmem:[%s9657_s0 + $0x13c8] ss:$16 sps:$4 sm:$0xff]  }
 0x2f4   : > { %5771 = vmatpush1.bf16.msra.mxu0 %v8724_v22  ;;  %6603 = vmatpush1.bf16.msra.mxu1 %v8727_v12  ;;  %v8819_v22 = vld [vmem:[%s9657_s0 + $0x13e4] ss:$16 sps:$4 sm:$0xff]   ;;  %v8822_v12 = vld [vmem:[%s9657_s0 + $0x13ec] ss:$16 sps:$4 sm:$0xff]  }
 0x2f5   : > { %5773 = vmatprep.subr.bf16.mxu0 %v8729_v24  ;;  %6605 = vmatprep.subr.bf16.mxu1 %v8732_v14  ;;  %v8821_v24 = vld [vmem:[%s9657_s0 + $0x13e0] ss:$16 sps:$4 sm:$0xff]   ;;  %v8824_v14 = vld [vmem:[%s9657_s0 + $0x13e8] ss:$16 sps:$4 sm:$0xff]  }
 0x2f7   : > { %3590 = vmatmul.mubr.f32.vlgmr.msra.gmra.mrb[0].mxu0 %v10257_v23  ;;  %4513 = vmatmul.mubr.f32.vlgmr.msra.gmra.mrb[0].mxu1 %v10257_v23  ;;  %v8746_v23 = vld [vmem:[%s9657_s0 + $0x1248] ss:$16 sps:$4 sm:$0xff]  }
 0x2f8   : > { %5775 = vmatpush1.bf16.msra.mxu0 %v8731_v26  ;;  %6607 = vmatpush1.bf16.msra.mxu1 %v8734_v16  ;;  %v8826_v26 = vld [vmem:[%s9657_s0 + $0x1404] ss:$16 sps:$4 sm:$0xff]   ;;  %v8829_v16 = vld [vmem:[%s9657_s0 + $0x140c] ss:$16 sps:$4 sm:$0xff]  }
 0x2f9   : > { %5777 = vmatprep.subr.bf16.mxu0 %v8735_v27  ;;  %6609 = vmatprep.subr.bf16.mxu1 %v8738_v28  ;;  %v10399_v27 = vld [vmem:[%s9689_s8 + $0x50] sm:$0xff] }
 0x2fa   : > { %3660 = vmatprep.mubr.f32.mxu0 %v2940_v19  ;;  %4583 = vmatprep.mubr.f32.mxu1 %v2940_v19  ;;  %v8828_v28 = vld [vmem:[%s9657_s0 + $0x1400] ss:$16 sps:$4 sm:$0xff]   ;;  %v8831_v19 = vld [vmem:[%s9657_s0 + $0x1408] ss:$16 sps:$4 sm:$0xff]  }
 0x2fc   : > { %5779 = vmatpush1.bf16.msra.mxu0 %v8737_v29  ;;  %6611 = vmatpush1.bf16.msra.mxu1 %v8740_v30  ;;  %v8832_v29 = vld [vmem:[%s9657_s0 + $0x1424] ss:$16 sps:$4 sm:$0xff]   ;;  %v8835_v30 = vld [vmem:[%s9657_s0 + $0x142c] ss:$16 sps:$4 sm:$0xff]  }
 0x2fd   : > { %5781 = vmatprep.subr.bf16.mxu0 %v8741_v10  ;;  %6613 = vmatprep.subr.bf16.mxu1 %v8744_v31  ;;  %v2941_v10 = vcombine.high %v10399_v27, %v10399_v27  ;;  %v8834_v31 = vld [vmem:[%s9657_s0 + $0x1420] ss:$16 sps:$4 sm:$0xff]  }
 0x300   : > { %5783 = vmatpush1.bf16.msra.mxu0 %v8743_v32  ;;  %6615 = vmatpush1.bf16.msra.mxu1 %v8746_v23  ;;  %v8837_v32 = vld [vmem:[%s9657_s0 + $0x1428] ss:$16 sps:$4 sm:$0xff]   ;;  %v8838_v23 = vld [vmem:[%s9657_s0 + $0x1444] ss:$16 sps:$4 sm:$0xff]  }
 0x301   : > { %5785 = vmatprep.subr.bf16.mxu0 %v8747_v33  ;;  %6617 = vmatprep.subr.bf16.mxu1 %v8750_v34  ;;  %v8841_v33 = vld [vmem:[%s9657_s0 + $0x144c] ss:$16 sps:$4 sm:$0xff]   ;;  %v8840_v34 = vld [vmem:[%s9657_s0 + $0x1440] ss:$16 sps:$4 sm:$0xff]  }
 0x304   : > { %5787 = vmatpush1.bf16.msra.mxu0 %v8749_v35  ;;  %6619 = vmatpush1.bf16.msra.mxu1 %v8752_v36  ;;  %v8844_v35 = vld [vmem:[%s9657_s0 + $0x1464] ss:$16 sps:$4 sm:$0xff]   ;;  %v8847_v36 = vld [vmem:[%s9657_s0 + $0x146c] ss:$16 sps:$4 sm:$0xff]  }
 0x305   : > { %5789 = vmatprep.subr.bf16.mxu0 %v8753_v37  ;;  %6621 = vmatprep.subr.bf16.mxu1 %v8756_v38  ;;  %v8846_v37 = vld [vmem:[%s9657_s0 + $0x1460] ss:$16 sps:$4 sm:$0xff]   ;;  %v8849_v38 = vld [vmem:[%s9657_s0 + $0x1468] ss:$16 sps:$4 sm:$0xff]  }
 0x308   : > { %5791 = vmatpush1.bf16.msra.mxu0 %v8755_v39  ;;  %6623 = vmatpush1.bf16.msra.mxu1 %v8758_v40  ;;  %v8850_v39 = vld [vmem:[%s9657_s0 + $0x1484] ss:$16 sps:$4 sm:$0xff]   ;;  %v8853_v40 = vld [vmem:[%s9657_s0 + $0x148c] ss:$16 sps:$4 sm:$0xff]  }
 0x309   : > { %5793 = vmatprep.subr.bf16.mxu0 %v8759_v41  ;;  %6625 = vmatprep.subr.bf16.mxu1 %v8762_v42  ;;  %v8852_v41 = vld [vmem:[%s9657_s0 + $0x1480] ss:$16 sps:$4 sm:$0xff]   ;;  %v8855_v42 = vld [vmem:[%s9657_s0 + $0x1488] ss:$16 sps:$4 sm:$0xff]  }
 0x30c   : > { %5795 = vmatpush1.bf16.msra.mxu0 %v8761_v43  ;;  %6627 = vmatpush1.bf16.msra.mxu1 %v8764_v44  ;;  %v8856_v43 = vld [vmem:[%s9657_s0 + $0x14a4] ss:$16 sps:$4 sm:$0xff]   ;;  %v8859_v44 = vld [vmem:[%s9657_s0 + $0x14ac] ss:$16 sps:$4 sm:$0xff]  }
 0x30d   : > { %5797 = vmatprep.subr.bf16.mxu0 %v8765_v45  ;;  %6629 = vmatprep.subr.bf16.mxu1 %v8768_v46  ;;  %v8858_v45 = vld [vmem:[%s9657_s0 + $0x14a0] ss:$16 sps:$4 sm:$0xff]   ;;  %v8861_v46 = vld [vmem:[%s9657_s0 + $0x14a8] ss:$16 sps:$4 sm:$0xff]  }
 0x310   : > { %5799 = vmatpush1.bf16.msra.mxu0 %v8767_v47  ;;  %6631 = vmatpush1.bf16.msra.mxu1 %v8770_v48  ;;  %v8862_v47 = vld [vmem:[%s9657_s0 + $0x14c4] ss:$16 sps:$4 sm:$0xff]   ;;  %v8865_v48 = vld [vmem:[%s9657_s0 + $0x14cc] ss:$16 sps:$4 sm:$0xff]  }
 0x311   : > { %5801 = vmatprep.subr.bf16.mxu0 %v8771_v49  ;;  %6633 = vmatprep.subr.bf16.mxu1 %v8774_v50  ;;  %v8864_v49 = vld [vmem:[%s9657_s0 + $0x14c0] ss:$16 sps:$4 sm:$0xff]   ;;  %v8867_v50 = vld [vmem:[%s9657_s0 + $0x14c8] ss:$16 sps:$4 sm:$0xff]  }
 0x314   : > { %5803 = vmatpush1.bf16.msra.mxu0 %v8773_v51  ;;  %6635 = vmatpush1.bf16.msra.mxu1 %v8776_v52  ;;  %v8868_v51 = vld [vmem:[%s9657_s0 + $0x14e4] ss:$16 sps:$4 sm:$0xff]   ;;  %v8871_v52 = vld [vmem:[%s9657_s0 + $0x14ec] ss:$16 sps:$4 sm:$0xff]  }
 0x315   : > { %5805 = vmatprep.subr.bf16.mxu0 %v8777_v53  ;;  %6637 = vmatprep.subr.bf16.mxu1 %v8780_v54  ;;  %v8870_v53 = vld [vmem:[%s9657_s0 + $0x14e0] ss:$16 sps:$4 sm:$0xff]   ;;  %v8873_v54 = vld [vmem:[%s9657_s0 + $0x14e8] ss:$16 sps:$4 sm:$0xff]  }
 0x318   : > { %5807 = vmatpush1.bf16.msra.mxu0 %v8779_v55  ;;  %6639 = vmatpush1.bf16.msra.mxu1 %v8782_v56  ;;  %v8874_v55 = vld [vmem:[%s9657_s0 + $0x1504] ss:$16 sps:$4 sm:$0xff]   ;;  %v8877_v56 = vld [vmem:[%s9657_s0 + $0x150c] ss:$16 sps:$4 sm:$0xff]  }
 0x319   : > { %5809 = vmatprep.subr.bf16.mxu0 %v8783_v57  ;;  %6641 = vmatprep.subr.bf16.mxu1 %v8786_v58  ;;  %v8876_v57 = vld [vmem:[%s9657_s0 + $0x1500] ss:$16 sps:$4 sm:$0xff]   ;;  %v8879_v58 = vld [vmem:[%s9657_s0 + $0x1508] ss:$16 sps:$4 sm:$0xff]  }
 0x31c   : > { %5811 = vmatpush1.bf16.msra.mxu0 %v8785_v59  ;;  %6643 = vmatpush1.bf16.msra.mxu1 %v8788_v60  ;;  %v8880_v59 = vld [vmem:[%s9657_s0 + $0x1524] ss:$16 sps:$4 sm:$0xff]   ;;  %v8883_v60 = vld [vmem:[%s9657_s0 + $0x152c] ss:$16 sps:$4 sm:$0xff]  }
 0x31d   : > { %5813 = vmatprep.subr.bf16.mxu0 %v8789_v61  ;;  %6645 = vmatprep.subr.bf16.mxu1 %v8792_v62  ;;  %v8882_v61 = vld [vmem:[%s9657_s0 + $0x1520] ss:$16 sps:$4 sm:$0xff]   ;;  %v8885_v62 = vld [vmem:[%s9657_s0 + $0x1528] ss:$16 sps:$4 sm:$0xff]  }
 0x320   : > { %5815 = vmatpush1.bf16.msra.mxu0 %v8791_v63  ;;  %6647 = vmatpush1.bf16.msra.mxu1 %v8794_v0  ;;  %v8886_v63 = vld [vmem:[%s9657_s0 + $0x1544] ss:$16 sps:$4 sm:$0xff]   ;;  %v8889_v0 = vld [vmem:[%s9657_s0 + $0x154c] ss:$16 sps:$4 sm:$0xff]  }
 0x321   : > { %5817 = vmatprep.subr.bf16.mxu0 %v8795_v1  ;;  %6649 = vmatprep.subr.bf16.mxu1 %v8798_v2  ;;  %v8888_v1 = vld [vmem:[%s9657_s0 + $0x1540] ss:$16 sps:$4 sm:$0xff]   ;;  %v8891_v2 = vld [vmem:[%s9657_s0 + $0x1548] ss:$16 sps:$4 sm:$0xff]  }
 0x324   : > { %5819 = vmatpush1.bf16.msra.mxu0 %v8797_v3  ;;  %6651 = vmatpush1.bf16.msra.mxu1 %v8800_v4  ;;  %v8892_v3 = vld [vmem:[%s9657_s0 + $0x1564] ss:$16 sps:$4 sm:$0xff]   ;;  %v8895_v4 = vld [vmem:[%s9657_s0 + $0x156c] ss:$16 sps:$4 sm:$0xff]  }
 0x325   : > { %5821 = vmatprep.subr.bf16.mxu0 %v8801_v5  ;;  %6653 = vmatprep.subr.bf16.mxu1 %v8804_v6  ;;  %v8894_v5 = vld [vmem:[%s9657_s0 + $0x1560] ss:$16 sps:$4 sm:$0xff]   ;;  %v8897_v6 = vld [vmem:[%s9657_s0 + $0x1568] ss:$16 sps:$4 sm:$0xff]  }
 0x328   : > { %5823 = vmatpush1.bf16.msra.mxu0 %v8803_v7  ;;  %6655 = vmatpush1.bf16.msra.mxu1 %v8806_v8  ;;  %v8898_v7 = vld [vmem:[%s9657_s0 + $0x1584] ss:$16 sps:$4 sm:$0xff]   ;;  %v8901_v8 = vld [vmem:[%s9657_s0 + $0x158c] ss:$16 sps:$4 sm:$0xff]  }
 0x329   : > { %5825 = vmatprep.subr.bf16.mxu0 %v8807_v9  ;;  %6657 = vmatprep.subr.bf16.mxu1 %v8810_v11  ;;  %v8900_v9 = vld [vmem:[%s9657_s0 + $0x1580] ss:$16 sps:$4 sm:$0xff]   ;;  %v8903_v11 = vld [vmem:[%s9657_s0 + $0x1588] ss:$16 sps:$4 sm:$0xff]  }
 0x32c   : > { %5827 = vmatpush1.bf16.msra.mxu0 %v8809_v13  ;;  %6659 = vmatpush1.bf16.msra.mxu1 %v8812_v15  ;;  %v8904_v13 = vld [vmem:[%s9657_s0 + $0x15a4] ss:$16 sps:$4 sm:$0xff]   ;;  %v8907_v15 = vld [vmem:[%s9657_s0 + $0x15ac] ss:$16 sps:$4 sm:$0xff]  }
 0x32d   : > { %5829 = vmatprep.subr.bf16.mxu0 %v8813_v17  ;;  %6661 = vmatprep.subr.bf16.mxu1 %v8816_v18  ;;  %v8906_v17 = vld [vmem:[%s9657_s0 + $0x15a0] ss:$16 sps:$4 sm:$0xff]   ;;  %v8909_v18 = vld [vmem:[%s9657_s0 + $0x15a8] ss:$16 sps:$4 sm:$0xff]  }
 0x330   : > { %5831 = vmatpush1.bf16.msra.mxu0 %v8815_v20  ;;  %6663 = vmatpush1.bf16.msra.mxu1 %v8818_v21  ;;  %v8910_v20 = vld [vmem:[%s9657_s0 + $0x15c4] ss:$16 sps:$4 sm:$0xff]   ;;  %v8913_v21 = vld [vmem:[%s9657_s0 + $0x15cc] ss:$16 sps:$4 sm:$0xff]  }
 0x331   : > { %5833 = vmatprep.subr.bf16.mxu0 %v8819_v22  ;;  %6665 = vmatprep.subr.bf16.mxu1 %v8822_v12  ;;  %v8912_v22 = vld [vmem:[%s9657_s0 + $0x15c0] ss:$16 sps:$4 sm:$0xff]   ;;  %v8915_v12 = vld [vmem:[%s9657_s0 + $0x15c8] ss:$16 sps:$4 sm:$0xff]  }
 0x334   : > { %5835 = vmatpush1.bf16.msra.mxu0 %v8821_v24  ;;  %6667 = vmatpush1.bf16.msra.mxu1 %v8824_v14  ;;  %v8916_v24 = vld [vmem:[%s9657_s0 + $0x15e4] ss:$16 sps:$4 sm:$0xff]   ;;  %v8919_v14 = vld [vmem:[%s9657_s0 + $0x15ec] ss:$16 sps:$4 sm:$0xff]  }
 0x335   : > { %5837 = vmatprep.subr.bf16.mxu0 %v8826_v26  ;;  %6669 = vmatprep.subr.bf16.mxu1 %v8829_v16  ;;  %v8918_v26 = vld [vmem:[%s9657_s0 + $0x15e0] ss:$16 sps:$4 sm:$0xff]   ;;  %v8921_v16 = vld [vmem:[%s9657_s0 + $0x15e8] ss:$16 sps:$4 sm:$0xff]  }
 0x337   : > { %3661 = vmatmul.mubr.f32.vlgmr.msra.gmra.mrb[0].mxu0 %v10328_v25  ;;  %4584 = vmatmul.mubr.f32.vlgmr.msra.gmra.mrb[0].mxu1 %v10328_v25  ;;  %v8843_v25 = vld [vmem:[%s9657_s0 + $0x1448] ss:$16 sps:$4 sm:$0xff]  }
 0x338   : > { %5839 = vmatpush1.bf16.msra.mxu0 %v8828_v28  ;;  %6671 = vmatpush1.bf16.msra.mxu1 %v8831_v19  ;;  %v8923_v28 = vld [vmem:[%s9657_s0 + $0x1604] ss:$16 sps:$4 sm:$0xff]   ;;  %v8926_v19 = vld [vmem:[%s9657_s0 + $0x160c] ss:$16 sps:$4 sm:$0xff]  }
 0x339   : > { %5841 = vmatprep.subr.bf16.mxu0 %v8832_v29  ;;  %6673 = vmatprep.subr.bf16.mxu1 %v8835_v30  ;;  %v10470_v29 = vld [vmem:[%s9689_s8 + $0x58] sm:$0xff]  ;;  %v8925_v30 = vld [vmem:[%s9657_s0 + $0x1600] ss:$16 sps:$4 sm:$0xff]  }
 0x33a   : > { %3731 = vmatprep.mubr.f32.mxu0 %v2941_v10  ;;  %4654 = vmatprep.mubr.f32.mxu1 %v2941_v10  ;;  %v8928_v10 = vld [vmem:[%s9657_s0 + $0x1608] ss:$16 sps:$4 sm:$0xff]  }
 0x33c   : > { %5843 = vmatpush1.bf16.msra.mxu0 %v8834_v31  ;;  %6675 = vmatpush1.bf16.msra.mxu1 %v8837_v32  ;;  %v8929_v31 = vld [vmem:[%s9657_s0 + $0x1624] ss:$16 sps:$4 sm:$0xff]   ;;  %v8932_v32 = vld [vmem:[%s9657_s0 + $0x162c] ss:$16 sps:$4 sm:$0xff]  }
 0x33d   : > { %5845 = vmatprep.subr.bf16.mxu0 %v8838_v23  ;;  %6677 = vmatprep.subr.bf16.mxu1 %v8841_v33  ;;  %v2942_v23 = vcombine.high %v10470_v29, %v10470_v29  ;;  %v8931_v33 = vld [vmem:[%s9657_s0 + $0x1620] ss:$16 sps:$4 sm:$0xff]  }
 0x340   : > { %5847 = vmatpush1.bf16.msra.mxu0 %v8840_v34  ;;  %6679 = vmatpush1.bf16.msra.mxu1 %v8843_v25  ;;  %v8934_v34 = vld [vmem:[%s9657_s0 + $0x1628] ss:$16 sps:$4 sm:$0xff]   ;;  %v8935_v25 = vld [vmem:[%s9657_s0 + $0x1644] ss:$16 sps:$4 sm:$0xff]  }
 0x341   : > { %5849 = vmatprep.subr.bf16.mxu0 %v8844_v35  ;;  %6681 = vmatprep.subr.bf16.mxu1 %v8847_v36  ;;  %v8938_v35 = vld [vmem:[%s9657_s0 + $0x164c] ss:$16 sps:$4 sm:$0xff]   ;;  %v8937_v36 = vld [vmem:[%s9657_s0 + $0x1640] ss:$16 sps:$4 sm:$0xff]  }
 0x344   : > { %5851 = vmatpush1.bf16.msra.mxu0 %v8846_v37  ;;  %6683 = vmatpush1.bf16.msra.mxu1 %v8849_v38  ;;  %v8941_v37 = vld [vmem:[%s9657_s0 + $0x1664] ss:$16 sps:$4 sm:$0xff]   ;;  %v8944_v38 = vld [vmem:[%s9657_s0 + $0x166c] ss:$16 sps:$4 sm:$0xff]  }
 0x345   : > { %5853 = vmatprep.subr.bf16.mxu0 %v8850_v39  ;;  %6685 = vmatprep.subr.bf16.mxu1 %v8853_v40  ;;  %v8943_v39 = vld [vmem:[%s9657_s0 + $0x1660] ss:$16 sps:$4 sm:$0xff]   ;;  %v8946_v40 = vld [vmem:[%s9657_s0 + $0x1668] ss:$16 sps:$4 sm:$0xff]  }
 0x348   : > { %5855 = vmatpush1.bf16.msra.mxu0 %v8852_v41  ;;  %6687 = vmatpush1.bf16.msra.mxu1 %v8855_v42  ;;  %v8947_v41 = vld [vmem:[%s9657_s0 + $0x1684] ss:$16 sps:$4 sm:$0xff]   ;;  %v8950_v42 = vld [vmem:[%s9657_s0 + $0x168c] ss:$16 sps:$4 sm:$0xff]  }
 0x349   : > { %5857 = vmatprep.subr.bf16.mxu0 %v8856_v43  ;;  %6689 = vmatprep.subr.bf16.mxu1 %v8859_v44  ;;  %v8949_v43 = vld [vmem:[%s9657_s0 + $0x1680] ss:$16 sps:$4 sm:$0xff]   ;;  %v8952_v44 = vld [vmem:[%s9657_s0 + $0x1688] ss:$16 sps:$4 sm:$0xff]  }
 0x34c   : > { %5859 = vmatpush1.bf16.msra.mxu0 %v8858_v45  ;;  %6691 = vmatpush1.bf16.msra.mxu1 %v8861_v46  ;;  %v8953_v45 = vld [vmem:[%s9657_s0 + $0x16a4] ss:$16 sps:$4 sm:$0xff]   ;;  %v8956_v46 = vld [vmem:[%s9657_s0 + $0x16ac] ss:$16 sps:$4 sm:$0xff]  }
 0x34d   : > { %5861 = vmatprep.subr.bf16.mxu0 %v8862_v47  ;;  %6693 = vmatprep.subr.bf16.mxu1 %v8865_v48  ;;  %v8955_v47 = vld [vmem:[%s9657_s0 + $0x16a0] ss:$16 sps:$4 sm:$0xff]   ;;  %v8958_v48 = vld [vmem:[%s9657_s0 + $0x16a8] ss:$16 sps:$4 sm:$0xff]  }
 0x350   : > { %5863 = vmatpush1.bf16.msra.mxu0 %v8864_v49  ;;  %6695 = vmatpush1.bf16.msra.mxu1 %v8867_v50  ;;  %v8959_v49 = vld [vmem:[%s9657_s0 + $0x16c4] ss:$16 sps:$4 sm:$0xff]   ;;  %v8962_v50 = vld [vmem:[%s9657_s0 + $0x16cc] ss:$16 sps:$4 sm:$0xff]  }
 0x351   : > { %5865 = vmatprep.subr.bf16.mxu0 %v8868_v51  ;;  %6697 = vmatprep.subr.bf16.mxu1 %v8871_v52  ;;  %v8961_v51 = vld [vmem:[%s9657_s0 + $0x16c0] ss:$16 sps:$4 sm:$0xff]   ;;  %v8964_v52 = vld [vmem:[%s9657_s0 + $0x16c8] ss:$16 sps:$4 sm:$0xff]  }
 0x354   : > { %5867 = vmatpush1.bf16.msra.mxu0 %v8870_v53  ;;  %6699 = vmatpush1.bf16.msra.mxu1 %v8873_v54  ;;  %v8965_v53 = vld [vmem:[%s9657_s0 + $0x16e4] ss:$16 sps:$4 sm:$0xff]   ;;  %v8968_v54 = vld [vmem:[%s9657_s0 + $0x16ec] ss:$16 sps:$4 sm:$0xff]  }
 0x355   : > { %5869 = vmatprep.subr.bf16.mxu0 %v8874_v55  ;;  %6701 = vmatprep.subr.bf16.mxu1 %v8877_v56  ;;  %v8967_v55 = vld [vmem:[%s9657_s0 + $0x16e0] ss:$16 sps:$4 sm:$0xff]   ;;  %v8970_v56 = vld [vmem:[%s9657_s0 + $0x16e8] ss:$16 sps:$4 sm:$0xff]  }
 0x358   : > { %5871 = vmatpush1.bf16.msra.mxu0 %v8876_v57  ;;  %6703 = vmatpush1.bf16.msra.mxu1 %v8879_v58  ;;  %v8971_v57 = vld [vmem:[%s9657_s0 + $0x1704] ss:$16 sps:$4 sm:$0xff]   ;;  %v8974_v58 = vld [vmem:[%s9657_s0 + $0x170c] ss:$16 sps:$4 sm:$0xff]  }
 0x359   : > { %5873 = vmatprep.subr.bf16.mxu0 %v8880_v59  ;;  %6705 = vmatprep.subr.bf16.mxu1 %v8883_v60  ;;  %v8973_v59 = vld [vmem:[%s9657_s0 + $0x1700] ss:$16 sps:$4 sm:$0xff]   ;;  %v8976_v60 = vld [vmem:[%s9657_s0 + $0x1708] ss:$16 sps:$4 sm:$0xff]  }
 0x35c   : > { %5875 = vmatpush1.bf16.msra.mxu0 %v8882_v61  ;;  %6707 = vmatpush1.bf16.msra.mxu1 %v8885_v62  ;;  %v8977_v61 = vld [vmem:[%s9657_s0 + $0x1724] ss:$16 sps:$4 sm:$0xff]   ;;  %v8980_v62 = vld [vmem:[%s9657_s0 + $0x172c] ss:$16 sps:$4 sm:$0xff]  }
 0x35d   : > { %5877 = vmatprep.subr.bf16.mxu0 %v8886_v63  ;;  %6709 = vmatprep.subr.bf16.mxu1 %v8889_v0  ;;  %v8979_v63 = vld [vmem:[%s9657_s0 + $0x1720] ss:$16 sps:$4 sm:$0xff]   ;;  %v8982_v0 = vld [vmem:[%s9657_s0 + $0x1728] ss:$16 sps:$4 sm:$0xff]  }
 0x360   : > { %5879 = vmatpush1.bf16.msra.mxu0 %v8888_v1  ;;  %6711 = vmatpush1.bf16.msra.mxu1 %v8891_v2  ;;  %v8983_v1 = vld [vmem:[%s9657_s0 + $0x1744] ss:$16 sps:$4 sm:$0xff]   ;;  %v8986_v2 = vld [vmem:[%s9657_s0 + $0x174c] ss:$16 sps:$4 sm:$0xff]  }
 0x361   : > { %5881 = vmatprep.subr.bf16.mxu0 %v8892_v3  ;;  %6713 = vmatprep.subr.bf16.mxu1 %v8895_v4  ;;  %v8985_v3 = vld [vmem:[%s9657_s0 + $0x1740] ss:$16 sps:$4 sm:$0xff]   ;;  %v8988_v4 = vld [vmem:[%s9657_s0 + $0x1748] ss:$16 sps:$4 sm:$0xff]  }
 0x364   : > { %5883 = vmatpush1.bf16.msra.mxu0 %v8894_v5  ;;  %6715 = vmatpush1.bf16.msra.mxu1 %v8897_v6  ;;  %v8989_v5 = vld [vmem:[%s9657_s0 + $0x1764] ss:$16 sps:$4 sm:$0xff]   ;;  %v8992_v6 = vld [vmem:[%s9657_s0 + $0x176c] ss:$16 sps:$4 sm:$0xff]  }
 0x365   : > { %5885 = vmatprep.subr.bf16.mxu0 %v8898_v7  ;;  %6717 = vmatprep.subr.bf16.mxu1 %v8901_v8  ;;  %v8991_v7 = vld [vmem:[%s9657_s0 + $0x1760] ss:$16 sps:$4 sm:$0xff]   ;;  %v8994_v8 = vld [vmem:[%s9657_s0 + $0x1768] ss:$16 sps:$4 sm:$0xff]  }
 0x368   : > { %5887 = vmatpush1.bf16.msra.mxu0 %v8900_v9  ;;  %6719 = vmatpush1.bf16.msra.mxu1 %v8903_v11  ;;  %v8995_v9 = vld [vmem:[%s9657_s0 + $0x1784] ss:$16 sps:$4 sm:$0xff]   ;;  %v8998_v11 = vld [vmem:[%s9657_s0 + $0x178c] ss:$16 sps:$4 sm:$0xff]  }
 0x369   : > { %5889 = vmatprep.subr.bf16.mxu0 %v8904_v13  ;;  %6721 = vmatprep.subr.bf16.mxu1 %v8907_v15  ;;  %v8997_v13 = vld [vmem:[%s9657_s0 + $0x1780] ss:$16 sps:$4 sm:$0xff]   ;;  %v9000_v15 = vld [vmem:[%s9657_s0 + $0x1788] ss:$16 sps:$4 sm:$0xff]  }
 0x36c   : > { %5891 = vmatpush1.bf16.msra.mxu0 %v8906_v17  ;;  %6723 = vmatpush1.bf16.msra.mxu1 %v8909_v18  ;;  %v9001_v17 = vld [vmem:[%s9657_s0 + $0x17a4] ss:$16 sps:$4 sm:$0xff]   ;;  %v9004_v18 = vld [vmem:[%s9657_s0 + $0x17ac] ss:$16 sps:$4 sm:$0xff]  }
 0x36d   : > { %5893 = vmatprep.subr.bf16.mxu0 %v8910_v20  ;;  %6725 = vmatprep.subr.bf16.mxu1 %v8913_v21  ;;  %v9003_v20 = vld [vmem:[%s9657_s0 + $0x17a0] ss:$16 sps:$4 sm:$0xff]   ;;  %v9006_v21 = vld [vmem:[%s9657_s0 + $0x17a8] ss:$16 sps:$4 sm:$0xff]  }
 0x370   : > { %5895 = vmatpush1.bf16.msra.mxu0 %v8912_v22  ;;  %6727 = vmatpush1.bf16.msra.mxu1 %v8915_v12  ;;  %v9007_v22 = vld [vmem:[%s9657_s0 + $0x17c4] ss:$16 sps:$4 sm:$0xff]   ;;  %v9010_v12 = vld [vmem:[%s9657_s0 + $0x17cc] ss:$16 sps:$4 sm:$0xff]  }
 0x371   : > { %5897 = vmatprep.subr.bf16.mxu0 %v8916_v24  ;;  %6729 = vmatprep.subr.bf16.mxu1 %v8919_v14  ;;  %v9009_v24 = vld [vmem:[%s9657_s0 + $0x17c0] ss:$16 sps:$4 sm:$0xff]   ;;  %v9012_v14 = vld [vmem:[%s9657_s0 + $0x17c8] ss:$16 sps:$4 sm:$0xff]  }
 0x374   : > { %5899 = vmatpush1.bf16.msra.mxu0 %v8918_v26  ;;  %6731 = vmatpush1.bf16.msra.mxu1 %v8921_v16  ;;  %v9013_v26 = vld [vmem:[%s9657_s0 + $0x17e4] ss:$16 sps:$4 sm:$0xff]   ;;  %v9016_v16 = vld [vmem:[%s9657_s0 + $0x17ec] ss:$16 sps:$4 sm:$0xff]  }
 0x375   : > { %5901 = vmatprep.subr.bf16.mxu0 %v8923_v28  ;;  %6733 = vmatprep.subr.bf16.mxu1 %v8926_v19  ;;  %v9015_v28 = vld [vmem:[%s9657_s0 + $0x17e0] ss:$16 sps:$4 sm:$0xff]   ;;  %v9018_v19 = vld [vmem:[%s9657_s0 + $0x17e8] ss:$16 sps:$4 sm:$0xff]  }
 0x377   : > { %3732 = vmatmul.mubr.f32.vlgmr.msra.gmra.mrb[0].mxu0 %v10399_v27  ;;  %4655 = vmatmul.mubr.f32.vlgmr.msra.gmra.mrb[0].mxu1 %v10399_v27  ;;  %v8940_v27 = vld [vmem:[%s9657_s0 + $0x1648] ss:$16 sps:$4 sm:$0xff]  }
 0x378   : > { %5903 = vmatpush1.bf16.msra.mxu0 %v8925_v30  ;;  %6735 = vmatpush1.bf16.msra.mxu1 %v8928_v10  ;;  %v9020_v30 = vld [vmem:[%s9657_s0 + $0x1804] ss:$16 sps:$4 sm:$0xff]   ;;  %v9023_v10 = vld [vmem:[%s9657_s0 + $0x180c] ss:$16 sps:$4 sm:$0xff]  }
 0x379   : > { %5905 = vmatprep.subr.bf16.mxu0 %v8929_v31  ;;  %6737 = vmatprep.subr.bf16.mxu1 %v8932_v32  ;;  %v10541_v31 = vld [vmem:[%s9689_s8 + $0x60] sm:$0xff] }
 0x37a   : > { %3802 = vmatprep.mubr.f32.mxu0 %v2942_v23  ;;  %4725 = vmatprep.mubr.f32.mxu1 %v2942_v23  ;;  %v9022_v32 = vld [vmem:[%s9657_s0 + $0x1800] ss:$16 sps:$4 sm:$0xff]   ;;  %v9025_v23 = vld [vmem:[%s9657_s0 + $0x1808] ss:$16 sps:$4 sm:$0xff]  }
 0x37c   : > { %5907 = vmatpush1.bf16.msra.mxu0 %v8931_v33  ;;  %6739 = vmatpush1.bf16.msra.mxu1 %v8934_v34  ;;  %v9026_v33 = vld [vmem:[%s9657_s0 + $0x1824] ss:$16 sps:$4 sm:$0xff]   ;;  %v9029_v34 = vld [vmem:[%s9657_s0 + $0x182c] ss:$16 sps:$4 sm:$0xff]  }
 0x37d   : > { %5909 = vmatprep.subr.bf16.mxu0 %v8935_v25  ;;  %6741 = vmatprep.subr.bf16.mxu1 %v8938_v35  ;;  %v2943_v25 = vcombine.high %v10541_v31, %v10541_v31  ;;  %v9028_v35 = vld [vmem:[%s9657_s0 + $0x1820] ss:$16 sps:$4 sm:$0xff]  }
 0x380   : > { %5911 = vmatpush1.bf16.msra.mxu0 %v8937_v36  ;;  %6743 = vmatpush1.bf16.msra.mxu1 %v8940_v27  ;;  %v9031_v36 = vld [vmem:[%s9657_s0 + $0x1828] ss:$16 sps:$4 sm:$0xff]   ;;  %v9032_v27 = vld [vmem:[%s9657_s0 + $0x1844] ss:$16 sps:$4 sm:$0xff]  }
 0x381   : > { %5913 = vmatprep.subr.bf16.mxu0 %v8941_v37  ;;  %6745 = vmatprep.subr.bf16.mxu1 %v8944_v38  ;;  %v9035_v37 = vld [vmem:[%s9657_s0 + $0x184c] ss:$16 sps:$4 sm:$0xff]   ;;  %v9034_v38 = vld [vmem:[%s9657_s0 + $0x1840] ss:$16 sps:$4 sm:$0xff]  }
 0x384   : > { %5915 = vmatpush1.bf16.msra.mxu0 %v8943_v39  ;;  %6747 = vmatpush1.bf16.msra.mxu1 %v8946_v40  ;;  %v9038_v39 = vld [vmem:[%s9657_s0 + $0x1864] ss:$16 sps:$4 sm:$0xff]   ;;  %v9041_v40 = vld [vmem:[%s9657_s0 + $0x186c] ss:$16 sps:$4 sm:$0xff]  }
 0x385   : > { %5917 = vmatprep.subr.bf16.mxu0 %v8947_v41  ;;  %6749 = vmatprep.subr.bf16.mxu1 %v8950_v42  ;;  %v9040_v41 = vld [vmem:[%s9657_s0 + $0x1860] ss:$16 sps:$4 sm:$0xff]   ;;  %v9043_v42 = vld [vmem:[%s9657_s0 + $0x1868] ss:$16 sps:$4 sm:$0xff]  }
 0x388   : > { %5919 = vmatpush1.bf16.msra.mxu0 %v8949_v43  ;;  %6751 = vmatpush1.bf16.msra.mxu1 %v8952_v44  ;;  %v9044_v43 = vld [vmem:[%s9657_s0 + $0x1884] ss:$16 sps:$4 sm:$0xff]   ;;  %v9047_v44 = vld [vmem:[%s9657_s0 + $0x188c] ss:$16 sps:$4 sm:$0xff]  }
 0x389   : > { %5921 = vmatprep.subr.bf16.mxu0 %v8953_v45  ;;  %6753 = vmatprep.subr.bf16.mxu1 %v8956_v46  ;;  %v9046_v45 = vld [vmem:[%s9657_s0 + $0x1880] ss:$16 sps:$4 sm:$0xff]   ;;  %v9049_v46 = vld [vmem:[%s9657_s0 + $0x1888] ss:$16 sps:$4 sm:$0xff]  }
 0x38c   : > { %5923 = vmatpush1.bf16.msra.mxu0 %v8955_v47  ;;  %6755 = vmatpush1.bf16.msra.mxu1 %v8958_v48  ;;  %v9050_v47 = vld [vmem:[%s9657_s0 + $0x18a4] ss:$16 sps:$4 sm:$0xff]   ;;  %v9053_v48 = vld [vmem:[%s9657_s0 + $0x18ac] ss:$16 sps:$4 sm:$0xff]  }
 0x38d   : > { %5925 = vmatprep.subr.bf16.mxu0 %v8959_v49  ;;  %6757 = vmatprep.subr.bf16.mxu1 %v8962_v50  ;;  %v9052_v49 = vld [vmem:[%s9657_s0 + $0x18a0] ss:$16 sps:$4 sm:$0xff]   ;;  %v9055_v50 = vld [vmem:[%s9657_s0 + $0x18a8] ss:$16 sps:$4 sm:$0xff]  }
 0x390   : > { %5927 = vmatpush1.bf16.msra.mxu0 %v8961_v51  ;;  %6759 = vmatpush1.bf16.msra.mxu1 %v8964_v52  ;;  %v9056_v51 = vld [vmem:[%s9657_s0 + $0x18c4] ss:$16 sps:$4 sm:$0xff]   ;;  %v9059_v52 = vld [vmem:[%s9657_s0 + $0x18cc] ss:$16 sps:$4 sm:$0xff]  }
 0x391   : > { %5929 = vmatprep.subr.bf16.mxu0 %v8965_v53  ;;  %6761 = vmatprep.subr.bf16.mxu1 %v8968_v54  ;;  %v9058_v53 = vld [vmem:[%s9657_s0 + $0x18c0] ss:$16 sps:$4 sm:$0xff]   ;;  %v9061_v54 = vld [vmem:[%s9657_s0 + $0x18c8] ss:$16 sps:$4 sm:$0xff]  }
 0x394   : > { %5931 = vmatpush1.bf16.msra.mxu0 %v8967_v55  ;;  %6763 = vmatpush1.bf16.msra.mxu1 %v8970_v56  ;;  %v9062_v55 = vld [vmem:[%s9657_s0 + $0x18e4] ss:$16 sps:$4 sm:$0xff]   ;;  %v9065_v56 = vld [vmem:[%s9657_s0 + $0x18ec] ss:$16 sps:$4 sm:$0xff]  }
 0x395   : > { %5933 = vmatprep.subr.bf16.mxu0 %v8971_v57  ;;  %6765 = vmatprep.subr.bf16.mxu1 %v8974_v58  ;;  %v9064_v57 = vld [vmem:[%s9657_s0 + $0x18e0] ss:$16 sps:$4 sm:$0xff]   ;;  %v9067_v58 = vld [vmem:[%s9657_s0 + $0x18e8] ss:$16 sps:$4 sm:$0xff]  }
 0x398   : > { %5935 = vmatpush1.bf16.msra.mxu0 %v8973_v59  ;;  %6767 = vmatpush1.bf16.msra.mxu1 %v8976_v60  ;;  %v9068_v59 = vld [vmem:[%s9657_s0 + $0x1904] ss:$16 sps:$4 sm:$0xff]   ;;  %v9071_v60 = vld [vmem:[%s9657_s0 + $0x190c] ss:$16 sps:$4 sm:$0xff]  }
 0x399   : > { %5937 = vmatprep.subr.bf16.mxu0 %v8977_v61  ;;  %6769 = vmatprep.subr.bf16.mxu1 %v8980_v62  ;;  %v9070_v61 = vld [vmem:[%s9657_s0 + $0x1900] ss:$16 sps:$4 sm:$0xff]   ;;  %v9073_v62 = vld [vmem:[%s9657_s0 + $0x1908] ss:$16 sps:$4 sm:$0xff]  }
 0x39c   : > { %5939 = vmatpush1.bf16.msra.mxu0 %v8979_v63  ;;  %6771 = vmatpush1.bf16.msra.mxu1 %v8982_v0  ;;  %v9074_v63 = vld [vmem:[%s9657_s0 + $0x1924] ss:$16 sps:$4 sm:$0xff]   ;;  %v9077_v0 = vld [vmem:[%s9657_s0 + $0x192c] ss:$16 sps:$4 sm:$0xff]  }
 0x39d   : > { %5941 = vmatprep.subr.bf16.mxu0 %v8983_v1  ;;  %6773 = vmatprep.subr.bf16.mxu1 %v8986_v2  ;;  %v9076_v1 = vld [vmem:[%s9657_s0 + $0x1920] ss:$16 sps:$4 sm:$0xff]   ;;  %v9079_v2 = vld [vmem:[%s9657_s0 + $0x1928] ss:$16 sps:$4 sm:$0xff]  }
 0x3a0   : > { %5943 = vmatpush1.bf16.msra.mxu0 %v8985_v3  ;;  %6775 = vmatpush1.bf16.msra.mxu1 %v8988_v4  ;;  %v9080_v3 = vld [vmem:[%s9657_s0 + $0x1944] ss:$16 sps:$4 sm:$0xff]   ;;  %v9083_v4 = vld [vmem:[%s9657_s0 + $0x194c] ss:$16 sps:$4 sm:$0xff]  }
 0x3a1   : > { %5945 = vmatprep.subr.bf16.mxu0 %v8989_v5  ;;  %6777 = vmatprep.subr.bf16.mxu1 %v8992_v6  ;;  %v9082_v5 = vld [vmem:[%s9657_s0 + $0x1940] ss:$16 sps:$4 sm:$0xff]   ;;  %v9085_v6 = vld [vmem:[%s9657_s0 + $0x1948] ss:$16 sps:$4 sm:$0xff]  }
 0x3a4   : > { %5947 = vmatpush1.bf16.msra.mxu0 %v8991_v7  ;;  %6779 = vmatpush1.bf16.msra.mxu1 %v8994_v8  ;;  %v9086_v7 = vld [vmem:[%s9657_s0 + $0x1964] ss:$16 sps:$4 sm:$0xff]   ;;  %v9089_v8 = vld [vmem:[%s9657_s0 + $0x196c] ss:$16 sps:$4 sm:$0xff]  }
 0x3a5   : > { %5949 = vmatprep.subr.bf16.mxu0 %v8995_v9  ;;  %6781 = vmatprep.subr.bf16.mxu1 %v8998_v11  ;;  %v9088_v9 = vld [vmem:[%s9657_s0 + $0x1960] ss:$16 sps:$4 sm:$0xff]   ;;  %v9091_v11 = vld [vmem:[%s9657_s0 + $0x1968] ss:$16 sps:$4 sm:$0xff]  }
 0x3a8   : > { %5951 = vmatpush1.bf16.msra.mxu0 %v8997_v13  ;;  %6783 = vmatpush1.bf16.msra.mxu1 %v9000_v15  ;;  %v9092_v13 = vld [vmem:[%s9657_s0 + $0x1984] ss:$16 sps:$4 sm:$0xff]   ;;  %v9095_v15 = vld [vmem:[%s9657_s0 + $0x198c] ss:$16 sps:$4 sm:$0xff]  }
 0x3a9   : > { %5953 = vmatprep.subr.bf16.mxu0 %v9001_v17  ;;  %6785 = vmatprep.subr.bf16.mxu1 %v9004_v18  ;;  %v9094_v17 = vld [vmem:[%s9657_s0 + $0x1980] ss:$16 sps:$4 sm:$0xff]   ;;  %v9097_v18 = vld [vmem:[%s9657_s0 + $0x1988] ss:$16 sps:$4 sm:$0xff]  }
 0x3ac   : > { %5955 = vmatpush1.bf16.msra.mxu0 %v9003_v20  ;;  %6787 = vmatpush1.bf16.msra.mxu1 %v9006_v21  ;;  %v9098_v20 = vld [vmem:[%s9657_s0 + $0x19a4] ss:$16 sps:$4 sm:$0xff]   ;;  %v9101_v21 = vld [vmem:[%s9657_s0 + $0x19ac] ss:$16 sps:$4 sm:$0xff]  }
 0x3ad   : > { %5957 = vmatprep.subr.bf16.mxu0 %v9007_v22  ;;  %6789 = vmatprep.subr.bf16.mxu1 %v9010_v12  ;;  %v9100_v22 = vld [vmem:[%s9657_s0 + $0x19a0] ss:$16 sps:$4 sm:$0xff]   ;;  %v9103_v12 = vld [vmem:[%s9657_s0 + $0x19a8] ss:$16 sps:$4 sm:$0xff]  }
 0x3b0   : > { %5959 = vmatpush1.bf16.msra.mxu0 %v9009_v24  ;;  %6791 = vmatpush1.bf16.msra.mxu1 %v9012_v14  ;;  %v9104_v24 = vld [vmem:[%s9657_s0 + $0x19c4] ss:$16 sps:$4 sm:$0xff]   ;;  %v9107_v14 = vld [vmem:[%s9657_s0 + $0x19cc] ss:$16 sps:$4 sm:$0xff]  }
 0x3b1   : > { %5961 = vmatprep.subr.bf16.mxu0 %v9013_v26  ;;  %6793 = vmatprep.subr.bf16.mxu1 %v9016_v16  ;;  %v9106_v26 = vld [vmem:[%s9657_s0 + $0x19c0] ss:$16 sps:$4 sm:$0xff]   ;;  %v9109_v16 = vld [vmem:[%s9657_s0 + $0x19c8] ss:$16 sps:$4 sm:$0xff]  }
 0x3b4   : > { %5963 = vmatpush1.bf16.msra.mxu0 %v9015_v28  ;;  %6795 = vmatpush1.bf16.msra.mxu1 %v9018_v19  ;;  %v9110_v28 = vld [vmem:[%s9657_s0 + $0x19e4] ss:$16 sps:$4 sm:$0xff]   ;;  %v9113_v19 = vld [vmem:[%s9657_s0 + $0x19ec] ss:$16 sps:$4 sm:$0xff]  }
 0x3b5   : > { %5965 = vmatprep.subr.bf16.mxu0 %v9020_v30  ;;  %6797 = vmatprep.subr.bf16.mxu1 %v9023_v10  ;;  %v9112_v30 = vld [vmem:[%s9657_s0 + $0x19e0] ss:$16 sps:$4 sm:$0xff]   ;;  %v9115_v10 = vld [vmem:[%s9657_s0 + $0x19e8] ss:$16 sps:$4 sm:$0xff]  }
 0x3b7   : > { %3803 = vmatmul.mubr.f32.vlgmr.msra.gmra.mrb[0].mxu0 %v10470_v29  ;;  %4726 = vmatmul.mubr.f32.vlgmr.msra.gmra.mrb[0].mxu1 %v10470_v29  ;;  %v9037_v29 = vld [vmem:[%s9657_s0 + $0x1848] ss:$16 sps:$4 sm:$0xff]   ;;  %s10748_s0 = sld [smem:[#allocation12_spill]] }
 0x3b8   : > { %5967 = vmatpush1.bf16.msra.mxu0 %v9022_v32  ;;  %6799 = vmatpush1.bf16.msra.mxu1 %v9025_v23 }
 0x3b9   : > { %5969 = vmatprep.subr.bf16.mxu0 %v9026_v33  ;;  %6801 = vmatprep.subr.bf16.mxu1 %v9029_v34  ;;  %v2903_v33 = vld [vmem:[%s9684_s5] sm:$0xff] }
 0x3ba   : > { %3873 = vmatprep.mubr.f32.mxu0 %v2943_v25  ;;  %4796 = vmatprep.mubr.f32.mxu1 %v2943_v25  ;;  %v2904_v25 = vld [vmem:[%s9684_s5 + $0x8] sm:$0xff] }
 0x3bc   : > { %5971 = vmatpush1.bf16.msra.mxu0 %v9028_v35  ;;  %6803 = vmatpush1.bf16.msra.mxu1 %v9031_v36 }
 0x3bd   : > { %5973 = vmatprep.subr.bf16.mxu0 %v9032_v27  ;;  %6805 = vmatprep.subr.bf16.mxu1 %v9035_v37  ;;  %p5189_p10 = scmp.ne.s32.totalorder %s10748_s0, 1 }
 0x3be   : > { %vm4851_vm0 = vcmask (!%p5189_p10), 1043456  }
 0x3c0   : > { %5975 = vmatpush1.bf16.msra.mxu0 %v9034_v38  ;;  %6807 = vmatpush1.bf16.msra.mxu1 %v9037_v29  ;;  %v4823_v29 = vlaneseq (!%p5189_p10) }
 0x3c1   : > { %5977 = vmatprep.subr.bf16.mxu0 %v9038_v39  ;;  %6809 = vmatprep.subr.bf16.mxu1 %v9041_v40  ;;  %v4821_v39 = vld [vmem:[%s319_s6] sm:$0xf] (!%p5189_p10) }
 0x3c4   : > { %5979 = vmatpush1.bf16.msra.mxu0 %v9040_v41  ;;  %6811 = vmatpush1.bf16.msra.mxu1 %v9043_v42 }
 0x3c5   : > { %5981 = vmatprep.subr.bf16.mxu0 %v9044_v43  ;;  %6813 = vmatprep.subr.bf16.mxu1 %v9047_v44 }
 0x3c8   : > { %5983 = vmatpush1.bf16.msra.mxu0 %v9046_v45  ;;  %6815 = vmatpush1.bf16.msra.mxu1 %v9049_v46 }
 0x3c9   : > { %5985 = vmatprep.subr.bf16.mxu0 %v9050_v47  ;;  %6817 = vmatprep.subr.bf16.mxu1 %v9053_v48 }
 0x3cc   : > { %5987 = vmatpush1.bf16.msra.mxu0 %v9052_v49  ;;  %6819 = vmatpush1.bf16.msra.mxu1 %v9055_v50 }
 0x3cd   : > { %5989 = vmatprep.subr.bf16.mxu0 %v9056_v51  ;;  %6821 = vmatprep.subr.bf16.mxu1 %v9059_v52 }
 0x3d0   : > { %5991 = vmatpush1.bf16.msra.mxu0 %v9058_v53  ;;  %6823 = vmatpush1.bf16.msra.mxu1 %v9061_v54 }
 0x3d1   : > { %5993 = vmatprep.subr.bf16.mxu0 %v9062_v55  ;;  %6825 = vmatprep.subr.bf16.mxu1 %v9065_v56 }
 0x3d4   : > { %5995 = vmatpush1.bf16.msra.mxu0 %v9064_v57  ;;  %6827 = vmatpush1.bf16.msra.mxu1 %v9067_v58 }
 0x3d5   : > { %5997 = vmatprep.subr.bf16.mxu0 %v9068_v59  ;;  %6829 = vmatprep.subr.bf16.mxu1 %v9071_v60 }
 0x3d8   : > { %5999 = vmatpush1.bf16.msra.mxu0 %v9070_v61  ;;  %6831 = vmatpush1.bf16.msra.mxu1 %v9073_v62 }
 0x3d9   : > { %6001 = vmatprep.subr.bf16.mxu0 %v9074_v63  ;;  %6833 = vmatprep.subr.bf16.mxu1 %v9077_v0 }
 0x3dc   : > { %6003 = vmatpush1.bf16.msra.mxu0 %v9076_v1  ;;  %6835 = vmatpush1.bf16.msra.mxu1 %v9079_v2 }
 0x3dd   : > { %6005 = vmatprep.subr.bf16.mxu0 %v9080_v3  ;;  %6837 = vmatprep.subr.bf16.mxu1 %v9083_v4 }
 0x3e0   : > { %6007 = vmatpush1.bf16.msra.mxu0 %v9082_v5  ;;  %6839 = vmatpush1.bf16.msra.mxu1 %v9085_v6 }
 0x3e1   : > { %6009 = vmatprep.subr.bf16.mxu0 %v9086_v7  ;;  %6841 = vmatprep.subr.bf16.mxu1 %v9089_v8 }
 0x3e4   : > { %6011 = vmatpush1.bf16.msra.mxu0 %v9088_v9  ;;  %6843 = vmatpush1.bf16.msra.mxu1 %v9091_v11 }
 0x3e5   : > { %6013 = vmatprep.subr.bf16.mxu0 %v9092_v13  ;;  %6845 = vmatprep.subr.bf16.mxu1 %v9095_v15 }
 0x3e8   : > { %6015 = vmatpush1.bf16.msra.mxu0 %v9094_v17  ;;  %6847 = vmatpush1.bf16.msra.mxu1 %v9097_v18 }
 0x3e9   : > { %6017 = vmatprep.subr.bf16.mxu0 %v9098_v20  ;;  %6849 = vmatprep.subr.bf16.mxu1 %v9101_v21 }
 0x3ec   : > { %6019 = vmatpush1.bf16.msra.mxu0 %v9100_v22  ;;  %6851 = vmatpush1.bf16.msra.mxu1 %v9103_v12 }
 0x3ed   : > { %6021 = vmatprep.subr.bf16.mxu0 %v9104_v24  ;;  %6853 = vmatprep.subr.bf16.mxu1 %v9107_v14 }
 0x3f0   : > { %6023 = vmatpush1.bf16.msra.mxu0 %v9106_v26  ;;  %6855 = vmatpush1.bf16.msra.mxu1 %v9109_v16 }
 0x3f1   : > { %6025 = vmatprep.subr.bf16.mxu0 %v9110_v28  ;;  %6857 = vmatprep.subr.bf16.mxu1 %v9113_v19 }
 0x3f4   : > { %6027 = vmatpush1.bf16.msra.mxu0 %v9112_v30  ;;  %6859 = vmatpush1.bf16.msra.mxu1 %v9115_v10 }
 0x3f7   : > { %3874 = vmatmul.mubr.f32.vlgmr.msra.gmra.mrb[0].mxu0 %v10541_v31  ;;  %4797 = vmatmul.mubr.f32.vlgmr.msra.gmra.mrb[0].mxu1 %v10541_v31  ;;  %v4824_v31 = vshrl.u32 (!%p5189_p10), %v4823_v29, 7 }
 0x3f9   : > { %v10618_v40 = vsub.s32 (!%p5189_p10), 0, %v4824_v31  ;;  %v10620_v41 = vsub.s32 (!%p5189_p10), 1, %v4824_v31  ;;  %v10622_v42 = vsub.s32 (!%p5189_p10), 2, %v4824_v31  ;;  %v10624_v43 = vsub.s32 (!%p5189_p10), 3, %v4824_v31 }
 0x3fb   : > { %v4826_v44 = vrot.slane (!%p5189_p10), %v4821_v39, %v10618_v40  ;;  %v4830_v45 = vrot.slane (!%p5189_p10), %v4821_v39, %v10620_v41  ;;  %v4834_v46 = vrot.slane (!%p5189_p10), %v4821_v39, %v10622_v42  ;;  %v4838_v47 = vrot.slane (!%p5189_p10), %v4821_v39, %v10624_v43 }
 0x3fd   : > { %v4839_v50 = vcombine.low (!%p5189_p10), %v4826_v44, %v4830_v45  ;;  %v4840_v51 = vcombine.low (!%p5189_p10), %v4834_v46, %v4838_v47 }
 0x4ca   : > { %v3875_v32 = vpop.f32.mrb[0].mxu0  ;;  %v4798_v23 = vpop.f32.mrb[0].mxu1  ;;  %4818 = sbr.rel (%p5189_p10) target bundleno = 1307 (0x51b), region = 64 }
 0x4cb   : > { %v3877_v34 = vpop.f32.mrb[1].mxu0  ;;  %v4800_v35 = vpop.f32.mrb[1].mxu1 }
 0x4cc   : > { %v4807_v36 = vcombine.low %v3875_v32, %v3877_v34  ;;  %v4808_v27 = vcombine.low %v4798_v23, %v4800_v35 }
 0x4ce   : > { %v4811_v37 = vadd.f32 %v4807_v36, %v2903_v33  ;;  %v4812_v38 = vadd.f32 %v4808_v27, %v2904_v25 }
 0x4d0   : > { %4813 = vst [vmem:[%s9684_s5] sm:$0xff] %v4811_v37  ;;  %4814 = vst [vmem:[%s9684_s5 + $0x8] sm:$0xff] %v4812_v38 }
 0x4d7   : > { %v4819_v48 = vld [vmem:[%s9684_s5] sm:$0xff]  ;;  %v4820_v49 = vld [vmem:[%s9684_s5 + $0x8] sm:$0xff] }
 0x4d8   : > { %v4843_v52 = vadd.f32 %v4839_v50, %v4819_v48  ;;  %v4844_v53 = vadd.f32 %v4840_v51, %v4820_v49 }
 0x4da   : > { %v4847_v54 = vcombine.high %v4843_v52, %v4843_v52  ;;  %v4848_v55 = vcombine.high %v4844_v53, %v4844_v53  ;;  %v4852_v56 = vsel %vm4851_vm0, %v4843_v52, 0.0  ;;  %v4866_v57 = vsel %vm4851_vm0, %v4844_v53, 0.0 }
 0x4db   : > { %v4853_v58 = vrot.slane %v4852_v56, 4  ;;  %v4867_v59 = vrot.slane %v4866_v57, 4 }
 0x4dc   : > { %v4859_v60 = vsel %vm4851_vm0, %v4847_v54, 0.0  ;;  %v4873_v61 = vsel %vm4851_vm0, %v4848_v55, 0.0 }
 0x4dd   : > { %v4854_v62 = vadd.f32 %v4853_v58, %v4852_v56  ;;  %v4860_v63 = vrot.slane %v4859_v60, 4  ;;  %v4868_v0 = vadd.f32 %v4867_v59, %v4866_v57  ;;  %v4874_v1 = vrot.slane %v4873_v61, 4 }
 0x4df   : > { %v4855_v2 = vrot.slane %v4854_v62, 2  ;;  %v4861_v3 = vadd.f32 %v4860_v63, %v4859_v60  ;;  %v4869_v4 = vrot.slane %v4868_v0, 2  ;;  %v4875_v5 = vadd.f32 %v4874_v1, %v4873_v61 }
 0x4e1   : > { %v4856_v6 = vadd.f32 %v4855_v2, %v4854_v62  ;;  %v4862_v7 = vrot.slane %v4861_v3, 2  ;;  %v4870_v8 = vadd.f32 %v4869_v4, %v4868_v0  ;;  %v4876_v9 = vrot.slane %v4875_v5, 2 }
 0x4e3   : > { %v4857_v11 = vrot.slane %v4856_v6, 1  ;;  %v4863_v13 = vadd.f32 %v4862_v7, %v4861_v3  ;;  %v4871_v15 = vrot.slane %v4870_v8, 1  ;;  %v4877_v17 = vadd.f32 %v4876_v9, %v4875_v5  ;;  %v4977_v9 = vld [vmem:[%s337_s30] sm:$0xf] }
 0x4e5   : > { %v4858_v18 = vadd.f32 %v4857_v11, %v4856_v6  ;;  %v4864_v20 = vrot.slane %v4863_v13, 1  ;;  %v4872_v21 = vadd.f32 %v4871_v15, %v4870_v8  ;;  %v4878_v22 = vrot.slane %v4877_v17, 1  ;;  %v4953_v8 = vld [vmem:[%s328_s11] sm:$0xf] }
 0x4e6   : > { %v4958_v11 = vrot.slane %v4953_v8, %v10618_v40 }
 0x4e7   : > { %v4865_v12 = vadd.f32 %v4864_v20, %v4863_v13  ;;  %v4879_v24 = vadd.f32 %v4878_v22, %v4877_v17  ;;  %v4881_v14 = vmul.f32 0.25, %v4858_v18  ;;  %v4883_v26 = vmul.f32 0.25, %v4872_v21 }
 0x4e8   : > { %v4962_v13 = vrot.slane %v4953_v8, %v10620_v41  ;;  %v4966_v17 = vrot.slane %v4953_v8, %v10622_v42  ;;  %v4970_v18 = vrot.slane %v4953_v8, %v10624_v43  ;;  %v4982_v21 = vrot.slane %v4977_v9, %v10618_v40 }
 0x4e9   : > { %v4882_v16 = vmul.f32 0.25, %v4865_v12  ;;  %v4884_v28 = vmul.f32 0.25, %v4879_v24  ;;  %v4986_v22 = vrot.slane %v4977_v9, %v10620_v41  ;;  %v4990_v24 = vrot.slane %v4977_v9, %v10622_v42 }
 0x4eb   : > { %v4889_v19 = vcombine.low %v4881_v14, %v4882_v16  ;;  %v4890_v30 = vcombine.low %v4883_v26, %v4884_v28  ;;  %v4994_v14 = vrot.slane %v4977_v9, %v10624_v43  ;;  %v4971_v28 = vcombine.low %v4958_v11, %v4962_v13 }
 0x4ed   : > { %v10636_v10 = vsub.f32 %v4843_v52, %v4889_v19  ;;  %v10638_v32 = vsub.f32 %v4844_v53, %v4890_v30  ;;  %v4972_v30 = vcombine.low %v4966_v17, %v4970_v18  ;;  %v4996_v40 = vcombine.low %v4990_v24, %v4994_v14 }
 0x4ef   : > { %v4895_v23 = vmul.f32 %v10636_v10, %v10636_v10  ;;  %v4896_v33 = vmul.f32 %v10638_v32, %v10638_v32 }
 0x4f1   : > { %v4899_v34 = vcombine.high %v4895_v23, %v4895_v23  ;;  %v4900_v25 = vcombine.high %v4896_v33, %v4896_v33  ;;  %v4903_v35 = vsel %vm4851_vm0, %v4895_v23, 0.0  ;;  %v4917_v36 = vsel %vm4851_vm0, %v4896_v33, 0.0 }
 0x4f2   : > { %v4904_v27 = vrot.slane %v4903_v35, 4  ;;  %v4918_v37 = vrot.slane %v4917_v36, 4  ;;  %v4995_v33 = vcombine.low %v4982_v21, %v4986_v22 }
 0x4f3   : > { %v4910_v38 = vsel %vm4851_vm0, %v4899_v34, 0.0  ;;  %v4924_v29 = vsel %vm4851_vm0, %v4900_v25, 0.0 }
 0x4f4   : > { %v4905_v31 = vadd.f32 %v4904_v27, %v4903_v35  ;;  %v4911_v39 = vrot.slane %v4910_v38, 4  ;;  %v4919_v44 = vadd.f32 %v4918_v37, %v4917_v36  ;;  %v4925_v45 = vrot.slane %v4924_v29, 4 }
 0x4f6   : > { %v4906_v46 = vrot.slane %v4905_v31, 2  ;;  %v4912_v47 = vadd.f32 %v4911_v39, %v4910_v38  ;;  %v4920_v48 = vrot.slane %v4919_v44, 2  ;;  %v4926_v49 = vadd.f32 %v4925_v45, %v4924_v29 }
 0x4f8   : > { %v4907_v50 = vadd.f32 %v4906_v46, %v4905_v31  ;;  %v4913_v51 = vrot.slane %v4912_v47, 2  ;;  %v4921_v52 = vadd.f32 %v4920_v48, %v4919_v44  ;;  %v4927_v53 = vrot.slane %v4926_v49, 2 }
 0x4fa   : > { %v4908_v54 = vrot.slane %v4907_v50, 1  ;;  %v4914_v55 = vadd.f32 %v4913_v51, %v4912_v47  ;;  %v4922_v56 = vrot.slane %v4921_v52, 1  ;;  %v4928_v57 = vadd.f32 %v4927_v53, %v4926_v49 }
 0x4fc   : > { %v4909_v58 = vadd.f32 %v4908_v54, %v4907_v50  ;;  %v4915_v59 = vrot.slane %v4914_v55, 1  ;;  %v4923_v60 = vadd.f32 %v4922_v56, %v4921_v52  ;;  %v4929_v61 = vrot.slane %v4928_v57, 1 }
 0x4fe   : > { %v4916_v62 = vadd.f32 %v4915_v59, %v4914_v55  ;;  %v4930_v63 = vadd.f32 %v4929_v61, %v4928_v57  ;;  %v4931_v0 = vmul.f32 0.25, %v4909_v58  ;;  %v4933_v1 = vmul.f32 0.25, %v4923_v60 }
 0x500   : > { %v4932_v2 = vmul.f32 0.25, %v4916_v62  ;;  %v4934_v3 = vmul.f32 0.25, %v4930_v63  ;;  %v4935_v4 = vadd.f32 1e-05, %v4931_v0  ;;  %v4937_v5 = vadd.f32 1e-05, %v4933_v1 }
 0x502   : > { %v4936_v6 = vadd.f32 1e-05, %v4932_v2  ;;  %v4938_v7 = vadd.f32 1e-05, %v4934_v3  ;;  %9117 = vrsqrt.f32 %v4935_v4 }
 0x503   : > { %9119 = vrsqrt.f32 %v4937_v5 }
 0x504   : > { %9121 = vrsqrt.f32 %v4936_v6 }
 0x505   : > { %9123 = vrsqrt.f32 %v4938_v7 }
 0x50c   : > { %v9118_v15 = vpop.eup %9117 }
 0x50d   : > { %v9120_v20 = vpop.eup %9119 }
 0x50e   : > { %v9122_v12 = vpop.eup %9121 }
 0x50f   : > { %v9124_v26 = vpop.eup %9123  ;;  %v4947_v16 = vcombine.low %v9118_v15, %v9122_v12 }
 0x510   : > { %v4948_v19 = vcombine.low %v9120_v20, %v9124_v26 }
 0x511   : > { %v4951_v23 = vmul.f32 %v4947_v16, %v10636_v10 }
 0x512   : > { %v4952_v34 = vmul.f32 %v4948_v19, %v10638_v32 }
 0x513   : > { %v4975_v25 = vmul.f32 %v4971_v28, %v4951_v23 }
 0x514   : > { %v4976_v41 = vmul.f32 %v4972_v30, %v4952_v34 }
 0x515   : > { %v4999_v35 = vadd.f32 %v4995_v33, %v4975_v25 }
 0x516   : > { %v5000_v36 = vadd.f32 %v4996_v40, %v4976_v41 }
 0x517   : > { %v5001_v42 = vmax.f32 %v4999_v35, 0.0 }
 0x518   : > { %v5002_v27 = vmax.f32 %v5000_v36, 0.0 }
 0x519   : > { %5003 = vst [vmem:[%s9684_s5] sm:$0xff] %v5001_v42 }
 0x51a   : > { %5004 = vst [vmem:[%s9684_s5 + $0x8] sm:$0xff] %v5002_v27 }
 0x51b PF: > { %s24_s28 = sadd.s32 1, %s9343_s28   ;;  %s10749_s9 = sld [smem:[#allocation17_spill]] }
 0x51c   : > { %p21_p2 = scmp.ge.s32.totalorder %s24_s28, 6   ;;  %s10750_s16 = sld [smem:[#allocation18_spill]] }
 0x51d   : > { %s10751_s25 = sld [smem:[#allocation14_spill]]  ;;  %s10752_s13 = sld [smem:[#allocation15_spill]] }
 0x51e   : > { %s10753_s27 = sld [smem:[#allocation16_spill]]  ;;  %s10754_s18 = smov %s9307_s19 }
 0x51f   : > { %s10755_s19 = smov %s9311_s20  ;;  %s10757_s21 = smov %s9319_s22 }
 0x520   : > { %s10758_s22 = smov %s9323_s23  ;;  %s10760_s24 = smov %s9335_s26 }
 0x521   : > { %s10756_s20 = smov %s10749_s9  ;;  %23 = sbr.rel (!%p21_p2) target bundleno = 15 (0xf), region = 128 }
 0x522   : > { %s10759_s23 = smov %s10750_s16 }
 0x523   : > { %s10761_s26 = smov %s10752_s13 }
 0x528   :  { %5027 = vsyncpa [#allocation3], 1 }
 0x529   :  { %5029 = vsyncpa [#allocation3 + $0x1], 1 }
 0x52a   :  { %5030 = vsyncpa [#allocation5], 1 }
 0x52b   :  { %5032 = vsyncpa [#allocation5 + $0x1], 1 }
 0x52c   :  { %5033 = vsyncpa [#allocation8], 1 }
 0x52d   :  { %5035 = vsyncpa [#allocation8 + $0x1], 1 }

</bundles_post_ra>
